<compile_context>
chip_gen: v5e
topology: v5e:2x2
jax: 0.10.0
libtpu: 0.0.40
codegen_flags: <defaults>
</compile_context>

<pallas_src>
import numpy as np
import jax
import jax.numpy as jnp
from jax.experimental import pallas as pl
from jax.experimental.pallas import tpu as pltpu

# ---------------- model hyper-params (small instantiation) ----------------
IN_H = IN_W = 16                  # input spatial size
IN_PIX = IN_H * IN_W              # 256 flattened input pixels
K = 7                             # conv kernel size (fixed by the module)
C_OUT = 50                        # conv output channels (fixed by the module)
OH = OW = IN_H - K + 1            # 10 : conv output spatial
POOL = 2
PH, PW = OH // POOL, OW // POOL   # 5, 5 pooled spatial
NPOS = PH * PW                    # 25 pooled positions
FLAT = C_OUT * NPOS               # 1250 = num_flat_features (PyTorch order c*25+g)
HID = 400
NCLS = 1

# ------------------------- padded TPU-friendly sizes ----------------------
FLAT_PAD = 1280                   # 1250 -> 1280 (10 x 128 lanes, fully lane-dense)
HID_PAD = 512                     # hidden 400 -> 512
NCLS_PAD = 128                    # head 1 -> 128 (lane-dense output stores)

TB_MAX = 256                      # images per grid step (upper bound)
VMEM_LIMIT = 32 * 1024 * 1024     # explicit (v5e default scoped VMEM is 16 MiB)


# ---------------------------- fused Pallas kernel --------------------------
def fused_forward_kernel(x_ref, wq_ref, bc_ref, w1_ref, b1_ref,
                         w2_ref, b2_ref, w3_ref, b3_ref, o_ref):
    # x_ref : (TB, 256) bf16          flattened 16x16 images
    # wq_ref: (4, 256, FLAT_PAD) bf16 unrolled conv weights, one slab per 2x2
    #         pool quadrant; column f = c*25 + g (exact PyTorch flatten order),
    #         columns f >= 1250 are exactly zero.
    # bc_ref: (1, FLAT_PAD) f32       conv bias broadcast over pooled positions
    # w1/w2/w3 bf16 (in,out); b1/b2/b3 f32 (1,out); padding rows/cols are zero.
    # o_ref : (TB, NCLS_PAD) f32      only column 0 is the real score
    x = x_ref[...]

    # Conv as quadrant-looped dense matmuls with a running elementwise max
    # == 2x2 max-pool of the 7x7 VALID conv.
    m = jnp.dot(x, wq_ref[0], preferred_element_type=jnp.float32)
    for q in range(1, POOL * POOL):
        m = jnp.maximum(m, jnp.dot(x, wq_ref[q],
                                   preferred_element_type=jnp.float32))

    # Pool-before-bias+ReLU: ReLU(max_q(conv_q) + b) == max_q(ReLU(conv_q + b)).
    # Padded lanes stay exactly 0 (zero conv columns AND zero bias).
    a = jnp.maximum(m + bc_ref[...], 0.0).astype(jnp.bfloat16)

    h = jnp.dot(a, w1_ref[...], preferred_element_type=jnp.float32)
    h = jnp.maximum(h + b1_ref[...], 0.0).astype(jnp.bfloat16)
    h = jnp.dot(h, w2_ref[...], preferred_element_type=jnp.float32)
    h = jnp.maximum(h + b2_ref[...], 0.0).astype(jnp.bfloat16)
    out = jnp.dot(h, w3_ref[...], preferred_element_type=jnp.float32)
    o_ref[...] = (out + b3_ref[...]).astype(o_ref.dtype)


# ------------------------------ wrapper ------------------------------------
def fused_forward(xf, kp, tb):
    n_pad = xf.shape[0]
    grid = n_pad // tb

    flops = 2 * n_pad * (POOL * POOL * IN_PIX * FLAT_PAD
                         + FLAT_PAD * HID_PAD
                         + HID_PAD * HID_PAD
                         + HID_PAD * NCLS_PAD)
    bytes_accessed = (n_pad * IN_PIX * 2 + n_pad * NCLS_PAD * 4
                      + (POOL * POOL * IN_PIX * FLAT_PAD
                         + FLAT_PAD * HID_PAD + HID_PAD * HID_PAD
                         + HID_PAD * NCLS_PAD) * 2
                      + (FLAT_PAD + 2 * HID_PAD + NCLS_PAD) * 4)

    const2 = lambda i: (0, 0)          # weights/biases: VMEM-resident blocks
    return pl.pallas_call(
        fused_forward_kernel,
        out_shape=jax.ShapeDtypeStruct((n_pad, NCLS_PAD), jnp.float32),
        grid=(grid,),
        in_specs=[
            pl.BlockSpec((tb, IN_PIX), lambda i: (i, 0)),
            pl.BlockSpec((POOL * POOL, IN_PIX, FLAT_PAD), lambda i: (0, 0, 0)),
            pl.BlockSpec((1, FLAT_PAD), const2),
            pl.BlockSpec((FLAT_PAD, HID_PAD), const2),
            pl.BlockSpec((1, HID_PAD), const2),
            pl.BlockSpec((HID_PAD, HID_PAD), const2),
            pl.BlockSpec((1, HID_PAD), const2),
            pl.BlockSpec((HID_PAD, NCLS_PAD), const2),
            pl.BlockSpec((1, NCLS_PAD), const2),
        ],
        out_specs=pl.BlockSpec((tb, NCLS_PAD), lambda i: (i, 0)),
        compiler_params=pltpu.CompilerParams(
            dimension_semantics=("parallel",),
            vmem_limit_bytes=VMEM_LIMIT),
        cost_estimate=pl.CostEstimate(flops=flops, transcendentals=0,
                                      bytes_accessed=bytes_accessed),
    )(xf, kp["wq"], kp["bc"], kp["w1"], kp["b1"],
      kp["w2"], kp["b2"], kp["w3"], kp["b3"])


# ------------------------------- glue ---------------------------------------
def _choose_tile(n):
    """Batch tile TB (multiple of 8) and padded batch (multiple of TB).

    Prefers >= 2 grid steps once there is enough work to split, so the
    "parallel" grid axis can shard across both TensorCores on v7x.
    """
    n_pad8 = ((max(n, 1) + 7) // 8) * 8
    if n_pad8 <= 8:
        return 8, 8
    n_tiles = max(2, -(-n_pad8 // TB_MAX))
    tb = min(TB_MAX, ((-(-n_pad8 // n_tiles) + 7) // 8) * 8)
    n_tiles = -(-n_pad8 // tb)
    return tb, tb * n_tiles


def prep_input(x, n_pad):
    """(N,1,H,W) f32 -> (n_pad, 256) bf16. Cast to bf16 BEFORE reshaping/padding."""
    n = x.shape[0]
    xf = x.astype(jnp.bfloat16).reshape(n, IN_PIX)
    if n_pad > n:
        xf = jnp.pad(xf, ((0, n_pad - n), (0, 0)))
    return xf


@jax.jit
def forward(kp, x):
    n = x.shape[0]
    tb, n_pad = _choose_tile(n)
    xf = prep_input(x, n_pad)
    out = fused_forward(xf, kp, tb)        # (n_pad, NCLS_PAD)
    return out[:n, :NCLS]                  # (N, 1)


# --------------------- deterministic parameter init -------------------------
def init_torch_like_params(key):
    ks = jax.random.split(key, 8)

    def u(k, shape, fan_in):
        b = 1.0 / (fan_in ** 0.5)
        return jax.random.uniform(k, shape, jnp.float32, -b, b)

    return dict(
        conv_w=u(ks[0], (C_OUT, 1, K, K), K * K),
        conv_b=u(ks[1], (C_OUT,), K * K),
        fc1_w=u(ks[2], (HID, FLAT), FLAT), fc1_b=u(ks[3], (HID,), FLAT),
        fc2_w=u(ks[4], (HID, HID), HID), fc2_b=u(ks[5], (HID,), HID),
        out_w=u(ks[6], (NCLS, HID), HID), out_b=u(ks[7], (NCLS,), HID),
    )


def to_kernel_params(p):
    f32, bf16 = jnp.float32, jnp.bfloat16

    # Unrolled conv weights: for quadrant q and pooled cell g, the conv output
    # position is (2*py+qi, 2*px+qj); its column in slab q holds the 7x7 kernel
    # stamped at that receptive field (zeros elsewhere), so the dense matmul
    # reproduces the VALID conv exactly.  Column index f = c*25 + g == PyTorch
    # flatten order, so fc1 needs no row reordering at all.
    kern_hwc = np.asarray(p["conv_w"], np.float32)[:, 0].transpose(1, 2, 0)  # (7,7,50)
    wq = np.zeros((POOL * POOL, IN_H, IN_W, FLAT_PAD), np.float32)
    for q in range(POOL * POOL):
        qi, qj = divmod(q, POOL)
        for g in range(NPOS):
            py, px = divmod(g, PW)
            oy, ox = py * POOL + qi, px * POOL + qj
            wq[q, oy:oy + K, ox:ox + K, g:FLAT:NPOS] = kern_hwc
    wq = jnp.asarray(wq.reshape(POOL * POOL, IN_PIX, FLAT_PAD), bf16)

    # Conv bias broadcast over pooled positions: bc[f = c*25 + g] = conv_b[c].
    bc = np.zeros((1, FLAT_PAD), np.float32)
    bc[0, :FLAT] = np.repeat(np.asarray(p["conv_b"], np.float32), NPOS)
    bc = jnp.asarray(bc, f32)

    def pad2(a, rows, cols):
        a = jnp.asarray(a, f32)
        return jnp.pad(a, ((0, rows - a.shape[0]), (0, cols - a.shape[1])))

    w1 = pad2(p["fc1_w"].T, FLAT_PAD, HID_PAD).astype(bf16)
    b1 = pad2(p["fc1_b"][None, :], 1, HID_PAD)
    w2 = pad2(p["fc2_w"].T, HID_PAD, HID_PAD).astype(bf16)
    b2 = pad2(p["fc2_b"][None, :], 1, HID_PAD)
    w3 = pad2(p["out_w"].T, HID_PAD, NCLS_PAD).astype(bf16)
    b3 = pad2(p["out_b"][None, :], 1, NCLS_PAD)
    return dict(wq=wq, bc=bc, w1=w1, b1=b1, w2=w2, b2=b2, w3=w3, b3=b3)


# --------------------- pure-JAX reference (f32, HIGHEST) ---------------------
def reference_forward(p, x):
    hi = jax.lax.Precision.HIGHEST
    conv = jax.lax.conv_general_dilated(
        x, p["conv_w"], (1, 1), "VALID",
        dimension_numbers=("NCHW", "OIHW", "NCHW"), precision=hi)
    conv = jax.nn.relu(conv + p["conv_b"][None, :, None, None])
    pooled = jax.lax.reduce_window(conv, -jnp.inf, jax.lax.max,
                                   (1, 1, POOL, POOL), (1, 1, POOL, POOL),
                                   "VALID")
    flat = pooled.reshape(x.shape[0], -1)
    h = jax.nn.relu(jnp.dot(flat, p["fc1_w"].T, precision=hi) + p["fc1_b"])
    h = jax.nn.relu(jnp.dot(h, p["fc2_w"].T, precision=hi) + p["fc2_b"])
    return jnp.dot(h, p["out_w"].T, precision=hi) + p["out_b"]


# --------------------------------- main --------------------------------------
if __name__ == "__main__":
    key = jax.random.PRNGKey(0)
    pkey, xkey = jax.random.split(key)
    torch_params = init_torch_like_params(pkey)
    kparams = to_kernel_params(torch_params)

    x = jax.random.normal(xkey, (2, 1, IN_H, IN_W), jnp.float32)  # NCHW

    y = jax.block_until_ready(forward(kparams, x))
    assert y.shape == (2, NCLS), y.shape

    y_ref = reference_forward(torch_params, x)
    # bf16 MXU operands (inputs + weights) with f32 accumulation vs HIGHEST f32 ref.
    assert jnp.allclose(y, y_ref, atol=5e-2, rtol=5e-2), (y, y_ref)

    print("KERNEL_OK")
</pallas_src>

<mosaic_0001>
module attributes {stable_mosaic.version = 11 : i64} {
  func.func @fused_forward_kernel(%arg0: i32, %arg1: memref<8x256xbf16, #tpu.memory_space<vmem>>, %arg2: memref<4x256x1280xbf16, #tpu.memory_space<vmem>>, %arg3: memref<1x1280xf32, #tpu.memory_space<vmem>>, %arg4: memref<1280x512xbf16, #tpu.memory_space<vmem>>, %arg5: memref<1x512xf32, #tpu.memory_space<vmem>>, %arg6: memref<512x512xbf16, #tpu.memory_space<vmem>>, %arg7: memref<1x512xf32, #tpu.memory_space<vmem>>, %arg8: memref<512x128xbf16, #tpu.memory_space<vmem>>, %arg9: memref<1x128xf32, #tpu.memory_space<vmem>>, %arg10: memref<8x128xf32, #tpu.memory_space<vmem>>) attributes {dimension_semantics = [#tpu.dimension_semantics<parallel>], iteration_bounds = array<i64: 1>, scalar_prefetch = 0 : i64, scratch_operands = 0 : i64, tpu.core_type = #tpu.core_type<tc>, window_params = [{transform_indices = @transform_0, window_bounds = array<i64: 8, 256>}, {pipeline_mode = #tpu.pipeline_mode<synchronous>, transform_indices = @transform_1, window_bounds = array<i64: 4, 256, 1280>}, {pipeline_mode = #tpu.pipeline_mode<synchronous>, transform_indices = @transform_2, window_bounds = array<i64: 1, 1280>}, {pipeline_mode = #tpu.pipeline_mode<synchronous>, transform_indices = @transform_3, window_bounds = array<i64: 1280, 512>}, {pipeline_mode = #tpu.pipeline_mode<synchronous>, transform_indices = @transform_4, window_bounds = array<i64: 1, 512>}, {pipeline_mode = #tpu.pipeline_mode<synchronous>, transform_indices = @transform_5, window_bounds = array<i64: 512, 512>}, {pipeline_mode = #tpu.pipeline_mode<synchronous>, transform_indices = @transform_6, window_bounds = array<i64: 1, 512>}, {pipeline_mode = #tpu.pipeline_mode<synchronous>, transform_indices = @transform_7, window_bounds = array<i64: 512, 128>}, {pipeline_mode = #tpu.pipeline_mode<synchronous>, transform_indices = @transform_8, window_bounds = array<i64: 1, 128>}, {transform_indices = @transform_9, window_bounds = array<i64: 8, 128>}]} {
    %c0 = arith.constant 0 : index
    %c0_0 = arith.constant 0 : index
    %0 = vector.load %arg1[%c0, %c0_0] : memref<8x256xbf16, #tpu.memory_space<vmem>>, vector<8x256xbf16>
    %c0_1 = arith.constant 0 : index
    %c0_2 = arith.constant 0 : index
    %c0_3 = arith.constant 0 : index
    %1 = vector.load %arg2[%c0_1, %c0_2, %c0_3] : memref<4x256x1280xbf16, #tpu.memory_space<vmem>>, vector<1x256x1280xbf16>
    %2 = vector.shape_cast %1 : vector<1x256x1280xbf16> to vector<256x1280xbf16>
    %cst = arith.constant dense<0.000000e+00> : vector<8x1280xf32>
    %3 = tpu.matmul %0, %2, %cst {dimension_numbers = #tpu.dot_dimension_numbers<[1], [0], [0], [1], [0, 0, 1, 1], [], []>} : vector<8x256xbf16>, vector<256x1280xbf16>, vector<8x1280xf32> -> vector<8x1280xf32>
    %c1 = arith.constant 1 : index
    %c0_4 = arith.constant 0 : index
    %c0_5 = arith.constant 0 : index
    %4 = vector.load %arg2[%c1, %c0_4, %c0_5] : memref<4x256x1280xbf16, #tpu.memory_space<vmem>>, vector<1x256x1280xbf16>
    %5 = vector.shape_cast %4 : vector<1x256x1280xbf16> to vector<256x1280xbf16>
    %cst_6 = arith.constant dense<0.000000e+00> : vector<8x1280xf32>
    %6 = tpu.matmul %0, %5, %cst_6 {dimension_numbers = #tpu.dot_dimension_numbers<[1], [0], [0], [1], [0, 0, 1, 1], [], []>} : vector<8x256xbf16>, vector<256x1280xbf16>, vector<8x1280xf32> -> vector<8x1280xf32>
    %7 = arith.maximumf %3, %6 : vector<8x1280xf32>
    %c2 = arith.constant 2 : index
    %c0_7 = arith.constant 0 : index
    %c0_8 = arith.constant 0 : index
    %8 = vector.load %arg2[%c2, %c0_7, %c0_8] : memref<4x256x1280xbf16, #tpu.memory_space<vmem>>, vector<1x256x1280xbf16>
    %9 = vector.shape_cast %8 : vector<1x256x1280xbf16> to vector<256x1280xbf16>
    %cst_9 = arith.constant dense<0.000000e+00> : vector<8x1280xf32>
    %10 = tpu.matmul %0, %9, %cst_9 {dimension_numbers = #tpu.dot_dimension_numbers<[1], [0], [0], [1], [0, 0, 1, 1], [], []>} : vector<8x256xbf16>, vector<256x1280xbf16>, vector<8x1280xf32> -> vector<8x1280xf32>
    %11 = arith.maximumf %7, %10 : vector<8x1280xf32>
    %c3 = arith.constant 3 : index
    %c0_10 = arith.constant 0 : index
    %c0_11 = arith.constant 0 : index
    %12 = vector.load %arg2[%c3, %c0_10, %c0_11] : memref<4x256x1280xbf16, #tpu.memory_space<vmem>>, vector<1x256x1280xbf16>
    %13 = vector.shape_cast %12 : vector<1x256x1280xbf16> to vector<256x1280xbf16>
    %cst_12 = arith.constant dense<0.000000e+00> : vector<8x1280xf32>
    %14 = tpu.matmul %0, %13, %cst_12 {dimension_numbers = #tpu.dot_dimension_numbers<[1], [0], [0], [1], [0, 0, 1, 1], [], []>} : vector<8x256xbf16>, vector<256x1280xbf16>, vector<8x1280xf32> -> vector<8x1280xf32>
    %15 = arith.maximumf %11, %14 : vector<8x1280xf32>
    %c0_13 = arith.constant 0 : index
    %c0_14 = arith.constant 0 : index
    %16 = vector.load %arg3[%c0_13, %c0_14] : memref<1x1280xf32, #tpu.memory_space<vmem>>, vector<1x1280xf32>
    %17 = vector.broadcast %16 : vector<1x1280xf32> to vector<8x1280xf32>
    %18 = arith.addf %15, %17 : vector<8x1280xf32>
    %cst_15 = arith.constant 0.000000e+00 : f32
    %19 = vector.broadcast %cst_15 : f32 to vector<8x1280xf32>
    %20 = arith.maximumf %18, %19 : vector<8x1280xf32>
    %21 = arith.truncf %20 : vector<8x1280xf32> to vector<8x1280xbf16>
    %c0_16 = arith.constant 0 : index
    %c0_17 = arith.constant 0 : index
    %22 = vector.load %arg4[%c0_16, %c0_17] : memref<1280x512xbf16, #tpu.memory_space<vmem>>, vector<1280x512xbf16>
    %cst_18 = arith.constant dense<0.000000e+00> : vector<8x512xf32>
    %23 = tpu.matmul %21, %22, %cst_18 {dimension_numbers = #tpu.dot_dimension_numbers<[1], [0], [0], [1], [0, 0, 1, 1], [], []>} : vector<8x1280xbf16>, vector<1280x512xbf16>, vector<8x512xf32> -> vector<8x512xf32>
    %c0_19 = arith.constant 0 : index
    %c0_20 = arith.constant 0 : index
    %24 = vector.load %arg5[%c0_19, %c0_20] : memref<1x512xf32, #tpu.memory_space<vmem>>, vector<1x512xf32>
    %25 = vector.broadcast %24 : vector<1x512xf32> to vector<8x512xf32>
    %26 = arith.addf %23, %25 : vector<8x512xf32>
    %cst_21 = arith.constant 0.000000e+00 : f32
    %27 = vector.broadcast %cst_21 : f32 to vector<8x512xf32>
    %28 = arith.maximumf %26, %27 : vector<8x512xf32>
    %29 = arith.truncf %28 : vector<8x512xf32> to vector<8x512xbf16>
    %c0_22 = arith.constant 0 : index
    %c0_23 = arith.constant 0 : index
    %30 = vector.load %arg6[%c0_22, %c0_23] : memref<512x512xbf16, #tpu.memory_space<vmem>>, vector<512x512xbf16>
    %cst_24 = arith.constant dense<0.000000e+00> : vector<8x512xf32>
    %31 = tpu.matmul %29, %30, %cst_24 {dimension_numbers = #tpu.dot_dimension_numbers<[1], [0], [0], [1], [0, 0, 1, 1], [], []>} : vector<8x512xbf16>, vector<512x512xbf16>, vector<8x512xf32> -> vector<8x512xf32>
    %c0_25 = arith.constant 0 : index
    %c0_26 = arith.constant 0 : index
    %32 = vector.load %arg7[%c0_25, %c0_26] : memref<1x512xf32, #tpu.memory_space<vmem>>, vector<1x512xf32>
    %33 = vector.broadcast %32 : vector<1x512xf32> to vector<8x512xf32>
    %34 = arith.addf %31, %33 : vector<8x512xf32>
    %cst_27 = arith.constant 0.000000e+00 : f32
    %35 = vector.broadcast %cst_27 : f32 to vector<8x512xf32>
    %36 = arith.maximumf %34, %35 : vector<8x512xf32>
    %37 = arith.truncf %36 : vector<8x512xf32> to vector<8x512xbf16>
    %c0_28 = arith.constant 0 : index
    %c0_29 = arith.constant 0 : index
    %38 = vector.load %arg8[%c0_28, %c0_29] : memref<512x128xbf16, #tpu.memory_space<vmem>>, vector<512x128xbf16>
    %cst_30 = arith.constant dense<0.000000e+00> : vector<8x128xf32>
    %39 = tpu.matmul %37, %38, %cst_30 {dimension_numbers = #tpu.dot_dimension_numbers<[1], [0], [0], [1], [0, 0, 1, 1], [], []>} : vector<8x512xbf16>, vector<512x128xbf16>, vector<8x128xf32> -> vector<8x128xf32>
    %c0_31 = arith.constant 0 : index
    %c0_32 = arith.constant 0 : index
    %40 = vector.load %arg9[%c0_31, %c0_32] : memref<1x128xf32, #tpu.memory_space<vmem>>, vector<1x128xf32>
    %41 = vector.broadcast %40 : vector<1x128xf32> to vector<8x128xf32>
    %42 = arith.addf %39, %41 : vector<8x128xf32>
    %c0_33 = arith.constant 0 : index
    %c0_34 = arith.constant 0 : index
    %43 = vector.load %arg10[%c0_33, %c0_34] : memref<8x128xf32, #tpu.memory_space<vmem>>, vector<8x128xf32>
    tpu.vector_store %arg10[%c0_33, %c0_34], %42 {strides = array<i32>} : memref<8x128xf32, #tpu.memory_space<vmem>>, vector<8x128xf32>,
    return
  }
  func.func @transform_0(%arg0: i32) -> (i32, i32) {
    %c0_i32 = arith.constant 0 : i32
    %c0_i32_0 = arith.constant 0 : i32
    return %arg0, %c0_i32 : i32, i32
  }
  func.func @transform_1(%arg0: i32) -> (i32, i32, i32) {
    %c0_i32 = arith.constant 0 : i32
    %c0_i32_0 = arith.constant 0 : i32
    %c0_i32_1 = arith.constant 0 : i32
    %c0_i32_2 = arith.constant 0 : i32
    return %c0_i32, %c0_i32_0, %c0_i32_1 : i32, i32, i32
  }
  func.func @transform_2(%arg0: i32) -> (i32, i32) {
    %c0_i32 = arith.constant 0 : i32
    %c0_i32_0 = arith.constant 0 : i32
    %c0_i32_1 = arith.constant 0 : i32
    return %c0_i32, %c0_i32_0 : i32, i32
  }
  func.func @transform_3(%arg0: i32) -> (i32, i32) {
    %c0_i32 = arith.constant 0 : i32
    %c0_i32_0 = arith.constant 0 : i32
    %c0_i32_1 = arith.constant 0 : i32
    return %c0_i32, %c0_i32_0 : i32, i32
  }
  func.func @transform_4(%arg0: i32) -> (i32, i32) {
    %c0_i32 = arith.constant 0 : i32
    %c0_i32_0 = arith.constant 0 : i32
    %c0_i32_1 = arith.constant 0 : i32
    return %c0_i32, %c0_i32_0 : i32, i32
  }
  func.func @transform_5(%arg0: i32) -> (i32, i32) {
    %c0_i32 = arith.constant 0 : i32
    %c0_i32_0 = arith.constant 0 : i32
    %c0_i32_1 = arith.constant 0 : i32
    return %c0_i32, %c0_i32_0 : i32, i32
  }
  func.func @transform_6(%arg0: i32) -> (i32, i32) {
    %c0_i32 = arith.constant 0 : i32
    %c0_i32_0 = arith.constant 0 : i32
    %c0_i32_1 = arith.constant 0 : i32
    return %c0_i32, %c0_i32_0 : i32, i32
  }
  func.func @transform_7(%arg0: i32) -> (i32, i32) {
    %c0_i32 = arith.constant 0 : i32
    %c0_i32_0 = arith.constant 0 : i32
    %c0_i32_1 = arith.constant 0 : i32
    return %c0_i32, %c0_i32_0 : i32, i32
  }
  func.func @transform_8(%arg0: i32) -> (i32, i32) {
    %c0_i32 = arith.constant 0 : i32
    %c0_i32_0 = arith.constant 0 : i32
    %c0_i32_1 = arith.constant 0 : i32
    return %c0_i32, %c0_i32_0 : i32, i32
  }
  func.func @transform_9(%arg0: i32) -> (i32, i32) {
    %c0_i32 = arith.constant 0 : i32
    %c0_i32_0 = arith.constant 0 : i32
    return %arg0, %c0_i32 : i32, i32
  }
}

</mosaic_0001>

<bundles_post_ra>
// kernel: forward.1
= control target key start
LH: loop header
LB: loop body
LE: loop exit
PB: predicated region body
PF: predicated region fallthrough
CT: control target
= control target key end

     0   :  { %14 = vsyncpa [#allocation3], 0  ;;  %s15221_s0 = inlined_call_operand.vmem [shape: bf16[8,256], index: 0, kind: input, shape index: {}]   ;;  %s15222_s1 = inlined_call_operand.hbm [shape: bf16[4,256,1280], index: 1, kind: input, shape index: {}]   ;;  %s15223_s2 = inlined_call_operand.hbm [shape: f32[1,1280], index: 2, kind: input, shape index: {}]   ;;  %s15224_s3 = inlined_call_operand.hbm [shape: bf16[1280,512], index: 3, kind: input, shape index: {}]   ;;  %s15225_s4 = inlined_call_operand.hbm [shape: f32[1,512], index: 4, kind: input, shape index: {}]   ;;  %s15226_s5 = inlined_call_operand.hbm [shape: bf16[512,512], index: 5, kind: input, shape index: {}]   ;;  %s15227_s6 = inlined_call_operand.hbm [shape: f32[1,512], index: 6, kind: input, shape index: {}]   ;;  %s15228_s7 = inlined_call_operand.hbm [shape: bf16[512,128], index: 7, kind: input, shape index: {}]   ;;  %s15229_s8 = inlined_call_operand.hbm [shape: f32[1,128], index: 8, kind: input, shape index: {}]   ;;  %s15230_s9 = inlined_call_operand.vmem [shape: f32[8,128], index: 9, kind: output, shape index: {}]  }
   0x1   :  { %15 = vsyncpa [#allocation5], 0 }
   0x2   :  { %16 = vsyncpa [#allocation8], 0 }
   0x3   :  { %17 = vsyncpa [#allocation11], 0  ;;  %s39_s11 = sshll.u32 %s15223_s2, 4  ;;  %s40_s11 = int_to_ptr.hbm [resolvable:$true] %s39_s11 }
   0x4   :  { %18 = vsyncpa [#allocation14], 0  ;;  %s14717_s12 = smov [#allocation4]   ;;  %s63_s16 = sshll.u32 %s15225_s4, 4  ;;  %s64_s16 = int_to_ptr.hbm [resolvable:$true] %s63_s16 }
   0x5   :  { %s41_s13 = sshll.u32 %s14717_s12, 4  ;;  %s14718_s17 = smov [#allocation7]   ;;  %s42_s13 = int_to_ptr.vmem [resolvable:$true] %s41_s13 }
   0x6   :  { %44 = dma.hbm_to_vmem [thread:$0]  %s40_s11, 160, %s42_s13, [#allocation5]  }
   0x7   :  { %s65_s18 = sshll.u32 %s14718_s17, 4  ;;  %s87_s21 = sshll.u32 %s15227_s6, 4  ;;  %s66_s18 = int_to_ptr.vmem [resolvable:$true] %s65_s18  ;;  %s88_s21 = int_to_ptr.hbm [resolvable:$true] %s87_s21 }
   0x8   :  { %68 = dma.hbm_to_vmem [thread:$0]  %s64_s16, 64, %s66_s18, [#allocation8]  }
   0x9   :  { %s25_s23 = sshll.u32 %s15222_s1, 4  ;;  %s14719_s24 = smov [#allocation10]   ;;  %s26_s23 = int_to_ptr.hbm [resolvable:$true] %s25_s23 }
   0xa   :  { %s89_s25 = sshll.u32 %s14719_s24, 4  ;;  %s14720_s4 = smov [#allocation2]   ;;  %s90_s25 = int_to_ptr.vmem [resolvable:$true] %s89_s25 }
   0xb   :  { %92 = dma.hbm_to_vmem [thread:$0]  %s88_s21, 64, %s90_s25, [#allocation11]  }
   0xc   :  { %s27_s26 = sshll.u32 %s14720_s4, 4  ;;  %s14721_s27 = smov 640   ;;  %s28_s26 = int_to_ptr.vmem [resolvable:$true] %s27_s26 }
   0xd   :  { %s14722_s28 = smov 40   ;;  %s49_s30 = sshll.u32 %s15224_s3, 4  ;;  %s50_s30 = int_to_ptr.hbm [resolvable:$true] %s49_s30 }
   0xe   :  { %33 = dma.hbm_to_vmem [thread:$0]  %s26_s23, 81920, %s28_s26, [#allocation3], %s14721_s27, %s14721_s27, %s14722_s28  }
   0xf   :  { %s14723_s10 = smov [#allocation6]   ;;  %s73_s13 = sshll.u32 %s15226_s5, 4  ;;  %s74_s13 = int_to_ptr.hbm [resolvable:$true] %s73_s13 }
  0x10   :  { %s51_s11 = sshll.u32 %s14723_s10, 4  ;;  %s14724_s14 = smov 256   ;;  %s52_s11 = int_to_ptr.vmem [resolvable:$true] %s51_s11 }
  0x11   :  { %s14725_s15 = smov 16   ;;  %s14726_s16 = smov [#allocation9]  }
  0x12   :  { %57 = dma.hbm_to_vmem [thread:$0]  %s50_s30, 40960, %s52_s11, [#allocation5], %s14724_s14, %s14724_s14, %s14725_s15  }
  0x13   :  { %s75_s17 = sshll.u32 %s14726_s16, 4  ;;  %s97_s20 = sshll.u32 %s15228_s7, 4  ;;  %s76_s17 = int_to_ptr.vmem [resolvable:$true] %s75_s17  ;;  %s98_s20 = int_to_ptr.hbm [resolvable:$true] %s97_s20 }
  0x14   :  { %81 = dma.hbm_to_vmem [thread:$0]  %s74_s13, 16384, %s76_s17, [#allocation8], %s14724_s14, %s14724_s14, %s14725_s15  }
  0x15   :  { %s14727_s3 = smov [#allocation12]   ;;  %s111_s5 = sshll.u32 %s15229_s8, 4  ;;  %s112_s5 = int_to_ptr.hbm [resolvable:$true] %s111_s5 }
  0x16   :  { %s99_s21 = sshll.u32 %s14727_s3, 4  ;;  %s14728_s23 = smov 64   ;;  %s100_s21 = int_to_ptr.vmem [resolvable:$true] %s99_s21 }
  0x17   :  { %s14729_s24 = smov 4   ;;  %s14730_s25 = smov [#allocation13]  }
  0x18   :  { %105 = dma.hbm_to_vmem [thread:$0]  %s98_s20, 4096, %s100_s21, [#allocation11], %s14728_s23, %s14728_s23, %s14729_s24  }
  0x19   :  { %s113_s4 = sshll.u32 %s14730_s25, 4  ;;  %s114_s4 = int_to_ptr.vmem [resolvable:$true] %s113_s4 }
  0x1a   :  { %116 = dma.hbm_to_vmem [thread:$0]  %s112_s5, 16, %s114_s4, [#allocation14]  }
  0x1b   :  { %14707 = dma.done.wait [#allocation3], 81920  }
  0x1c   :  { %14708 = vsyncadd [#allocation3], 4294885376 }
  0x1d   :  { %14709 = dma.done.wait [#allocation5], 41120  }
  0x1e   :  { %14710 = vsyncadd [#allocation5], 4294926176 }
  0x1f   :  { %14711 = dma.done.wait [#allocation8], 16448  }
  0x20   :  { %14712 = vsyncadd [#allocation8], 4294950848 }
  0x21   :  { %14713 = dma.done.wait [#allocation11], 4160  }
  0x22   :  { %14714 = vsyncadd [#allocation11], 4294963136 }
  0x23   :  { %14715 = dma.done.wait [#allocation14], 16  }
  0x24   :  { %14716 = vsyncadd [#allocation14], 4294967280  ;;  %v9180_v0 = vld [vmem:[#allocation2 + $0x230] sm:$0xf]  ;;  %v13453_v1 = vld [vmem:[#allocation2 + $0x254] sm:$0xf0] }
  0x25   :  { %v9500_v2 = vld [vmem:[#allocation2 + $0x4b0] sm:$0xf]  ;;  %v9181_v3 = vor.u32 %v13453_v1, %v9180_v0  ;;  %v13533_v4 = vld [vmem:[#allocation2 + $0x4d4] sm:$0xf0]  ;;  %v13448_v5 = vld [vmem:[#allocation2 + $0x234] sm:$0xf] }
  0x26   :  { %v9182_v6 = vld [vmem:[#allocation2 + $0x258] sm:$0xf0]  ;;  %v9501_v7 = vor.u32 %v13533_v4, %v9500_v2  ;;  %v13528_v9 = vld [vmem:[#allocation2 + $0x4b4] sm:$0xf]  ;;  %v9140_v11 = vld [vmem:[#allocation2 + $0x1e0] sm:$0xf] }
  0x27   :  { %v9185_v8 = vor.u32 %v13448_v5, %v9182_v6  ;;  %v9502_v10 = vld [vmem:[#allocation2 + $0x4d8] sm:$0xf0]  ;;  %1117 = vmatpush.bf16.msra.mxu0 %v9181_v3  ;;  %v13443_v13 = vld [vmem:[#allocation2 + $0x204] sm:$0xf0]  ;;  %v9460_v14 = vld [vmem:[#allocation2 + $0x460] sm:$0xf] }
  0x28   :  { %v9505_v12 = vor.u32 %v13528_v9, %v9502_v10  ;;  %v13523_v15 = vld [vmem:[#allocation2 + $0x484] sm:$0xf0]  ;;  %1130 = vmatpush.bf16.msra.mxu1 %v9501_v7  ;;  %v9141_v16 = vor.u32 %v13443_v13, %v9140_v11  ;;  %v13438_v18 = vld [vmem:[#allocation2 + $0x1e4] sm:$0xf]  ;;  %v9142_v19 = vld [vmem:[#allocation2 + $0x208] sm:$0xf0] }
  0x29   :  { %1143 = vmatpush.bf16.msra.mxu2 %v9185_v8  ;;  %v9461_v17 = vor.u32 %v13523_v15, %v9460_v14  ;;  %v13518_v20 = vld [vmem:[#allocation2 + $0x464] sm:$0xf]  ;;  %v9145_v21 = vor.u32 %v13438_v18, %v9142_v19  ;;  %v9462_v22 = vld [vmem:[#allocation2 + $0x488] sm:$0xf0]  ;;  %v9100_v23 = vld [vmem:[#allocation2 + $0x190] sm:$0xf] }
  0x2a   :  { %1156 = vmatpush.bf16.msra.mxu3 %v9505_v12  ;;  %v13433_v24 = vld [vmem:[#allocation2 + $0x1b4] sm:$0xf0]  ;;  %v9465_v25 = vor.u32 %v13518_v20, %v9462_v22  ;;  %v9420_v26 = vld [vmem:[#allocation2 + $0x410] sm:$0xf]  ;;  %v13428_v28 = vld [vmem:[#allocation2 + $0x194] sm:$0xf] }
  0x2b   :  { %v13513_v27 = vld [vmem:[#allocation2 + $0x434] sm:$0xf0]  ;;  %1118 = vmatpush.bf16.msra.mxu0 %v9141_v16  ;;  %v9101_v29 = vor.u32 %v13433_v24, %v9100_v23  ;;  %v9102_v30 = vld [vmem:[#allocation2 + $0x1b8] sm:$0xf0]  ;;  %v13508_v31 = vld [vmem:[#allocation2 + $0x414] sm:$0xf] }
  0x2c   :  { %v9422_v32 = vld [vmem:[#allocation2 + $0x438] sm:$0xf0]  ;;  %1131 = vmatpush.bf16.msra.mxu1 %v9461_v17  ;;  %v9421_v33 = vor.u32 %v13513_v27, %v9420_v26  ;;  %v9105_v34 = vor.u32 %v13428_v28, %v9102_v30  ;;  %v9060_v35 = vld [vmem:[#allocation2 + $0x140] sm:$0xf]  ;;  %v13423_v36 = vld [vmem:[#allocation2 + $0x164] sm:$0xf0] }
  0x2d   :  { %1144 = vmatpush.bf16.msra.mxu2 %v9145_v21  ;;  %v9380_v37 = vld [vmem:[#allocation2 + $0x3c0] sm:$0xf]  ;;  %v9425_v38 = vor.u32 %v13508_v31, %v9422_v32  ;;  %v13503_v39 = vld [vmem:[#allocation2 + $0x3e4] sm:$0xf0]  ;;  %v13418_v40 = vld [vmem:[#allocation2 + $0x144] sm:$0xf]  ;;  %v9061_v44 = vor.u32 %v13423_v36, %v9060_v35 }
  0x2e   :  { %1157 = vmatpush.bf16.msra.mxu3 %v9465_v25  ;;  %v9062_v41 = vld [vmem:[#allocation2 + $0x168] sm:$0xf0]  ;;  %v13498_v42 = vld [vmem:[#allocation2 + $0x3c4] sm:$0xf]  ;;  %v9381_v45 = vor.u32 %v13503_v39, %v9380_v37  ;;  %v9020_v47 = vld [vmem:[#allocation2 + $0xf0] sm:$0xf] }
  0x2f   :  { %v9382_v43 = vld [vmem:[#allocation2 + $0x3e8] sm:$0xf0]  ;;  %1119 = vmatpush.bf16.msra.mxu0 %v9101_v29  ;;  %v9065_v46 = vor.u32 %v13418_v40, %v9062_v41  ;;  %v13413_v48 = vld [vmem:[#allocation2 + $0x114] sm:$0xf0]  ;;  %v9340_v49 = vld [vmem:[#allocation2 + $0x370] sm:$0xf] }
  0x30   :  { %1132 = vmatpush.bf16.msra.mxu1 %v9421_v33  ;;  %v9385_v50 = vor.u32 %v13498_v42, %v9382_v43  ;;  %v13493_v51 = vld [vmem:[#allocation2 + $0x394] sm:$0xf0]  ;;  %v13408_v52 = vld [vmem:[#allocation2 + $0xf4] sm:$0xf]  ;;  %v9022_v53 = vld [vmem:[#allocation2 + $0x118] sm:$0xf0]  ;;  %v9021_v56 = vor.u32 %v13413_v48, %v9020_v47 }
  0x31   :  { %1145 = vmatpush.bf16.msra.mxu2 %v9105_v34  ;;  %v13488_v54 = vld [vmem:[#allocation2 + $0x374] sm:$0xf]  ;;  %v9342_v55 = vld [vmem:[#allocation2 + $0x398] sm:$0xf0]  ;;  %v9341_v57 = vor.u32 %v13493_v51, %v9340_v49  ;;  %v9025_v58 = vor.u32 %v13408_v52, %v9022_v53  ;;  %v8980_v59 = vld [vmem:[#allocation2 + $0xa0] sm:$0xf] }
  0x32   :  { %1158 = vmatpush.bf16.msra.mxu3 %v9425_v38  ;;  %v13403_v60 = vld [vmem:[#allocation2 + $0xc4] sm:$0xf0]  ;;  %v9300_v61 = vld [vmem:[#allocation2 + $0x320] sm:$0xf]  ;;  %v9345_v62 = vor.u32 %v13488_v54, %v9342_v55  ;;  %v13398_v0 = vld [vmem:[#allocation2 + $0xa4] sm:$0xf] }
  0x33   :  { %1120 = vmatpush.bf16.msra.mxu0 %v9061_v44  ;;  %v13483_v63 = vld [vmem:[#allocation2 + $0x344] sm:$0xf0]  ;;  %v8982_v1 = vld [vmem:[#allocation2 + $0xc8] sm:$0xf0]  ;;  %v13478_v2 = vld [vmem:[#allocation2 + $0x324] sm:$0xf]  ;;  %v8981_v4 = vor.u32 %v13403_v60, %v8980_v59 }
  0x34   :  { %1133 = vmatpush.bf16.msra.mxu1 %v9381_v45  ;;  %v9302_v3 = vld [vmem:[#allocation2 + $0x348] sm:$0xf0]  ;;  %v9301_v5 = vor.u32 %v13483_v63, %v9300_v61  ;;  %v8985_v6 = vor.u32 %v13398_v0, %v8982_v1  ;;  %v8940_v7 = vld [vmem:[#allocation2 + $0x50] sm:$0xf]  ;;  %v13393_v8 = vld [vmem:[#allocation2 + $0x74] sm:$0xf0] }
  0x35   :  { %1146 = vmatpush.bf16.msra.mxu2 %v9065_v46  ;;  %v9260_v9 = vld [vmem:[#allocation2 + $0x2d0] sm:$0xf]  ;;  %v9305_v10 = vor.u32 %v13478_v2, %v9302_v3  ;;  %v13473_v11 = vld [vmem:[#allocation2 + $0x2f4] sm:$0xf0]  ;;  %v13388_v12 = vld [vmem:[#allocation2 + $0x54] sm:$0xf]  ;;  %v8941_v16 = vor.u32 %v13393_v8, %v8940_v7 }
  0x36   :  { %1159 = vmatpush.bf16.msra.mxu3 %v9385_v50  ;;  %v8942_v13 = vld [vmem:[#allocation2 + $0x78] sm:$0xf0]  ;;  %v13468_v14 = vld [vmem:[#allocation2 + $0x2d4] sm:$0xf]  ;;  %v8900_v17 = vld [vmem:[#allocation2] sm:$0xf]  ;;  %v9261_v19 = vor.u32 %v13473_v11, %v9260_v9 }
  0x37   :  { %1121 = vmatpush.bf16.msra.mxu0 %v9021_v56  ;;  %v9262_v15 = vld [vmem:[#allocation2 + $0x2f8] sm:$0xf0]  ;;  %v13383_v18 = vld [vmem:[#allocation2 + $0x24] sm:$0xf0]  ;;  %v8945_v20 = vor.u32 %v13388_v12, %v8942_v13  ;;  %v9220_v21 = vld [vmem:[#allocation2 + $0x280] sm:$0xf] }
  0x38   :  { %1134 = vmatpush.bf16.msra.mxu1 %v9341_v57  ;;  %v13463_v22 = vld [vmem:[#allocation2 + $0x2a4] sm:$0xf0]  ;;  %v13378_v23 = vld [vmem:[#allocation2 + $0x4] sm:$0xf]  ;;  %v9265_v24 = vor.u32 %v13468_v14, %v9262_v15  ;;  %v8902_v25 = vld [vmem:[#allocation2 + $0x28] sm:$0xf0]  ;;  %v8901_v31 = vor.u32 %v13383_v18, %v8900_v17 }
  0x39   :  { %1147 = vmatpush.bf16.msra.mxu2 %v9025_v58  ;;  %v13458_v26 = vld [vmem:[#allocation2 + $0x284] sm:$0xf]  ;;  %v9222_v27 = vld [vmem:[#allocation2 + $0x2a8] sm:$0xf0]  ;;  %v9188_v28 = vld [vmem:[#allocation2 + $0x238] sm:$0xf]  ;;  %v9221_v35 = vor.u32 %v13463_v22, %v9220_v21  ;;  %v8905_v36 = vor.u32 %v13378_v23, %v8902_v25 }
  0x3a   :  { %1160 = vmatpush.bf16.msra.mxu3 %v9345_v62  ;;  %v13454_v29 = vld [vmem:[#allocation2 + $0x25c] sm:$0xf0]  ;;  %v9508_v30 = vld [vmem:[#allocation2 + $0x4b8] sm:$0xf]  ;;  %v13449_v33 = vld [vmem:[#allocation2 + $0x23c] sm:$0xf]  ;;  %v9225_v39 = vor.u32 %v13458_v26, %v9222_v27 }
  0x3b   :  { %1122 = vmatpush.bf16.msra.mxu0 %v8981_v4  ;;  %v13534_v32 = vld [vmem:[#allocation2 + $0x4dc] sm:$0xf0]  ;;  %v9190_v34 = vld [vmem:[#allocation2 + $0x260] sm:$0xf0]  ;;  %v13529_v37 = vld [vmem:[#allocation2 + $0x4bc] sm:$0xf]  ;;  %v9189_v40 = vor.u32 %v13454_v29, %v9188_v28 }
  0x3c   :  { %1135 = vmatpush.bf16.msra.mxu1 %v9301_v5  ;;  %v9510_v38 = vld [vmem:[#allocation2 + $0x4e0] sm:$0xf0]  ;;  %v9509_v41 = vor.u32 %v13534_v32, %v9508_v30  ;;  %v9193_v42 = vor.u32 %v13449_v33, %v9190_v34  ;;  %v9148_v43 = vld [vmem:[#allocation2 + $0x1e8] sm:$0xf]  ;;  %v13444_v44 = vld [vmem:[#allocation2 + $0x20c] sm:$0xf0] }
  0x3d   :  { %1148 = vmatpush.bf16.msra.mxu2 %v8985_v6  ;;  %v9468_v45 = vld [vmem:[#allocation2 + $0x468] sm:$0xf]  ;;  %v9513_v46 = vor.u32 %v13529_v37, %v9510_v38  ;;  %v13524_v47 = vld [vmem:[#allocation2 + $0x48c] sm:$0xf0]  ;;  %v13439_v48 = vld [vmem:[#allocation2 + $0x1ec] sm:$0xf]  ;;  %v9149_v52 = vor.u32 %v13444_v44, %v9148_v43 }
  0x3e   :  { %1161 = vmatpush.bf16.msra.mxu3 %v9305_v10  ;;  %v9150_v49 = vld [vmem:[#allocation2 + $0x210] sm:$0xf0]  ;;  %v13519_v50 = vld [vmem:[#allocation2 + $0x46c] sm:$0xf]  ;;  %v9469_v53 = vor.u32 %v13524_v47, %v9468_v45  ;;  %v9108_v55 = vld [vmem:[#allocation2 + $0x198] sm:$0xf] }
  0x3f   :  { %1123 = vmatpush.bf16.msra.mxu0 %v8941_v16  ;;  %v9470_v51 = vld [vmem:[#allocation2 + $0x490] sm:$0xf0]  ;;  %v9153_v54 = vor.u32 %v13439_v48, %v9150_v49  ;;  %v13434_v56 = vld [vmem:[#allocation2 + $0x1bc] sm:$0xf0]  ;;  %v9428_v57 = vld [vmem:[#allocation2 + $0x418] sm:$0xf] }
  0x40   :  { %1136 = vmatpush.bf16.msra.mxu1 %v9261_v19  ;;  %v9473_v58 = vor.u32 %v13519_v50, %v9470_v51  ;;  %v13514_v59 = vld [vmem:[#allocation2 + $0x43c] sm:$0xf0]  ;;  %v13429_v60 = vld [vmem:[#allocation2 + $0x19c] sm:$0xf]  ;;  %v9110_v61 = vld [vmem:[#allocation2 + $0x1c0] sm:$0xf0]  ;;  %v9109_v0 = vor.u32 %v13434_v56, %v9108_v55 }
  0x41   :  { %1149 = vmatpush.bf16.msra.mxu2 %v8945_v20  ;;  %v13509_v62 = vld [vmem:[#allocation2 + $0x41c] sm:$0xf]  ;;  %v9430_v63 = vld [vmem:[#allocation2 + $0x440] sm:$0xf0]  ;;  %v9429_v2 = vor.u32 %v13514_v59, %v9428_v57  ;;  %v9113_v3 = vor.u32 %v13429_v60, %v9110_v61  ;;  %v9068_v4 = vld [vmem:[#allocation2 + $0x148] sm:$0xf] }
  0x42   :  { %1162 = vmatpush.bf16.msra.mxu3 %v9265_v24  ;;  %v149_v1 = vld [vmem:[%s15221_s0] sm:$0xff]  ;;  %v13424_v5 = vld [vmem:[#allocation2 + $0x16c] sm:$0xf0]  ;;  %v9388_v6 = vld [vmem:[#allocation2 + $0x3c8] sm:$0xf]  ;;  %v9433_v9 = vor.u32 %v13509_v62, %v9430_v63 }
  0x43   :  { %1124 = vmatpush.bf16.msra.mxu0 %v8901_v31  ;;  %v311_v7 = vunpack.c.l.b16 %v149_v1  ;;  %v312_v8 = vunpack.c.h.b16 %v149_v1  ;;  %v13504_v10 = vld [vmem:[#allocation2 + $0x3ec] sm:$0xf0]  ;;  %v13419_v11 = vld [vmem:[#allocation2 + $0x14c] sm:$0xf]  ;;  %v9070_v12 = vld [vmem:[#allocation2 + $0x170] sm:$0xf0]  ;;  %v9069_v17 = vor.u32 %v13424_v5, %v9068_v4 }
  0x44   :  { %1137 = vmatpush.bf16.msra.mxu1 %v9221_v35  ;;  %v13499_v13 = vld [vmem:[#allocation2 + $0x3cc] sm:$0xf]  ;;  %v9390_v14 = vld [vmem:[#allocation2 + $0x3f0] sm:$0xf0]  ;;  %v9389_v18 = vor.u32 %v13504_v10, %v9388_v6  ;;  %v9073_v19 = vor.u32 %v13419_v11, %v9070_v12  ;;  %v9028_v20 = vld [vmem:[#allocation2 + $0xf8] sm:$0xf] }
  0x45   :  { %1150 = vmatpush.bf16.msra.mxu2 %v8905_v36  ;;  %v14808_v15 = vpack.c.b16 %v311_v7, %v311_v7  ;;  %v14810_v16 = vpack.c.b16 %v312_v8, %v312_v8  ;;  %v13414_v21 = vld [vmem:[#allocation2 + $0x11c] sm:$0xf0]  ;;  %v9348_v22 = vld [vmem:[#allocation2 + $0x378] sm:$0xf]  ;;  %v9393_v23 = vor.u32 %v13499_v13, %v9390_v14  ;;  %v13409_v25 = vld [vmem:[#allocation2 + $0xfc] sm:$0xf] }
  0x46   :  { %1163 = vmatpush.bf16.msra.mxu3 %v9225_v39  ;;  %v13494_v24 = vld [vmem:[#allocation2 + $0x39c] sm:$0xf0]  ;;  %v9030_v26 = vld [vmem:[#allocation2 + $0x120] sm:$0xf0]  ;;  %v13489_v27 = vld [vmem:[#allocation2 + $0x37c] sm:$0xf]  ;;  %v9029_v29 = vor.u32 %v13414_v21, %v9028_v20 }
  0x47   :  { %1169 = vmatpush.bf16.msrb.mxu0 %v9189_v40  ;;  %v9350_v28 = vld [vmem:[#allocation2 + $0x3a0] sm:$0xf0]  ;;  %1138 = vmatmul.bf16.vlgmr.msra.gmra.mxu1 %v14810_v16  ;;  %v9349_v30 = vor.u32 %v13494_v24, %v9348_v22  ;;  %v9033_v31 = vor.u32 %v13409_v25, %v9030_v26  ;;  %v8988_v32 = vld [vmem:[#allocation2 + $0xa8] sm:$0xf]  ;;  %v13404_v33 = vld [vmem:[#allocation2 + $0xcc] sm:$0xf0] }
  0x48   :  { %1182 = vmatpush.bf16.msrb.mxu1 %v9509_v41  ;;  %1151 = vmatmul.bf16.vlgmr.msra.gmra.mxu2 %v14808_v15  ;;  %v9308_v34 = vld [vmem:[#allocation2 + $0x328] sm:$0xf]  ;;  %v9353_v35 = vor.u32 %v13489_v27, %v9350_v28  ;;  %v13484_v36 = vld [vmem:[#allocation2 + $0x34c] sm:$0xf0]  ;;  %v13399_v37 = vld [vmem:[#allocation2 + $0xac] sm:$0xf]  ;;  %v8989_v41 = vor.u32 %v13404_v33, %v8988_v32 }
  0x49   :  { %1195 = vmatpush.bf16.msrb.mxu2 %v9193_v42  ;;  %1164 = vmatmul.bf16.vlgmr.msra.gmra.mxu3 %v14810_v16  ;;  %v8990_v38 = vld [vmem:[#allocation2 + $0xd0] sm:$0xf0]  ;;  %v13479_v39 = vld [vmem:[#allocation2 + $0x32c] sm:$0xf]  ;;  %v9309_v42 = vor.u32 %v13484_v36, %v9308_v34  ;;  %v8948_v44 = vld [vmem:[#allocation2 + $0x58] sm:$0xf] }
  0x4a   :  { %1208 = vmatpush.bf16.msrb.mxu3 %v9513_v46  ;;  %1125 = vmatmul.bf16.vlgmr.msra.gmra.mxu0 %v14808_v15  ;;  %v9310_v40 = vld [vmem:[#allocation2 + $0x350] sm:$0xf0]  ;;  %v8993_v43 = vor.u32 %v13399_v37, %v8990_v38  ;;  %v13394_v45 = vld [vmem:[#allocation2 + $0x7c] sm:$0xf0]  ;;  %v9268_v46 = vld [vmem:[#allocation2 + $0x2d8] sm:$0xf] }
  0x4b   :  { %1170 = vmatpush.bf16.msrb.mxu0 %v9149_v52  ;;  %v9313_v47 = vor.u32 %v13479_v39, %v9310_v40  ;;  %v13474_v48 = vld [vmem:[#allocation2 + $0x2fc] sm:$0xf0]  ;;  %v13389_v49 = vld [vmem:[#allocation2 + $0x5c] sm:$0xf]  ;;  %v8950_v50 = vld [vmem:[#allocation2 + $0x80] sm:$0xf0] }
  0x4c   :  { %1183 = vmatpush.bf16.msrb.mxu1 %v9469_v53  ;;  %v13469_v51 = vld [vmem:[#allocation2 + $0x2dc] sm:$0xf]  ;;  %v9270_v52 = vld [vmem:[#allocation2 + $0x300] sm:$0xf0]  ;;  %v8949_v53 = vor.u32 %v13394_v45, %v8948_v44  ;;  %v13384_v55 = vld [vmem:[#allocation2 + $0x2c] sm:$0xf0]  ;;  %v9269_v56 = vor.u32 %v13474_v48, %v9268_v46  ;;  %v8953_v57 = vor.u32 %v13389_v49, %v8950_v50 }
  0x4d   :  { %1196 = vmatpush.bf16.msrb.mxu2 %v9153_v54  ;;  %v8908_v54 = vld [vmem:[#allocation2 + $0x8] sm:$0xf]  ;;  %v13464_v59 = vld [vmem:[#allocation2 + $0x2ac] sm:$0xf0]  ;;  %v13379_v60 = vld [vmem:[#allocation2 + $0xc] sm:$0xf]  ;;  %v9273_v61 = vor.u32 %v13469_v51, %v9270_v52 }
  0x4e   :  { %1209 = vmatpush.bf16.msrb.mxu3 %v9473_v58  ;;  %v9228_v58 = vld [vmem:[#allocation2 + $0x288] sm:$0xf]  ;;  %v8910_v62 = vld [vmem:[#allocation2 + $0x30] sm:$0xf0]  ;;  %v13459_v63 = vld [vmem:[#allocation2 + $0x28c] sm:$0xf]  ;;  %v8909_v4 = vor.u32 %v13384_v55, %v8908_v54 }
  0x4f   :  { %1171 = vmatpush.bf16.msrb.mxu0 %v9109_v0  ;;  %v9230_v0 = vld [vmem:[#allocation2 + $0x2b0] sm:$0xf0]  ;;  %v9196_v1 = vld [vmem:[#allocation2 + $0x240] sm:$0xf]  ;;  %v13535_v5 = vld [vmem:[#allocation2 + $0x4e4] sm:$0xf0]  ;;  %v9229_v8 = vor.u32 %v13464_v59, %v9228_v58 }
  0x50   :  { %1184 = vmatpush.bf16.msrb.mxu1 %v9429_v2  ;;  %v13455_v2 = vld [vmem:[#allocation2 + $0x264] sm:$0xf0]  ;;  %v13450_v6 = vld [vmem:[#allocation2 + $0x244] sm:$0xf]  ;;  %v9198_v7 = vld [vmem:[#allocation2 + $0x268] sm:$0xf0]  ;;  %v9233_v12 = vor.u32 %v13459_v63, %v9230_v0 }
  0x51   :  { %1197 = vmatpush.bf16.msrb.mxu2 %v9113_v3  ;;  %v9516_v3 = vld [vmem:[#allocation2 + $0x4c0] sm:$0xf]  ;;  %v13530_v10 = vld [vmem:[#allocation2 + $0x4c4] sm:$0xf]  ;;  %v9518_v11 = vld [vmem:[#allocation2 + $0x4e8] sm:$0xf0]  ;;  %v9197_v13 = vor.u32 %v13455_v2, %v9196_v1 }
  0x52   :  { %1210 = vmatpush.bf16.msrb.mxu3 %v9433_v9  ;;  %v8913_v9 = vor.u32 %v13379_v60, %v8910_v62  ;;  %v9517_v14 = vor.u32 %v13535_v5, %v9516_v3  ;;  %v9476_v20 = vld [vmem:[#allocation2 + $0x470] sm:$0xf]  ;;  %v9521_v21 = vor.u32 %v13530_v10, %v9518_v11  ;;  %v13525_v22 = vld [vmem:[#allocation2 + $0x494] sm:$0xf0]  ;;  %v9158_v24 = vld [vmem:[#allocation2 + $0x218] sm:$0xf0] }
  0x53   :  { %1172 = vmatpush.bf16.msrb.mxu0 %v9069_v17  ;;  %v9201_v17 = vor.u32 %v13450_v6, %v9198_v7  ;;  %v13520_v25 = vld [vmem:[#allocation2 + $0x474] sm:$0xf]  ;;  %v9478_v26 = vld [vmem:[#allocation2 + $0x498] sm:$0xf0]  ;;  %v9477_v28 = vor.u32 %v13525_v22, %v9476_v20  ;;  %v9436_v32 = vld [vmem:[#allocation2 + $0x420] sm:$0xf] }
  0x54   :  { %1185 = vmatpush.bf16.msrb.mxu1 %v9389_v18  ;;  %v9156_v18 = vld [vmem:[#allocation2 + $0x1f0] sm:$0xf]  ;;  %v9481_v33 = vor.u32 %v13520_v25, %v9478_v26  ;;  %v13515_v34 = vld [vmem:[#allocation2 + $0x444] sm:$0xf0]  ;;  %v9118_v36 = vld [vmem:[#allocation2 + $0x1c8] sm:$0xf0] }
  0x55   :  { %1198 = vmatpush.bf16.msrb.mxu2 %v9073_v19  ;;  %v13445_v19 = vld [vmem:[#allocation2 + $0x214] sm:$0xf0]  ;;  %v13510_v37 = vld [vmem:[#allocation2 + $0x424] sm:$0xf]  ;;  %v9438_v38 = vld [vmem:[#allocation2 + $0x448] sm:$0xf0]  ;;  %v9437_v40 = vor.u32 %v13515_v34, %v9436_v32 }
  0x56   :  { %1211 = vmatpush.bf16.msrb.mxu3 %v9393_v23  ;;  %v13440_v23 = vld [vmem:[#allocation2 + $0x1f4] sm:$0xf]  ;;  %v9157_v27 = vor.u32 %v13445_v19, %v9156_v18  ;;  %v9396_v44 = vld [vmem:[#allocation2 + $0x3d0] sm:$0xf]  ;;  %v9441_v45 = vor.u32 %v13510_v37, %v9438_v38  ;;  %v13505_v46 = vld [vmem:[#allocation2 + $0x3f4] sm:$0xf0] }
  0x57   :  { %1173 = vmatpush.bf16.msrb.mxu0 %v9029_v29  ;;  %v9161_v29 = vor.u32 %v13440_v23, %v9158_v24  ;;  %v9078_v48 = vld [vmem:[#allocation2 + $0x178] sm:$0xf0]  ;;  %v13500_v49 = vld [vmem:[#allocation2 + $0x3d4] sm:$0xf]  ;;  %v9397_v52 = vor.u32 %v13505_v46, %v9396_v44  ;;  %v9036_v54 = vld [vmem:[#allocation2 + $0x100] sm:$0xf] }
  0x58   :  { %1186 = vmatpush.bf16.msrb.mxu1 %v9349_v30  ;;  %v9116_v30 = vld [vmem:[#allocation2 + $0x1a0] sm:$0xf]  ;;  %v9398_v50 = vld [vmem:[#allocation2 + $0x3f8] sm:$0xf0]  ;;  %v13415_v55 = vld [vmem:[#allocation2 + $0x124] sm:$0xf0] }
  0x59   :  { %1199 = vmatpush.bf16.msrb.mxu2 %v9033_v31  ;;  %v13435_v31 = vld [vmem:[#allocation2 + $0x1c4] sm:$0xf0]  ;;  %v13410_v59 = vld [vmem:[#allocation2 + $0x104] sm:$0xf]  ;;  %v9038_v60 = vld [vmem:[#allocation2 + $0x128] sm:$0xf0]  ;;  %v9037_v63 = vor.u32 %v13415_v55, %v9036_v54 }
  0x5a   :  { %1212 = vmatpush.bf16.msrb.mxu3 %v9353_v35  ;;  %v13430_v35 = vld [vmem:[#allocation2 + $0x1a4] sm:$0xf]  ;;  %v9117_v39 = vor.u32 %v13435_v31, %v9116_v30  ;;  %v13495_v58 = vld [vmem:[#allocation2 + $0x3a4] sm:$0xf0]  ;;  %v9358_v62 = vld [vmem:[#allocation2 + $0x3a8] sm:$0xf0]  ;;  %v9041_v1 = vor.u32 %v13410_v59, %v9038_v60 }
  0x5b   :  { %1174 = vmatpush.bf16.msrb.mxu0 %v8989_v41  ;;  %v9121_v41 = vor.u32 %v13430_v35, %v9118_v36  ;;  %v8996_v2 = vld [vmem:[#allocation2 + $0xb0] sm:$0xf]  ;;  %v13405_v3 = vld [vmem:[#allocation2 + $0xd4] sm:$0xf0]  ;;  %v13400_v7 = vld [vmem:[#allocation2 + $0xb4] sm:$0xf] }
  0x5c   :  { %1187 = vmatpush.bf16.msrb.mxu1 %v9309_v42  ;;  %v9076_v42 = vld [vmem:[#allocation2 + $0x150] sm:$0xf]  ;;  %v13485_v6 = vld [vmem:[#allocation2 + $0x354] sm:$0xf0]  ;;  %v9318_v10 = vld [vmem:[#allocation2 + $0x358] sm:$0xf0]  ;;  %v8997_v11 = vor.u32 %v13405_v3, %v8996_v2 }
  0x5d   :  { %1200 = vmatpush.bf16.msrb.mxu2 %v8993_v43  ;;  %v13425_v43 = vld [vmem:[#allocation2 + $0x174] sm:$0xf0]  ;;  %v9276_v18 = vld [vmem:[#allocation2 + $0x2e0] sm:$0xf]  ;;  %v13475_v20 = vld [vmem:[#allocation2 + $0x304] sm:$0xf0] }
  0x5e   :  { %1213 = vmatpush.bf16.msrb.mxu3 %v9313_v47  ;;  %v13420_v47 = vld [vmem:[#allocation2 + $0x154] sm:$0xf]  ;;  %v9077_v51 = vor.u32 %v13425_v43, %v9076_v42  ;;  %v8958_v22 = vld [vmem:[#allocation2 + $0x88] sm:$0xf0]  ;;  %v13470_v23 = vld [vmem:[#allocation2 + $0x2e4] sm:$0xf] }
  0x5f   :  { %1175 = vmatpush.bf16.msrb.mxu0 %v8949_v53  ;;  %v9081_v53 = vor.u32 %v13420_v47, %v9078_v48  ;;  %v9278_v24 = vld [vmem:[#allocation2 + $0x308] sm:$0xf0]  ;;  %v8916_v26 = vld [vmem:[#allocation2 + $0x10] sm:$0xf]  ;;  %v13465_v31 = vld [vmem:[#allocation2 + $0x2b4] sm:$0xf0] }
  0x60   :  { %1188 = vmatpush.bf16.msrb.mxu1 %v9269_v56  ;;  %v9356_v56 = vld [vmem:[#allocation2 + $0x380] sm:$0xf]  ;;  %v9236_v30 = vld [vmem:[#allocation2 + $0x290] sm:$0xf]  ;;  %v13380_v32 = vld [vmem:[#allocation2 + $0x14] sm:$0xf] }
  0x61   :  { %1201 = vmatpush.bf16.msrb.mxu2 %v8953_v57  ;;  %v9401_v57 = vor.u32 %v13500_v49, %v9398_v50  ;;  %v9357_v0 = vor.u32 %v13495_v58, %v9356_v56  ;;  %v8918_v34 = vld [vmem:[#allocation2 + $0x38] sm:$0xf0]  ;;  %v13460_v35 = vld [vmem:[#allocation2 + $0x294] sm:$0xf]  ;;  %v9204_v37 = vld [vmem:[#allocation2 + $0x248] sm:$0xf]  ;;  %v9237_v44 = vor.u32 %v13465_v31, %v9236_v30 }
  0x62   :  { %1214 = vmatpush.bf16.msrb.mxu3 %v9273_v61  ;;  %v13490_v61 = vld [vmem:[#allocation2 + $0x384] sm:$0xf]  ;;  %v9238_v36 = vld [vmem:[#allocation2 + $0x2b8] sm:$0xf0]  ;;  %v13456_v38 = vld [vmem:[#allocation2 + $0x26c] sm:$0xf0] }
  0x63   :  { %1176 = vmatpush.bf16.msrb.mxu0 %v8909_v4  ;;  %v9316_v4 = vld [vmem:[#allocation2 + $0x330] sm:$0xf]  ;;  %v9361_v5 = vor.u32 %v13490_v61, %v9358_v62  ;;  %v13451_v42 = vld [vmem:[#allocation2 + $0x24c] sm:$0xf]  ;;  %v9206_v43 = vld [vmem:[#allocation2 + $0x270] sm:$0xf0]  ;;  %v9241_v48 = vor.u32 %v13460_v35, %v9238_v36  ;;  %v9205_v49 = vor.u32 %v13456_v38, %v9204_v37 }
  0x64   :  { %1189 = vmatpush.bf16.msrb.mxu1 %v9229_v8  ;;  %v8998_v8 = vld [vmem:[#allocation2 + $0xd8] sm:$0xf0]  ;;  %v13531_v46 = vld [vmem:[#allocation2 + $0x4cc] sm:$0xf]  ;;  %v9526_v47 = vld [vmem:[#allocation2 + $0x4f0] sm:$0xf0] }
  0x65   :  { %1202 = vmatpush.bf16.msrb.mxu2 %v8913_v9  ;;  %v13480_v9 = vld [vmem:[#allocation2 + $0x334] sm:$0xf]  ;;  %v9484_v54 = vld [vmem:[#allocation2 + $0x478] sm:$0xf]  ;;  %v9529_v55 = vor.u32 %v13531_v46, %v9526_v47  ;;  %v13526_v56 = vld [vmem:[#allocation2 + $0x49c] sm:$0xf0] }
  0x66   :  { %1215 = vmatpush.bf16.msrb.mxu3 %v9233_v12  ;;  %1177 = vmatmul.bf16.vlgmr.msrb.gmra.mxu0 %v14808_v15  ;;  %v9317_v12 = vor.u32 %v13485_v6, %v9316_v4  ;;  %v9321_v19 = vor.u32 %v13480_v9, %v9318_v10  ;;  %v9166_v58 = vld [vmem:[#allocation2 + $0x220] sm:$0xf0]  ;;  %v13521_v59 = vld [vmem:[#allocation2 + $0x47c] sm:$0xf]  ;;  %v9485_v62 = vor.u32 %v13526_v56, %v9484_v54  ;;  %v9444_v2 = vld [vmem:[#allocation2 + $0x428] sm:$0xf] }
  0x67   :  { %1221 = vmatpush.bf16.msra.mxu0 %v9197_v13  ;;  %1190 = vmatmul.bf16.vlgmr.msrb.gmra.mxu1 %v14810_v16  ;;  %v9001_v13 = vor.u32 %v13400_v7, %v8998_v8  ;;  %v9486_v60 = vld [vmem:[#allocation2 + $0x4a0] sm:$0xf0]  ;;  %v13516_v4 = vld [vmem:[#allocation2 + $0x44c] sm:$0xf0]  ;;  %v9126_v6 = vld [vmem:[#allocation2 + $0x1d0] sm:$0xf0] }
  0x68   :  { %1234 = vmatpush.bf16.msra.mxu1 %v9517_v14  ;;  %1203 = vmatmul.bf16.vlgmr.msrb.gmra.mxu2 %v14808_v15  ;;  %v8956_v14 = vld [vmem:[#allocation2 + $0x60] sm:$0xf]  ;;  %v9489_v3 = vor.u32 %v13521_v59, %v9486_v60  ;;  %v13511_v7 = vld [vmem:[#allocation2 + $0x42c] sm:$0xf]  ;;  %v9446_v8 = vld [vmem:[#allocation2 + $0x450] sm:$0xf0]  ;;  %v9445_v10 = vor.u32 %v13516_v4, %v9444_v2 }
  0x69   :  { %1247 = vmatpush.bf16.msra.mxu2 %v9201_v17  ;;  %1216 = vmatmul.bf16.vlgmr.msrb.gmra.mxu3 %v14810_v16  ;;  %v13395_v17 = vld [vmem:[#allocation2 + $0x84] sm:$0xf0]  ;;  %v13496_v30 = vld [vmem:[#allocation2 + $0x3ac] sm:$0xf0]  ;;  %v13411_v31 = vld [vmem:[#allocation2 + $0x10c] sm:$0xf] }
  0x6a   :  { %1260 = vmatpush.bf16.msra.mxu3 %v9521_v21  ;;  %v13390_v21 = vld [vmem:[#allocation2 + $0x64] sm:$0xf]  ;;  %v8957_v25 = vor.u32 %v13395_v17, %v8956_v14  ;;  %v9404_v14 = vld [vmem:[#allocation2 + $0x3d8] sm:$0xf]  ;;  %v9449_v17 = vor.u32 %v13511_v7, %v9446_v8  ;;  %v13476_v54 = vld [vmem:[#allocation2 + $0x30c] sm:$0xf0] }
  0x6b   :  { %1222 = vmatpush.bf16.msra.mxu0 %v9157_v27  ;;  %v13385_v27 = vld [vmem:[#allocation2 + $0x34] sm:$0xf0]  ;;  %v9326_v46 = vld [vmem:[#allocation2 + $0x360] sm:$0xf0]  ;;  %v8966_v56 = vld [vmem:[#allocation2 + $0x90] sm:$0xf0] }
  0x6c   :  { %1235 = vmatpush.bf16.msra.mxu1 %v9477_v28  ;;  %v9277_v28 = vor.u32 %v13475_v20, %v9276_v18  ;;  %v13506_v18 = vld [vmem:[#allocation2 + $0x3fc] sm:$0xf0]  ;;  %v9086_v20 = vld [vmem:[#allocation2 + $0x180] sm:$0xf0]  ;;  %v9004_v38 = vld [vmem:[#allocation2 + $0xb8] sm:$0xf] }
  0x6d   :  { %1248 = vmatpush.bf16.msra.mxu2 %v9161_v29  ;;  %v8961_v29 = vor.u32 %v13390_v21, %v8958_v22  ;;  %v13501_v21 = vld [vmem:[#allocation2 + $0x3dc] sm:$0xf]  ;;  %v9406_v22 = vld [vmem:[#allocation2 + $0x400] sm:$0xf0]  ;;  %v8924_v60 = vld [vmem:[#allocation2 + $0x18] sm:$0xf] }
  0x6e   :  { %1261 = vmatpush.bf16.msra.mxu3 %v9481_v33  ;;  %v9281_v33 = vor.u32 %v13470_v23, %v9278_v24  ;;  %v9405_v24 = vor.u32 %v13506_v18, %v9404_v14  ;;  %v13381_v2 = vld [vmem:[#allocation2 + $0x1c] sm:$0xf]  ;;  %v8926_v4 = vld [vmem:[#allocation2 + $0x40] sm:$0xf0]  ;;  %v9212_v7 = vld [vmem:[#allocation2 + $0x250] sm:$0xf] }
  0x6f   :  { %1223 = vmatpush.bf16.msra.mxu0 %v9117_v39  ;;  %v9524_v39 = vld [vmem:[#allocation2 + $0x4c8] sm:$0xf]  ;;  %v13457_v8 = vld [vmem:[#allocation2 + $0x274] sm:$0xf0]  ;;  %v13532_v18 = vld [vmem:[#allocation2 + $0x4d4] sm:$0xf] }
  0x70   :  { %1236 = vmatpush.bf16.msra.mxu1 %v9437_v40  ;;  %v8917_v40 = vor.u32 %v13385_v27, %v8916_v26  ;;  %v9044_v26 = vld [vmem:[#allocation2 + $0x108] sm:$0xf]  ;;  %v13416_v27 = vld [vmem:[#allocation2 + $0x12c] sm:$0xf0] }
  0x71   :  { %1249 = vmatpush.bf16.msra.mxu2 %v9121_v41  ;;  %v13536_v41 = vld [vmem:[#allocation2 + $0x4ec] sm:$0xf0]  ;;  %v9045_v35 = vor.u32 %v13416_v27, %v9044_v26  ;;  %v9492_v26 = vld [vmem:[#allocation2 + $0x480] sm:$0xf] }
  0x72   :  { %1262 = vmatpush.bf16.msra.mxu3 %v9441_v45  ;;  %v8921_v45 = vor.u32 %v13380_v32, %v8918_v34  ;;  %v9525_v50 = vor.u32 %v13536_v41, %v9524_v39  ;;  %v9046_v32 = vld [vmem:[#allocation2 + $0x130] sm:$0xf0]  ;;  %v13406_v39 = vld [vmem:[#allocation2 + $0xdc] sm:$0xf0] }
  0x73   :  { %1224 = vmatpush.bf16.msra.mxu0 %v9077_v51  ;;  %v9209_v51 = vor.u32 %v13451_v42, %v9206_v43  ;;  %v9366_v34 = vld [vmem:[#allocation2 + $0x3b0] sm:$0xf0]  ;;  %v9049_v37 = vor.u32 %v13411_v31, %v9046_v32  ;;  %v13486_v42 = vld [vmem:[#allocation2 + $0x35c] sm:$0xf0]  ;;  %v13401_v43 = vld [vmem:[#allocation2 + $0xbc] sm:$0xf]  ;;  %v9005_v47 = vor.u32 %v13406_v39, %v9004_v38 }
  0x74   :  { %1237 = vmatpush.bf16.msra.mxu1 %v9397_v52  ;;  %v9164_v52 = vld [vmem:[#allocation2 + $0x1f8] sm:$0xf]  ;;  %v13522_v31 = vld [vmem:[#allocation2 + $0x484] sm:$0xf]  ;;  %v9494_v32 = vld [vmem:[#allocation2 + $0x4a8] sm:$0xf0] }
  0x75   :  { %1250 = vmatpush.bf16.msra.mxu2 %v9081_v53  ;;  %v13446_v53 = vld [vmem:[#allocation2 + $0x21c] sm:$0xf0]  ;;  %v9452_v38 = vld [vmem:[#allocation2 + $0x430] sm:$0xf]  ;;  %v9497_v39 = vor.u32 %v13522_v31, %v9494_v32 }
  0x76   :  { %1263 = vmatpush.bf16.msra.mxu3 %v9401_v57  ;;  %v13441_v57 = vld [vmem:[#allocation2 + $0x1fc] sm:$0xf]  ;;  %v9165_v61 = vor.u32 %v13446_v53, %v9164_v52  ;;  %v9284_v52 = vld [vmem:[#allocation2 + $0x2e8] sm:$0xf]  ;;  %v8932_v32 = vld [vmem:[#allocation2 + $0x20] sm:$0xf] }
  0x77   :  { %1225 = vmatpush.bf16.msra.mxu0 %v9037_v63  ;;  %v9169_v63 = vor.u32 %v13441_v57, %v9166_v58  ;;  %v13471_v57 = vld [vmem:[#allocation2 + $0x2ec] sm:$0xf]  ;;  %v9286_v58 = vld [vmem:[#allocation2 + $0x310] sm:$0xf0] }
  0x78   :  { %1238 = vmatpush.bf16.msra.mxu1 %v9357_v0  ;;  %v9124_v0 = vld [vmem:[#allocation2 + $0x1a8] sm:$0xf] }
  0x79   :  { %1251 = vmatpush.bf16.msra.mxu2 %v9041_v1  ;;  %v13436_v1 = vld [vmem:[#allocation2 + $0x1cc] sm:$0xf0] }
  0x7a   :  { %1264 = vmatpush.bf16.msra.mxu3 %v9361_v5  ;;  %v13431_v5 = vld [vmem:[#allocation2 + $0x1ac] sm:$0xf]  ;;  %v9125_v9 = vor.u32 %v13436_v1, %v9124_v0  ;;  %v9244_v0 = vld [vmem:[#allocation2 + $0x298] sm:$0xf]  ;;  %v13466_v1 = vld [vmem:[#allocation2 + $0x2bc] sm:$0xf0] }
  0x7b   :  { %1226 = vmatpush.bf16.msra.mxu0 %v8997_v11  ;;  %v9129_v11 = vor.u32 %v13431_v5, %v9126_v6  ;;  %v13461_v5 = vld [vmem:[#allocation2 + $0x29c] sm:$0xf]  ;;  %v9246_v6 = vld [vmem:[#allocation2 + $0x2c0] sm:$0xf0]  ;;  %v9245_v14 = vor.u32 %v13466_v1, %v9244_v0  ;;  %v13497_v0 = vld [vmem:[#allocation2 + $0x3b4] sm:$0xf0] }
  0x7c   :  { %1239 = vmatpush.bf16.msra.mxu1 %v9317_v12  ;;  %v9084_v12 = vld [vmem:[#allocation2 + $0x158] sm:$0xf]  ;;  %v13412_v1 = vld [vmem:[#allocation2 + $0x114] sm:$0xf] }
  0x7d   :  { %1252 = vmatpush.bf16.msra.mxu2 %v9001_v13  ;;  %v13426_v13 = vld [vmem:[#allocation2 + $0x17c] sm:$0xf0] }
  0x7e   :  { %1265 = vmatpush.bf16.msra.mxu3 %v9321_v19  ;;  %v13421_v19 = vld [vmem:[#allocation2 + $0x15c] sm:$0xf]  ;;  %v9085_v23 = vor.u32 %v13426_v13, %v9084_v12  ;;  %v13452_v12 = vld [vmem:[#allocation2 + $0x254] sm:$0xf] }
  0x7f   :  { %1227 = vmatpush.bf16.msra.mxu0 %v8957_v25  ;;  %v9089_v25 = vor.u32 %v13421_v19, %v9086_v20  ;;  %v9214_v13 = vld [vmem:[#allocation2 + $0x278] sm:$0xf0]  ;;  %v9249_v20 = vor.u32 %v13461_v5, %v9246_v6 }
  0x80   :  { %1240 = vmatpush.bf16.msra.mxu1 %v9277_v28  ;;  %v9364_v28 = vld [vmem:[#allocation2 + $0x388] sm:$0xf]  ;;  %v9534_v19 = vld [vmem:[#allocation2 + $0x4f8] sm:$0xf0] }
  0x81   :  { %1253 = vmatpush.bf16.msra.mxu2 %v8961_v29  ;;  %v9409_v29 = vor.u32 %v13501_v21, %v9406_v22  ;;  %v9365_v36 = vor.u32 %v13496_v30, %v9364_v28  ;;  %v9213_v21 = vor.u32 %v13457_v8, %v9212_v7  ;;  %v9537_v27 = vor.u32 %v13532_v18, %v9534_v19  ;;  %v13527_v28 = vld [vmem:[#allocation2 + $0x4a4] sm:$0xf0]  ;;  %v9174_v30 = vld [vmem:[#allocation2 + $0x228] sm:$0xf0]  ;;  %v9012_v8 = vld [vmem:[#allocation2 + $0xc0] sm:$0xf] }
  0x82   :  { %1266 = vmatpush.bf16.msra.mxu3 %v9281_v33  ;;  %v13491_v33 = vld [vmem:[#allocation2 + $0x38c] sm:$0xf] }
  0x83   :  { %1228 = vmatpush.bf16.msra.mxu0 %v8917_v40  ;;  %v9324_v40 = vld [vmem:[#allocation2 + $0x338] sm:$0xf]  ;;  %v9369_v41 = vor.u32 %v13491_v33, %v9366_v34  ;;  %v9493_v34 = vor.u32 %v13527_v28, %v9492_v26  ;;  %v9334_v18 = vld [vmem:[#allocation2 + $0x368] sm:$0xf0]  ;;  %v8974_v28 = vld [vmem:[#allocation2 + $0x98] sm:$0xf0] }
  0x84   :  { %1241 = vmatpush.bf16.msra.mxu1 %v9237_v44  ;;  %v9006_v44 = vld [vmem:[#allocation2 + $0xe0] sm:$0xf0]  ;;  %v13477_v26 = vld [vmem:[#allocation2 + $0x314] sm:$0xf0] }
  0x85   :  { %1254 = vmatpush.bf16.msra.mxu2 %v8921_v45  ;;  %v13481_v45 = vld [vmem:[#allocation2 + $0x33c] sm:$0xf] }
  0x86   :  { %1267 = vmatpush.bf16.msra.mxu3 %v9241_v48  ;;  %1229 = vmatmul.bf16.vlgmr.msra.gmra.mxu0 %v14808_v15  ;;  %v9325_v48 = vor.u32 %v13486_v42, %v9324_v40  ;;  %v9329_v53 = vor.u32 %v13481_v45, %v9326_v46  ;;  %v13517_v40 = vld [vmem:[#allocation2 + $0x454] sm:$0xf0]  ;;  %v9134_v42 = vld [vmem:[#allocation2 + $0x1d8] sm:$0xf0] }
  0x87   :  { %1273 = vmatpush.bf16.msrb.mxu0 %v9205_v49  ;;  %1242 = vmatmul.bf16.vlgmr.msra.gmra.mxu1 %v14810_v16  ;;  %v9009_v49 = vor.u32 %v13401_v43, %v9006_v44  ;;  %v13512_v43 = vld [vmem:[#allocation2 + $0x434] sm:$0xf]  ;;  %v9454_v44 = vld [vmem:[#allocation2 + $0x458] sm:$0xf0]  ;;  %v9453_v46 = vor.u32 %v13517_v40, %v9452_v38  ;;  %v13382_v38 = vld [vmem:[#allocation2 + $0x24] sm:$0xf] }
  0x88   :  { %1286 = vmatpush.bf16.msrb.mxu1 %v9525_v50  ;;  %1255 = vmatmul.bf16.vlgmr.msra.gmra.mxu2 %v14808_v15  ;;  %v8964_v50 = vld [vmem:[#allocation2 + $0x68] sm:$0xf]  ;;  %v8934_v40 = vld [vmem:[#allocation2 + $0x48] sm:$0xf0] }
  0x89   :  { %1299 = vmatpush.bf16.msrb.mxu2 %v9209_v51  ;;  %1268 = vmatmul.bf16.vlgmr.msra.gmra.mxu3 %v14810_v16  ;;  %v13396_v51 = vld [vmem:[#allocation2 + $0x8c] sm:$0xf0] }
  0x8a   :  { %1312 = vmatpush.bf16.msrb.mxu3 %v9529_v55  ;;  %v13391_v55 = vld [vmem:[#allocation2 + $0x6c] sm:$0xf]  ;;  %v8965_v59 = vor.u32 %v13396_v51, %v8964_v50  ;;  %v9412_v50 = vld [vmem:[#allocation2 + $0x3e0] sm:$0xf]  ;;  %v9457_v51 = vor.u32 %v13512_v43, %v9454_v44  ;;  %v9820_v43 = vld [vmem:[#allocation2 + $0x730] sm:$0xf] }
  0x8b   :  { %1274 = vmatpush.bf16.msrb.mxu0 %v9165_v61  ;;  %v13386_v61 = vld [vmem:[#allocation2 + $0x3c] sm:$0xf0]  ;;  %v13613_v44 = vld [vmem:[#allocation2 + $0x754] sm:$0xf0] }
  0x8c   :  { %1287 = vmatpush.bf16.msrb.mxu1 %v9485_v62  ;;  %v9285_v62 = vor.u32 %v13476_v54, %v9284_v52  ;;  %v13507_v52 = vld [vmem:[#allocation2 + $0x404] sm:$0xf0]  ;;  %v9094_v54 = vld [vmem:[#allocation2 + $0x188] sm:$0xf0] }
  0x8d   :  { %1300 = vmatpush.bf16.msrb.mxu2 %v9169_v63  ;;  %v8969_v63 = vor.u32 %v13391_v55, %v8966_v56  ;;  %v13502_v55 = vld [vmem:[#allocation2 + $0x3e4] sm:$0xf]  ;;  %v9414_v56 = vld [vmem:[#allocation2 + $0x408] sm:$0xf0] }
  0x8e   :  { %1313 = vmatpush.bf16.msrb.mxu3 %v9489_v3  ;;  %v9289_v3 = vor.u32 %v13471_v57, %v9286_v58  ;;  %v9413_v58 = vor.u32 %v13507_v52, %v9412_v50  ;;  %v13688_v52 = vld [vmem:[#allocation2 + $0x9b4] sm:$0xf] }
  0x8f   :  { %1275 = vmatpush.bf16.msrb.mxu0 %v9125_v9  ;;  %v9532_v9 = vld [vmem:[#allocation2 + $0x4d0] sm:$0xf] }
  0x90   :  { %1288 = vmatpush.bf16.msrb.mxu1 %v9445_v10  ;;  %v8925_v10 = vor.u32 %v13386_v61, %v8924_v60  ;;  %v9052_v60 = vld [vmem:[#allocation2 + $0x110] sm:$0xf]  ;;  %v13417_v61 = vld [vmem:[#allocation2 + $0x134] sm:$0xf0] }
  0x91   :  { %1301 = vmatpush.bf16.msrb.mxu2 %v9129_v11  ;;  %v13537_v11 = vld [vmem:[#allocation2 + $0x4f4] sm:$0xf0]  ;;  %v9053_v5 = vor.u32 %v13417_v61, %v9052_v60  ;;  %v10100_v60 = vld [vmem:[#allocation2 + $0x960] sm:$0xf] }
  0x92   :  { %1314 = vmatpush.bf16.msrb.mxu3 %v9449_v17  ;;  %v8929_v17 = vor.u32 %v13381_v2, %v8926_v4  ;;  %v9533_v22 = vor.u32 %v13537_v11, %v9532_v9  ;;  %v9054_v2 = vld [vmem:[#allocation2 + $0x138] sm:$0xf0]  ;;  %v13407_v9 = vld [vmem:[#allocation2 + $0xe4] sm:$0xf0] }
  0x93   :  { %1276 = vmatpush.bf16.msrb.mxu0 %v9085_v23  ;;  %v9217_v23 = vor.u32 %v13452_v12, %v9214_v13  ;;  %v9374_v4 = vld [vmem:[#allocation2 + $0x3b8] sm:$0xf0]  ;;  %v9057_v7 = vor.u32 %v13412_v1, %v9054_v2  ;;  %v13487_v12 = vld [vmem:[#allocation2 + $0x364] sm:$0xf0]  ;;  %v13402_v13 = vld [vmem:[#allocation2 + $0xc4] sm:$0xf]  ;;  %v9013_v19 = vor.u32 %v13407_v9, %v9012_v8 }
  0x94   :  { %1289 = vmatpush.bf16.msrb.mxu1 %v9405_v24  ;;  %v9172_v24 = vld [vmem:[#allocation2 + $0x200] sm:$0xf]  ;;  %v13678_v1 = vld [vmem:[#allocation2 + $0x964] sm:$0xf]  ;;  %v10102_v2 = vld [vmem:[#allocation2 + $0x988] sm:$0xf0] }
  0x95   :  { %1302 = vmatpush.bf16.msrb.mxu2 %v9089_v25  ;;  %v13447_v25 = vld [vmem:[#allocation2 + $0x224] sm:$0xf0]  ;;  %v10060_v8 = vld [vmem:[#allocation2 + $0x910] sm:$0xf]  ;;  %v10105_v9 = vor.u32 %v13678_v1, %v10102_v2  ;;  %v13628_v2 = vld [vmem:[#allocation2 + $0x7d4] sm:$0xf] }
  0x96   :  { %1315 = vmatpush.bf16.msrb.mxu3 %v9409_v29  ;;  %v13442_v29 = vld [vmem:[#allocation2 + $0x204] sm:$0xf]  ;;  %v9173_v33 = vor.u32 %v13447_v25, %v9172_v24  ;;  %v9292_v24 = vld [vmem:[#allocation2 + $0x2f0] sm:$0xf] }
  0x97   :  { %1277 = vmatpush.bf16.msrb.mxu0 %v9045_v35  ;;  %v9177_v35 = vor.u32 %v13442_v29, %v9174_v30  ;;  %v13472_v29 = vld [vmem:[#allocation2 + $0x2f4] sm:$0xf]  ;;  %v9294_v30 = vld [vmem:[#allocation2 + $0x318] sm:$0xf0] }
  0x98   :  { %1290 = vmatpush.bf16.msrb.mxu1 %v9365_v36  ;;  %v9132_v36 = vld [vmem:[#allocation2 + $0x1b0] sm:$0xf] }
  0x99   :  { %1303 = vmatpush.bf16.msrb.mxu2 %v9049_v37  ;;  %v13437_v37 = vld [vmem:[#allocation2 + $0x1d4] sm:$0xf0] }
  0x9a   :  { %1316 = vmatpush.bf16.msrb.mxu3 %v9369_v41  ;;  %v13432_v41 = vld [vmem:[#allocation2 + $0x1b4] sm:$0xf]  ;;  %v9133_v45 = vor.u32 %v13437_v37, %v9132_v36  ;;  %v9252_v36 = vld [vmem:[#allocation2 + $0x2a0] sm:$0xf]  ;;  %v13467_v37 = vld [vmem:[#allocation2 + $0x2c4] sm:$0xf0] }
  0x9b   :  { %1278 = vmatpush.bf16.msrb.mxu0 %v9005_v47  ;;  %v9137_v47 = vor.u32 %v13432_v41, %v9134_v42  ;;  %v13462_v41 = vld [vmem:[#allocation2 + $0x2a4] sm:$0xf]  ;;  %v9254_v42 = vld [vmem:[#allocation2 + $0x2c8] sm:$0xf0]  ;;  %v9253_v50 = vor.u32 %v13467_v37, %v9252_v36  ;;  %v13653_v36 = vld [vmem:[#allocation2 + $0x894] sm:$0xf0] }
  0x9c   :  { %1291 = vmatpush.bf16.msrb.mxu1 %v9325_v48  ;;  %v9092_v48 = vld [vmem:[#allocation2 + $0x160] sm:$0xf]  ;;  %v13568_v37 = vld [vmem:[#allocation2 + $0x5f4] sm:$0xf] }
  0x9d   :  { %1304 = vmatpush.bf16.msrb.mxu2 %v9009_v49  ;;  %v13427_v49 = vld [vmem:[#allocation2 + $0x184] sm:$0xf0] }
  0x9e   :  { %1317 = vmatpush.bf16.msrb.mxu3 %v9329_v53  ;;  %v13422_v53 = vld [vmem:[#allocation2 + $0x164] sm:$0xf]  ;;  %v9093_v57 = vor.u32 %v13427_v49, %v9092_v48  ;;  %v13608_v48 = vld [vmem:[#allocation2 + $0x734] sm:$0xf]  ;;  %v9822_v49 = vld [vmem:[#allocation2 + $0x758] sm:$0xf0] }
  0x9f   :  { %1279 = vmatpush.bf16.msrb.mxu0 %v8965_v59  ;;  %v9097_v59 = vor.u32 %v13422_v53, %v9094_v54  ;;  %v10142_v53 = vld [vmem:[#allocation2 + $0x9d8] sm:$0xf0]  ;;  %v9257_v54 = vor.u32 %v13462_v41, %v9254_v42 }
  0xa0   :  { %1292 = vmatpush.bf16.msrb.mxu1 %v9285_v62  ;;  %v9372_v62 = vld [vmem:[#allocation2 + $0x390] sm:$0xf]  ;;  %v10145_v61 = vor.u32 %v13688_v52, %v10142_v53  ;;  %v9942_v52 = vld [vmem:[#allocation2 + $0x848] sm:$0xf0] }
  0xa1   :  { %1305 = vmatpush.bf16.msrb.mxu2 %v8969_v63  ;;  %v9417_v63 = vor.u32 %v13502_v55, %v9414_v56  ;;  %v9373_v6 = vor.u32 %v13497_v0, %v9372_v62  ;;  %v9821_v55 = vor.u32 %v13613_v44, %v9820_v43  ;;  %v13683_v62 = vld [vmem:[#allocation2 + $0x984] sm:$0xf0]  ;;  %v9782_v0 = vld [vmem:[#allocation2 + $0x708] sm:$0xf0]  ;;  %v9620_v44 = vld [vmem:[#allocation2 + $0x5a0] sm:$0xf] }
  0xa2   :  { %1318 = vmatpush.bf16.msrb.mxu3 %v9289_v3  ;;  %v13492_v3 = vld [vmem:[#allocation2 + $0x394] sm:$0xf] }
  0xa3   :  { %1280 = vmatpush.bf16.msrb.mxu0 %v8925_v10  ;;  %v9332_v10 = vld [vmem:[#allocation2 + $0x340] sm:$0xf]  ;;  %v9377_v11 = vor.u32 %v13492_v3, %v9374_v4  ;;  %v10101_v4 = vor.u32 %v13683_v62, %v10100_v60  ;;  %v13633_v62 = vld [vmem:[#allocation2 + $0x7f4] sm:$0xf0] }
  0xa4   :  { %1293 = vmatpush.bf16.msrb.mxu1 %v9245_v14  ;;  %v9014_v14 = vld [vmem:[#allocation2 + $0xe8] sm:$0xf0] }
  0xa5   :  { %1306 = vmatpush.bf16.msrb.mxu2 %v8929_v17  ;;  %v13482_v17 = vld [vmem:[#allocation2 + $0x344] sm:$0xf] }
  0xa6   :  { %1319 = vmatpush.bf16.msrb.mxu3 %v9249_v20  ;;  %1281 = vmatmul.bf16.vlgmr.msrb.gmra.mxu0 %v14808_v15  ;;  %v9333_v20 = vor.u32 %v13487_v12, %v9332_v10  ;;  %v9337_v25 = vor.u32 %v13482_v17, %v9334_v18  ;;  %v13673_v10 = vld [vmem:[#allocation2 + $0x934] sm:$0xf0]  ;;  %v9742_v12 = vld [vmem:[#allocation2 + $0x6b8] sm:$0xf0] }
  0xa7   :  { %1325 = vmatpush.bf16.msra.mxu0 %v9213_v21  ;;  %1294 = vmatmul.bf16.vlgmr.msrb.gmra.mxu1 %v14810_v16  ;;  %v9017_v21 = vor.u32 %v13402_v13, %v9014_v14  ;;  %v13668_v13 = vld [vmem:[#allocation2 + $0x914] sm:$0xf]  ;;  %v10062_v14 = vld [vmem:[#allocation2 + $0x938] sm:$0xf0]  ;;  %v10061_v18 = vor.u32 %v13673_v10, %v10060_v8  ;;  %v13623_v10 = vld [vmem:[#allocation2 + $0x7a4] sm:$0xf0] }
  0xa8   :  { %1338 = vmatpush.bf16.msra.mxu1 %v9533_v22  ;;  %1307 = vmatmul.bf16.vlgmr.msrb.gmra.mxu2 %v14808_v15  ;;  %v8972_v22 = vld [vmem:[#allocation2 + $0x70] sm:$0xf] }
  0xa9   :  { %1351 = vmatpush.bf16.msra.mxu2 %v9217_v23  ;;  %1320 = vmatmul.bf16.vlgmr.msrb.gmra.mxu3 %v14810_v16  ;;  %v13397_v23 = vld [vmem:[#allocation2 + $0x94] sm:$0xf0] }
  0xaa   :  { %1364 = vmatpush.bf16.msra.mxu3 %v9537_v27  ;;  %v13392_v27 = vld [vmem:[#allocation2 + $0x74] sm:$0xf]  ;;  %v8973_v31 = vor.u32 %v13397_v23, %v8972_v22  ;;  %v10020_v22 = vld [vmem:[#allocation2 + $0x8c0] sm:$0xf]  ;;  %v10065_v23 = vor.u32 %v13668_v13, %v10062_v14  ;;  %v9542_v14 = vld [vmem:[#allocation2 + $0x528] sm:$0xf0] }
  0xab   :  { %1326 = vmatpush.bf16.msra.mxu0 %v9173_v33  ;;  %v13387_v33 = vld [vmem:[#allocation2 + $0x44] sm:$0xf0] }
  0xac   :  { %1339 = vmatpush.bf16.msra.mxu1 %v9493_v34  ;;  %v9293_v34 = vor.u32 %v13477_v26, %v9292_v24  ;;  %v13663_v24 = vld [vmem:[#allocation2 + $0x8e4] sm:$0xf0]  ;;  %v9702_v26 = vld [vmem:[#allocation2 + $0x668] sm:$0xf0] }
  0xad   :  { %1352 = vmatpush.bf16.msra.mxu2 %v9177_v35  ;;  %v8977_v35 = vor.u32 %v13392_v27, %v8974_v28  ;;  %v13658_v27 = vld [vmem:[#allocation2 + $0x8c4] sm:$0xf]  ;;  %v10022_v28 = vld [vmem:[#allocation2 + $0x8e8] sm:$0xf0] }
  0xae   :  { %1365 = vmatpush.bf16.msra.mxu3 %v9497_v39  ;;  %v9297_v39 = vor.u32 %v13472_v29, %v9294_v30  ;;  %v10021_v30 = vor.u32 %v13663_v24, %v10020_v22  ;;  %v10148_v22 = vld [vmem:[#allocation2 + $0x9b8] sm:$0xf] }
  0xaf   :  { %1327 = vmatpush.bf16.msra.mxu0 %v9133_v45  ;;  %v10140_v45 = vld [vmem:[#allocation2 + $0x9b0] sm:$0xf] }
  0xb0   :  { %1340 = vmatpush.bf16.msra.mxu1 %v9453_v46  ;;  %v8933_v46 = vor.u32 %v13387_v33, %v8932_v32  ;;  %v9660_v32 = vld [vmem:[#allocation2 + $0x5f0] sm:$0xf]  ;;  %v13573_v33 = vld [vmem:[#allocation2 + $0x614] sm:$0xf0] }
  0xb1   :  { %1353 = vmatpush.bf16.msra.mxu2 %v9137_v47  ;;  %v13693_v47 = vld [vmem:[#allocation2 + $0x9d4] sm:$0xf0]  ;;  %v9661_v41 = vor.u32 %v13573_v33, %v9660_v32  ;;  %v10150_v32 = vld [vmem:[#allocation2 + $0x9e0] sm:$0xf0] }
  0xb2   :  { %1366 = vmatpush.bf16.msra.mxu3 %v9457_v51  ;;  %v8937_v51 = vor.u32 %v13382_v38, %v8934_v40  ;;  %v10141_v56 = vor.u32 %v13693_v47, %v10140_v45  ;;  %v9662_v38 = vld [vmem:[#allocation2 + $0x618] sm:$0xf0]  ;;  %v13563_v45 = vld [vmem:[#allocation2 + $0x5c4] sm:$0xf0] }
  0xb3   :  { %1328 = vmatpush.bf16.msra.mxu0 %v9093_v57  ;;  %v9825_v57 = vor.u32 %v13608_v48, %v9822_v49  ;;  %v9982_v40 = vld [vmem:[#allocation2 + $0x898] sm:$0xf0]  ;;  %v9665_v43 = vor.u32 %v13568_v37, %v9662_v38  ;;  %v13643_v48 = vld [vmem:[#allocation2 + $0x844] sm:$0xf0]  ;;  %v13558_v49 = vld [vmem:[#allocation2 + $0x5a4] sm:$0xf]  ;;  %v9621_v53 = vor.u32 %v13563_v45, %v9620_v44 }
  0xb4   :  { %1341 = vmatpush.bf16.msra.mxu1 %v9413_v58  ;;  %v9780_v58 = vld [vmem:[#allocation2 + $0x6e0] sm:$0xf]  ;;  %v9788_v38 = vld [vmem:[#allocation2 + $0x6e8] sm:$0xf]  ;;  %v9790_v44 = vld [vmem:[#allocation2 + $0x710] sm:$0xf0] }
  0xb5   :  { %1354 = vmatpush.bf16.msra.mxu2 %v9097_v59  ;;  %v13603_v59 = vld [vmem:[#allocation2 + $0x704] sm:$0xf0]  ;;  %v13679_v45 = vld [vmem:[#allocation2 + $0x96c] sm:$0xf] }
  0xb6   :  { %1367 = vmatpush.bf16.msra.mxu3 %v9417_v63  ;;  %v13598_v63 = vld [vmem:[#allocation2 + $0x6e4] sm:$0xf]  ;;  %v9781_v3 = vor.u32 %v13603_v59, %v9780_v58  ;;  %v13553_v58 = vld [vmem:[#allocation2 + $0x574] sm:$0xf0]  ;;  %v9900_v59 = vld [vmem:[#allocation2 + $0x7d0] sm:$0xf] }
  0xb7   :  { %1329 = vmatpush.bf16.msra.mxu0 %v9053_v5  ;;  %v9785_v5 = vor.u32 %v13598_v63, %v9782_v0  ;;  %v13548_v63 = vld [vmem:[#allocation2 + $0x554] sm:$0xf]  ;;  %v9582_v0 = vld [vmem:[#allocation2 + $0x578] sm:$0xf0] }
  0xb8   :  { %1342 = vmatpush.bf16.msra.mxu1 %v9373_v6  ;;  %v9740_v6 = vld [vmem:[#allocation2 + $0x690] sm:$0xf]  ;;  %v9585_v8 = vor.u32 %v13548_v63, %v9582_v0  ;;  %v9708_v0 = vld [vmem:[#allocation2 + $0x648] sm:$0xf] }
  0xb9   :  { %1355 = vmatpush.bf16.msra.mxu2 %v9057_v7  ;;  %v13593_v7 = vld [vmem:[#allocation2 + $0x6b4] sm:$0xf0] }
  0xba   :  { %1368 = vmatpush.bf16.msra.mxu3 %v9377_v11  ;;  %v13588_v11 = vld [vmem:[#allocation2 + $0x694] sm:$0xf]  ;;  %v9741_v17 = vor.u32 %v13593_v7, %v9740_v6  ;;  %v13543_v6 = vld [vmem:[#allocation2 + $0x524] sm:$0xf0]  ;;  %v9901_v7 = vor.u32 %v13633_v62, %v9900_v59  ;;  %v13669_v59 = vld [vmem:[#allocation2 + $0x91c] sm:$0xf] }
  0xbb   :  { %1330 = vmatpush.bf16.msra.mxu0 %v9013_v19  ;;  %v9745_v19 = vor.u32 %v13588_v11, %v9742_v12  ;;  %v13538_v11 = vld [vmem:[#allocation2 + $0x504] sm:$0xf] }
  0xbc   :  { %1343 = vmatpush.bf16.msra.mxu1 %v9333_v20  ;;  %v9700_v20 = vld [vmem:[#allocation2 + $0x640] sm:$0xf] }
  0xbd   :  { %1356 = vmatpush.bf16.msra.mxu2 %v9017_v21  ;;  %v13583_v21 = vld [vmem:[#allocation2 + $0x664] sm:$0xf0] }
  0xbe   :  { %1369 = vmatpush.bf16.msra.mxu3 %v9337_v25  ;;  %v13578_v25 = vld [vmem:[#allocation2 + $0x644] sm:$0xf]  ;;  %v9701_v29 = vor.u32 %v13583_v21, %v9700_v20  ;;  %v9828_v20 = vld [vmem:[#allocation2 + $0x738] sm:$0xf]  ;;  %v13614_v21 = vld [vmem:[#allocation2 + $0x75c] sm:$0xf0] }
  0xbf   :  { %1331 = vmatpush.bf16.msra.mxu0 %v8973_v31  ;;  %v9705_v31 = vor.u32 %v13578_v25, %v9702_v26  ;;  %v13694_v25 = vld [vmem:[#allocation2 + $0x9dc] sm:$0xf0]  ;;  %v13609_v26 = vld [vmem:[#allocation2 + $0x73c] sm:$0xf] }
  0xc0   :  { %1344 = vmatpush.bf16.msra.mxu1 %v9293_v34  ;;  %v9980_v34 = vld [vmem:[#allocation2 + $0x870] sm:$0xf] }
  0xc1   :  { %1357 = vmatpush.bf16.msra.mxu2 %v8977_v35  ;;  %v10025_v35 = vor.u32 %v13658_v27, %v10022_v28  ;;  %v9981_v42 = vor.u32 %v13653_v36, %v9980_v34  ;;  %v9830_v27 = vld [vmem:[#allocation2 + $0x760] sm:$0xf0]  ;;  %v10149_v36 = vor.u32 %v13694_v25, %v10148_v22  ;;  %v13569_v22 = vld [vmem:[#allocation2 + $0x5fc] sm:$0xf] }
  0xc2   :  { %1370 = vmatpush.bf16.msra.mxu3 %v9297_v39  ;;  %v13648_v39 = vld [vmem:[#allocation2 + $0x874] sm:$0xf]  ;;  %v9833_v37 = vor.u32 %v13609_v26, %v9830_v27  ;;  %v13649_v26 = vld [vmem:[#allocation2 + $0x87c] sm:$0xf]  ;;  %v9990_v27 = vld [vmem:[#allocation2 + $0x8a0] sm:$0xf0] }
  0xc3   :  { %1332 = vmatpush.bf16.msra.mxu0 %v8933_v46  ;;  %v9940_v46 = vld [vmem:[#allocation2 + $0x820] sm:$0xf]  ;;  %v9985_v47 = vor.u32 %v13648_v39, %v9982_v40  ;;  %v13604_v39 = vld [vmem:[#allocation2 + $0x70c] sm:$0xf0]  ;;  %v10108_v40 = vld [vmem:[#allocation2 + $0x968] sm:$0xf] }
  0xc4   :  { %1345 = vmatpush.bf16.msra.mxu1 %v9253_v50  ;;  %v9622_v50 = vld [vmem:[#allocation2 + $0x5c8] sm:$0xf0]  ;;  %v1139_v60 = vpop.f32.mrf.mxu1 }
  0xc5   :  { %1358 = vmatpush.bf16.msra.mxu2 %v8937_v51  ;;  %v13638_v51 = vld [vmem:[#allocation2 + $0x824] sm:$0xf] }
  0xc6   :  { %1371 = vmatpush.bf16.msra.mxu3 %v9257_v54  ;;  %1333 = vmatmul.bf16.vlgmr.msra.gmra.mxu0 %v14808_v15 }
  0xc7   :  { %2338 = vmatpush.bf16.msrb.mxu0 %v9821_v55  ;;  %1346 = vmatmul.bf16.vlgmr.msra.gmra.mxu1 %v14810_v16  ;;  %v1126_v54 = vpop.f32.mrf.mxu0  ;;  %v9941_v55 = vor.u32 %v13643_v48, %v9940_v46  ;;  %v10110_v46 = vld [vmem:[#allocation2 + $0x990] sm:$0xf0]  ;;  %v9789_v48 = vor.u32 %v13604_v39, %v9788_v38 }
  0xc8   :  { %2351 = vmatpush.bf16.msrb.mxu1 %v10141_v56  ;;  %1359 = vmatmul.bf16.vlgmr.msra.gmra.mxu2 %v14808_v15  ;;  %v9625_v56 = vor.u32 %v13558_v49, %v9622_v50  ;;  %v14832_v1 = vadd.f32 %v1139_v60, %v1126_v54  ;;  %v10068_v54 = vld [vmem:[#allocation2 + $0x918] sm:$0xf]  ;;  %v10070_v60 = vld [vmem:[#allocation2 + $0x940] sm:$0xf0]  ;;  %v9630_v38 = vld [vmem:[#allocation2 + $0x5d0] sm:$0xf0] }
  0xc9   :  { %2364 = vmatpush.bf16.msrb.mxu2 %v9825_v57  ;;  %1372 = vmatmul.bf16.vlgmr.msra.gmra.mxu3 %v14810_v16  ;;  %v9580_v57 = vld [vmem:[#allocation2 + $0x550] sm:$0xf] }
  0xca   :  { %2377 = vmatpush.bf16.msrb.mxu3 %v10145_v61  ;;  %v9945_v61 = vor.u32 %v13638_v51, %v9942_v52  ;;  %v9748_v52 = vld [vmem:[#allocation2 + $0x698] sm:$0xf] }
  0xcb   :  { %2339 = vmatpush.bf16.msrb.mxu0 %v9781_v3  ;;  %v9902_v3 = vld [vmem:[#allocation2 + $0x7f8] sm:$0xf0]  ;;  %v1152_v12 = vpop.f32.mrf.mxu2 }
  0xcc   :  { %2352 = vmatpush.bf16.msrb.mxu1 %v10101_v4  ;;  %v9581_v4 = vor.u32 %v13553_v58, %v9580_v57  ;;  %v9905_v13 = vor.u32 %v13628_v2, %v9902_v3  ;;  %v1141_v33 = vpop.f32.mrf.mxu1  ;;  %v13589_v57 = vld [vmem:[#allocation2 + $0x69c] sm:$0xf]  ;;  %v9750_v58 = vld [vmem:[#allocation2 + $0x6c0] sm:$0xf0]  ;;  %v13584_v2 = vld [vmem:[#allocation2 + $0x66c] sm:$0xf0] }
  0xcd   :  { %2365 = vmatpush.bf16.msrb.mxu2 %v9785_v5  ;;  %v9540_v5 = vld [vmem:[#allocation2 + $0x500] sm:$0xf]  ;;  %v9753_v63 = vor.u32 %v13589_v57, %v9750_v58  ;;  %v10028_v3 = vld [vmem:[#allocation2 + $0x8c8] sm:$0xf] }
  0xce   :  { %2378 = vmatpush.bf16.msrb.mxu3 %v10105_v9  ;;  %v9860_v9 = vld [vmem:[#allocation2 + $0x780] sm:$0xf]  ;;  %v9541_v24 = vor.u32 %v13543_v6, %v9540_v5  ;;  %v13664_v5 = vld [vmem:[#allocation2 + $0x8ec] sm:$0xf0]  ;;  %v13579_v6 = vld [vmem:[#allocation2 + $0x64c] sm:$0xf] }
  0xcf   :  { %2340 = vmatpush.bf16.msrb.mxu0 %v9741_v17  ;;  %v13618_v17 = vld [vmem:[#allocation2 + $0x784] sm:$0xf]  ;;  %v1128_v28 = vpop.f32.mrf.mxu0  ;;  %v9948_v33 = vld [vmem:[#allocation2 + $0x828] sm:$0xf] }
  0xd0   :  { %2353 = vmatpush.bf16.msrb.mxu1 %v10061_v18  ;;  %v9862_v18 = vld [vmem:[#allocation2 + $0x7a8] sm:$0xf0]  ;;  %v9548_v58 = vld [vmem:[#allocation2 + $0x508] sm:$0xf] }
  0xd1   :  { %2366 = vmatpush.bf16.msrb.mxu2 %v9745_v19  ;;  %v1165_v19 = vpop.f32.mrf.mxu3  ;;  %v9865_v34 = vor.u32 %v13618_v17, %v9862_v18  ;;  %v13574_v17 = vld [vmem:[#allocation2 + $0x61c] sm:$0xf0]  ;;  %v9988_v18 = vld [vmem:[#allocation2 + $0x878] sm:$0xf] }
  0xd2   :  { %2379 = vmatpush.bf16.msrb.mxu3 %v10065_v23  ;;  %v14834_v23 = vadd.f32 %v1165_v19, %v1152_v12  ;;  %v10029_v12 = vor.u32 %v13664_v5, %v10028_v3  ;;  %v13619_v5 = vld [vmem:[#allocation2 + $0x78c] sm:$0xf] }
  0xd3   :  { %2341 = vmatpush.bf16.msrb.mxu0 %v9701_v29  ;;  %v9861_v29 = vor.u32 %v13623_v10, %v9860_v9  ;;  %v10030_v9 = vld [vmem:[#allocation2 + $0x8f0] sm:$0xf0]  ;;  %v9709_v10 = vor.u32 %v13584_v2, %v9708_v0  ;;  %v13539_v0 = vld [vmem:[#allocation2 + $0x50c] sm:$0xf] }
  0xd4   :  { %2354 = vmatpush.bf16.msrb.mxu1 %v10021_v30  ;;  %v9545_v30 = vor.u32 %v13538_v11, %v9542_v14  ;;  %v9668_v14 = vld [vmem:[#allocation2 + $0x5f8] sm:$0xf] }
  0xd5   :  { %2367 = vmatpush.bf16.msrb.mxu2 %v9705_v31  ;;  %v13689_v31 = vld [vmem:[#allocation2 + $0x9bc] sm:$0xf]  ;;  %v9669_v28 = vor.u32 %v13574_v17, %v9668_v14  ;;  %v9838_v14 = vld [vmem:[#allocation2 + $0x768] sm:$0xf0] }
  0xd6   :  { %2380 = vmatpush.bf16.msrb.mxu3 %v10025_v35  ;;  %v9829_v35 = vor.u32 %v13614_v21, %v9828_v20  ;;  %v13654_v21 = vld [vmem:[#allocation2 + $0x89c] sm:$0xf0] }
  0xd7   :  { %2342 = vmatpush.bf16.msrb.mxu0 %v9661_v41  ;;  %v10153_v41 = vor.u32 %v13689_v31, %v10150_v32  ;;  %v9628_v31 = vld [vmem:[#allocation2 + $0x5a8] sm:$0xf]  ;;  %v13564_v32 = vld [vmem:[#allocation2 + $0x5cc] sm:$0xf0] }
  0xd8   :  { %2355 = vmatpush.bf16.msrb.mxu1 %v9981_v42  ;;  %v13684_v42 = vld [vmem:[#allocation2 + $0x98c] sm:$0xf0] }
  0xd9   :  { %2368 = vmatpush.bf16.msrb.mxu2 %v9665_v43  ;;  %v13599_v43 = vld [vmem:[#allocation2 + $0x6ec] sm:$0xf]  ;;  %v1167_v49 = vpop.f32.mrf.mxu3  ;;  %v10109_v50 = vor.u32 %v13684_v42, %v10108_v40 }
  0xda   :  { %2381 = vmatpush.bf16.msrb.mxu3 %v9985_v47  ;;  %v1154_v47 = vpop.f32.mrf.mxu2  ;;  %v9793_v51 = vor.u32 %v13599_v43, %v9790_v44  ;;  %v13639_v40 = vld [vmem:[#allocation2 + $0x82c] sm:$0xf]  ;;  %v9629_v43 = vor.u32 %v13564_v32, %v9628_v31  ;;  %v9908_v49 = vld [vmem:[#allocation2 + $0x7d8] sm:$0xf]  ;;  %v13600_v32 = vld [vmem:[#allocation2 + $0x6f4] sm:$0xf] }
  0xdb   :  { %2343 = vmatpush.bf16.msrb.mxu0 %v9621_v53  ;;  %v13594_v53 = vld [vmem:[#allocation2 + $0x6bc] sm:$0xf0]  ;;  %v9588_v47 = vld [vmem:[#allocation2 + $0x558] sm:$0xf] }
  0xdc   :  { %2356 = vmatpush.bf16.msrb.mxu1 %v9941_v55  ;;  %v10113_v55 = vor.u32 %v13679_v45, %v10110_v46  ;;  %v13685_v31 = vld [vmem:[#allocation2 + $0x994] sm:$0xf0] }
  0xdd   :  { %2369 = vmatpush.bf16.msrb.mxu2 %v9625_v56  ;;  %v13674_v56 = vld [vmem:[#allocation2 + $0x93c] sm:$0xf0] }
  0xde   :  { %2382 = vmatpush.bf16.msrb.mxu3 %v9945_v61  ;;  %v9749_v61 = vor.u32 %v13594_v53, %v9748_v52  ;;  %v10069_v62 = vor.u32 %v13674_v56, %v10068_v54  ;;  %v13634_v52 = vld [vmem:[#allocation2 + $0x7fc] sm:$0xf0]  ;;  %v13549_v53 = vld [vmem:[#allocation2 + $0x55c] sm:$0xf]  ;;  %v9590_v54 = vld [vmem:[#allocation2 + $0x580] sm:$0xf0] }
  0xdf   :  { %2344 = vmatpush.bf16.msrb.mxu0 %v9581_v4  ;;  %v10073_v4 = vor.u32 %v13669_v59, %v10070_v60  ;;  %v9910_v56 = vld [vmem:[#allocation2 + $0x800] sm:$0xf0]  ;;  %v13544_v59 = vld [vmem:[#allocation2 + $0x52c] sm:$0xf0]  ;;  %v9909_v60 = vor.u32 %v13634_v52, %v9908_v49 }
  0xe0   :  { %2357 = vmatpush.bf16.msrb.mxu1 %v9901_v7  ;;  %v9710_v7 = vld [vmem:[#allocation2 + $0x670] sm:$0xf0]  ;;  %v9716_v52 = vld [vmem:[#allocation2 + $0x650] sm:$0xf] }
  0xe1   :  { %2370 = vmatpush.bf16.msrb.mxu2 %v9585_v8  ;;  %v13659_v8 = vld [vmem:[#allocation2 + $0x8cc] sm:$0xf] }
  0xe2   :  { %2383 = vmatpush.bf16.msrb.mxu3 %v9905_v13  ;;  %v9713_v13 = vor.u32 %v13579_v6, %v9710_v7  ;;  %v10033_v20 = vor.u32 %v13659_v8, %v10030_v9  ;;  %v9870_v6 = vld [vmem:[#allocation2 + $0x7b0] sm:$0xf0]  ;;  %v9836_v8 = vld [vmem:[#allocation2 + $0x740] sm:$0xf]  ;;  %v13615_v9 = vld [vmem:[#allocation2 + $0x764] sm:$0xf0] }
  0xe3   :  { %2345 = vmatpush.bf16.msrb.mxu0 %v9541_v24  ;;  %v1178_v11 = vpop.f32.mrf.mxu0  ;;  %v9670_v24 = vld [vmem:[#allocation2 + $0x620] sm:$0xf0] }
  0xe4   :  { %2358 = vmatpush.bf16.msrb.mxu1 %v9861_v29  ;;  %v1191_v19 = vpop.f32.mrf.mxu1  ;;  %v9989_v29 = vor.u32 %v13654_v21, %v9988_v18  ;;  %v9873_v21 = vor.u32 %v13619_v5, %v9870_v6 }
  0xe5   :  { %2371 = vmatpush.bf16.msrb.mxu2 %v9545_v30  ;;  %v14840_v25 = vadd.f32 %v1191_v19, %v1178_v11  ;;  %v9673_v30 = vor.u32 %v13569_v22, %v9670_v24  ;;  %v9549_v11 = vor.u32 %v13544_v59, %v9548_v58  ;;  %v13690_v19 = vld [vmem:[#allocation2 + $0x9c4] sm:$0xf]  ;;  %v9837_v22 = vor.u32 %v13615_v9, %v9836_v8  ;;  %v9718_v58 = vld [vmem:[#allocation2 + $0x678] sm:$0xf0]  ;;  %v13660_v59 = vld [vmem:[#allocation2 + $0x8d4] sm:$0xf] }
  0xe6   :  { %2384 = vmatpush.bf16.msrb.mxu3 %v9865_v34  ;;  %2346 = vmatmul.bf16.vlgmr.msrb.gmra.mxu0 %v14808_v15  ;;  %v13570_v8 = vld [vmem:[#allocation2 + $0x604] sm:$0xf]  ;;  %v9678_v9 = vld [vmem:[#allocation2 + $0x628] sm:$0xf0] }
  0xe7   :  { %2390 = vmatpush.bf16.msra.mxu0 %v9829_v35  ;;  %2359 = vmatmul.bf16.vlgmr.msrb.gmra.mxu1 %v14810_v16  ;;  %v9993_v35 = vor.u32 %v13649_v26, %v9990_v27  ;;  %v9796_v27 = vld [vmem:[#allocation2 + $0x6f0] sm:$0xf] }
  0xe8   :  { %2403 = vmatpush.bf16.msra.mxu1 %v10149_v36  ;;  %2372 = vmatmul.bf16.vlgmr.msrb.gmra.mxu2 %v14808_v15  ;;  %v13644_v36 = vld [vmem:[#allocation2 + $0x84c] sm:$0xf0] }
  0xe9   :  { %2416 = vmatpush.bf16.msra.mxu2 %v9833_v37  ;;  %2385 = vmatmul.bf16.vlgmr.msrb.gmra.mxu3 %v14810_v16  ;;  %v13559_v37 = vld [vmem:[#allocation2 + $0x5ac] sm:$0xf]  ;;  %v9949_v45 = vor.u32 %v13644_v36, %v9948_v33  ;;  %v9798_v33 = vld [vmem:[#allocation2 + $0x718] sm:$0xf0] }
  0xea   :  { %2429 = vmatpush.bf16.msra.mxu3 %v10153_v41  ;;  %v9950_v41 = vld [vmem:[#allocation2 + $0x850] sm:$0xf0]  ;;  %v9633_v46 = vor.u32 %v13559_v37, %v9630_v38  ;;  %v9801_v38 = vor.u32 %v13600_v32, %v9798_v33 }
  0xeb   :  { %2391 = vmatpush.bf16.msra.mxu0 %v9789_v48  ;;  %v1204_v34 = vpop.f32.mrf.mxu2  ;;  %v1180_v44 = vpop.f32.mrf.mxu0  ;;  %v13554_v48 = vld [vmem:[#allocation2 + $0x57c] sm:$0xf0] }
  0xec   :  { %2404 = vmatpush.bf16.msra.mxu1 %v10109_v50  ;;  %v1217_v39 = vpop.f32.mrf.mxu3  ;;  %v1193_v50 = vpop.f32.mrf.mxu1  ;;  %v9589_v57 = vor.u32 %v13554_v48, %v9588_v47  ;;  %v13675_v44 = vld [vmem:[#allocation2 + $0x944] sm:$0xf0]  ;;  %v13670_v47 = vld [vmem:[#allocation2 + $0x924] sm:$0xf]  ;;  %v10078_v48 = vld [vmem:[#allocation2 + $0x948] sm:$0xf0] }
  0xed   :  { %2417 = vmatpush.bf16.msra.mxu2 %v9793_v51  ;;  %v14842_v42 = vadd.f32 %v1217_v39, %v1204_v34  ;;  %v9953_v51 = vor.u32 %v13639_v40, %v9950_v41  ;;  %v13680_v34 = vld [vmem:[#allocation2 + $0x974] sm:$0xf]  ;;  %v9756_v39 = vld [vmem:[#allocation2 + $0x6a0] sm:$0xf]  ;;  %v13595_v40 = vld [vmem:[#allocation2 + $0x6c4] sm:$0xf0] }
  0xee   :  { %2430 = vmatpush.bf16.msra.mxu3 %v10113_v55  ;;  %v13629_v55 = vld [vmem:[#allocation2 + $0x7dc] sm:$0xf]  ;;  %v10076_v41 = vld [vmem:[#allocation2 + $0x920] sm:$0xf]  ;;  %v9757_v49 = vor.u32 %v13595_v40, %v9756_v39 }
  0xef   :  { %2392 = vmatpush.bf16.msra.mxu0 %v9749_v61  ;;  %v9593_v61 = vor.u32 %v13549_v53, %v9590_v54  ;;  %v9913_v3 = vor.u32 %v13629_v55, %v9910_v56  ;;  %v10077_v50 = vor.u32 %v13675_v44, %v10076_v41  ;;  %v13585_v53 = vld [vmem:[#allocation2 + $0x674] sm:$0xf0]  ;;  %v10036_v54 = vld [vmem:[#allocation2 + $0x8d0] sm:$0xf]  ;;  %v10081_v55 = vor.u32 %v13670_v47, %v10078_v48  ;;  %v13635_v41 = vld [vmem:[#allocation2 + $0x804] sm:$0xf0] }
  0xf0   :  { %2405 = vmatpush.bf16.msra.mxu1 %v10069_v62  ;;  %v9868_v62 = vld [vmem:[#allocation2 + $0x788] sm:$0xf]  ;;  %v13665_v56 = vld [vmem:[#allocation2 + $0x8f4] sm:$0xf0]  ;;  %v9598_v44 = vld [vmem:[#allocation2 + $0x588] sm:$0xf0] }
  0xf1   :  { %2418 = vmatpush.bf16.msra.mxu2 %v9753_v63  ;;  %v13624_v63 = vld [vmem:[#allocation2 + $0x7ac] sm:$0xf0] }
  0xf2   :  { %2431 = vmatpush.bf16.msra.mxu3 %v10073_v4  ;;  %v9550_v4 = vld [vmem:[#allocation2 + $0x530] sm:$0xf0]  ;;  %v9869_v17 = vor.u32 %v13624_v63, %v9868_v62  ;;  %v10037_v63 = vor.u32 %v13665_v56, %v10036_v54  ;;  %v9556_v48 = vld [vmem:[#allocation2 + $0x510] sm:$0xf] }
  0xf3   :  { %2393 = vmatpush.bf16.msra.mxu0 %v9709_v10  ;;  %v1206_v2 = vpop.f32.mrf.mxu2  ;;  %v10156_v10 = vld [vmem:[#allocation2 + $0x9c0] sm:$0xf]  ;;  %v9553_v18 = vor.u32 %v13539_v0, %v9550_v4  ;;  %v13540_v54 = vld [vmem:[#allocation2 + $0x514] sm:$0xf] }
  0xf4   :  { %2406 = vmatpush.bf16.msra.mxu1 %v10029_v12  ;;  %v1219_v7 = vpop.f32.mrf.mxu3  ;;  %v13695_v12 = vld [vmem:[#allocation2 + $0x9e4] sm:$0xf0]  ;;  %v9676_v2 = vld [vmem:[#allocation2 + $0x600] sm:$0xf] }
  0xf5   :  { %2419 = vmatpush.bf16.msra.mxu2 %v9713_v13  ;;  %v13610_v13 = vld [vmem:[#allocation2 + $0x744] sm:$0xf]  ;;  %v10157_v24 = vor.u32 %v13695_v12, %v10156_v10  ;;  %v9996_v4 = vld [vmem:[#allocation2 + $0x880] sm:$0xf]  ;;  %v13655_v7 = vld [vmem:[#allocation2 + $0x8a4] sm:$0xf0] }
  0xf6   :  { %2432 = vmatpush.bf16.msra.mxu3 %v10033_v20  ;;  %v10158_v20 = vld [vmem:[#allocation2 + $0x9e8] sm:$0xf0]  ;;  %v9841_v26 = vor.u32 %v13610_v13, %v9838_v14  ;;  %v9997_v14 = vor.u32 %v13655_v7, %v9996_v4  ;;  %v9846_v4 = vld [vmem:[#allocation2 + $0x770] sm:$0xf0] }
  0xf7   :  { %2394 = vmatpush.bf16.msra.mxu0 %v9669_v28  ;;  %v13605_v28 = vld [vmem:[#allocation2 + $0x714] sm:$0xf0]  ;;  %v9998_v12 = vld [vmem:[#allocation2 + $0x8a8] sm:$0xf0] }
  0xf8   :  { %2407 = vmatpush.bf16.msra.mxu1 %v9989_v29  ;;  %v10116_v29 = vld [vmem:[#allocation2 + $0x970] sm:$0xf]  ;;  %v9797_v36 = vor.u32 %v13605_v28, %v9796_v27  ;;  %v9638_v27 = vld [vmem:[#allocation2 + $0x5d8] sm:$0xf0]  ;;  %v13691_v7 = vld [vmem:[#allocation2 + $0x9cc] sm:$0xf] }
  0xf9   :  { %2420 = vmatpush.bf16.msra.mxu2 %v9673_v30  ;;  %v10161_v30 = vor.u32 %v13690_v19, %v10158_v20  ;;  %v10117_v37 = vor.u32 %v13685_v31, %v10116_v29  ;;  %v13565_v19 = vld [vmem:[#allocation2 + $0x5d4] sm:$0xf0]  ;;  %v9956_v20 = vld [vmem:[#allocation2 + $0x830] sm:$0xf]  ;;  %v13640_v29 = vld [vmem:[#allocation2 + $0x834] sm:$0xf] }
  0xfa   :  { %2433 = vmatpush.bf16.msra.mxu3 %v9993_v35  ;;  %v10118_v35 = vld [vmem:[#allocation2 + $0x998] sm:$0xf0] }
  0xfb   :  { %2395 = vmatpush.bf16.msra.mxu0 %v9629_v43  ;;  %v10121_v43 = vor.u32 %v13680_v34, %v10118_v35 }
  0xfc   :  { %2408 = vmatpush.bf16.msra.mxu1 %v9949_v45  ;;  %v13590_v45 = vld [vmem:[#allocation2 + $0x6a4] sm:$0xf] }
  0xfd   :  { %2421 = vmatpush.bf16.msra.mxu2 %v9633_v46  ;;  %v9758_v46 = vld [vmem:[#allocation2 + $0x6c8] sm:$0xf0] }
  0xfe   :  { %2434 = vmatpush.bf16.msra.mxu3 %v9953_v51  ;;  %v9761_v51 = vor.u32 %v13590_v45, %v9758_v46  ;;  %v13630_v45 = vld [vmem:[#allocation2 + $0x7e4] sm:$0xf]  ;;  %v9918_v46 = vld [vmem:[#allocation2 + $0x808] sm:$0xf0] }
  0xff   :  { %2396 = vmatpush.bf16.msra.mxu0 %v9589_v57  ;;  %v13580_v57 = vld [vmem:[#allocation2 + $0x654] sm:$0xf]  ;;  %v9921_v56 = vor.u32 %v13630_v45, %v9918_v46  ;;  %v13586_v45 = vld [vmem:[#allocation2 + $0x67c] sm:$0xf0]  ;;  %v10044_v46 = vld [vmem:[#allocation2 + $0x8d8] sm:$0xf] }
 0x100   :  { %2409 = vmatpush.bf16.msra.mxu1 %v9909_v60  ;;  %v10038_v60 = vld [vmem:[#allocation2 + $0x8f8] sm:$0xf0]  ;;  %v9721_v0 = vor.u32 %v13580_v57, %v9718_v58  ;;  %v13620_v58 = vld [vmem:[#allocation2 + $0x794] sm:$0xf] }
 0x101   :  { %2422 = vmatpush.bf16.msra.mxu2 %v9593_v61  ;;  %v9717_v61 = vor.u32 %v13585_v53, %v9716_v52  ;;  %v10041_v6 = vor.u32 %v13660_v59, %v10038_v60  ;;  %v9876_v52 = vld [vmem:[#allocation2 + $0x790] sm:$0xf]  ;;  %v13625_v53 = vld [vmem:[#allocation2 + $0x7b4] sm:$0xf0]  ;;  %v9558_v57 = vld [vmem:[#allocation2 + $0x538] sm:$0xf0] }
 0x102   :  { %2435 = vmatpush.bf16.msra.mxu3 %v9913_v3  ;;  %v13575_v3 = vld [vmem:[#allocation2 + $0x624] sm:$0xf0]  ;;  %v9878_v59 = vld [vmem:[#allocation2 + $0x7b8] sm:$0xf0] }
 0x103   :  { %2397 = vmatpush.bf16.msra.mxu0 %v9549_v11  ;;  %v1230_v62 = vpop.f32.mrf.mxu0  ;;  %v13650_v11 = vld [vmem:[#allocation2 + $0x884] sm:$0xf]  ;;  %v9677_v13 = vor.u32 %v13575_v3, %v9676_v2  ;;  %v13696_v2 = vld [vmem:[#allocation2 + $0x9ec] sm:$0xf0]  ;;  %v13611_v3 = vld [vmem:[#allocation2 + $0x74c] sm:$0xf] }
 0x104   :  { %2410 = vmatpush.bf16.msra.mxu1 %v9869_v17  ;;  %v1243_v5 = vpop.f32.mrf.mxu1  ;;  %v9681_v17 = vor.u32 %v13570_v8, %v9678_v9  ;;  %v10166_v8 = vld [vmem:[#allocation2 + $0x9f0] sm:$0xf0]  ;;  %v9881_v9 = vor.u32 %v13620_v58, %v9878_v59  ;;  %v13576_v58 = vld [vmem:[#allocation2 + $0x62c] sm:$0xf0]  ;;  %v10004_v59 = vld [vmem:[#allocation2 + $0x888] sm:$0xf] }
 0x105   :  { %2423 = vmatpush.bf16.msra.mxu2 %v9553_v18  ;;  %v14848_v10 = vadd.f32 %v1243_v5, %v1230_v62  ;;  %v9636_v18 = vld [vmem:[#allocation2 + $0x5b0] sm:$0xf]  ;;  %v9877_v5 = vor.u32 %v13625_v53, %v9876_v52  ;;  %v10046_v52 = vld [vmem:[#allocation2 + $0x900] sm:$0xf0] }
 0x106   :  { %2436 = vmatpush.bf16.msra.mxu3 %v9873_v21  ;;  %2398 = vmatmul.bf16.vlgmr.msra.gmra.mxu0 %v14808_v15  ;;  %v9637_v32 = vor.u32 %v13565_v19, %v9636_v18  ;;  %v13616_v62 = vld [vmem:[#allocation2 + $0x76c] sm:$0xf0]  ;;  %v10124_v18 = vld [vmem:[#allocation2 + $0x978] sm:$0xf]  ;;  %v10169_v19 = vor.u32 %v13691_v7, %v10166_v8 }
 0x107   :  { %2442 = vmatpush.bf16.msrb.mxu0 %v9837_v22  ;;  %2411 = vmatmul.bf16.vlgmr.msra.gmra.mxu1 %v14810_v16  ;;  %v10001_v22 = vor.u32 %v13650_v11, %v9998_v12  ;;  %v9644_v8 = vld [vmem:[#allocation2 + $0x5b8] sm:$0xf] }
 0x108   :  { %2455 = vmatpush.bf16.msrb.mxu1 %v10157_v24  ;;  %2424 = vmatmul.bf16.vlgmr.msra.gmra.mxu2 %v14808_v15  ;;  %v13645_v24 = vld [vmem:[#allocation2 + $0x854] sm:$0xf0] }
 0x109   :  { %2468 = vmatpush.bf16.msrb.mxu2 %v9841_v26  ;;  %2437 = vmatmul.bf16.vlgmr.msra.gmra.mxu3 %v14810_v16  ;;  %v13560_v26 = vld [vmem:[#allocation2 + $0x5b4] sm:$0xf]  ;;  %v9957_v34 = vor.u32 %v13645_v24, %v9956_v20  ;;  %v13686_v20 = vld [vmem:[#allocation2 + $0x99c] sm:$0xf0]  ;;  %v13681_v24 = vld [vmem:[#allocation2 + $0x97c] sm:$0xf] }
 0x10a   :  { %2481 = vmatpush.bf16.msrb.mxu3 %v10161_v30  ;;  %v9958_v30 = vld [vmem:[#allocation2 + $0x858] sm:$0xf0]  ;;  %v9641_v35 = vor.u32 %v13560_v26, %v9638_v27  ;;  %v10126_v26 = vld [vmem:[#allocation2 + $0x9a0] sm:$0xf0] }
 0x10b   :  { %2443 = vmatpush.bf16.msrb.mxu0 %v9797_v36  ;;  %v1256_v21 = vpop.f32.mrf.mxu2  ;;  %v1232_v33 = vpop.f32.mrf.mxu0  ;;  %v9596_v36 = vld [vmem:[#allocation2 + $0x560] sm:$0xf]  ;;  %v9961_v40 = vor.u32 %v13640_v29, %v9958_v30  ;;  %v9764_v30 = vld [vmem:[#allocation2 + $0x6a8] sm:$0xf] }
 0x10c   :  { %2456 = vmatpush.bf16.msrb.mxu1 %v10117_v37  ;;  %v1269_v28 = vpop.f32.mrf.mxu3  ;;  %v13555_v37 = vld [vmem:[#allocation2 + $0x584] sm:$0xf0]  ;;  %v1245_v39 = vpop.f32.mrf.mxu1 }
 0x10d   :  { %2469 = vmatpush.bf16.msrb.mxu2 %v9801_v38  ;;  %v14850_v31 = vadd.f32 %v1269_v28, %v1256_v21  ;;  %v9916_v38 = vld [vmem:[#allocation2 + $0x7e0] sm:$0xf]  ;;  %v9597_v47 = vor.u32 %v13555_v37, %v9596_v36  ;;  %v13601_v21 = vld [vmem:[#allocation2 + $0x6fc] sm:$0xf]  ;;  %v10125_v28 = vor.u32 %v13686_v20, %v10124_v18  ;;  %v10084_v33 = vld [vmem:[#allocation2 + $0x928] sm:$0xf] }
 0x10e   :  { %2482 = vmatpush.bf16.msrb.mxu3 %v10121_v43  ;;  %v13550_v43 = vld [vmem:[#allocation2 + $0x564] sm:$0xf]  ;;  %v13591_v36 = vld [vmem:[#allocation2 + $0x6ac] sm:$0xf]  ;;  %v9766_v37 = vld [vmem:[#allocation2 + $0x6d0] sm:$0xf0] }
 0x10f   :  { %2444 = vmatpush.bf16.msrb.mxu0 %v9757_v49  ;;  %v13545_v49 = vld [vmem:[#allocation2 + $0x534] sm:$0xf0]  ;;  %v10086_v39 = vld [vmem:[#allocation2 + $0x950] sm:$0xf0]  ;;  %v9646_v18 = vld [vmem:[#allocation2 + $0x5e0] sm:$0xf0] }
 0x110   :  { %2457 = vmatpush.bf16.msrb.mxu1 %v10077_v50  ;;  %v9917_v50 = vor.u32 %v13635_v41, %v9916_v38  ;;  %v13671_v38 = vld [vmem:[#allocation2 + $0x92c] sm:$0xf]  ;;  %v13641_v20 = vld [vmem:[#allocation2 + $0x83c] sm:$0xf] }
 0x111   :  { %2470 = vmatpush.bf16.msrb.mxu2 %v9761_v51  ;;  %v9601_v51 = vor.u32 %v13550_v43, %v9598_v44  ;;  %v9769_v43 = vor.u32 %v13591_v36, %v9766_v37  ;;  %v9724_v44 = vld [vmem:[#allocation2 + $0x658] sm:$0xf]  ;;  %v13551_v36 = vld [vmem:[#allocation2 + $0x56c] sm:$0xf]  ;;  %v9606_v37 = vld [vmem:[#allocation2 + $0x590] sm:$0xf0] }
 0x112   :  { %2483 = vmatpush.bf16.msrb.mxu3 %v10081_v55  ;;  %v9725_v53 = vor.u32 %v13586_v45, %v9724_v44  ;;  %v9609_v45 = vor.u32 %v13551_v36, %v9606_v37 }
 0x113   :  { %2445 = vmatpush.bf16.msrb.mxu0 %v9717_v61  ;;  %v1258_v55 = vpop.f32.mrf.mxu2  ;;  %v9844_v61 = vld [vmem:[#allocation2 + $0x748] sm:$0xf] }
 0x114   :  { %2458 = vmatpush.bf16.msrb.mxu1 %v10037_v63  ;;  %v1271_v60 = vpop.f32.mrf.mxu3  ;;  %v10164_v63 = vld [vmem:[#allocation2 + $0x9c8] sm:$0xf]  ;;  %v9845_v11 = vor.u32 %v13616_v62, %v9844_v61  ;;  %v13656_v62 = vld [vmem:[#allocation2 + $0x8ac] sm:$0xf0] }
 0x115   :  { %2471 = vmatpush.bf16.msrb.mxu2 %v9721_v0  ;;  %v9557_v0 = vor.u32 %v13545_v49, %v9556_v48  ;;  %v10165_v12 = vor.u32 %v13696_v2, %v10164_v63  ;;  %v13666_v48 = vld [vmem:[#allocation2 + $0x8fc] sm:$0xf0]  ;;  %v13581_v49 = vld [vmem:[#allocation2 + $0x65c] sm:$0xf]  ;;  %v13571_v63 = vld [vmem:[#allocation2 + $0x60c] sm:$0xf] }
 0x116   :  { %2484 = vmatpush.bf16.msrb.mxu3 %v10041_v6  ;;  %v9561_v6 = vor.u32 %v13540_v54, %v9558_v57  ;;  %v10045_v55 = vor.u32 %v13666_v48, %v10044_v46  ;;  %v9684_v57 = vld [vmem:[#allocation2 + $0x608] sm:$0xf]  ;;  %v9884_v46 = vld [vmem:[#allocation2 + $0x798] sm:$0xf]  ;;  %v13541_v48 = vld [vmem:[#allocation2 + $0x51c] sm:$0xf] }
 0x117   :  { %2446 = vmatpush.bf16.msrb.mxu0 %v9677_v13  ;;  %v9849_v13 = vor.u32 %v13611_v3, %v9846_v4  ;;  %v13651_v3 = vld [vmem:[#allocation2 + $0x88c] sm:$0xf]  ;;  %v10006_v4 = vld [vmem:[#allocation2 + $0x8b0] sm:$0xf0] }
 0x118   :  { %2459 = vmatpush.bf16.msrb.mxu1 %v9997_v14  ;;  %v9804_v14 = vld [vmem:[#allocation2 + $0x6f8] sm:$0xf] }
 0x119   :  { %2472 = vmatpush.bf16.msrb.mxu2 %v9681_v17  ;;  %v13606_v17 = vld [vmem:[#allocation2 + $0x71c] sm:$0xf0] }
 0x11a   :  { %2485 = vmatpush.bf16.msrb.mxu3 %v10001_v22  ;;  %v9806_v22 = vld [vmem:[#allocation2 + $0x720] sm:$0xf0]  ;;  %v9805_v27 = vor.u32 %v13606_v17, %v9804_v14  ;;  %v13646_v14 = vld [vmem:[#allocation2 + $0x85c] sm:$0xf0]  ;;  %v13561_v17 = vld [vmem:[#allocation2 + $0x5bc] sm:$0xf] }
 0x11b   :  { %2447 = vmatpush.bf16.msrb.mxu0 %v9637_v32  ;;  %v9809_v29 = vor.u32 %v13601_v21, %v9806_v22  ;;  %v13596_v32 = vld [vmem:[#allocation2 + $0x6cc] sm:$0xf0]  ;;  %v9966_v21 = vld [vmem:[#allocation2 + $0x860] sm:$0xf0] }
 0x11c   :  { %2460 = vmatpush.bf16.msrb.mxu1 %v9957_v34  ;;  %v10129_v34 = vor.u32 %v13681_v24, %v10126_v26 }
 0x11d   :  { %2473 = vmatpush.bf16.msrb.mxu2 %v9641_v35  ;;  %v13676_v35 = vld [vmem:[#allocation2 + $0x94c] sm:$0xf0] }
 0x11e   :  { %2486 = vmatpush.bf16.msrb.mxu3 %v9961_v40  ;;  %v9765_v40 = vor.u32 %v13596_v32, %v9764_v30  ;;  %v10085_v41 = vor.u32 %v13676_v35, %v10084_v33  ;;  %v13556_v30 = vld [vmem:[#allocation2 + $0x58c] sm:$0xf0]  ;;  %v9924_v32 = vld [vmem:[#allocation2 + $0x7e8] sm:$0xf] }
 0x11f   :  { %2448 = vmatpush.bf16.msrb.mxu0 %v9597_v47  ;;  %v10089_v47 = vor.u32 %v13671_v38, %v10086_v39  ;;  %v13636_v35 = vld [vmem:[#allocation2 + $0x80c] sm:$0xf0]  ;;  %v13631_v38 = vld [vmem:[#allocation2 + $0x7ec] sm:$0xf]  ;;  %v9926_v39 = vld [vmem:[#allocation2 + $0x810] sm:$0xf0] }
 0x120   :  { %2461 = vmatpush.bf16.msrb.mxu1 %v9917_v50  ;;  %v9726_v50 = vld [vmem:[#allocation2 + $0x680] sm:$0xf0]  ;;  %v9925_v44 = vor.u32 %v13636_v35, %v9924_v32  ;;  %v13592_v32 = vld [vmem:[#allocation2 + $0x6b4] sm:$0xf]  ;;  %v10094_v35 = vld [vmem:[#allocation2 + $0x958] sm:$0xf0] }
 0x121   :  { %2474 = vmatpush.bf16.msrb.mxu2 %v9601_v51  ;;  %v13661_v51 = vld [vmem:[#allocation2 + $0x8dc] sm:$0xf] }
 0x122   :  { %2487 = vmatpush.bf16.msrb.mxu3 %v9921_v56  ;;  %v9729_v56 = vor.u32 %v13581_v49, %v9726_v50  ;;  %v10049_v61 = vor.u32 %v13661_v51, %v10046_v52  ;;  %v9929_v50 = vor.u32 %v13631_v38, %v9926_v39  ;;  %v9566_v51 = vld [vmem:[#allocation2 + $0x540] sm:$0xf0]  ;;  %v13621_v52 = vld [vmem:[#allocation2 + $0x79c] sm:$0xf]  ;;  %v9732_v39 = vld [vmem:[#allocation2 + $0x660] sm:$0xf] }
 0x123   :  { %2449 = vmatpush.bf16.msrb.mxu0 %v9557_v0  ;;  %v1282_v54 = vpop.f32.mrf.mxu0  ;;  %v9686_v0 = vld [vmem:[#allocation2 + $0x630] sm:$0xf0] }
 0x124   :  { %2462 = vmatpush.bf16.msrb.mxu1 %v9877_v5  ;;  %v1295_v60 = vpop.f32.mrf.mxu1  ;;  %v9685_v5 = vor.u32 %v13576_v58, %v9684_v57  ;;  %v9689_v7 = vor.u32 %v13571_v63, %v9686_v0  ;;  %v10172_v57 = vld [vmem:[#allocation2 + $0x9d0] sm:$0xf]  ;;  %v9569_v63 = vor.u32 %v13541_v48, %v9566_v51  ;;  %v13692_v0 = vld [vmem:[#allocation2 + $0x9d4] sm:$0xf]  ;;  %v10054_v48 = vld [vmem:[#allocation2 + $0x908] sm:$0xf0] }
 0x125   :  { %2475 = vmatpush.bf16.msrb.mxu2 %v9561_v6  ;;  %v14856_v2 = vadd.f32 %v1295_v60, %v1282_v54  ;;  %v10005_v6 = vor.u32 %v13656_v62, %v10004_v59  ;;  %v13697_v59 = vld [vmem:[#allocation2 + $0x9f4] sm:$0xf0]  ;;  %v13612_v60 = vld [vmem:[#allocation2 + $0x754] sm:$0xf] }
 0x126   :  { %2488 = vmatpush.bf16.msrb.mxu3 %v9881_v9  ;;  %2450 = vmatmul.bf16.vlgmr.msrb.gmra.mxu0 %v14808_v15  ;;  %v13566_v9 = vld [vmem:[#allocation2 + $0x5dc] sm:$0xf0] }
 0x127   :  { %2494 = vmatpush.bf16.msra.mxu0 %v9845_v11  ;;  %2463 = vmatmul.bf16.vlgmr.msrb.gmra.mxu1 %v14810_v16  ;;  %v9964_v11 = vld [vmem:[#allocation2 + $0x838] sm:$0xf]  ;;  %v9645_v24 = vor.u32 %v13566_v9, %v9644_v8  ;;  %v9812_v8 = vld [vmem:[#allocation2 + $0x700] sm:$0xf]  ;;  %v13607_v9 = vld [vmem:[#allocation2 + $0x724] sm:$0xf0] }
 0x128   :  { %2507 = vmatpush.bf16.msra.mxu1 %v10165_v12  ;;  %2476 = vmatmul.bf16.vlgmr.msrb.gmra.mxu2 %v14808_v15 }
 0x129   :  { %2520 = vmatpush.bf16.msra.mxu2 %v9849_v13  ;;  %2489 = vmatmul.bf16.vlgmr.msrb.gmra.mxu3 %v14810_v16  ;;  %v10009_v13 = vor.u32 %v13651_v3, %v10006_v4  ;;  %v10174_v3 = vld [vmem:[#allocation2 + $0x9f8] sm:$0xf0] }
 0x12a   :  { %2533 = vmatpush.bf16.msra.mxu3 %v10169_v19 }
 0x12b   :  { %2495 = vmatpush.bf16.msra.mxu0 %v9805_v27  ;;  %v1308_v12 = vpop.f32.mrf.mxu2  ;;  %v1284_v26 = vpop.f32.mrf.mxu0  ;;  %v9965_v27 = vor.u32 %v13646_v14, %v9964_v11  ;;  %v10132_v11 = vld [vmem:[#allocation2 + $0x980] sm:$0xf]  ;;  %v13602_v14 = vld [vmem:[#allocation2 + $0x704] sm:$0xf] }
 0x12c   :  { %2508 = vmatpush.bf16.msra.mxu1 %v10125_v28  ;;  %v1321_v19 = vpop.f32.mrf.mxu3  ;;  %v9649_v28 = vor.u32 %v13561_v17, %v9646_v18  ;;  %v1297_v33 = vpop.f32.mrf.mxu1  ;;  %v9814_v17 = vld [vmem:[#allocation2 + $0x728] sm:$0xf0]  ;;  %v13682_v18 = vld [vmem:[#allocation2 + $0x984] sm:$0xf]  ;;  %v9772_v26 = vld [vmem:[#allocation2 + $0x6b0] sm:$0xf] }
 0x12d   :  { %2521 = vmatpush.bf16.msra.mxu2 %v9809_v29  ;;  %v14858_v22 = vadd.f32 %v1321_v19, %v1308_v12  ;;  %v9604_v29 = vld [vmem:[#allocation2 + $0x568] sm:$0xf]  ;;  %v10177_v12 = vor.u32 %v13692_v0, %v10174_v3  ;;  %v10134_v19 = vld [vmem:[#allocation2 + $0x9a8] sm:$0xf0]  ;;  %v9774_v33 = vld [vmem:[#allocation2 + $0x6d8] sm:$0xf0] }
 0x12e   :  { %2534 = vmatpush.bf16.msra.mxu3 %v10129_v34  ;;  %v9969_v34 = vor.u32 %v13641_v20, %v9966_v21  ;;  %v9813_v20 = vor.u32 %v13607_v9, %v9812_v8  ;;  %v9777_v38 = vor.u32 %v13592_v32, %v9774_v33  ;;  %v13647_v9 = vld [vmem:[#allocation2 + $0x864] sm:$0xf0]  ;;  %v13637_v33 = vld [vmem:[#allocation2 + $0x814] sm:$0xf0] }
 0x12f   :  { %2496 = vmatpush.bf16.msra.mxu0 %v9765_v40  ;;  %v9605_v40 = vor.u32 %v13556_v30, %v9604_v29  ;;  %v10137_v29 = vor.u32 %v13682_v18, %v10134_v19  ;;  %v13677_v30 = vld [vmem:[#allocation2 + $0x954] sm:$0xf0] }
 0x130   :  { %2509 = vmatpush.bf16.msra.mxu1 %v10085_v41  ;;  %v9564_v41 = vld [vmem:[#allocation2 + $0x518] sm:$0xf] }
 0x131   :  { %2522 = vmatpush.bf16.msra.mxu2 %v9769_v43  ;;  %v13546_v43 = vld [vmem:[#allocation2 + $0x53c] sm:$0xf0] }
 0x132   :  { %2535 = vmatpush.bf16.msra.mxu3 %v10089_v47  ;;  %v13626_v47 = vld [vmem:[#allocation2 + $0x7bc] sm:$0xf0]  ;;  %v9565_v58 = vor.u32 %v13546_v43, %v9564_v41 }
 0x133   :  { %2497 = vmatpush.bf16.msra.mxu0 %v9725_v53  ;;  %v1310_v49 = vpop.f32.mrf.mxu2  ;;  %v9886_v53 = vld [vmem:[#allocation2 + $0x7c0] sm:$0xf0]  ;;  %v9885_v62 = vor.u32 %v13626_v47, %v9884_v46  ;;  %v10052_v41 = vld [vmem:[#allocation2 + $0x8e0] sm:$0xf]  ;;  %v9734_v46 = vld [vmem:[#allocation2 + $0x688] sm:$0xf0] }
 0x134   :  { %2510 = vmatpush.bf16.msra.mxu1 %v10045_v55  ;;  %v1323_v54 = vpop.f32.mrf.mxu3  ;;  %v9852_v55 = vld [vmem:[#allocation2 + $0x750] sm:$0xf]  ;;  %v9889_v4 = vor.u32 %v13621_v52, %v9886_v53  ;;  %v13662_v47 = vld [vmem:[#allocation2 + $0x8e4] sm:$0xf] }
 0x135   :  { %2523 = vmatpush.bf16.msra.mxu2 %v9729_v56  ;;  %v13617_v56 = vld [vmem:[#allocation2 + $0x774] sm:$0xf0]  ;;  %v9692_v54 = vld [vmem:[#allocation2 + $0x610] sm:$0xf] }
 0x136   :  { %2536 = vmatpush.bf16.msra.mxu3 %v10049_v61  ;;  %v9854_v61 = vld [vmem:[#allocation2 + $0x778] sm:$0xf0] }
 0x137   :  { %2498 = vmatpush.bf16.msra.mxu0 %v9685_v5  ;;  %v9853_v5 = vor.u32 %v13617_v56, %v9852_v55  ;;  %v13577_v55 = vld [vmem:[#allocation2 + $0x634] sm:$0xf0]  ;;  %v10012_v56 = vld [vmem:[#allocation2 + $0x890] sm:$0xf] }
 0x138   :  { %2511 = vmatpush.bf16.msra.mxu1 %v10005_v6  ;;  %v10173_v6 = vor.u32 %v13697_v59, %v10172_v57  ;;  %v13657_v59 = vld [vmem:[#allocation2 + $0x8b4] sm:$0xf0]  ;;  %v9693_v0 = vor.u32 %v13577_v55, %v9692_v54  ;;  %v10780_v54 = vld [vmem:[#allocation2 + $0xeb0] sm:$0xf] }
 0x139   :  { %2524 = vmatpush.bf16.msra.mxu2 %v9689_v7  ;;  %v9857_v7 = vor.u32 %v13612_v60, %v9854_v61  ;;  %v13572_v60 = vld [vmem:[#allocation2 + $0x614] sm:$0xf]  ;;  %v9694_v61 = vld [vmem:[#allocation2 + $0x638] sm:$0xf0]  ;;  %v10013_v3 = vor.u32 %v13657_v59, %v10012_v56 }
 0x13a   :  { %2537 = vmatpush.bf16.msra.mxu3 %v10009_v13  ;;  %v13687_v13 = vld [vmem:[#allocation2 + $0x9a4] sm:$0xf0]  ;;  %v13768_v59 = vld [vmem:[#allocation2 + $0xc34] sm:$0xf] }
 0x13b   :  { %2499 = vmatpush.bf16.msra.mxu0 %v9645_v24  ;;  %v10133_v21 = vor.u32 %v13687_v13, %v10132_v11  ;;  %v9817_v24 = vor.u32 %v13602_v14, %v9814_v17  ;;  %v13562_v11 = vld [vmem:[#allocation2 + $0x5c4] sm:$0xf]  ;;  %v9974_v17 = vld [vmem:[#allocation2 + $0x868] sm:$0xf0] }
 0x13c   :  { %2512 = vmatpush.bf16.msra.mxu1 %v9965_v27  ;;  %v13597_v27 = vld [vmem:[#allocation2 + $0x6d4] sm:$0xf0]  ;;  %v13642_v14 = vld [vmem:[#allocation2 + $0x844] sm:$0xf] }
 0x13d   :  { %2525 = vmatpush.bf16.msra.mxu2 %v9649_v28  ;;  %v10092_v28 = vld [vmem:[#allocation2 + $0x930] sm:$0xf]  ;;  %v9773_v36 = vor.u32 %v13597_v27, %v9772_v26  ;;  %v9977_v32 = vor.u32 %v13642_v14, %v9974_v17  ;;  %v10422_v14 = vld [vmem:[#allocation2 + $0xc08] sm:$0xf0]  ;;  %v13838_v17 = vld [vmem:[#allocation2 + $0xe64] sm:$0xf] }
 0x13e   :  { %2538 = vmatpush.bf16.msra.mxu3 %v9969_v34  ;;  %v13672_v34 = vld [vmem:[#allocation2 + $0x934] sm:$0xf]  ;;  %v10093_v37 = vor.u32 %v13677_v30, %v10092_v28  ;;  %v9612_v28 = vld [vmem:[#allocation2 + $0x570] sm:$0xf] }
 0x13f   :  { %2500 = vmatpush.bf16.msra.mxu0 %v9605_v40  ;;  %v13587_v40 = vld [vmem:[#allocation2 + $0x684] sm:$0xf0]  ;;  %v10097_v43 = vor.u32 %v13672_v34, %v10094_v35  ;;  %v9932_v30 = vld [vmem:[#allocation2 + $0x7f0] sm:$0xf]  ;;  %v13552_v34 = vld [vmem:[#allocation2 + $0x574] sm:$0xf] }
 0x140   :  { %2513 = vmatpush.bf16.msra.mxu1 %v9925_v44  ;;  %v13667_v44 = vld [vmem:[#allocation2 + $0x904] sm:$0xf0]  ;;  %v9614_v35 = vld [vmem:[#allocation2 + $0x598] sm:$0xf0] }
 0x141   :  { %2526 = vmatpush.bf16.msra.mxu2 %v9609_v45  ;;  %v13582_v45 = vld [vmem:[#allocation2 + $0x664] sm:$0xf]  ;;  %v10053_v52 = vor.u32 %v13667_v44, %v10052_v41  ;;  %v9933_v41 = vor.u32 %v13637_v33, %v9932_v30  ;;  %v9892_v44 = vld [vmem:[#allocation2 + $0x7a0] sm:$0xf]  ;;  %v13833_v30 = vld [vmem:[#allocation2 + $0xe34] sm:$0xf0] }
 0x142   :  { %2539 = vmatpush.bf16.msra.mxu3 %v9929_v50  ;;  %v9733_v50 = vor.u32 %v13587_v40, %v9732_v39  ;;  %v9737_v53 = vor.u32 %v13582_v45, %v9734_v46  ;;  %v9572_v39 = vld [vmem:[#allocation2 + $0x520] sm:$0xf]  ;;  %v13547_v40 = vld [vmem:[#allocation2 + $0x544] sm:$0xf0]  ;;  %v13542_v46 = vld [vmem:[#allocation2 + $0x524] sm:$0xf] }
 0x143   :  { %2501 = vmatpush.bf16.msra.mxu0 %v9565_v58  ;;  %v1334_v49 = vpop.f32.mrf.mxu0  ;;  %v10057_v58 = vor.u32 %v13662_v47, %v10054_v48  ;;  %v13627_v45 = vld [vmem:[#allocation2 + $0x7c4] sm:$0xf0]  ;;  %v9574_v48 = vld [vmem:[#allocation2 + $0x548] sm:$0xf0]  ;;  %v9573_v56 = vor.u32 %v13547_v40, %v9572_v39  ;;  %v10382_v33 = vld [vmem:[#allocation2 + $0xbb8] sm:$0xf0] }
 0x144   :  { %2514 = vmatpush.bf16.msra.mxu1 %v9885_v62  ;;  %v1347_v51 = vpop.f32.mrf.mxu1  ;;  %v13652_v62 = vld [vmem:[#allocation2 + $0x894] sm:$0xf]  ;;  %v10340_v39 = vld [vmem:[#allocation2 + $0xb40] sm:$0xf]  ;;  %v13743_v40 = vld [vmem:[#allocation2 + $0xb64] sm:$0xf0] }
 0x145   :  { %2527 = vmatpush.bf16.msra.mxu2 %v9569_v63  ;;  %v14864_v57 = vadd.f32 %v1347_v51, %v1334_v49  ;;  %v10014_v63 = vld [vmem:[#allocation2 + $0x8b8] sm:$0xf0]  ;;  %v13622_v49 = vld [vmem:[#allocation2 + $0x7a4] sm:$0xf] }
 0x146   :  { %2540 = vmatpush.bf16.msra.mxu3 %v9889_v4  ;;  %2502 = vmatmul.bf16.vlgmr.msra.gmra.mxu0 %v14808_v15  ;;  %v9697_v4 = vor.u32 %v13572_v60, %v9694_v61  ;;  %v10017_v8 = vor.u32 %v13652_v62, %v10014_v63  ;;  %v10462_v60 = vld [vmem:[#allocation2 + $0xc58] sm:$0xf0]  ;;  %v9893_v61 = vor.u32 %v13627_v45, %v9892_v44  ;;  %v13848_v63 = vld [vmem:[#allocation2 + $0xeb4] sm:$0xf]  ;;  %v13823_v44 = vld [vmem:[#allocation2 + $0xde4] sm:$0xf0] }
 0x147   :  { %2546 = vmatpush.bf16.msrb.mxu0 %v9853_v5  ;;  %2515 = vmatmul.bf16.vlgmr.msra.gmra.mxu1 %v14810_v16  ;;  %v9652_v5 = vld [vmem:[#allocation2 + $0x5c0] sm:$0xf]  ;;  %v9577_v62 = vor.u32 %v13542_v46, %v9574_v48  ;;  %v13738_v45 = vld [vmem:[#allocation2 + $0xb44] sm:$0xf]  ;;  %v10342_v46 = vld [vmem:[#allocation2 + $0xb68] sm:$0xf0] }
 0x148   :  { %2559 = vmatpush.bf16.msrb.mxu1 %v10173_v6  ;;  %2528 = vmatmul.bf16.vlgmr.msra.gmra.mxu2 %v14808_v15  ;;  %v13567_v6 = vld [vmem:[#allocation2 + $0x5e4] sm:$0xf0]  ;;  %v13818_v48 = vld [vmem:[#allocation2 + $0xdc4] sm:$0xf] }
 0x149   :  { %2572 = vmatpush.bf16.msrb.mxu2 %v9857_v7  ;;  %2541 = vmatmul.bf16.vlgmr.msra.gmra.mxu3 %v14810_v16  ;;  %v9972_v7 = vld [vmem:[#allocation2 + $0x840] sm:$0xf] }
 0x14a   :  { %2585 = vmatpush.bf16.msrb.mxu3 %v10177_v12  ;;  %v9654_v12 = vld [vmem:[#allocation2 + $0x5e8] sm:$0xf0]  ;;  %v9973_v26 = vor.u32 %v13647_v9, %v9972_v7  ;;  %v10420_v7 = vld [vmem:[#allocation2 + $0xbe0] sm:$0xf] }
 0x14b   :  { %2547 = vmatpush.bf16.msrb.mxu0 %v9813_v20  ;;  %v1360_v13 = vpop.f32.mrf.mxu2  ;;  %v1336_v19 = vpop.f32.mrf.mxu0  ;;  %v9653_v20 = vor.u32 %v13567_v6, %v9652_v5  ;;  %v9657_v27 = vor.u32 %v13562_v11, %v9654_v12  ;;  %v10465_v6 = vor.u32 %v13768_v59, %v10462_v60  ;;  %v10740_v9 = vld [vmem:[#allocation2 + $0xe60] sm:$0xf]  ;;  %v13843_v12 = vld [vmem:[#allocation2 + $0xe84] sm:$0xf0]  ;;  %v13813_v60 = vld [vmem:[#allocation2 + $0xd94] sm:$0xf0] }
 0x14c   :  { %2560 = vmatpush.bf16.msrb.mxu1 %v10133_v21  ;;  %v1373_v18 = vpop.f32.mrf.mxu3 }
 0x14d   :  { %2573 = vmatpush.bf16.msrb.mxu2 %v9817_v24  ;;  %v14866_v21 = vadd.f32 %v1373_v18, %v1360_v13  ;;  %v1349_v24 = vpop.f32.mrf.mxu1  ;;  %v13758_v13 = vld [vmem:[#allocation2 + $0xbe4] sm:$0xf]  ;;  %v10742_v18 = vld [vmem:[#allocation2 + $0xe88] sm:$0xf0] }
 0x14e   :  { %2586 = vmatpush.bf16.msrb.mxu3 %v10137_v29  ;;  %v13557_v29 = vld [vmem:[#allocation2 + $0x594] sm:$0xf0]  ;;  %v10425_v24 = vor.u32 %v13758_v13, %v10422_v14  ;;  %v13803_v13 = vld [vmem:[#allocation2 + $0xd44] sm:$0xf0]  ;;  %v13718_v14 = vld [vmem:[#allocation2 + $0xaa4] sm:$0xf] }
 0x14f   :  { %2548 = vmatpush.bf16.msrb.mxu0 %v9773_v36  ;;  %v13632_v36 = vld [vmem:[#allocation2 + $0x7f4] sm:$0xf] }
 0x150   :  { %2561 = vmatpush.bf16.msrb.mxu1 %v10093_v37  ;;  %v9934_v37 = vld [vmem:[#allocation2 + $0x818] sm:$0xf0] }
 0x151   :  { %2574 = vmatpush.bf16.msrb.mxu2 %v9777_v38  ;;  %v9613_v38 = vor.u32 %v13557_v29, %v9612_v28  ;;  %v9937_v47 = vor.u32 %v13632_v36, %v9934_v37  ;;  %v10700_v28 = vld [vmem:[#allocation2 + $0xe10] sm:$0xf]  ;;  %v10745_v29 = vor.u32 %v13838_v17, %v10742_v18  ;;  %v10262_v17 = vld [vmem:[#allocation2 + $0xac8] sm:$0xf0] }
 0x152   :  { %2587 = vmatpush.bf16.msrb.mxu3 %v10097_v43  ;;  %v9617_v43 = vor.u32 %v13552_v34, %v9614_v35  ;;  %v13828_v34 = vld [vmem:[#allocation2 + $0xe14] sm:$0xf]  ;;  %v10702_v35 = vld [vmem:[#allocation2 + $0xe38] sm:$0xf0]  ;;  %v10701_v37 = vor.u32 %v13833_v30, %v10700_v28  ;;  %v10265_v30 = vor.u32 %v13718_v14, %v10262_v17  ;;  %v10428_v14 = vld [vmem:[#allocation2 + $0xbe8] sm:$0xf] }
 0x153   :  { %2549 = vmatpush.bf16.msrb.mxu0 %v9733_v50  ;;  %v9894_v50 = vld [vmem:[#allocation2 + $0x7c8] sm:$0xf0]  ;;  %v1362_v51 = vpop.f32.mrf.mxu2  ;;  %v13764_v17 = vld [vmem:[#allocation2 + $0xc0c] sm:$0xf0] }
 0x154   :  { %2562 = vmatpush.bf16.msrb.mxu1 %v10053_v52  ;;  %v10460_v52 = vld [vmem:[#allocation2 + $0xc30] sm:$0xf]  ;;  %v1375_v55 = vpop.f32.mrf.mxu3  ;;  %v10341_v51 = vor.u32 %v13743_v40, %v10340_v39  ;;  %v10222_v39 = vld [vmem:[#allocation2 + $0xa78] sm:$0xf0]  ;;  %v13788_v40 = vld [vmem:[#allocation2 + $0xcd4] sm:$0xf] }
 0x155   :  { %2575 = vmatpush.bf16.msrb.mxu2 %v9737_v53  ;;  %v13773_v53 = vld [vmem:[#allocation2 + $0xc54] sm:$0xf0]  ;;  %v10300_v55 = vld [vmem:[#allocation2 + $0xaf0] sm:$0xf] }
 0x156   :  { %2588 = vmatpush.bf16.msrb.mxu3 %v10057_v58  ;;  %v13853_v58 = vld [vmem:[#allocation2 + $0xed4] sm:$0xf0] }
 0x157   :  { %2550 = vmatpush.bf16.msrb.mxu0 %v9693_v0  ;;  %v10782_v0 = vld [vmem:[#allocation2 + $0xed8] sm:$0xf0]  ;;  %v10781_v5 = vor.u32 %v13853_v58, %v10780_v54  ;;  %v10345_v54 = vor.u32 %v13738_v45, %v10342_v46  ;;  %v10620_v58 = vld [vmem:[#allocation2 + $0xd70] sm:$0xf]  ;;  %v13703_v45 = vld [vmem:[#allocation2 + $0xa24] sm:$0xf0] }
 0x158   :  { %2563 = vmatpush.bf16.msrb.mxu1 %v10013_v3  ;;  %v9897_v3 = vor.u32 %v13622_v49, %v9894_v50  ;;  %v10785_v11 = vor.u32 %v13848_v63, %v10782_v0  ;;  %v10662_v49 = vld [vmem:[#allocation2 + $0xde8] sm:$0xf0]  ;;  %v13808_v0 = vld [vmem:[#allocation2 + $0xd74] sm:$0xf] }
 0x159   :  { %2576 = vmatpush.bf16.msrb.mxu2 %v9697_v4  ;;  %v10461_v4 = vor.u32 %v13773_v53, %v10460_v52  ;;  %v10665_v59 = vor.u32 %v13818_v48, %v10662_v49  ;;  %v10500_v48 = vld [vmem:[#allocation2 + $0xc80] sm:$0xf]  ;;  %v13783_v49 = vld [vmem:[#allocation2 + $0xca4] sm:$0xf0] }
 0x15a   :  { %2589 = vmatpush.bf16.msrb.mxu3 %v10017_v8  ;;  %v13763_v8 = vld [vmem:[#allocation2 + $0xc04] sm:$0xf0] }
 0x15b   :  { %2551 = vmatpush.bf16.msrb.mxu0 %v9653_v20  ;;  %v10421_v19 = vor.u32 %v13763_v8, %v10420_v7  ;;  %v10741_v20 = vor.u32 %v13843_v12, %v10740_v9  ;;  %v10260_v7 = vld [vmem:[#allocation2 + $0xaa0] sm:$0xf]  ;;  %v13723_v8 = vld [vmem:[#allocation2 + $0xac4] sm:$0xf0] }
 0x15c   :  { %2564 = vmatpush.bf16.msrb.mxu1 %v9973_v26  ;;  %v10380_v26 = vld [vmem:[#allocation2 + $0xb90] sm:$0xf]  ;;  %v10580_v9 = vld [vmem:[#allocation2 + $0xd20] sm:$0xf] }
 0x15d   :  { %2577 = vmatpush.bf16.msrb.mxu2 %v9657_v27  ;;  %v13753_v27 = vld [vmem:[#allocation2 + $0xbb4] sm:$0xf0] }
 0x15e   :  { %2590 = vmatpush.bf16.msrb.mxu3 %v9977_v32  ;;  %v13748_v32 = vld [vmem:[#allocation2 + $0xb94] sm:$0xf]  ;;  %v10381_v36 = vor.u32 %v13753_v27, %v10380_v26  ;;  %v10261_v27 = vor.u32 %v13723_v8, %v10260_v7  ;;  %v13849_v7 = vld [vmem:[#allocation2 + $0xebc] sm:$0xf]  ;;  %v10790_v8 = vld [vmem:[#allocation2 + $0xee0] sm:$0xf0] }
 0x15f   :  { %2552 = vmatpush.bf16.msrb.mxu0 %v9613_v38  ;;  %v10385_v38 = vor.u32 %v13748_v32, %v10382_v33  ;;  %v10220_v32 = vld [vmem:[#allocation2 + $0xa50] sm:$0xf]  ;;  %v13713_v33 = vld [vmem:[#allocation2 + $0xa74] sm:$0xf0] }
 0x160   :  { %2565 = vmatpush.bf16.msrb.mxu1 %v9933_v41  ;;  %v10660_v41 = vld [vmem:[#allocation2 + $0xdc0] sm:$0xf] }
 0x161   :  { %2578 = vmatpush.bf16.msrb.mxu2 %v9617_v43  ;;  %v10705_v43 = vor.u32 %v13828_v34, %v10702_v35  ;;  %v10661_v53 = vor.u32 %v13823_v44, %v10660_v41  ;;  %v10540_v34 = vld [vmem:[#allocation2 + $0xcd0] sm:$0xf]  ;;  %v10542_v41 = vld [vmem:[#allocation2 + $0xcf8] sm:$0xf0]  ;;  %v10180_v44 = vld [vmem:[#allocation2 + $0xa00] sm:$0xf] }
 0x162   :  { %2591 = vmatpush.bf16.msrb.mxu3 %v9937_v47 }
 0x163   :  { %2553 = vmatpush.bf16.msrb.mxu0 %v9573_v56  ;;  %v2347_v47 = vpop.f32.mrf.mxu0  ;;  %v13733_v56 = vld [vmem:[#allocation2 + $0xb14] sm:$0xf0] }
 0x164   :  { %2566 = vmatpush.bf16.msrb.mxu1 %v9893_v61  ;;  %v2360_v50 = vpop.f32.mrf.mxu1  ;;  %v13728_v61 = vld [vmem:[#allocation2 + $0xaf4] sm:$0xf] }
 0x165   :  { %2579 = vmatpush.bf16.msrb.mxu2 %v9577_v62  ;;  %v14872_v52 = vadd.f32 %v2360_v50, %v2347_v47  ;;  %v10302_v62 = vld [vmem:[#allocation2 + $0xb18] sm:$0xf0]  ;;  %v13698_v50 = vld [vmem:[#allocation2 + $0xa04] sm:$0xf] }
 0x166   :  { %2592 = vmatpush.bf16.msrb.mxu3 %v9897_v3  ;;  %2554 = vmatmul.bf16.vlgmr.msrb.gmra.mxu0 %v14808_v15  ;;  %v10622_v3 = vld [vmem:[#allocation2 + $0xd98] sm:$0xf0] }
 0x167   :  { %3569 = vmatpush.bf16.msra.mxu0 %v10461_v4  ;;  %2567 = vmatmul.bf16.vlgmr.msrb.gmra.mxu1 %v14810_v16  ;;  %v2598_v63 = vmax.f32 %v14832_v1, %v14872_v52  ;;  %v10301_v4 = vor.u32 %v13733_v56, %v10300_v55  ;;  %v10502_v55 = vld [vmem:[#allocation2 + $0xca8] sm:$0xf0]  ;;  %v13958_v52 = vld [vmem:[#allocation2 + $0x1224] sm:$0xf] }
 0x168   :  { %3582 = vmatpush.bf16.msra.mxu1 %v10781_v5  ;;  %2580 = vmatmul.bf16.vlgmr.msrb.gmra.mxu2 %v14808_v15  ;;  %v10621_v5 = vor.u32 %v13813_v60, %v10620_v58  ;;  %v10468_v58 = vld [vmem:[#allocation2 + $0xc38] sm:$0xf] }
 0x169   :  { %3595 = vmatpush.bf16.msra.mxu2 %v10465_v6  ;;  %2593 = vmatmul.bf16.vlgmr.msrb.gmra.mxu3 %v14810_v16  ;;  %v10305_v6 = vor.u32 %v13728_v61, %v10302_v62  ;;  %v10788_v60 = vld [vmem:[#allocation2 + $0xeb8] sm:$0xf]  ;;  %v10181_v62 = vor.u32 %v13703_v45, %v10180_v44  ;;  %v10710_v44 = vld [vmem:[#allocation2 + $0xe40] sm:$0xf0] }
 0x16a   :  { %3608 = vmatpush.bf16.msra.mxu3 %v10785_v11  ;;  %v10625_v11 = vor.u32 %v13808_v0, %v10622_v3  ;;  %v13854_v0 = vld [vmem:[#allocation2 + $0xedc] sm:$0xf0]  ;;  %v13769_v3 = vld [vmem:[#allocation2 + $0xc3c] sm:$0xf] }
 0x16b   :  { %3570 = vmatpush.bf16.msra.mxu0 %v10421_v19  ;;  %v2373_v12 = vpop.f32.mrf.mxu2  ;;  %v13798_v19 = vld [vmem:[#allocation2 + $0xd24] sm:$0xf] }
 0x16c   :  { %3583 = vmatpush.bf16.msra.mxu1 %v10741_v20  ;;  %v2386_v18 = vpop.f32.mrf.mxu3  ;;  %v10582_v20 = vld [vmem:[#allocation2 + $0xd48] sm:$0xf0]  ;;  %v2362_v28 = vpop.f32.mrf.mxu1 }
 0x16d   :  { %3596 = vmatpush.bf16.msra.mxu2 %v10425_v24  ;;  %v2349_v24 = vpop.f32.mrf.mxu0  ;;  %v14876_v26 = vadd.f32 %v2386_v18, %v2373_v12  ;;  %v10789_v12 = vor.u32 %v13854_v0, %v10788_v60  ;;  %v10748_v18 = vld [vmem:[#allocation2 + $0xe68] sm:$0xf]  ;;  %v13839_v28 = vld [vmem:[#allocation2 + $0xe6c] sm:$0xf] }
 0x16e   :  { %3609 = vmatpush.bf16.msra.mxu3 %v10745_v29  ;;  %v10581_v29 = vor.u32 %v13803_v13, %v10580_v9  ;;  %v13759_v24 = vld [vmem:[#allocation2 + $0xbec] sm:$0xf] }
 0x16f   :  { %3571 = vmatpush.bf16.msra.mxu0 %v10381_v36  ;;  %v2599_v35 = vmax.f32 %v14834_v23, %v14876_v26  ;;  %v10585_v36 = vor.u32 %v13798_v19, %v10582_v20  ;;  %v10793_v19 = vor.u32 %v13849_v7, %v10790_v8  ;;  %v13844_v20 = vld [vmem:[#allocation2 + $0xe8c] sm:$0xf0]  ;;  %v13814_v8 = vld [vmem:[#allocation2 + $0xd9c] sm:$0xf0]  ;;  %v10822_v26 = vld [vmem:[#allocation2 + $0xf28] sm:$0xf0] }
 0x170   :  { %3584 = vmatpush.bf16.msra.mxu1 %v10701_v37  ;;  %v13793_v37 = vld [vmem:[#allocation2 + $0xcf4] sm:$0xf0] }
 0x171   :  { %3597 = vmatpush.bf16.msra.mxu2 %v10385_v38  ;;  %v13708_v38 = vld [vmem:[#allocation2 + $0xa54] sm:$0xf]  ;;  %v10541_v46 = vor.u32 %v13793_v37, %v10540_v34  ;;  %v10388_v34 = vld [vmem:[#allocation2 + $0xb98] sm:$0xf] }
 0x172   :  { %3610 = vmatpush.bf16.msra.mxu3 %v10705_v43  ;;  %v10221_v43 = vor.u32 %v13713_v33, %v10220_v32  ;;  %v10225_v47 = vor.u32 %v13708_v38, %v10222_v39  ;;  %v10749_v32 = vor.u32 %v13844_v20, %v10748_v18  ;;  %v10708_v37 = vld [vmem:[#allocation2 + $0xe18] sm:$0xf]  ;;  %v13834_v39 = vld [vmem:[#allocation2 + $0xe3c] sm:$0xf0]  ;;  %v10268_v20 = vld [vmem:[#allocation2 + $0xaa8] sm:$0xf] }
 0x173   :  { %3572 = vmatpush.bf16.msra.mxu0 %v10341_v51  ;;  %v10545_v51 = vor.u32 %v13788_v40, %v10542_v41  ;;  %v2375_v56 = vpop.f32.mrf.mxu2  ;;  %v13749_v40 = vld [vmem:[#allocation2 + $0xb9c] sm:$0xf]  ;;  %v10390_v41 = vld [vmem:[#allocation2 + $0xbc0] sm:$0xf0] }
 0x174   :  { %3585 = vmatpush.bf16.msra.mxu1 %v10661_v53  ;;  %v10182_v53 = vld [vmem:[#allocation2 + $0xa28] sm:$0xf0]  ;;  %v2388_v61 = vpop.f32.mrf.mxu3 }
 0x175   :  { %3598 = vmatpush.bf16.msra.mxu2 %v10345_v54  ;;  %v13778_v54 = vld [vmem:[#allocation2 + $0xc84] sm:$0xf] }
 0x176   :  { %3611 = vmatpush.bf16.msra.mxu3 %v10665_v59  ;;  %v13774_v59 = vld [vmem:[#allocation2 + $0xc5c] sm:$0xf0]  ;;  %v10505_v9 = vor.u32 %v13778_v54, %v10502_v55  ;;  %v13739_v54 = vld [vmem:[#allocation2 + $0xb4c] sm:$0xf]  ;;  %v10350_v55 = vld [vmem:[#allocation2 + $0xb70] sm:$0xf0] }
 0x177   :  { %3573 = vmatpush.bf16.msra.mxu0 %v10301_v4  ;;  %v10470_v4 = vld [vmem:[#allocation2 + $0xc60] sm:$0xf0] }
 0x178   :  { %3586 = vmatpush.bf16.msra.mxu1 %v10621_v5  ;;  %v10501_v5 = vor.u32 %v13783_v49, %v10500_v48  ;;  %v10473_v13 = vor.u32 %v13769_v3, %v10470_v4  ;;  %v10348_v48 = vld [vmem:[#allocation2 + $0xb48] sm:$0xf]  ;;  %v13744_v49 = vld [vmem:[#allocation2 + $0xb6c] sm:$0xf0]  ;;  %v10353_v3 = vor.u32 %v13739_v54, %v10350_v55  ;;  %v10308_v4 = vld [vmem:[#allocation2 + $0xaf8] sm:$0xf] }
 0x179   :  { %3599 = vmatpush.bf16.msra.mxu2 %v10305_v6  ;;  %v10185_v6 = vor.u32 %v13698_v50, %v10182_v53  ;;  %v10668_v50 = vld [vmem:[#allocation2 + $0xdc8] sm:$0xf]  ;;  %v13824_v53 = vld [vmem:[#allocation2 + $0xdec] sm:$0xf0]  ;;  %v10349_v61 = vor.u32 %v13744_v49, %v10348_v48  ;;  %v13789_v54 = vld [vmem:[#allocation2 + $0xcdc] sm:$0xf] }
 0x17a   :  { %3612 = vmatpush.bf16.msra.mxu3 %v10625_v11  ;;  %v10469_v11 = vor.u32 %v13774_v59, %v10468_v58  ;;  %v13819_v58 = vld [vmem:[#allocation2 + $0xdcc] sm:$0xf]  ;;  %v10670_v59 = vld [vmem:[#allocation2 + $0xdf0] sm:$0xf0]  ;;  %v10669_v0 = vor.u32 %v13824_v53, %v10668_v50  ;;  %v13794_v50 = vld [vmem:[#allocation2 + $0xcfc] sm:$0xf0] }
 0x17b   :  { %3574 = vmatpush.bf16.msra.mxu0 %v10261_v27  ;;  %v10430_v27 = vld [vmem:[#allocation2 + $0xc10] sm:$0xf0]  ;;  %v10673_v7 = vor.u32 %v13819_v58, %v10670_v59  ;;  %v10230_v53 = vld [vmem:[#allocation2 + $0xa80] sm:$0xf0]  ;;  %v10188_v58 = vld [vmem:[#allocation2 + $0xa08] sm:$0xf] }
 0x17c   :  { %3587 = vmatpush.bf16.msra.mxu1 %v10581_v29  ;;  %v10750_v29 = vld [vmem:[#allocation2 + $0xe90] sm:$0xf0]  ;;  %v10433_v33 = vor.u32 %v13759_v24, %v10430_v27  ;;  %v13724_v24 = vld [vmem:[#allocation2 + $0xacc] sm:$0xf0]  ;;  %v10588_v27 = vld [vmem:[#allocation2 + $0xd28] sm:$0xf] }
 0x17d   :  { %3600 = vmatpush.bf16.msra.mxu2 %v10265_v30  ;;  %v10429_v30 = vor.u32 %v13764_v17, %v10428_v14  ;;  %v10753_v38 = vor.u32 %v13839_v28, %v10750_v29  ;;  %v10630_v14 = vld [vmem:[#allocation2 + $0xda0] sm:$0xf0]  ;;  %v13704_v59 = vld [vmem:[#allocation2 + $0xa2c] sm:$0xf0] }
 0x17e   :  { %3613 = vmatpush.bf16.msra.mxu3 %v10585_v36  ;;  %v13754_v36 = vld [vmem:[#allocation2 + $0xbbc] sm:$0xf0]  ;;  %v10550_v55 = vld [vmem:[#allocation2 + $0xd00] sm:$0xf0] }
 0x17f   :  { %3575 = vmatpush.bf16.msra.mxu0 %v10221_v43  ;;  %v13829_v43 = vld [vmem:[#allocation2 + $0xe1c] sm:$0xf]  ;;  %v10389_v45 = vor.u32 %v13754_v36, %v10388_v34  ;;  %v13799_v36 = vld [vmem:[#allocation2 + $0xd2c] sm:$0xf] }
 0x180   :  { %3588 = vmatpush.bf16.msra.mxu1 %v10541_v46  ;;  %v10709_v46 = vor.u32 %v13834_v39, %v10708_v37  ;;  %v10590_v37 = vld [vmem:[#allocation2 + $0xd50] sm:$0xf0] }
 0x181   :  { %3601 = vmatpush.bf16.msra.mxu2 %v10225_v47  ;;  %v10393_v47 = vor.u32 %v13749_v40, %v10390_v41  ;;  %v10269_v40 = vor.u32 %v13724_v24, %v10268_v20  ;;  %v10593_v49 = vor.u32 %v13799_v36, %v10590_v37  ;;  %v13770_v20 = vld [vmem:[#allocation2 + $0xc44] sm:$0xf]  ;;  %v10478_v24 = vld [vmem:[#allocation2 + $0xc68] sm:$0xf0]  ;;  %v10436_v37 = vld [vmem:[#allocation2 + $0xbf0] sm:$0xf] }
 0x182   :  { %3614 = vmatpush.bf16.msra.mxu3 %v10545_v51  ;;  %v10713_v51 = vor.u32 %v13829_v43, %v10710_v44  ;;  %v10481_v36 = vor.u32 %v13770_v20, %v10478_v24 }
 0x183   :  { %3576 = vmatpush.bf16.msra.mxu0 %v10181_v62  ;;  %v2399_v56 = vpop.f32.mrf.mxu0 }
 0x184   :  { %3589 = vmatpush.bf16.msra.mxu1 %v10501_v5  ;;  %v2412_v60 = vpop.f32.mrf.mxu1  ;;  %v13734_v5 = vld [vmem:[#allocation2 + $0xb1c] sm:$0xf0] }
 0x185   :  { %3602 = vmatpush.bf16.msra.mxu2 %v10185_v6  ;;  %v14884_v62 = vadd.f32 %v2412_v60, %v2399_v56  ;;  %v10628_v6 = vld [vmem:[#allocation2 + $0xd78] sm:$0xf]  ;;  %v10309_v17 = vor.u32 %v13734_v5, %v10308_v4  ;;  %v13699_v4 = vld [vmem:[#allocation2 + $0xa0c] sm:$0xf]  ;;  %v10553_v5 = vor.u32 %v13789_v54, %v10550_v55  ;;  %v13755_v54 = vld [vmem:[#allocation2 + $0xbc4] sm:$0xf0] }
 0x186   :  { %3615 = vmatpush.bf16.msra.mxu3 %v10505_v9  ;;  %3577 = vmatmul.bf16.vlgmr.msra.gmra.mxu0 %v14808_v15  ;;  %v13729_v9 = vld [vmem:[#allocation2 + $0xafc] sm:$0xf]  ;;  %v10629_v18 = vor.u32 %v13814_v8, %v10628_v6  ;;  %v10190_v6 = vld [vmem:[#allocation2 + $0xa30] sm:$0xf0]  ;;  %v10716_v55 = vld [vmem:[#allocation2 + $0xe20] sm:$0xf] }
 0x187   :  { %3621 = vmatpush.bf16.msrb.mxu0 %v10469_v11  ;;  %3590 = vmatmul.bf16.vlgmr.msra.gmra.mxu1 %v14810_v16  ;;  %v10310_v11 = vld [vmem:[#allocation2 + $0xb20] sm:$0xf0]  ;;  %v10510_v8 = vld [vmem:[#allocation2 + $0xcb0] sm:$0xf0] }
 0x188   :  { %3634 = vmatpush.bf16.msrb.mxu1 %v10789_v12  ;;  %3603 = vmatmul.bf16.vlgmr.msra.gmra.mxu2 %v14808_v15  ;;  %v2600_v12 = vmax.f32 %v14840_v25, %v14884_v62  ;;  %v13959_v62 = vld [vmem:[#allocation2 + $0x122c] sm:$0xf] }
 0x189   :  { %3647 = vmatpush.bf16.msrb.mxu2 %v10473_v13  ;;  %3616 = vmatmul.bf16.vlgmr.msra.gmra.mxu3 %v14810_v16  ;;  %v13809_v13 = vld [vmem:[#allocation2 + $0xd7c] sm:$0xf] }
 0x18a   :  { %3660 = vmatpush.bf16.msrb.mxu3 %v10793_v19  ;;  %v10313_v19 = vor.u32 %v13729_v9, %v10310_v11  ;;  %v10633_v28 = vor.u32 %v13809_v13, %v10630_v14  ;;  %v10476_v11 = vld [vmem:[#allocation2 + $0xc40] sm:$0xf]  ;;  %v13775_v13 = vld [vmem:[#allocation2 + $0xc64] sm:$0xf0] }
 0x18b   :  { %3622 = vmatpush.bf16.msrb.mxu0 %v10429_v30  ;;  %v2425_v29 = vpop.f32.mrf.mxu2  ;;  %v13804_v30 = vld [vmem:[#allocation2 + $0xd4c] sm:$0xf0]  ;;  %v10796_v14 = vld [vmem:[#allocation2 + $0xec0] sm:$0xf] }
 0x18c   :  { %3635 = vmatpush.bf16.msrb.mxu1 %v10749_v32  ;;  %v13719_v32 = vld [vmem:[#allocation2 + $0xaac] sm:$0xf]  ;;  %v2438_v34 = vpop.f32.mrf.mxu3  ;;  %v2414_v41 = vpop.f32.mrf.mxu1  ;;  %v10589_v43 = vor.u32 %v13804_v30, %v10588_v27 }
 0x18d   :  { %3648 = vmatpush.bf16.msrb.mxu2 %v10433_v33  ;;  %v10270_v33 = vld [vmem:[#allocation2 + $0xad0] sm:$0xf0]  ;;  %v14888_v39 = vadd.f32 %v2438_v34, %v2425_v29  ;;  %v13850_v29 = vld [vmem:[#allocation2 + $0xec4] sm:$0xf]  ;;  %v10798_v30 = vld [vmem:[#allocation2 + $0xee8] sm:$0xf0] }
 0x18e   :  { %3661 = vmatpush.bf16.msrb.mxu3 %v10753_v38  ;;  %v2401_v38 = vpop.f32.mrf.mxu0  ;;  %v10273_v44 = vor.u32 %v13719_v32, %v10270_v33  ;;  %v10477_v33 = vor.u32 %v13775_v13, %v10476_v11  ;;  %v10801_v41 = vor.u32 %v13850_v29, %v10798_v30  ;;  %v13825_v11 = vld [vmem:[#allocation2 + $0xdf4] sm:$0xf0]  ;;  %v13740_v13 = vld [vmem:[#allocation2 + $0xb54] sm:$0xf]  ;;  %v10316_v30 = vld [vmem:[#allocation2 + $0xb00] sm:$0xf] }
 0x18f   :  { %3623 = vmatpush.bf16.msrb.mxu0 %v10389_v45  ;;  %v10228_v45 = vld [vmem:[#allocation2 + $0xa58] sm:$0xf]  ;;  %v2601_v48 = vmax.f32 %v14842_v42, %v14888_v39  ;;  %v10830_v39 = vld [vmem:[#allocation2 + $0xf30] sm:$0xf0] }
 0x190   :  { %3636 = vmatpush.bf16.msrb.mxu1 %v10709_v46  ;;  %v13714_v46 = vld [vmem:[#allocation2 + $0xa7c] sm:$0xf0]  ;;  %v13765_v38 = vld [vmem:[#allocation2 + $0xc14] sm:$0xf0] }
 0x191   :  { %3649 = vmatpush.bf16.msrb.mxu2 %v10393_v47  ;;  %v10548_v47 = vld [vmem:[#allocation2 + $0xcd8] sm:$0xf]  ;;  %v10229_v56 = vor.u32 %v13714_v46, %v10228_v45  ;;  %v10438_v45 = vld [vmem:[#allocation2 + $0xc18] sm:$0xf0]  ;;  %v13840_v46 = vld [vmem:[#allocation2 + $0xe74] sm:$0xf] }
 0x192   :  { %3662 = vmatpush.bf16.msrb.mxu3 %v10713_v51  ;;  %v13709_v51 = vld [vmem:[#allocation2 + $0xa5c] sm:$0xf]  ;;  %v10549_v60 = vor.u32 %v13794_v50, %v10548_v47 }
 0x193   :  { %3624 = vmatpush.bf16.msrb.mxu0 %v10349_v61  ;;  %v10233_v61 = vor.u32 %v13709_v51, %v10230_v53  ;;  %v2427_v9 = vpop.f32.mrf.mxu2  ;;  %v10758_v47 = vld [vmem:[#allocation2 + $0xe98] sm:$0xf0]  ;;  %v10396_v53 = vld [vmem:[#allocation2 + $0xba0] sm:$0xf] }
 0x194   :  { %3637 = vmatpush.bf16.msrb.mxu1 %v10669_v0  ;;  %v10508_v0 = vld [vmem:[#allocation2 + $0xc88] sm:$0xf] }
 0x195   :  { %3650 = vmatpush.bf16.msrb.mxu2 %v10353_v3  ;;  %v13784_v3 = vld [vmem:[#allocation2 + $0xcac] sm:$0xf0] }
 0x196   :  { %3663 = vmatpush.bf16.msrb.mxu3 %v10673_v7  ;;  %v13779_v7 = vld [vmem:[#allocation2 + $0xc8c] sm:$0xf]  ;;  %v10509_v27 = vor.u32 %v13784_v3, %v10508_v0  ;;  %v10397_v3 = vor.u32 %v13755_v54, %v10396_v53  ;;  %v13805_v54 = vld [vmem:[#allocation2 + $0xd54] sm:$0xf0] }
 0x197   :  { %3625 = vmatpush.bf16.msrb.mxu0 %v10309_v17  ;;  %v2440_v17 = vpop.f32.mrf.mxu3  ;;  %v10513_v32 = vor.u32 %v13779_v7, %v10510_v8  ;;  %v10718_v0 = vld [vmem:[#allocation2 + $0xe48] sm:$0xf0]  ;;  %v13745_v7 = vld [vmem:[#allocation2 + $0xb74] sm:$0xf0]  ;;  %v10676_v8 = vld [vmem:[#allocation2 + $0xdd0] sm:$0xf] }
 0x198   :  { %3638 = vmatpush.bf16.msrb.mxu1 %v10629_v18  ;;  %v10189_v18 = vor.u32 %v13704_v59, %v10188_v58  ;;  %v13835_v58 = vld [vmem:[#allocation2 + $0xe44] sm:$0xf0]  ;;  %v13750_v59 = vld [vmem:[#allocation2 + $0xba4] sm:$0xf] }
 0x199   :  { %3651 = vmatpush.bf16.msrb.mxu2 %v10313_v19  ;;  %v13855_v19 = vld [vmem:[#allocation2 + $0xee4] sm:$0xf0] }
 0x19a   :  { %3664 = vmatpush.bf16.msrb.mxu3 %v10633_v28  ;;  %v10193_v28 = vor.u32 %v13699_v4, %v10190_v6  ;;  %v10797_v34 = vor.u32 %v13855_v19, %v10796_v14  ;;  %v10717_v4 = vor.u32 %v13835_v58, %v10716_v55  ;;  %v10356_v6 = vld [vmem:[#allocation2 + $0xb50] sm:$0xf]  ;;  %v10358_v14 = vld [vmem:[#allocation2 + $0xb78] sm:$0xf0]  ;;  %v13720_v55 = vld [vmem:[#allocation2 + $0xab4] sm:$0xf] }
 0x19b   :  { %3626 = vmatpush.bf16.msrb.mxu0 %v10269_v40  ;;  %v10756_v40 = vld [vmem:[#allocation2 + $0xe70] sm:$0xf]  ;;  %v10678_v19 = vld [vmem:[#allocation2 + $0xdf8] sm:$0xf0]  ;;  %v10357_v24 = vor.u32 %v13745_v7, %v10356_v6  ;;  %v10361_v29 = vor.u32 %v13740_v13, %v10358_v14  ;;  %v10236_v7 = vld [vmem:[#allocation2 + $0xa60] sm:$0xf] }
 0x19c   :  { %3639 = vmatpush.bf16.msrb.mxu1 %v10589_v43  ;;  %v13845_v43 = vld [vmem:[#allocation2 + $0xe94] sm:$0xf0]  ;;  %v13795_v14 = vld [vmem:[#allocation2 + $0xd04] sm:$0xf0] }
 0x19d   :  { %3652 = vmatpush.bf16.msrb.mxu2 %v10273_v44  ;;  %v13760_v44 = vld [vmem:[#allocation2 + $0xbf4] sm:$0xf]  ;;  %v10757_v50 = vor.u32 %v13845_v43, %v10756_v40  ;;  %v10638_v43 = vld [vmem:[#allocation2 + $0xda8] sm:$0xf0] }
 0x19e   :  { %3665 = vmatpush.bf16.msrb.mxu3 %v10593_v49  ;;  %v10437_v49 = vor.u32 %v13765_v38, %v10436_v37  ;;  %v10441_v51 = vor.u32 %v13760_v44, %v10438_v45  ;;  %v13730_v37 = vld [vmem:[#allocation2 + $0xb04] sm:$0xf]  ;;  %v10318_v38 = vld [vmem:[#allocation2 + $0xb28] sm:$0xf0] }
 0x19f   :  { %3627 = vmatpush.bf16.msrb.mxu0 %v10229_v56  ;;  %v10761_v56 = vor.u32 %v13840_v46, %v10758_v47  ;;  %v10321_v46 = vor.u32 %v13730_v37, %v10318_v38  ;;  %v10276_v47 = vld [vmem:[#allocation2 + $0xab0] sm:$0xf]  ;;  %v10198_v38 = vld [vmem:[#allocation2 + $0xa38] sm:$0xf0] }
 0x1a0   :  { %3640 = vmatpush.bf16.msrb.mxu1 %v10549_v60  ;;  %v10398_v60 = vld [vmem:[#allocation2 + $0xbc8] sm:$0xf0] }
 0x1a1   :  { %3653 = vmatpush.bf16.msrb.mxu2 %v10233_v61  ;;  %v13830_v61 = vld [vmem:[#allocation2 + $0xe24] sm:$0xf] }
 0x1a2   :  { %3666 = vmatpush.bf16.msrb.mxu3 %v10553_v5  ;;  %v10401_v5 = vor.u32 %v13750_v59, %v10398_v60  ;;  %v10721_v9 = vor.u32 %v13830_v61, %v10718_v0  ;;  %v13800_v59 = vld [vmem:[#allocation2 + $0xd34] sm:$0xf]  ;;  %v10598_v60 = vld [vmem:[#allocation2 + $0xd58] sm:$0xf0] }
 0x1a3   :  { %3628 = vmatpush.bf16.msrb.mxu0 %v10189_v18  ;;  %v2451_v17 = vpop.f32.mrf.mxu0  ;;  %v13820_v18 = vld [vmem:[#allocation2 + $0xdd4] sm:$0xf]  ;;  %v10601_v13 = vor.u32 %v13800_v59, %v10598_v60 }
 0x1a4   :  { %3641 = vmatpush.bf16.msrb.mxu1 %v10509_v27  ;;  %v2464_v20 = vpop.f32.mrf.mxu1  ;;  %v10806_v59 = vld [vmem:[#allocation2 + $0xef0] sm:$0xf0] }
 0x1a5   :  { %3654 = vmatpush.bf16.msrb.mxu2 %v10193_v28  ;;  %v14896_v27 = vadd.f32 %v2464_v20, %v2451_v17  ;;  %v10677_v28 = vor.u32 %v13825_v11, %v10676_v8  ;;  %v13715_v8 = vld [vmem:[#allocation2 + $0xa84] sm:$0xf0]  ;;  %v13710_v17 = vld [vmem:[#allocation2 + $0xa64] sm:$0xf]  ;;  %v10558_v20 = vld [vmem:[#allocation2 + $0xd08] sm:$0xf0] }
 0x1a6   :  { %3667 = vmatpush.bf16.msrb.mxu3 %v10513_v32  ;;  %3629 = vmatmul.bf16.vlgmr.msrb.gmra.mxu0 %v14808_v15  ;;  %v13735_v32 = vld [vmem:[#allocation2 + $0xb24] sm:$0xf0] }
 0x1a7   :  { %3673 = vmatpush.bf16.msra.mxu0 %v10477_v33  ;;  %3642 = vmatmul.bf16.vlgmr.msrb.gmra.mxu1 %v14810_v16  ;;  %v10636_v33 = vld [vmem:[#allocation2 + $0xd80] sm:$0xf]  ;;  %v2602_v40 = vmax.f32 %v14848_v10, %v14896_v27  ;;  %v10317_v44 = vor.u32 %v13735_v32, %v10316_v30  ;;  %v13960_v27 = vld [vmem:[#allocation2 + $0x1234] sm:$0xf] }
 0x1a8   :  { %3686 = vmatpush.bf16.msra.mxu1 %v10797_v34  ;;  %3655 = vmatmul.bf16.vlgmr.msrb.gmra.mxu2 %v14808_v15  ;;  %v10681_v34 = vor.u32 %v13820_v18, %v10678_v19  ;;  %v10238_v18 = vld [vmem:[#allocation2 + $0xa88] sm:$0xf0]  ;;  %v13790_v19 = vld [vmem:[#allocation2 + $0xce4] sm:$0xf] }
 0x1a9   :  { %3699 = vmatpush.bf16.msra.mxu2 %v10481_v36  ;;  %3668 = vmatmul.bf16.vlgmr.msrb.gmra.mxu3 %v14810_v16  ;;  %v13815_v36 = vld [vmem:[#allocation2 + $0xda4] sm:$0xf0]  ;;  %v10241_v32 = vor.u32 %v13710_v17, %v10238_v18  ;;  %v10561_v37 = vor.u32 %v13790_v19, %v10558_v20  ;;  %v13841_v17 = vld [vmem:[#allocation2 + $0xe7c] sm:$0xf]  ;;  %v10766_v18 = vld [vmem:[#allocation2 + $0xea0] sm:$0xf0] }
 0x1aa   :  { %3712 = vmatpush.bf16.msra.mxu3 %v10801_v41  ;;  %v13810_v41 = vld [vmem:[#allocation2 + $0xd84] sm:$0xf]  ;;  %v10637_v45 = vor.u32 %v13815_v36, %v10636_v33  ;;  %v10516_v33 = vld [vmem:[#allocation2 + $0xc90] sm:$0xf]  ;;  %v13700_v36 = vld [vmem:[#allocation2 + $0xa14] sm:$0xf] }
 0x1ab   :  { %3674 = vmatpush.bf16.msra.mxu0 %v10437_v49  ;;  %v13725_v49 = vld [vmem:[#allocation2 + $0xad4] sm:$0xf0]  ;;  %v2477_v53 = vpop.f32.mrf.mxu2  ;;  %v2453_v61 = vpop.f32.mrf.mxu0 }
 0x1ac   :  { %3687 = vmatpush.bf16.msra.mxu1 %v10757_v50  ;;  %v10596_v50 = vld [vmem:[#allocation2 + $0xd30] sm:$0xf]  ;;  %v2490_v58 = vpop.f32.mrf.mxu3 }
 0x1ad   :  { %3700 = vmatpush.bf16.msra.mxu2 %v10441_v51  ;;  %v10641_v51 = vor.u32 %v13810_v41, %v10638_v43  ;;  %v14900_v0 = vadd.f32 %v2490_v58, %v2477_v53  ;;  %v13780_v41 = vld [vmem:[#allocation2 + $0xc94] sm:$0xf]  ;;  %v10518_v43 = vld [vmem:[#allocation2 + $0xcb8] sm:$0xf0]  ;;  %v13771_v53 = vld [vmem:[#allocation2 + $0xc4c] sm:$0xf] }
 0x1ae   :  { %3713 = vmatpush.bf16.msra.mxu3 %v10761_v56  ;;  %v10278_v56 = vld [vmem:[#allocation2 + $0xad8] sm:$0xf0]  ;;  %v13851_v58 = vld [vmem:[#allocation2 + $0xecc] sm:$0xf]  ;;  %v10521_v60 = vor.u32 %v13780_v41, %v10518_v43 }
 0x1af   :  { %3675 = vmatpush.bf16.msra.mxu0 %v10397_v3  ;;  %v10277_v3 = vor.u32 %v13725_v49, %v10276_v47  ;;  %v10281_v6 = vor.u32 %v13720_v55, %v10278_v56  ;;  %v2603_v11 = vmax.f32 %v14850_v31, %v14900_v0  ;;  %v10804_v47 = vld [vmem:[#allocation2 + $0xec8] sm:$0xf]  ;;  %v10201_v56 = vor.u32 %v13700_v36, %v10198_v38  ;;  %v10406_v36 = vld [vmem:[#allocation2 + $0xbd0] sm:$0xf0]  ;;  %v10838_v0 = vld [vmem:[#allocation2 + $0xf38] sm:$0xf0] }
 0x1b0   :  { %3688 = vmatpush.bf16.msra.mxu1 %v10717_v4  ;;  %v2466_v4 = vpop.f32.mrf.mxu1  ;;  %v10726_v38 = vld [vmem:[#allocation2 + $0xe50] sm:$0xf0] }
 0x1b1   :  { %3701 = vmatpush.bf16.msra.mxu2 %v10401_v5  ;;  %v10597_v5 = vor.u32 %v13805_v54, %v10596_v50  ;;  %v10486_v54 = vld [vmem:[#allocation2 + $0xc70] sm:$0xf0] }
 0x1b2   :  { %3714 = vmatpush.bf16.msra.mxu3 %v10721_v9  ;;  %v10556_v9 = vld [vmem:[#allocation2 + $0xce0] sm:$0xf]  ;;  %v10489_v4 = vor.u32 %v13771_v53, %v10486_v54  ;;  %v10366_v53 = vld [vmem:[#allocation2 + $0xb80] sm:$0xf0] }
 0x1b3   :  { %3676 = vmatpush.bf16.msra.mxu0 %v10357_v24  ;;  %v10237_v24 = vor.u32 %v13715_v8, %v10236_v7  ;;  %v10557_v30 = vor.u32 %v13795_v14, %v10556_v9  ;;  %v10764_v7 = vld [vmem:[#allocation2 + $0xe78] sm:$0xf]  ;;  %v10809_v8 = vor.u32 %v13851_v58, %v10806_v59  ;;  %v13846_v9 = vld [vmem:[#allocation2 + $0xe9c] sm:$0xf0]  ;;  %v10446_v14 = vld [vmem:[#allocation2 + $0xc20] sm:$0xf0] }
 0x1b4   :  { %3689 = vmatpush.bf16.msra.mxu1 %v10677_v28  ;;  %v10196_v28 = vld [vmem:[#allocation2 + $0xa10] sm:$0xf]  ;;  %v2492_v49 = vpop.f32.mrf.mxu3  ;;  %v10765_v20 = vor.u32 %v13846_v9, %v10764_v7  ;;  %v13731_v9 = vld [vmem:[#allocation2 + $0xb0c] sm:$0xf] }
 0x1b5   :  { %3702 = vmatpush.bf16.msra.mxu2 %v10361_v29  ;;  %v13705_v29 = vld [vmem:[#allocation2 + $0xa34] sm:$0xf0] }
 0x1b6   :  { %3715 = vmatpush.bf16.msra.mxu3 %v10681_v34  ;;  %v13785_v34 = vld [vmem:[#allocation2 + $0xcb4] sm:$0xf0]  ;;  %v10197_v50 = vor.u32 %v13705_v29, %v10196_v28  ;;  %v10404_v28 = vld [vmem:[#allocation2 + $0xba8] sm:$0xf]  ;;  %v13756_v29 = vld [vmem:[#allocation2 + $0xbcc] sm:$0xf0] }
 0x1b7   :  { %3677 = vmatpush.bf16.msra.mxu0 %v10317_v44  ;;  %v2479_v44 = vpop.f32.mrf.mxu2  ;;  %v10517_v55 = vor.u32 %v13785_v34, %v10516_v33  ;;  %v13836_v33 = vld [vmem:[#allocation2 + $0xe4c] sm:$0xf0]  ;;  %v13751_v34 = vld [vmem:[#allocation2 + $0xbac] sm:$0xf]  ;;  %v10405_v41 = vor.u32 %v13756_v29, %v10404_v28  ;;  %v10284_v28 = vld [vmem:[#allocation2 + $0xab8] sm:$0xf] }
 0x1b8   :  { %3690 = vmatpush.bf16.msra.mxu1 %v10637_v45  ;;  %v10484_v45 = vld [vmem:[#allocation2 + $0xc48] sm:$0xf]  ;;  %v10409_v44 = vor.u32 %v13751_v34, %v10406_v36  ;;  %v13726_v29 = vld [vmem:[#allocation2 + $0xadc] sm:$0xf0]  ;;  %v13721_v36 = vld [vmem:[#allocation2 + $0xabc] sm:$0xf] }
 0x1b9   :  { %3703 = vmatpush.bf16.msra.mxu2 %v10321_v46  ;;  %v13776_v46 = vld [vmem:[#allocation2 + $0xc6c] sm:$0xf0]  ;;  %v13806_v34 = vld [vmem:[#allocation2 + $0xd5c] sm:$0xf0] }
 0x1ba   :  { %3716 = vmatpush.bf16.msra.mxu3 %v10641_v51  ;;  %v13856_v51 = vld [vmem:[#allocation2 + $0xeec] sm:$0xf0]  ;;  %v10485_v61 = vor.u32 %v13776_v46, %v10484_v45  ;;  %v10364_v45 = vld [vmem:[#allocation2 + $0xb58] sm:$0xf]  ;;  %v13746_v46 = vld [vmem:[#allocation2 + $0xb7c] sm:$0xf0] }
 0x1bb   :  { %3678 = vmatpush.bf16.msra.mxu0 %v10277_v3  ;;  %v10805_v3 = vor.u32 %v13856_v51, %v10804_v47  ;;  %v10684_v47 = vld [vmem:[#allocation2 + $0xdd8] sm:$0xf]  ;;  %v13741_v51 = vld [vmem:[#allocation2 + $0xb5c] sm:$0xf]  ;;  %v10365_v59 = vor.u32 %v13746_v46, %v10364_v45  ;;  %v10285_v46 = vor.u32 %v13726_v29, %v10284_v28  ;;  %v10526_v28 = vld [vmem:[#allocation2 + $0xcc0] sm:$0xf0] }
 0x1bc   :  { %3691 = vmatpush.bf16.msra.mxu1 %v10597_v5  ;;  %v10444_v5 = vld [vmem:[#allocation2 + $0xbf8] sm:$0xf] }
 0x1bd   :  { %3704 = vmatpush.bf16.msra.mxu2 %v10281_v6  ;;  %v13766_v6 = vld [vmem:[#allocation2 + $0xc1c] sm:$0xf0] }
 0x1be   :  { %3717 = vmatpush.bf16.msra.mxu3 %v10601_v13  ;;  %v13761_v13 = vld [vmem:[#allocation2 + $0xbfc] sm:$0xf]  ;;  %v10445_v19 = vor.u32 %v13766_v6, %v10444_v5  ;;  %v13736_v5 = vld [vmem:[#allocation2 + $0xb2c] sm:$0xf0]  ;;  %v10644_v6 = vld [vmem:[#allocation2 + $0xd88] sm:$0xf] }
 0x1bf   :  { %3679 = vmatpush.bf16.msra.mxu0 %v10237_v24  ;;  %v10449_v24 = vor.u32 %v13761_v13, %v10446_v14  ;;  %v10326_v13 = vld [vmem:[#allocation2 + $0xb30] sm:$0xf0] }
 0x1c0   :  { %3692 = vmatpush.bf16.msra.mxu1 %v10557_v30  ;;  %v10724_v30 = vld [vmem:[#allocation2 + $0xe28] sm:$0xf] }
 0x1c1   :  { %3705 = vmatpush.bf16.msra.mxu2 %v10241_v32  ;;  %v10769_v32 = vor.u32 %v13841_v17, %v10766_v18  ;;  %v10725_v43 = vor.u32 %v13836_v33, %v10724_v30  ;;  %v13811_v17 = vld [vmem:[#allocation2 + $0xd8c] sm:$0xf]  ;;  %v10646_v18 = vld [vmem:[#allocation2 + $0xdb0] sm:$0xf0]  ;;  %v10604_v30 = vld [vmem:[#allocation2 + $0xd38] sm:$0xf] }
 0x1c2   :  { %3718 = vmatpush.bf16.msra.mxu3 %v10561_v37  ;;  %v13831_v37 = vld [vmem:[#allocation2 + $0xe2c] sm:$0xf] }
 0x1c3   :  { %3680 = vmatpush.bf16.msra.mxu0 %v10197_v50  ;;  %v10729_v49 = vor.u32 %v13831_v37, %v10726_v38  ;;  %v13826_v50 = vld [vmem:[#allocation2 + $0xdfc] sm:$0xf0]  ;;  %v2503_v54 = vpop.f32.mrf.mxu0  ;;  %v10286_v37 = vld [vmem:[#allocation2 + $0xae0] sm:$0xf0] }
 0x1c4   :  { %3693 = vmatpush.bf16.msra.mxu1 %v10517_v55  ;;  %v13821_v55 = vld [vmem:[#allocation2 + $0xddc] sm:$0xf]  ;;  %v2516_v58 = vpop.f32.mrf.mxu1 }
 0x1c5   :  { %3706 = vmatpush.bf16.msra.mxu2 %v10201_v56  ;;  %v10686_v56 = vld [vmem:[#allocation2 + $0xe00] sm:$0xf0] }
 0x1c6   :  { %3719 = vmatpush.bf16.msra.mxu3 %v10521_v60  ;;  %3681 = vmatmul.bf16.vlgmr.msra.gmra.mxu0 %v14808_v15  ;;  %v14908_v60 = vadd.f32 %v2516_v58, %v2503_v54  ;;  %v10689_v7 = vor.u32 %v13821_v55, %v10686_v56  ;;  %v10564_v54 = vld [vmem:[#allocation2 + $0xce8] sm:$0xf]  ;;  %v13796_v58 = vld [vmem:[#allocation2 + $0xd0c] sm:$0xf0] }
 0x1c7   :  { %3725 = vmatpush.bf16.msrb.mxu0 %v10485_v61  ;;  %3694 = vmatmul.bf16.vlgmr.msra.gmra.mxu1 %v14810_v16  ;;  %v10685_v61 = vor.u32 %v13826_v50, %v10684_v47  ;;  %v10289_v50 = vor.u32 %v13721_v36, %v10286_v37  ;;  %v13857_v37 = vld [vmem:[#allocation2 + $0xef4] sm:$0xf0] }
 0x1c8   :  { %3738 = vmatpush.bf16.msrb.mxu1 %v10805_v3  ;;  %3707 = vmatmul.bf16.vlgmr.msra.gmra.mxu2 %v14808_v15  ;;  %v10369_v3 = vor.u32 %v13741_v51, %v10366_v53  ;;  %v2604_v14 = vmax.f32 %v14856_v2, %v14908_v60  ;;  %v10244_v51 = vld [vmem:[#allocation2 + $0xa68] sm:$0xf]  ;;  %v13716_v53 = vld [vmem:[#allocation2 + $0xa8c] sm:$0xf0]  ;;  %v13961_v60 = vld [vmem:[#allocation2 + $0x123c] sm:$0xf] }
 0x1c9   :  { %3751 = vmatpush.bf16.msrb.mxu2 %v10489_v4  ;;  %3720 = vmatmul.bf16.vlgmr.msra.gmra.mxu3 %v14810_v16  ;;  %v10324_v4 = vld [vmem:[#allocation2 + $0xb08] sm:$0xf] }
 0x1ca   :  { %3764 = vmatpush.bf16.msrb.mxu3 %v10809_v8  ;;  %v13816_v8 = vld [vmem:[#allocation2 + $0xdac] sm:$0xf0] }
 0x1cb   :  { %3726 = vmatpush.bf16.msrb.mxu0 %v10445_v19  ;;  %v10325_v19 = vor.u32 %v13736_v5, %v10324_v4  ;;  %v2529_v33 = vpop.f32.mrf.mxu2  ;;  %v10566_v4 = vld [vmem:[#allocation2 + $0xd10] sm:$0xf0]  ;;  %v10245_v5 = vor.u32 %v13716_v53, %v10244_v51 }
 0x1cc   :  { %3739 = vmatpush.bf16.msrb.mxu1 %v10765_v20  ;;  %v10645_v20 = vor.u32 %v13816_v8, %v10644_v6  ;;  %v2542_v38 = vpop.f32.mrf.mxu3  ;;  %v2518_v47 = vpop.f32.mrf.mxu1  ;;  %v10204_v6 = vld [vmem:[#allocation2 + $0xa18] sm:$0xf]  ;;  %v10565_v8 = vor.u32 %v13796_v58, %v10564_v54  ;;  %v10452_v54 = vld [vmem:[#allocation2 + $0xc00] sm:$0xf] }
 0x1cd   :  { %3752 = vmatpush.bf16.msrb.mxu2 %v10449_v24  ;;  %v10329_v24 = vor.u32 %v13731_v9, %v10326_v13  ;;  %v14912_v45 = vadd.f32 %v2542_v38, %v2529_v33  ;;  %v10524_v13 = vld [vmem:[#allocation2 + $0xc98] sm:$0xf]  ;;  %v10812_v33 = vld [vmem:[#allocation2 + $0xed0] sm:$0xf]  ;;  %v13772_v38 = vld [vmem:[#allocation2 + $0xc54] sm:$0xf] }
 0x1ce   :  { %3765 = vmatpush.bf16.msrb.mxu3 %v10769_v32  ;;  %v10649_v32 = vor.u32 %v13811_v17, %v10646_v18  ;;  %v13786_v17 = vld [vmem:[#allocation2 + $0xcbc] sm:$0xf0]  ;;  %v13701_v18 = vld [vmem:[#allocation2 + $0xa1c] sm:$0xf]  ;;  %v10813_v51 = vor.u32 %v13857_v37, %v10812_v33  ;;  %v13747_v37 = vld [vmem:[#allocation2 + $0xb84] sm:$0xf0] }
 0x1cf   :  { %3727 = vmatpush.bf16.msrb.mxu0 %v10405_v41  ;;  %v13801_v41 = vld [vmem:[#allocation2 + $0xd3c] sm:$0xf]  ;;  %v2605_v55 = vmax.f32 %v14858_v22, %v14912_v45  ;;  %v10772_v58 = vld [vmem:[#allocation2 + $0xe80] sm:$0xf]  ;;  %v10846_v45 = vld [vmem:[#allocation2 + $0xf40] sm:$0xf0] }
 0x1d0   :  { %3740 = vmatpush.bf16.msrb.mxu1 %v10725_v43  ;;  %v10606_v43 = vld [vmem:[#allocation2 + $0xd60] sm:$0xf0]  ;;  %v10814_v47 = vld [vmem:[#allocation2 + $0xef8] sm:$0xf0] }
 0x1d1   :  { %3753 = vmatpush.bf16.msrb.mxu2 %v10409_v44  ;;  %v2505_v44 = vpop.f32.mrf.mxu0  ;;  %v10609_v56 = vor.u32 %v13801_v41, %v10606_v43  ;;  %v10494_v41 = vld [vmem:[#allocation2 + $0xc78] sm:$0xf0]  ;;  %v10525_v43 = vor.u32 %v13786_v17, %v10524_v13  ;;  %v10412_v13 = vld [vmem:[#allocation2 + $0xbb0] sm:$0xf]  ;;  %v13757_v17 = vld [vmem:[#allocation2 + $0xbd4] sm:$0xf0] }
 0x1d2   :  { %3766 = vmatpush.bf16.msrb.mxu3 %v10729_v49  ;;  %v10605_v49 = vor.u32 %v13806_v34, %v10604_v30  ;;  %v10492_v30 = vld [vmem:[#allocation2 + $0xc50] sm:$0xf]  ;;  %v10497_v53 = vor.u32 %v13772_v38, %v10494_v41  ;;  %v10692_v38 = vld [vmem:[#allocation2 + $0xde0] sm:$0xf] }
 0x1d3   :  { %3728 = vmatpush.bf16.msrb.mxu0 %v10365_v59  ;;  %v13711_v59 = vld [vmem:[#allocation2 + $0xa6c] sm:$0xf]  ;;  %v2531_v29 = vpop.f32.mrf.mxu2 }
 0x1d4   :  { %3741 = vmatpush.bf16.msrb.mxu1 %v10685_v61  ;;  %v10246_v61 = vld [vmem:[#allocation2 + $0xa90] sm:$0xf0]  ;;  %v2544_v34 = vpop.f32.mrf.mxu3 }
 0x1d5   :  { %3754 = vmatpush.bf16.msrb.mxu2 %v10369_v3  ;;  %v13791_v3 = vld [vmem:[#allocation2 + $0xcec] sm:$0xf]  ;;  %v10249_v9 = vor.u32 %v13711_v59, %v10246_v61  ;;  %v13847_v61 = vld [vmem:[#allocation2 + $0xea4] sm:$0xf0]  ;;  %v13832_v29 = vld [vmem:[#allocation2 + $0xe34] sm:$0xf] }
 0x1d6   :  { %3767 = vmatpush.bf16.msrb.mxu3 %v10689_v7  ;;  %v13706_v7 = vld [vmem:[#allocation2 + $0xa3c] sm:$0xf0] }
 0x1d7   :  { %3729 = vmatpush.bf16.msrb.mxu0 %v10325_v19  ;;  %v10569_v19 = vor.u32 %v13791_v3, %v10566_v4  ;;  %v10205_v36 = vor.u32 %v13706_v7, %v10204_v6  ;;  %v13762_v3 = vld [vmem:[#allocation2 + $0xc04] sm:$0xf]  ;;  %v10454_v4 = vld [vmem:[#allocation2 + $0xc28] sm:$0xf0] }
 0x1d8   :  { %3742 = vmatpush.bf16.msrb.mxu1 %v10645_v20  ;;  %v10206_v20 = vld [vmem:[#allocation2 + $0xa40] sm:$0xf0]  ;;  %v10774_v6 = vld [vmem:[#allocation2 + $0xea8] sm:$0xf0] }
 0x1d9   :  { %3755 = vmatpush.bf16.msrb.mxu2 %v10329_v24  ;;  %v13781_v24 = vld [vmem:[#allocation2 + $0xc9c] sm:$0xf]  ;;  %v10209_v44 = vor.u32 %v13701_v18, %v10206_v20  ;;  %v10732_v18 = vld [vmem:[#allocation2 + $0xe30] sm:$0xf]  ;;  %v13837_v20 = vld [vmem:[#allocation2 + $0xe54] sm:$0xf0] }
 0x1da   :  { %3768 = vmatpush.bf16.msrb.mxu3 %v10649_v32  ;;  %v13777_v32 = vld [vmem:[#allocation2 + $0xc74] sm:$0xf0]  ;;  %v10733_v33 = vor.u32 %v13837_v20, %v10732_v18  ;;  %v10292_v20 = vld [vmem:[#allocation2 + $0xac0] sm:$0xf] }
 0x1db   :  { %3730 = vmatpush.bf16.msrb.mxu0 %v10285_v46  ;;  %v13852_v46 = vld [vmem:[#allocation2 + $0xed4] sm:$0xf] }
 0x1dc   :  { %3743 = vmatpush.bf16.msrb.mxu1 %v10605_v49  ;;  %v10529_v49 = vor.u32 %v13781_v24, %v10526_v28  ;;  %v10817_v59 = vor.u32 %v13852_v46, %v10814_v47  ;;  %v13752_v24 = vld [vmem:[#allocation2 + $0xbb4] sm:$0xf]  ;;  %v10414_v28 = vld [vmem:[#allocation2 + $0xbd8] sm:$0xf0]  ;;  %v10374_v46 = vld [vmem:[#allocation2 + $0xb88] sm:$0xf0] }
 0x1dd   :  { %3756 = vmatpush.bf16.msrb.mxu2 %v10289_v50  ;;  %v10493_v50 = vor.u32 %v13777_v32, %v10492_v30  ;;  %v10734_v30 = vld [vmem:[#allocation2 + $0xe58] sm:$0xf0]  ;;  %v10413_v32 = vor.u32 %v13757_v17, %v10412_v13  ;;  %v10417_v34 = vor.u32 %v13752_v24, %v10414_v28  ;;  %v13727_v24 = vld [vmem:[#allocation2 + $0xae4] sm:$0xf0]  ;;  %v10612_v28 = vld [vmem:[#allocation2 + $0xd40] sm:$0xf] }
 0x1de   :  { %3769 = vmatpush.bf16.msrb.mxu3 %v10609_v56  ;;  %v13767_v56 = vld [vmem:[#allocation2 + $0xc24] sm:$0xf0]  ;;  %v10737_v41 = vor.u32 %v13832_v29, %v10734_v30  ;;  %v10654_v13 = vld [vmem:[#allocation2 + $0xdb8] sm:$0xf0] }
 0x1df   :  { %3731 = vmatpush.bf16.msrb.mxu0 %v10245_v5  ;;  %v13842_v5 = vld [vmem:[#allocation2 + $0xe84] sm:$0xf]  ;;  %v10453_v7 = vor.u32 %v13767_v56, %v10452_v54 }
 0x1e0   :  { %3744 = vmatpush.bf16.msrb.mxu1 %v10565_v8  ;;  %v10773_v8 = vor.u32 %v13847_v61, %v10772_v58  ;;  %v13737_v61 = vld [vmem:[#allocation2 + $0xb34] sm:$0xf0] }
 0x1e1   :  { %3757 = vmatpush.bf16.msrb.mxu2 %v10249_v9  ;;  %v10457_v9 = vor.u32 %v13762_v3, %v10454_v4  ;;  %v10652_v3 = vld [vmem:[#allocation2 + $0xd90] sm:$0xf] }
 0x1e2   :  { %3770 = vmatpush.bf16.msrb.mxu3 %v10569_v19  ;;  %v10777_v19 = vor.u32 %v13842_v5, %v10774_v6  ;;  %v13817_v5 = vld [vmem:[#allocation2 + $0xdb4] sm:$0xf0]  ;;  %v13732_v6 = vld [vmem:[#allocation2 + $0xb14] sm:$0xf] }
 0x1e3   :  { %3732 = vmatpush.bf16.msrb.mxu0 %v10205_v36  ;;  %v10372_v36 = vld [vmem:[#allocation2 + $0xb60] sm:$0xf]  ;;  %v2555_v47 = vpop.f32.mrf.mxu0  ;;  %v10653_v18 = vor.u32 %v13817_v5, %v10652_v3  ;;  %v10254_v3 = vld [vmem:[#allocation2 + $0xa98] sm:$0xf0] }
 0x1e4   :  { %3745 = vmatpush.bf16.msrb.mxu1 %v10525_v43  ;;  %v13827_v43 = vld [vmem:[#allocation2 + $0xe04] sm:$0xf0]  ;;  %v10574_v5 = vld [vmem:[#allocation2 + $0xd18] sm:$0xf0] }
 0x1e5   :  { %3758 = vmatpush.bf16.msrb.mxu2 %v10209_v44  ;;  %v13742_v44 = vld [vmem:[#allocation2 + $0xb64] sm:$0xf]  ;;  %v10693_v56 = vor.u32 %v13827_v43, %v10692_v38  ;;  %v10614_v38 = vld [vmem:[#allocation2 + $0xd68] sm:$0xf0] }
 0x1e6   :  { %3771 = vmatpush.bf16.msrb.mxu3 %v10529_v49  ;;  %3733 = vmatmul.bf16.vlgmr.msrb.gmra.mxu0 %v14808_v15  ;;  %v13822_v49 = vld [vmem:[#allocation2 + $0xde4] sm:$0xf]  ;;  %v10377_v58 = vor.u32 %v13742_v44, %v10374_v46  ;;  %v10293_v44 = vor.u32 %v13727_v24, %v10292_v20 }
 0x1e7   :  { %3777 = vmatpush.bf16.msra.mxu0 %v10493_v50  ;;  %3746 = vmatmul.bf16.vlgmr.msrb.gmra.mxu1 %v14810_v16  ;;  %v10694_v50 = vld [vmem:[#allocation2 + $0xe08] sm:$0xf0]  ;;  %v13702_v20 = vld [vmem:[#allocation2 + $0xa24] sm:$0xf] }
 0x1e8   :  { %3790 = vmatpush.bf16.msra.mxu1 %v10813_v51  ;;  %3759 = vmatmul.bf16.vlgmr.msrb.gmra.mxu2 %v14808_v15  ;;  %v2568_v51 = vpop.f32.mrf.mxu1  ;;  %v10697_v4 = vor.u32 %v13822_v49, %v10694_v50  ;;  %v10252_v50 = vld [vmem:[#allocation2 + $0xa70] sm:$0xf] }
 0x1e9   :  { %3803 = vmatpush.bf16.msra.mxu2 %v10497_v53  ;;  %3772 = vmatmul.bf16.vlgmr.msrb.gmra.mxu3 %v14810_v16  ;;  %v10373_v53 = vor.u32 %v13747_v37, %v10372_v36  ;;  %v14920_v54 = vadd.f32 %v2568_v51, %v2555_v47  ;;  %v13802_v37 = vld [vmem:[#allocation2 + $0xd44] sm:$0xf]  ;;  %v13717_v51 = vld [vmem:[#allocation2 + $0xa94] sm:$0xf0] }
 0x1ea   :  { %3816 = vmatpush.bf16.msra.mxu3 %v10817_v59  ;;  %v10332_v59 = vld [vmem:[#allocation2 + $0xb10] sm:$0xf] }
 0x1eb   :  { %3778 = vmatpush.bf16.msra.mxu0 %v10453_v7  ;;  %v10334_v7 = vld [vmem:[#allocation2 + $0xb38] sm:$0xf0]  ;;  %v10333_v17 = vor.u32 %v13737_v61, %v10332_v59  ;;  %v2581_v30 = vpop.f32.mrf.mxu2  ;;  %v13797_v59 = vld [vmem:[#allocation2 + $0xd14] sm:$0xf0]  ;;  %v13712_v61 = vld [vmem:[#allocation2 + $0xa74] sm:$0xf] }
 0x1ec   :  { %3791 = vmatpush.bf16.msra.mxu1 %v10773_v8  ;;  %v2606_v8 = vmax.f32 %v14864_v57, %v14920_v54  ;;  %v2594_v36 = vpop.f32.mrf.mxu3  ;;  %v13962_v54 = vld [vmem:[#allocation2 + $0x1244] sm:$0xf] }
 0x1ed   :  { %3804 = vmatpush.bf16.msra.mxu2 %v10457_v9  ;;  %v13812_v9 = vld [vmem:[#allocation2 + $0xd94] sm:$0xf]  ;;  %v14924_v43 = vadd.f32 %v2594_v36, %v2581_v30  ;;  %v10534_v30 = vld [vmem:[#allocation2 + $0xcc8] sm:$0xf0]  ;;  %v11420_v36 = vld [vmem:[#allocation2 + $0x13b0] sm:$0xf] }
 0x1ee   :  { %3817 = vmatpush.bf16.msra.mxu3 %v10777_v19  ;;  %v10337_v19 = vor.u32 %v13732_v6, %v10334_v7  ;;  %v10657_v29 = vor.u32 %v13812_v9, %v10654_v13  ;;  %v10253_v6 = vor.u32 %v13717_v51, %v10252_v50  ;;  %v10212_v7 = vld [vmem:[#allocation2 + $0xa20] sm:$0xf]  ;;  %v13707_v9 = vld [vmem:[#allocation2 + $0xa44] sm:$0xf0]  ;;  %v14008_v50 = vld [vmem:[#allocation2 + $0x13b4] sm:$0xf] }
 0x1ef   :  { %3779 = vmatpush.bf16.msra.mxu0 %v10413_v32  ;;  %v13807_v32 = vld [vmem:[#allocation2 + $0xd64] sm:$0xf0]  ;;  %v11422_v51 = vld [vmem:[#allocation2 + $0x13d8] sm:$0xf0] }
 0x1f0   :  { %3792 = vmatpush.bf16.msra.mxu1 %v10733_v33  ;;  %v13722_v33 = vld [vmem:[#allocation2 + $0xac4] sm:$0xf]  ;;  %v2570_v46 = vpop.f32.mrf.mxu1  ;;  %v10613_v47 = vor.u32 %v13807_v32, %v10612_v28  ;;  %v10214_v28 = vld [vmem:[#allocation2 + $0xa48] sm:$0xf0] }
 0x1f1   :  { %3805 = vmatpush.bf16.msra.mxu2 %v10417_v34  ;;  %v10294_v34 = vld [vmem:[#allocation2 + $0xae8] sm:$0xf0]  ;;  %v11102_v46 = vld [vmem:[#allocation2 + $0x1158] sm:$0xf0] }
 0x1f2   :  { %3818 = vmatpush.bf16.msra.mxu3 %v10737_v41  ;;  %v2557_v41 = vpop.f32.mrf.mxu0  ;;  %v10297_v49 = vor.u32 %v13722_v33, %v10294_v34  ;;  %v11100_v33 = vld [vmem:[#allocation2 + $0x1130] sm:$0xf]  ;;  %v13933_v34 = vld [vmem:[#allocation2 + $0x1154] sm:$0xf0] }
 0x1f3   :  { %3780 = vmatpush.bf16.msra.mxu0 %v10373_v53  ;;  %v10572_v53 = vld [vmem:[#allocation2 + $0xcf0] sm:$0xf]  ;;  %v2583_v32 = vpop.f32.mrf.mxu2  ;;  %v14013_v41 = vld [vmem:[#allocation2 + $0x13d4] sm:$0xf0] }
 0x1f4   :  { %3793 = vmatpush.bf16.msra.mxu1 %v10693_v56  ;;  %v2607_v56 = vmax.f32 %v14866_v21, %v14924_v43  ;;  %v10573_v13 = vor.u32 %v13797_v59, %v10572_v53  ;;  %v11421_v59 = vor.u32 %v14013_v41, %v11420_v36  ;;  %v11062_v32 = vld [vmem:[#allocation2 + $0x1108] sm:$0xf0]  ;;  %v11022_v36 = vld [vmem:[#allocation2 + $0x10b8] sm:$0xf0]  ;;  %v13862_v43 = vld [vmem:[#allocation2 + $0xf24] sm:$0xf] }
 0x1f5   :  { %3806 = vmatpush.bf16.msra.mxu2 %v10377_v58  ;;  %v10617_v58 = vor.u32 %v13802_v37, %v10614_v38  ;;  %v2596_v37 = vpop.f32.mrf.mxu3  ;;  %v10213_v38 = vor.u32 %v13707_v9, %v10212_v7  ;;  %v14003_v7 = vld [vmem:[#allocation2 + $0x1384] sm:$0xf0]  ;;  %v13918_v9 = vld [vmem:[#allocation2 + $0x10e4] sm:$0xf] }
 0x1f6   :  { %3819 = vmatpush.bf16.msra.mxu3 %v10697_v4  ;;  %v13792_v4 = vld [vmem:[#allocation2 + $0xcf4] sm:$0xf] }
 0x1f7   :  { %3781 = vmatpush.bf16.msra.mxu0 %v10333_v17  ;;  %v10257_v17 = vor.u32 %v13712_v61, %v10254_v3  ;;  %v10577_v24 = vor.u32 %v13792_v4, %v10574_v5  ;;  %v11060_v3 = vld [vmem:[#allocation2 + $0x10e0] sm:$0xf]  ;;  %v13923_v4 = vld [vmem:[#allocation2 + $0x1104] sm:$0xf0]  ;;  %v13988_v37 = vld [vmem:[#allocation2 + $0x1314] sm:$0xf] }
 0x1f8   :  { %3794 = vmatpush.bf16.msra.mxu1 %v10653_v18  ;;  %v10532_v18 = vld [vmem:[#allocation2 + $0xca0] sm:$0xf] }
 0x1f9   :  { %3807 = vmatpush.bf16.msra.mxu2 %v10337_v19  ;;  %v13787_v19 = vld [vmem:[#allocation2 + $0xcc4] sm:$0xf0]  ;;  %v11380_v5 = vld [vmem:[#allocation2 + $0x1360] sm:$0xf] }
 0x1fa   :  { %3820 = vmatpush.bf16.msra.mxu3 %v10657_v29  ;;  %v13782_v29 = vld [vmem:[#allocation2 + $0xca4] sm:$0xf] }
 0x1fb   :  { %3782 = vmatpush.bf16.msra.mxu0 %v10293_v44  ;;  %v13928_v44 = vld [vmem:[#allocation2 + $0x1134] sm:$0xf]  ;;  %v10537_v53 = vor.u32 %v13782_v29, %v10534_v30  ;;  %v11340_v29 = vld [vmem:[#allocation2 + $0x1310] sm:$0xf] }
 0x1fc   :  { %3795 = vmatpush.bf16.msra.mxu1 %v10613_v47  ;;  %v10533_v47 = vor.u32 %v13787_v19, %v10532_v18  ;;  %v11105_v61 = vor.u32 %v13928_v44, %v11102_v46  ;;  %v11061_v18 = vor.u32 %v13923_v4, %v11060_v3  ;;  %v11381_v19 = vor.u32 %v14003_v7, %v11380_v5  ;;  %v13978_v3 = vld [vmem:[#allocation2 + $0x12c4] sm:$0xf]  ;;  %v11302_v4 = vld [vmem:[#allocation2 + $0x12e8] sm:$0xf0] }
 0x1fd   :  { %3808 = vmatpush.bf16.msra.mxu2 %v10297_v49  ;;  %v10217_v49 = vor.u32 %v13702_v20, %v10214_v28  ;;  %v11065_v20 = vor.u32 %v13918_v9, %v11062_v32  ;;  %v13913_v28 = vld [vmem:[#allocation2 + $0x10b4] sm:$0xf0] }
 0x1fe   :  { %3821 = vmatpush.bf16.msra.mxu3 %v10617_v58  ;;  %v11101_v58 = vor.u32 %v13933_v34, %v11100_v33  ;;  %v13993_v33 = vld [vmem:[#allocation2 + $0x1334] sm:$0xf0]  ;;  %v13908_v34 = vld [vmem:[#allocation2 + $0x1094] sm:$0xf] }
 0x1ff   :  { %3783 = vmatpush.bf16.msra.mxu0 %v10253_v6  ;;  %v11425_v6 = vor.u32 %v14008_v50, %v11422_v51  ;;  %v11341_v44 = vor.u32 %v13993_v33, %v11340_v29  ;;  %v11025_v46 = vor.u32 %v13908_v34, %v11022_v36  ;;  %v11300_v50 = vld [vmem:[#allocation2 + $0x12c0] sm:$0xf]  ;;  %v11262_v33 = vld [vmem:[#allocation2 + $0x1298] sm:$0xf0] }
 0x200   :  { %3796 = vmatpush.bf16.msra.mxu1 %v10573_v13  ;;  %v13998_v13 = vld [vmem:[#allocation2 + $0x1364] sm:$0xf] }
 0x201   :  { %3809 = vmatpush.bf16.msra.mxu2 %v10257_v17  ;;  %v11382_v17 = vld [vmem:[#allocation2 + $0x1388] sm:$0xf0] }
 0x202   :  { %3822 = vmatpush.bf16.msra.mxu3 %v10577_v24  ;;  %v11020_v24 = vld [vmem:[#allocation2 + $0x1090] sm:$0xf]  ;;  %v11385_v30 = vor.u32 %v13998_v13, %v11382_v17  ;;  %v13893_v17 = vld [vmem:[#allocation2 + $0x1014] sm:$0xf0] }
 0x203   :  { %3784 = vmatpush.bf16.msra.mxu0 %v10213_v38  ;;  %v11342_v38 = vld [vmem:[#allocation2 + $0x1338] sm:$0xf0]  ;;  %v11021_v41 = vor.u32 %v13913_v28, %v11020_v24  ;;  %v10940_v13 = vld [vmem:[#allocation2 + $0xff0] sm:$0xf]  ;;  %v13888_v24 = vld [vmem:[#allocation2 + $0xff4] sm:$0xf] }
 0x204   :  { %3797 = vmatpush.bf16.msra.mxu1 %v10533_v47  ;;  %v10980_v47 = vld [vmem:[#allocation2 + $0x1040] sm:$0xf]  ;;  %v11345_v51 = vor.u32 %v13988_v37, %v11342_v38  ;;  %v3591_v5 = vpop.f32.mrf.mxu1  ;;  %v10942_v28 = vld [vmem:[#allocation2 + $0x1018] sm:$0xf0]  ;;  %v10941_v34 = vor.u32 %v13893_v17, %v10940_v13  ;;  %v13953_v13 = vld [vmem:[#allocation2 + $0x11f4] sm:$0xf0] }
 0x205   :  { %3810 = vmatpush.bf16.msra.mxu2 %v10217_v49  ;;  %v13903_v49 = vld [vmem:[#allocation2 + $0x1064] sm:$0xf0]  ;;  %v10945_v37 = vor.u32 %v13888_v24, %v10942_v28  ;;  %v10900_v38 = vld [vmem:[#allocation2 + $0xfa0] sm:$0xf]  ;;  %v13868_v17 = vld [vmem:[#allocation2 + $0xf54] sm:$0xf] }
 0x206   :  { %3823 = vmatpush.bf16.msra.mxu3 %v10537_v53  ;;  %3785 = vmatmul.bf16.vlgmr.msra.gmra.mxu0 %v14808_v15  ;;  %v13983_v53 = vld [vmem:[#allocation2 + $0x12e4] sm:$0xf0]  ;;  %v10820_v28 = vld [vmem:[#allocation2 + $0xf00] sm:$0xf] }
 0x207   :  { %4800 = vmatpush.bf16.msrb.mxu0 %v11101_v58  ;;  %3798 = vmatmul.bf16.vlgmr.msra.gmra.mxu1 %v14810_v16  ;;  %v13898_v58 = vld [vmem:[#allocation2 + $0x1044] sm:$0xf]  ;;  %v11301_v9 = vor.u32 %v13983_v53, %v11300_v50 }
 0x208   :  { %4813 = vmatpush.bf16.msrb.mxu1 %v11421_v59  ;;  %3811 = vmatmul.bf16.vlgmr.msra.gmra.mxu2 %v14808_v15  ;;  %v10982_v59 = vld [vmem:[#allocation2 + $0x1068] sm:$0xf0]  ;;  %v13878_v50 = vld [vmem:[#allocation2 + $0xfa4] sm:$0xf] }
 0x209   :  { %4826 = vmatpush.bf16.msrb.mxu2 %v11105_v61  ;;  %3824 = vmatmul.bf16.vlgmr.msra.gmra.mxu3 %v14810_v16  ;;  %v3578_v61 = vpop.f32.mrf.mxu0  ;;  %v10985_v32 = vor.u32 %v13898_v58, %v10982_v59 }
 0x20a   :  { %4839 = vmatpush.bf16.msrb.mxu3 %v11425_v6  ;;  %v10981_v6 = vor.u32 %v13903_v49, %v10980_v47  ;;  %v3592_v7 = vadd.f32 %v3591_v5, %v3578_v61  ;;  %v13963_v49 = vld [vmem:[#allocation2 + $0x1244] sm:$0xf0]  ;;  %v10860_v5 = vld [vmem:[#allocation2 + $0xf50] sm:$0xf] }
 0x20b   :  { %4801 = vmatpush.bf16.msrb.mxu0 %v11061_v18  ;;  %v11260_v18 = vld [vmem:[#allocation2 + $0x1270] sm:$0xf]  ;;  %v3604_v47 = vpop.f32.mrf.mxu2 }
 0x20c   :  { %4814 = vmatpush.bf16.msrb.mxu1 %v11381_v19  ;;  %v11305_v19 = vor.u32 %v13978_v3, %v11302_v4  ;;  %v14935_v29 = vmax.f32 %v2598_v63, %v3592_v7  ;;  %v3617_v1 = vpop.f32.mrf.mxu3  ;;  %v11222_v63 = vld [vmem:[#allocation2 + $0x1248] sm:$0xf0]  ;;  %v3593_v61 = vpop.f32.mrf.mxu1  ;;  %v11180_v7 = vld [vmem:[#allocation2 + $0x11d0] sm:$0xf] }
 0x20d   :  { %4827 = vmatpush.bf16.msrb.mxu2 %v11065_v20  ;;  %v13973_v20 = vld [vmem:[#allocation2 + $0x1294] sm:$0xf0]  ;;  %v3618_v58 = vadd.f32 %v3617_v1, %v3604_v47  ;;  %v13934_v47 = vld [vmem:[#allocation2 + $0x115c] sm:$0xf0]  ;;  %v11430_v61 = vld [vmem:[#allocation2 + $0x13e0] sm:$0xf0] }
 0x20e   :  { %4840 = vmatpush.bf16.msrb.mxu3 %v11385_v30  ;;  %v13968_v30 = vld [vmem:[#allocation2 + $0x1274] sm:$0xf]  ;;  %v11261_v36 = vor.u32 %v13973_v20, %v11260_v18  ;;  %v10862_v18 = vld [vmem:[#allocation2 + $0xf78] sm:$0xf0]  ;;  %v14014_v1 = vld [vmem:[#allocation2 + $0x13dc] sm:$0xf0] }
 0x20f   :  { %4802 = vmatpush.bf16.msrb.mxu0 %v11021_v41  ;;  %v13883_v41 = vld [vmem:[#allocation2 + $0xfc4] sm:$0xf0]  ;;  %v11182_v20 = vld [vmem:[#allocation2 + $0x11f8] sm:$0xf0] }
 0x210   :  { %4815 = vmatpush.bf16.msrb.mxu1 %v11341_v44  ;;  %v11220_v44 = vld [vmem:[#allocation2 + $0x1220] sm:$0xf]  ;;  %v10901_v59 = vor.u32 %v13883_v41, %v10900_v38  ;;  %v13858_v38 = vld [vmem:[#allocation2 + $0xf04] sm:$0xf]  ;;  %v11142_v41 = vld [vmem:[#allocation2 + $0x11a8] sm:$0xf0] }
 0x211   :  { %4828 = vmatpush.bf16.msrb.mxu2 %v11025_v46  ;;  %v11265_v46 = vor.u32 %v13968_v30, %v11262_v33  ;;  %v3580_v53 = vpop.f32.mrf.mxu0  ;;  %v11221_v3 = vor.u32 %v13963_v49, %v11220_v44  ;;  %v13863_v30 = vld [vmem:[#allocation2 + $0xf24] sm:$0xf0]  ;;  %v11181_v33 = vor.u32 %v13953_v13, %v11180_v7  ;;  %v11428_v49 = vld [vmem:[#allocation2 + $0x13b8] sm:$0xf] }
 0x212   :  { %4841 = vmatpush.bf16.msrb.mxu3 %v11345_v51  ;;  %v10902_v51 = vld [vmem:[#allocation2 + $0xfc8] sm:$0xf0]  ;;  %v11068_v7 = vld [vmem:[#allocation2 + $0x10e8] sm:$0xf] }
 0x213   :  { %4803 = vmatpush.bf16.msrb.mxu0 %v10981_v6  ;;  %v10905_v4 = vor.u32 %v13878_v50, %v10902_v51  ;;  %v13873_v6 = vld [vmem:[#allocation2 + $0xf74] sm:$0xf0]  ;;  %v3606_v44 = vpop.f32.mrf.mxu2  ;;  %v10821_v51 = vor.u32 %v13863_v30, %v10820_v28  ;;  %v11388_v13 = vld [vmem:[#allocation2 + $0x1368] sm:$0xf]  ;;  %v11390_v28 = vld [vmem:[#allocation2 + $0x1390] sm:$0xf0] }
 0x214   :  { %4816 = vmatpush.bf16.msrb.mxu1 %v11301_v9  ;;  %v14940_v9 = vmax.f32 %v2599_v35, %v3618_v58  ;;  %v10861_v24 = vor.u32 %v13873_v6, %v10860_v5  ;;  %v13938_v35 = vld [vmem:[#allocation2 + $0x1184] sm:$0xf]  ;;  %v3619_v50 = vpop.f32.mrf.mxu3  ;;  %v10825_v58 = vor.u32 %v13858_v38, %v10822_v26  ;;  %v11429_v5 = vor.u32 %v14014_v1, %v11428_v49  ;;  %v11348_v38 = vld [vmem:[#allocation2 + $0x1318] sm:$0xf]  ;;  %v13994_v26 = vld [vmem:[#allocation2 + $0x133c] sm:$0xf0] }
 0x215   :  { %4829 = vmatpush.bf16.msrb.mxu2 %v10985_v32  ;;  %v11225_v32 = vor.u32 %v13958_v52, %v11222_v63  ;;  %v13929_v52 = vld [vmem:[#allocation2 + $0x113c] sm:$0xf]  ;;  %v11110_v63 = vld [vmem:[#allocation2 + $0x1160] sm:$0xf0]  ;;  %v11349_v49 = vor.u32 %v13994_v26, %v11348_v38  ;;  %v13904_v1 = vld [vmem:[#allocation2 + $0x106c] sm:$0xf0] }
 0x216   :  { %4842 = vmatpush.bf16.msrb.mxu3 %v11305_v19  ;;  %v13948_v19 = vld [vmem:[#allocation2 + $0x11d4] sm:$0xf]  ;;  %v11113_v6 = vor.u32 %v13929_v52, %v11110_v63  ;;  %v13989_v44 = vld [vmem:[#allocation2 + $0x131c] sm:$0xf]  ;;  %v11308_v52 = vld [vmem:[#allocation2 + $0x12c8] sm:$0xf] }
 0x217   :  { %4804 = vmatpush.bf16.msrb.mxu0 %v10941_v34  ;;  %v10865_v34 = vor.u32 %v13868_v17, %v10862_v18  ;;  %v11185_v23 = vor.u32 %v13948_v19, %v11182_v20  ;;  %v14004_v18 = vld [vmem:[#allocation2 + $0x138c] sm:$0xf0]  ;;  %v13919_v19 = vld [vmem:[#allocation2 + $0x10ec] sm:$0xf]  ;;  %v11070_v20 = vld [vmem:[#allocation2 + $0x1110] sm:$0xf0] }
 0x218   :  { %4817 = vmatpush.bf16.msrb.mxu1 %v11261_v36  ;;  %v11140_v36 = vld [vmem:[#allocation2 + $0x1180] sm:$0xf]  ;;  %v10908_v26 = vld [vmem:[#allocation2 + $0xfa8] sm:$0xf] }
 0x219   :  { %4830 = vmatpush.bf16.msrb.mxu2 %v10945_v37  ;;  %v13943_v37 = vld [vmem:[#allocation2 + $0x11a4] sm:$0xf0] }
 0x21a   :  { %4843 = vmatpush.bf16.msrb.mxu3 %v11265_v46  ;;  %v11108_v46 = vld [vmem:[#allocation2 + $0x1138] sm:$0xf]  ;;  %v11141_v53 = vor.u32 %v13943_v37, %v11140_v36  ;;  %v13914_v37 = vld [vmem:[#allocation2 + $0x10bc] sm:$0xf0] }
 0x21b   :  { %4805 = vmatpush.bf16.msrb.mxu0 %v10901_v59  ;;  %v14009_v59 = vld [vmem:[#allocation2 + $0x13bc] sm:$0xf]  ;;  %v11028_v36 = vld [vmem:[#allocation2 + $0x1098] sm:$0xf] }
 0x21c   :  { %4818 = vmatpush.bf16.msrb.mxu1 %v11221_v3  ;;  %v11145_v3 = vor.u32 %v13938_v35, %v11142_v41  ;;  %v11433_v17 = vor.u32 %v14009_v59, %v11430_v61  ;;  %v13909_v35 = vld [vmem:[#allocation2 + $0x109c] sm:$0xf]  ;;  %v11030_v41 = vld [vmem:[#allocation2 + $0x10c0] sm:$0xf0]  ;;  %v10990_v59 = vld [vmem:[#allocation2 + $0x1070] sm:$0xf0] }
 0x21d   :  { %4831 = vmatpush.bf16.msrb.mxu2 %v10905_v4  ;;  %v11109_v4 = vor.u32 %v13934_v47, %v11108_v46  ;;  %v11350_v46 = vld [vmem:[#allocation2 + $0x1340] sm:$0xf0]  ;;  %v11029_v47 = vor.u32 %v13914_v37, %v11028_v36  ;;  %v11033_v50 = vor.u32 %v13909_v35, %v11030_v41  ;;  %v13884_v35 = vld [vmem:[#allocation2 + $0xfcc] sm:$0xf0]  ;;  %v11228_v41 = vld [vmem:[#allocation2 + $0x1228] sm:$0xf] }
 0x21e   :  { %4844 = vmatpush.bf16.msrb.mxu3 %v11225_v32  ;;  %v13924_v32 = vld [vmem:[#allocation2 + $0x110c] sm:$0xf0]  ;;  %v11353_v63 = vor.u32 %v13989_v44, %v11350_v46  ;;  %v11270_v36 = vld [vmem:[#allocation2 + $0x12a0] sm:$0xf0] }
 0x21f   :  { %4806 = vmatpush.bf16.msrb.mxu0 %v10861_v24  ;;  %v13999_v24 = vld [vmem:[#allocation2 + $0x136c] sm:$0xf]  ;;  %v11069_v30 = vor.u32 %v13924_v32, %v11068_v7 }
 0x220   :  { %4819 = vmatpush.bf16.msrb.mxu1 %v11181_v33  ;;  %v11389_v33 = vor.u32 %v14004_v18, %v11388_v13  ;;  %v13894_v18 = vld [vmem:[#allocation2 + $0x101c] sm:$0xf0] }
 0x221   :  { %4832 = vmatpush.bf16.msrb.mxu2 %v10865_v34  ;;  %v11073_v34 = vor.u32 %v13919_v19, %v11070_v20  ;;  %v11268_v19 = vld [vmem:[#allocation2 + $0x1278] sm:$0xf] }
 0x222   :  { %4845 = vmatpush.bf16.msrb.mxu3 %v11185_v23  ;;  %v11393_v23 = vor.u32 %v13999_v24, %v11390_v28  ;;  %v13974_v24 = vld [vmem:[#allocation2 + $0x129c] sm:$0xf0]  ;;  %v13889_v28 = vld [vmem:[#allocation2 + $0xffc] sm:$0xf] }
 0x223   :  { %4807 = vmatpush.bf16.msrb.mxu0 %v10821_v51  ;;  %v10988_v51 = vld [vmem:[#allocation2 + $0x1048] sm:$0xf]  ;;  %v3630_v61 = vpop.f32.mrf.mxu0  ;;  %v11269_v38 = vor.u32 %v13974_v24, %v11268_v19 }
 0x224   :  { %4820 = vmatpush.bf16.msrb.mxu1 %v11141_v53  ;;  %v13984_v53 = vld [vmem:[#allocation2 + $0x12ec] sm:$0xf0]  ;;  %v10828_v19 = vld [vmem:[#allocation2 + $0xf08] sm:$0xf] }
 0x225   :  { %4833 = vmatpush.bf16.msrb.mxu2 %v10825_v58  ;;  %v13899_v58 = vld [vmem:[#allocation2 + $0x104c] sm:$0xf]  ;;  %v11309_v32 = vor.u32 %v13984_v53, %v11308_v52  ;;  %v10909_v52 = vor.u32 %v13884_v35, %v10908_v26  ;;  %v13935_v26 = vld [vmem:[#allocation2 + $0x1164] sm:$0xf0]  ;;  %v11436_v35 = vld [vmem:[#allocation2 + $0x13c0] sm:$0xf] }
 0x226   :  { %4846 = vmatpush.bf16.msrb.mxu3 %v11145_v3  ;;  %4808 = vmatmul.bf16.vlgmr.msrb.gmra.mxu0 %v14808_v15  ;;  %v13979_v3 = vld [vmem:[#allocation2 + $0x12cc] sm:$0xf]  ;;  %v10993_v13 = vor.u32 %v13899_v58, %v10990_v59  ;;  %v10868_v59 = vld [vmem:[#allocation2 + $0xf58] sm:$0xf] }
 0x227   :  { %4852 = vmatpush.bf16.msra.mxu0 %v11109_v4  ;;  %4821 = vmatmul.bf16.vlgmr.msrb.gmra.mxu1 %v14810_v16  ;;  %v11310_v4 = vld [vmem:[#allocation2 + $0x12f0] sm:$0xf0] }
 0x228   :  { %4865 = vmatpush.bf16.msra.mxu1 %v11429_v5  ;;  %4834 = vmatmul.bf16.vlgmr.msrb.gmra.mxu2 %v14808_v15  ;;  %v3643_v5 = vpop.f32.mrf.mxu1  ;;  %v11313_v20 = vor.u32 %v13979_v3, %v11310_v4  ;;  %v11188_v3 = vld [vmem:[#allocation2 + $0x11d8] sm:$0xf] }
 0x229   :  { %4878 = vmatpush.bf16.msra.mxu2 %v11113_v6  ;;  %4847 = vmatmul.bf16.vlgmr.msrb.gmra.mxu3 %v14810_v16  ;;  %v10989_v6 = vor.u32 %v13904_v1, %v10988_v51  ;;  %v3644_v7 = vadd.f32 %v3643_v5, %v3630_v61  ;;  %v13874_v61 = vld [vmem:[#allocation2 + $0xf7c] sm:$0xf0] }
 0x22a   :  { %4891 = vmatpush.bf16.msra.mxu3 %v11433_v17  ;;  %v10948_v17 = vld [vmem:[#allocation2 + $0xff8] sm:$0xf] }
 0x22b   :  { %4853 = vmatpush.bf16.msra.mxu0 %v11069_v30  ;;  %v10950_v30 = vld [vmem:[#allocation2 + $0x1020] sm:$0xf0]  ;;  %v10949_v37 = vor.u32 %v13894_v18, %v10948_v17  ;;  %v3656_v46 = vpop.f32.mrf.mxu2  ;;  %v3632_v51 = vpop.f32.mrf.mxu0  ;;  %v10869_v18 = vor.u32 %v13874_v61, %v10868_v59  ;;  %v11396_v59 = vld [vmem:[#allocation2 + $0x1370] sm:$0xf] }
 0x22c   :  { %4866 = vmatpush.bf16.msra.mxu1 %v11389_v33  ;;  %v14949_v33 = vmax.f32 %v2600_v12, %v3644_v7  ;;  %v3669_v25 = vpop.f32.mrf.mxu3  ;;  %v11230_v12 = vld [vmem:[#allocation2 + $0x1250] sm:$0xf0]  ;;  %v13869_v7 = vld [vmem:[#allocation2 + $0xf5c] sm:$0xf]  ;;  %v11190_v17 = vld [vmem:[#allocation2 + $0x1200] sm:$0xf0] }
 0x22d   :  { %4879 = vmatpush.bf16.msra.mxu2 %v11073_v34  ;;  %v13969_v34 = vld [vmem:[#allocation2 + $0x127c] sm:$0xf]  ;;  %v3670_v1 = vadd.f32 %v3669_v25, %v3656_v46  ;;  %v11233_v5 = vor.u32 %v13959_v62, %v11230_v12  ;;  %v14015_v46 = vld [vmem:[#allocation2 + $0x13e4] sm:$0xf0]  ;;  %v14010_v62 = vld [vmem:[#allocation2 + $0x13c4] sm:$0xf] }
 0x22e   :  { %4892 = vmatpush.bf16.msra.mxu3 %v11393_v23  ;;  %v10953_v23 = vor.u32 %v13889_v28, %v10950_v30  ;;  %v11273_v44 = vor.u32 %v13969_v34, %v11270_v36  ;;  %v11148_v30 = vld [vmem:[#allocation2 + $0x1188] sm:$0xf]  ;;  %v13944_v34 = vld [vmem:[#allocation2 + $0x11ac] sm:$0xf0]  ;;  %v13859_v36 = vld [vmem:[#allocation2 + $0xf0c] sm:$0xf] }
 0x22f   :  { %4854 = vmatpush.bf16.msra.mxu0 %v11029_v47  ;;  %v13964_v47 = vld [vmem:[#allocation2 + $0x124c] sm:$0xf0]  ;;  %v14954_v4 = vmax.f32 %v2601_v48, %v3670_v1  ;;  %v13939_v48 = vld [vmem:[#allocation2 + $0x118c] sm:$0xf]  ;;  %v10833_v25 = vor.u32 %v13859_v36, %v10830_v39 }
 0x230   :  { %4867 = vmatpush.bf16.msra.mxu1 %v11349_v49  ;;  %v13879_v49 = vld [vmem:[#allocation2 + $0xfac] sm:$0xf]  ;;  %v11229_v53 = vor.u32 %v13964_v47, %v11228_v41  ;;  %v13930_v47 = vld [vmem:[#allocation2 + $0x1144] sm:$0xf] }
 0x231   :  { %4880 = vmatpush.bf16.msra.mxu2 %v11033_v50  ;;  %v10910_v50 = vld [vmem:[#allocation2 + $0xfd0] sm:$0xf0]  ;;  %v11438_v12 = vld [vmem:[#allocation2 + $0x13e8] sm:$0xf0] }
 0x232   :  { %4893 = vmatpush.bf16.msra.mxu3 %v11353_v63  ;;  %v3645_v63 = vpop.f32.mrf.mxu1  ;;  %v10913_v58 = vor.u32 %v13879_v49, %v10910_v50  ;;  %v11118_v49 = vld [vmem:[#allocation2 + $0x1168] sm:$0xf0]  ;;  %v11149_v50 = vor.u32 %v13944_v34, %v11148_v30  ;;  %v11441_v61 = vor.u32 %v14010_v62, %v11438_v12  ;;  %v13995_v30 = vld [vmem:[#allocation2 + $0x1344] sm:$0xf0]  ;;  %v13910_v34 = vld [vmem:[#allocation2 + $0x10a4] sm:$0xf] }
 0x233   :  { %4855 = vmatpush.bf16.msra.mxu0 %v10989_v6  ;;  %v13954_v6 = vld [vmem:[#allocation2 + $0x11fc] sm:$0xf0]  ;;  %v11121_v63 = vor.u32 %v13930_v47, %v11118_v49  ;;  %v11038_v36 = vld [vmem:[#allocation2 + $0x10c8] sm:$0xf0]  ;;  %v10998_v47 = vld [vmem:[#allocation2 + $0x1078] sm:$0xf0] }
 0x234   :  { %4868 = vmatpush.bf16.msra.mxu1 %v11309_v32  ;;  %v10870_v32 = vld [vmem:[#allocation2 + $0xf80] sm:$0xf0]  ;;  %v11189_v24 = vor.u32 %v13954_v6, %v11188_v3  ;;  %v3671_v41 = vpop.f32.mrf.mxu3  ;;  %v14005_v3 = vld [vmem:[#allocation2 + $0x1394] sm:$0xf0]  ;;  %v11078_v6 = vld [vmem:[#allocation2 + $0x1118] sm:$0xf0] }
 0x235   :  { %4881 = vmatpush.bf16.msra.mxu2 %v10993_v13  ;;  %v13949_v13 = vld [vmem:[#allocation2 + $0x11dc] sm:$0xf]  ;;  %v10873_v28 = vor.u32 %v13869_v7, %v10870_v32  ;;  %v14000_v7 = vld [vmem:[#allocation2 + $0x1374] sm:$0xf]  ;;  %v11358_v39 = vld [vmem:[#allocation2 + $0x1348] sm:$0xf0] }
 0x236   :  { %4894 = vmatpush.bf16.msra.mxu3 %v11313_v20  ;;  %v13864_v20 = vld [vmem:[#allocation2 + $0xf2c] sm:$0xf0]  ;;  %v11193_v42 = vor.u32 %v13949_v13, %v11190_v17  ;;  %v11398_v32 = vld [vmem:[#allocation2 + $0x1398] sm:$0xf0]  ;;  %v11397_v17 = vor.u32 %v14005_v3, %v11396_v59  ;;  %v13890_v3 = vld [vmem:[#allocation2 + $0x1004] sm:$0xf] }
 0x237   :  { %4856 = vmatpush.bf16.msra.mxu0 %v10949_v37  ;;  %v11150_v37 = vld [vmem:[#allocation2 + $0x11b0] sm:$0xf0] }
 0x238   :  { %4869 = vmatpush.bf16.msra.mxu1 %v11269_v38  ;;  %v3658_v38 = vpop.f32.mrf.mxu2  ;;  %v11153_v51 = vor.u32 %v13939_v48, %v11150_v37 }
 0x239   :  { %4882 = vmatpush.bf16.msra.mxu2 %v10953_v23  ;;  %v11116_v23 = vld [vmem:[#allocation2 + $0x1140] sm:$0xf]  ;;  %v11041_v38 = vor.u32 %v13910_v34, %v11038_v36  ;;  %v13965_v34 = vld [vmem:[#allocation2 + $0x1254] sm:$0xf0]  ;;  %v13880_v36 = vld [vmem:[#allocation2 + $0xfb4] sm:$0xf] }
 0x23a   :  { %4895 = vmatpush.bf16.msra.mxu3 %v11273_v44  ;;  %v10829_v44 = vor.u32 %v13864_v20, %v10828_v19  ;;  %v11117_v1 = vor.u32 %v13935_v26, %v11116_v23  ;;  %v11036_v19 = vld [vmem:[#allocation2 + $0x10a0] sm:$0xf]  ;;  %v13915_v20 = vld [vmem:[#allocation2 + $0x10c4] sm:$0xf0]  ;;  %v10996_v23 = vld [vmem:[#allocation2 + $0x1050] sm:$0xf] }
 0x23b   :  { %4857 = vmatpush.bf16.msra.mxu0 %v10909_v52  ;;  %v11437_v52 = vor.u32 %v14015_v46, %v11436_v35  ;;  %v11037_v48 = vor.u32 %v13915_v20, %v11036_v19  ;;  %v13905_v26 = vld [vmem:[#allocation2 + $0x1074] sm:$0xf0]  ;;  %v11316_v35 = vld [vmem:[#allocation2 + $0x12d0] sm:$0xf]  ;;  %v13900_v46 = vld [vmem:[#allocation2 + $0x1054] sm:$0xf] }
 0x23c   :  { %4870 = vmatpush.bf16.msra.mxu1 %v11229_v53  ;;  %v11076_v53 = vld [vmem:[#allocation2 + $0x10f0] sm:$0xf]  ;;  %v10997_v12 = vor.u32 %v13905_v26, %v10996_v23  ;;  %v13885_v20 = vld [vmem:[#allocation2 + $0xfd4] sm:$0xf0] }
 0x23d   :  { %4883 = vmatpush.bf16.msra.mxu2 %v10913_v58  ;;  %v13925_v58 = vld [vmem:[#allocation2 + $0x1114] sm:$0xf0]  ;;  %v10916_v19 = vld [vmem:[#allocation2 + $0xfb0] sm:$0xf] }
 0x23e   :  { %4896 = vmatpush.bf16.msra.mxu3 %v11233_v5  ;;  %v13920_v5 = vld [vmem:[#allocation2 + $0x10f4] sm:$0xf]  ;;  %v11077_v13 = vor.u32 %v13925_v58, %v11076_v53  ;;  %v13895_v53 = vld [vmem:[#allocation2 + $0x1024] sm:$0xf0]  ;;  %v11276_v58 = vld [vmem:[#allocation2 + $0x1280] sm:$0xf] }
 0x23f   :  { %4858 = vmatpush.bf16.msra.mxu0 %v10869_v18  ;;  %v11081_v18 = vor.u32 %v13920_v5, %v11078_v6  ;;  %v10958_v5 = vld [vmem:[#allocation2 + $0x1028] sm:$0xf0] }
 0x240   :  { %4871 = vmatpush.bf16.msra.mxu1 %v11189_v24  ;;  %v11356_v24 = vld [vmem:[#allocation2 + $0x1320] sm:$0xf] }
 0x241   :  { %4884 = vmatpush.bf16.msra.mxu2 %v10873_v28  ;;  %v11401_v28 = vor.u32 %v14000_v7, %v11398_v32  ;;  %v11357_v37 = vor.u32 %v13995_v30, %v11356_v24  ;;  %v13970_v7 = vld [vmem:[#allocation2 + $0x1284] sm:$0xf]  ;;  %v11278_v32 = vld [vmem:[#allocation2 + $0x12a8] sm:$0xf0]  ;;  %v11236_v24 = vld [vmem:[#allocation2 + $0x1230] sm:$0xf] }
 0x242   :  { %4897 = vmatpush.bf16.msra.mxu3 %v11193_v42  ;;  %v13990_v42 = vld [vmem:[#allocation2 + $0x1324] sm:$0xf]  ;;  %v11237_v23 = vor.u32 %v13965_v34, %v11236_v24  ;;  %v11126_v24 = vld [vmem:[#allocation2 + $0x1170] sm:$0xf0]  ;;  %v14011_v34 = vld [vmem:[#allocation2 + $0x13cc] sm:$0xf] }
 0x243   :  { %4859 = vmatpush.bf16.msra.mxu0 %v10829_v44  ;;  %v11361_v41 = vor.u32 %v13990_v42, %v11358_v39  ;;  %v13985_v44 = vld [vmem:[#allocation2 + $0x12f4] sm:$0xf0]  ;;  %v3682_v49 = vpop.f32.mrf.mxu0  ;;  %v10918_v42 = vld [vmem:[#allocation2 + $0xfd8] sm:$0xf0] }
 0x244   :  { %4872 = vmatpush.bf16.msra.mxu1 %v11149_v50  ;;  %v13980_v50 = vld [vmem:[#allocation2 + $0x12d4] sm:$0xf]  ;;  %v3695_v62 = vpop.f32.mrf.mxu1  ;;  %v10921_v26 = vor.u32 %v13880_v36, %v10918_v42 }
 0x245   :  { %4885 = vmatpush.bf16.msra.mxu2 %v10833_v25  ;;  %v11318_v25 = vld [vmem:[#allocation2 + $0x12f8] sm:$0xf0]  ;;  %v11446_v36 = vld [vmem:[#allocation2 + $0x13f0] sm:$0xf0] }
 0x246   :  { %4898 = vmatpush.bf16.msra.mxu3 %v11153_v51  ;;  %4860 = vmatmul.bf16.vlgmr.msra.gmra.mxu0 %v14808_v15  ;;  %v3696_v51 = vadd.f32 %v3695_v62, %v3682_v49  ;;  %v11321_v59 = vor.u32 %v13980_v50, %v11318_v25  ;;  %v13955_v49 = vld [vmem:[#allocation2 + $0x1204] sm:$0xf0]  ;;  %v13870_v50 = vld [vmem:[#allocation2 + $0xf64] sm:$0xf]  ;;  %v10878_v25 = vld [vmem:[#allocation2 + $0xf88] sm:$0xf0] }
 0x247   :  { %4904 = vmatpush.bf16.msrb.mxu0 %v11117_v1  ;;  %4873 = vmatmul.bf16.vlgmr.msra.gmra.mxu1 %v14810_v16  ;;  %v11317_v1 = vor.u32 %v13985_v44, %v11316_v35  ;;  %v10876_v35 = vld [vmem:[#allocation2 + $0xf60] sm:$0xf]  ;;  %v13950_v62 = vld [vmem:[#allocation2 + $0x11e4] sm:$0xf] }
 0x248   :  { %4917 = vmatpush.bf16.msrb.mxu1 %v11437_v52  ;;  %4886 = vmatmul.bf16.vlgmr.msra.gmra.mxu2 %v14808_v15  ;;  %v11001_v52 = vor.u32 %v13900_v46, %v10998_v47  ;;  %v14963_v6 = vmax.f32 %v2602_v40, %v3696_v51  ;;  %v11238_v40 = vld [vmem:[#allocation2 + $0x1258] sm:$0xf0]  ;;  %v11196_v44 = vld [vmem:[#allocation2 + $0x11e0] sm:$0xf] }
 0x249   :  { %4930 = vmatpush.bf16.msrb.mxu2 %v11121_v63  ;;  %4899 = vmatmul.bf16.vlgmr.msra.gmra.mxu3 %v14810_v16  ;;  %v10956_v63 = vld [vmem:[#allocation2 + $0x1000] sm:$0xf]  ;;  %v11241_v47 = vor.u32 %v13960_v27, %v11238_v40 }
 0x24a   :  { %4943 = vmatpush.bf16.msrb.mxu3 %v11441_v61  ;;  %v13975_v61 = vld [vmem:[#allocation2 + $0x12a4] sm:$0xf0] }
 0x24b   :  { %4905 = vmatpush.bf16.msrb.mxu0 %v11077_v13  ;;  %v10957_v13 = vor.u32 %v13895_v53, %v10956_v63  ;;  %v3708_v30 = vpop.f32.mrf.mxu2  ;;  %v3684_v39 = vpop.f32.mrf.mxu0  ;;  %v11197_v63 = vor.u32 %v13955_v49, %v11196_v44  ;;  %v10881_v53 = vor.u32 %v13870_v50, %v10878_v25  ;;  %v11406_v44 = vld [vmem:[#allocation2 + $0x13a0] sm:$0xf0]  ;;  %v11044_v25 = vld [vmem:[#allocation2 + $0x10a8] sm:$0xf] }
 0x24c   :  { %4918 = vmatpush.bf16.msrb.mxu1 %v11397_v17  ;;  %v11277_v17 = vor.u32 %v13975_v61, %v11276_v58  ;;  %v3721_v10 = vpop.f32.mrf.mxu3  ;;  %v11156_v58 = vld [vmem:[#allocation2 + $0x1190] sm:$0xf]  ;;  %v13860_v61 = vld [vmem:[#allocation2 + $0xf14] sm:$0xf]  ;;  %v11084_v39 = vld [vmem:[#allocation2 + $0x10f8] sm:$0xf] }
 0x24d   :  { %4931 = vmatpush.bf16.msrb.mxu2 %v11081_v18  ;;  %v10961_v18 = vor.u32 %v13890_v3, %v10958_v5  ;;  %v11158_v3 = vld [vmem:[#allocation2 + $0x11b8] sm:$0xf0] }
 0x24e   :  { %4944 = vmatpush.bf16.msrb.mxu3 %v11401_v28  ;;  %v11281_v28 = vor.u32 %v13970_v7, %v11278_v32  ;;  %v11124_v7 = vld [vmem:[#allocation2 + $0x1148] sm:$0xf]  ;;  %v13936_v32 = vld [vmem:[#allocation2 + $0x116c] sm:$0xf0] }
 0x24f   :  { %4906 = vmatpush.bf16.msrb.mxu0 %v11037_v48  ;;  %v3722_v48 = vadd.f32 %v3721_v10, %v3708_v30  ;;  %v10841_v30 = vor.u32 %v13860_v61, %v10838_v0  ;;  %v11125_v10 = vor.u32 %v13936_v32, %v11124_v7  ;;  %v11004_v0 = vld [vmem:[#allocation2 + $0x1058] sm:$0xf]  ;;  %v13986_v7 = vld [vmem:[#allocation2 + $0x12fc] sm:$0xf0]  ;;  %v13901_v32 = vld [vmem:[#allocation2 + $0x105c] sm:$0xf] }
 0x250   :  { %4919 = vmatpush.bf16.msrb.mxu1 %v11357_v37  ;;  %v10917_v37 = vor.u32 %v13885_v20, %v10916_v19  ;;  %v14016_v19 = vld [vmem:[#allocation2 + $0x13ec] sm:$0xf0]  ;;  %v13931_v20 = vld [vmem:[#allocation2 + $0x114c] sm:$0xf] }
 0x251   :  { %4932 = vmatpush.bf16.msrb.mxu2 %v11041_v38  ;;  %v3697_v38 = vpop.f32.mrf.mxu1  ;;  %v14968_v46 = vmax.f32 %v2603_v11, %v3722_v48  ;;  %v13940_v11 = vld [vmem:[#allocation2 + $0x1194] sm:$0xf]  ;;  %v11129_v40 = vor.u32 %v13931_v20, %v11126_v24  ;;  %v13926_v48 = vld [vmem:[#allocation2 + $0x111c] sm:$0xf0] }
 0x252   :  { %4945 = vmatpush.bf16.msrb.mxu3 %v11361_v41  ;;  %v13875_v41 = vld [vmem:[#allocation2 + $0xf84] sm:$0xf0]  ;;  %v11161_v42 = vor.u32 %v13940_v11, %v11158_v3  ;;  %v11449_v38 = vor.u32 %v14011_v34, %v11446_v36  ;;  %v13906_v11 = vld [vmem:[#allocation2 + $0x107c] sm:$0xf0]  ;;  %v11324_v3 = vld [vmem:[#allocation2 + $0x12d8] sm:$0xf] }
 0x253   :  { %4907 = vmatpush.bf16.msrb.mxu0 %v10997_v12  ;;  %v11198_v12 = vld [vmem:[#allocation2 + $0x1208] sm:$0xf0]  ;;  %v10877_v51 = vor.u32 %v13875_v41, %v10876_v35  ;;  %v3710_v5 = vpop.f32.mrf.mxu2  ;;  %v11086_v35 = vld [vmem:[#allocation2 + $0x1120] sm:$0xf0]  ;;  %v14001_v41 = vld [vmem:[#allocation2 + $0x137c] sm:$0xf]  ;;  %v11005_v24 = vor.u32 %v13906_v11, %v11004_v0 }
 0x254   :  { %4920 = vmatpush.bf16.msrb.mxu1 %v11317_v1  ;;  %v10836_v1 = vld [vmem:[#allocation2 + $0xf10] sm:$0xf]  ;;  %v11201_v31 = vor.u32 %v13950_v62, %v11198_v12  ;;  %v11364_v12 = vld [vmem:[#allocation2 + $0x1328] sm:$0xf] }
 0x255   :  { %4933 = vmatpush.bf16.msrb.mxu2 %v11001_v52  ;;  %v13865_v52 = vld [vmem:[#allocation2 + $0xf34] sm:$0xf0]  ;;  %v13916_v62 = vld [vmem:[#allocation2 + $0x10cc] sm:$0xf0]  ;;  %v10964_v36 = vld [vmem:[#allocation2 + $0x1008] sm:$0xf] }
 0x256   :  { %4946 = vmatpush.bf16.msrb.mxu3 %v11321_v59  ;;  %v13945_v59 = vld [vmem:[#allocation2 + $0x11b4] sm:$0xf0]  ;;  %v11204_v0 = vld [vmem:[#allocation2 + $0x11e8] sm:$0xf] }
 0x257   :  { %4908 = vmatpush.bf16.msrb.mxu0 %v10957_v13  ;;  %v11444_v13 = vld [vmem:[#allocation2 + $0x13c8] sm:$0xf] }
 0x258   :  { %4921 = vmatpush.bf16.msrb.mxu1 %v11277_v17  ;;  %v3723_v17 = vpop.f32.mrf.mxu3  ;;  %v11445_v27 = vor.u32 %v14016_v19, %v11444_v13  ;;  %v11006_v13 = vld [vmem:[#allocation2 + $0x1080] sm:$0xf0] }
 0x259   :  { %4934 = vmatpush.bf16.msrb.mxu2 %v10961_v18  ;;  %v10837_v18 = vor.u32 %v13865_v52, %v10836_v1  ;;  %v13996_v1 = vld [vmem:[#allocation2 + $0x134c] sm:$0xf0]  ;;  %v13911_v52 = vld [vmem:[#allocation2 + $0x10ac] sm:$0xf]  ;;  %v11326_v19 = vld [vmem:[#allocation2 + $0x1300] sm:$0xf0]  ;;  %v11009_v34 = vor.u32 %v13901_v32, %v11006_v13 }
 0x25a   :  { %4947 = vmatpush.bf16.msrb.mxu3 %v11281_v28  ;;  %v11157_v28 = vor.u32 %v13945_v59, %v11156_v58  ;;  %v11366_v58 = vld [vmem:[#allocation2 + $0x1350] sm:$0xf0]  ;;  %v11045_v59 = vor.u32 %v13916_v62, %v11044_v25  ;;  %v11365_v61 = vor.u32 %v13996_v1, %v11364_v12  ;;  %v13966_v62 = vld [vmem:[#allocation2 + $0x125c] sm:$0xf0]  ;;  %v13881_v12 = vld [vmem:[#allocation2 + $0xfbc] sm:$0xf] }
 0x25b   :  { %4909 = vmatpush.bf16.msrb.mxu0 %v10917_v37  ;;  %v11404_v37 = vld [vmem:[#allocation2 + $0x1378] sm:$0xf]  ;;  %v10886_v32 = vld [vmem:[#allocation2 + $0xf90] sm:$0xf0]  ;;  %v13951_v13 = vld [vmem:[#allocation2 + $0x11ec] sm:$0xf] }
 0x25c   :  { %4922 = vmatpush.bf16.msrb.mxu1 %v11237_v23  ;;  %v14006_v23 = vld [vmem:[#allocation2 + $0x139c] sm:$0xf0] }
 0x25d   :  { %4935 = vmatpush.bf16.msrb.mxu2 %v10921_v26  ;;  %v13921_v26 = vld [vmem:[#allocation2 + $0x10fc] sm:$0xf]  ;;  %v11405_v49 = vor.u32 %v14006_v23, %v11404_v37  ;;  %v11286_v23 = vld [vmem:[#allocation2 + $0x12b0] sm:$0xf0] }
 0x25e   :  { %4948 = vmatpush.bf16.msrb.mxu3 %v11241_v47  ;;  %v11085_v47 = vor.u32 %v13926_v48, %v11084_v39  ;;  %v11089_v50 = vor.u32 %v13921_v26, %v11086_v35  ;;  %v13891_v39 = vld [vmem:[#allocation2 + $0x100c] sm:$0xf]  ;;  %v10966_v48 = vld [vmem:[#allocation2 + $0x1030] sm:$0xf0] }
 0x25f   :  { %4910 = vmatpush.bf16.msrb.mxu0 %v10877_v51  ;;  %v11409_v51 = vor.u32 %v14001_v41, %v11406_v44  ;;  %v10969_v41 = vor.u32 %v13891_v39, %v10966_v48  ;;  %v10924_v44 = vld [vmem:[#allocation2 + $0xfb8] sm:$0xf]  ;;  %v11452_v39 = vld [vmem:[#allocation2 + $0x13d0] sm:$0xf] }
 0x260   :  { %4923 = vmatpush.bf16.msrb.mxu1 %v11197_v63  ;;  %v11046_v63 = vld [vmem:[#allocation2 + $0x10d0] sm:$0xf0] }
 0x261   :  { %4936 = vmatpush.bf16.msrb.mxu2 %v10881_v53  ;;  %v13991_v53 = vld [vmem:[#allocation2 + $0x132c] sm:$0xf] }
 0x262   :  { %4949 = vmatpush.bf16.msrb.mxu3 %v11201_v31  ;;  %v11049_v31 = vor.u32 %v13911_v52, %v11046_v63  ;;  %v11369_v5 = vor.u32 %v13991_v53, %v11366_v58 }
 0x263   :  { %4911 = vmatpush.bf16.msrb.mxu0 %v10837_v18  ;;  %v3734_v17 = vpop.f32.mrf.mxu0  ;;  %v13981_v18 = vld [vmem:[#allocation2 + $0x12dc] sm:$0xf] }
 0x264   :  { %4924 = vmatpush.bf16.msrb.mxu1 %v11157_v28  ;;  %v3747_v20 = vpop.f32.mrf.mxu1 }
 0x265   :  { %4937 = vmatpush.bf16.msrb.mxu2 %v10841_v30  ;;  %v3748_v28 = vadd.f32 %v3747_v20, %v3734_v17  ;;  %v11325_v30 = vor.u32 %v13986_v7, %v11324_v3  ;;  %v13871_v7 = vld [vmem:[#allocation2 + $0xf6c] sm:$0xf]  ;;  %v11206_v17 = vld [vmem:[#allocation2 + $0x1210] sm:$0xf0]  ;;  %v13866_v20 = vld [vmem:[#allocation2 + $0xf3c] sm:$0xf0] }
 0x266   :  { %4950 = vmatpush.bf16.msrb.mxu3 %v11161_v42  ;;  %4912 = vmatmul.bf16.vlgmr.msrb.gmra.mxu0 %v14808_v15  ;;  %v13896_v42 = vld [vmem:[#allocation2 + $0x102c] sm:$0xf0]  ;;  %v11209_v22 = vor.u32 %v13951_v13, %v11206_v17  ;;  %v13912_v13 = vld [vmem:[#allocation2 + $0x10b4] sm:$0xf]  ;;  %v11054_v17 = vld [vmem:[#allocation2 + $0x10d8] sm:$0xf0] }
 0x267   :  { %4956 = vmatpush.bf16.msra.mxu0 %v11125_v10  ;;  %4925 = vmatmul.bf16.vlgmr.msrb.gmra.mxu1 %v14810_v16  ;;  %v11284_v10 = vld [vmem:[#allocation2 + $0x1288] sm:$0xf]  ;;  %v14977_v37 = vmax.f32 %v2604_v14, %v3748_v28  ;;  %v10965_v26 = vor.u32 %v13896_v42, %v10964_v36  ;;  %v11246_v14 = vld [vmem:[#allocation2 + $0x1260] sm:$0xf0]  ;;  %v10889_v28 = vor.u32 %v13871_v7, %v10886_v32  ;;  %v13861_v36 = vld [vmem:[#allocation2 + $0xf1c] sm:$0xf] }
 0x268   :  { %4969 = vmatpush.bf16.msra.mxu1 %v11445_v27  ;;  %4938 = vmatmul.bf16.vlgmr.msrb.gmra.mxu2 %v14808_v15  ;;  %v11329_v27 = vor.u32 %v13981_v18, %v11326_v19  ;;  %v11249_v3 = vor.u32 %v13961_v60, %v11246_v14  ;;  %v10844_v19 = vld [vmem:[#allocation2 + $0xf18] sm:$0xf]  ;;  %v11166_v42 = vld [vmem:[#allocation2 + $0x11c0] sm:$0xf0]  ;;  %v11412_v60 = vld [vmem:[#allocation2 + $0x1380] sm:$0xf] }
 0x269   :  { %4982 = vmatpush.bf16.msra.mxu2 %v11129_v40  ;;  %4951 = vmatmul.bf16.vlgmr.msrb.gmra.mxu3 %v14810_v16  ;;  %v13976_v40 = vld [vmem:[#allocation2 + $0x12ac] sm:$0xf0]  ;;  %v13997_v32 = vld [vmem:[#allocation2 + $0x1354] sm:$0xf0] }
 0x26a   :  { %4995 = vmatpush.bf16.msra.mxu3 %v11449_v38  ;;  %v13971_v38 = vld [vmem:[#allocation2 + $0x128c] sm:$0xf]  ;;  %v11285_v35 = vor.u32 %v13976_v40, %v11284_v10  ;;  %v13937_v40 = vld [vmem:[#allocation2 + $0x1174] sm:$0xf0] }
 0x26b   :  { %4957 = vmatpush.bf16.msra.mxu0 %v11085_v47  ;;  %v13886_v47 = vld [vmem:[#allocation2 + $0xfdc] sm:$0xf0]  ;;  %v3760_v25 = vpop.f32.mrf.mxu2  ;;  %v3736_v1 = vpop.f32.mrf.mxu0 }
 0x26c   :  { %4970 = vmatpush.bf16.msra.mxu1 %v11405_v49  ;;  %v11244_v49 = vld [vmem:[#allocation2 + $0x1238] sm:$0xf]  ;;  %v3773_v2 = vpop.f32.mrf.mxu3  ;;  %v10925_v63 = vor.u32 %v13886_v47, %v10924_v44  ;;  %v3749_v53 = vpop.f32.mrf.mxu1  ;;  %v10849_v44 = vor.u32 %v13861_v36, %v10846_v45  ;;  %v14012_v47 = vld [vmem:[#allocation2 + $0x13d4] sm:$0xf]  ;;  %v14007_v1 = vld [vmem:[#allocation2 + $0x13a4] sm:$0xf0] }
 0x26d   :  { %4983 = vmatpush.bf16.msra.mxu2 %v11089_v50  ;;  %v11289_v50 = vor.u32 %v13971_v38, %v11286_v23  ;;  %v3774_v52 = vadd.f32 %v3773_v2, %v3760_v25  ;;  %v11245_v58 = vor.u32 %v13966_v62, %v11244_v49  ;;  %v10845_v38 = vor.u32 %v13866_v20, %v10844_v19  ;;  %v14017_v23 = vld [vmem:[#allocation2 + $0x13f4] sm:$0xf0]  ;;  %v11454_v49 = vld [vmem:[#allocation2 + $0x13f8] sm:$0xf0]  ;;  %v13927_v2 = vld [vmem:[#allocation2 + $0x1124] sm:$0xf0] }
 0x26e   :  { %4996 = vmatpush.bf16.msra.mxu3 %v11409_v51  ;;  %v10926_v51 = vld [vmem:[#allocation2 + $0xfe0] sm:$0xf0]  ;;  %v11453_v62 = vor.u32 %v14017_v23, %v11452_v39  ;;  %v11457_v14 = vor.u32 %v14012_v47, %v11454_v49  ;;  %v11374_v19 = vld [vmem:[#allocation2 + $0x1358] sm:$0xf0]  ;;  %v11332_v36 = vld [vmem:[#allocation2 + $0x12e0] sm:$0xf] }
 0x26f   :  { %4958 = vmatpush.bf16.msra.mxu0 %v11045_v59  ;;  %v10929_v59 = vor.u32 %v13881_v12, %v10926_v51  ;;  %v14982_v11 = vmax.f32 %v2605_v55, %v3774_v52  ;;  %v13941_v55 = vld [vmem:[#allocation2 + $0x119c] sm:$0xf]  ;;  %v11092_v51 = vld [vmem:[#allocation2 + $0x1100] sm:$0xf]  ;;  %v13922_v52 = vld [vmem:[#allocation2 + $0x1104] sm:$0xf] }
 0x270   :  { %4971 = vmatpush.bf16.msra.mxu1 %v11365_v61  ;;  %v10884_v61 = vld [vmem:[#allocation2 + $0xf68] sm:$0xf]  ;;  %v14002_v53 = vld [vmem:[#allocation2 + $0x1384] sm:$0xf]  ;;  %v13977_v49 = vld [vmem:[#allocation2 + $0x12b4] sm:$0xf0] }
 0x271   :  { %4984 = vmatpush.bf16.msra.mxu2 %v11049_v31  ;;  %v13876_v31 = vld [vmem:[#allocation2 + $0xf8c] sm:$0xf0]  ;;  %v13987_v45 = vld [vmem:[#allocation2 + $0x1304] sm:$0xf0] }
 0x272   :  { %4997 = vmatpush.bf16.msra.mxu3 %v11369_v5  ;;  %v13956_v5 = vld [vmem:[#allocation2 + $0x120c] sm:$0xf0]  ;;  %v10885_v18 = vor.u32 %v13876_v31, %v10884_v61  ;;  %v11413_v61 = vor.u32 %v14007_v1, %v11412_v60  ;;  %v11333_v23 = vor.u32 %v13987_v45, %v11332_v36  ;;  %v10932_v1 = vld [vmem:[#allocation2 + $0xfc0] sm:$0xf]  ;;  %v13952_v36 = vld [vmem:[#allocation2 + $0x11f4] sm:$0xf] }
 0x273   :  { %4959 = vmatpush.bf16.msra.mxu0 %v11005_v24  ;;  %v11205_v24 = vor.u32 %v13956_v5, %v11204_v0  ;;  %v3762_v10 = vpop.f32.mrf.mxu2  ;;  %v11052_v0 = vld [vmem:[#allocation2 + $0x10b0] sm:$0xf] }
 0x274   :  { %4972 = vmatpush.bf16.msra.mxu1 %v11325_v30  ;;  %v11164_v30 = vld [vmem:[#allocation2 + $0x1198] sm:$0xf]  ;;  %v3775_v48 = vpop.f32.mrf.mxu3  ;;  %v11372_v5 = vld [vmem:[#allocation2 + $0x1330] sm:$0xf] }
 0x275   :  { %4985 = vmatpush.bf16.msra.mxu2 %v11009_v34  ;;  %v13946_v34 = vld [vmem:[#allocation2 + $0x11bc] sm:$0xf0] }
 0x276   :  { %4998 = vmatpush.bf16.msra.mxu3 %v11329_v27  ;;  %v11132_v27 = vld [vmem:[#allocation2 + $0x1150] sm:$0xf] }
 0x277   :  { %4960 = vmatpush.bf16.msra.mxu0 %v10965_v26  ;;  %v13932_v26 = vld [vmem:[#allocation2 + $0x1154] sm:$0xf]  ;;  %v11133_v25 = vor.u32 %v13937_v40, %v11132_v27  ;;  %v13982_v27 = vld [vmem:[#allocation2 + $0x12e4] sm:$0xf]  ;;  %v11334_v40 = vld [vmem:[#allocation2 + $0x1308] sm:$0xf0] }
 0x278   :  { %4973 = vmatpush.bf16.msra.mxu1 %v11285_v35  ;;  %v11134_v35 = vld [vmem:[#allocation2 + $0x1178] sm:$0xf0]  ;;  %v11337_v47 = vor.u32 %v13982_v27, %v11334_v40  ;;  %v13867_v27 = vld [vmem:[#allocation2 + $0xf44] sm:$0xf0]  ;;  %v11172_v40 = vld [vmem:[#allocation2 + $0x11a0] sm:$0xf] }
 0x279   :  { %4986 = vmatpush.bf16.msra.mxu2 %v10969_v41  ;;  %v11165_v41 = vor.u32 %v13946_v34, %v11164_v30  ;;  %v11137_v12 = vor.u32 %v13932_v26, %v11134_v35  ;;  %v11012_v30 = vld [vmem:[#allocation2 + $0x1060] sm:$0xf]  ;;  %v13907_v34 = vld [vmem:[#allocation2 + $0x1084] sm:$0xf0]  ;;  %v10972_v35 = vld [vmem:[#allocation2 + $0x1010] sm:$0xf] }
 0x27a   :  { %4999 = vmatpush.bf16.msra.mxu3 %v11289_v50  ;;  %v11169_v50 = vor.u32 %v13941_v55, %v11166_v42  ;;  %v13902_v55 = vld [vmem:[#allocation2 + $0x1064] sm:$0xf]  ;;  %v11014_v42 = vld [vmem:[#allocation2 + $0x1088] sm:$0xf0]  ;;  %v11013_v48 = vor.u32 %v13907_v34, %v11012_v30  ;;  %v13872_v30 = vld [vmem:[#allocation2 + $0xf74] sm:$0xf] }
 0x27b   :  { %4961 = vmatpush.bf16.msra.mxu0 %v10925_v63  ;;  %v11094_v63 = vld [vmem:[#allocation2 + $0x1128] sm:$0xf0]  ;;  %v11017_v26 = vor.u32 %v13902_v55, %v11014_v42  ;;  %v10894_v34 = vld [vmem:[#allocation2 + $0xf98] sm:$0xf0]  ;;  %v10852_v55 = vld [vmem:[#allocation2 + $0xf20] sm:$0xf] }
 0x27c   :  { %4974 = vmatpush.bf16.msra.mxu1 %v11245_v58  ;;  %v11414_v58 = vld [vmem:[#allocation2 + $0x13a8] sm:$0xf0]  ;;  %v11097_v31 = vor.u32 %v13922_v52, %v11094_v63  ;;  %v13887_v52 = vld [vmem:[#allocation2 + $0xfe4] sm:$0xf0]  ;;  %v11252_v63 = vld [vmem:[#allocation2 + $0x1240] sm:$0xf] }
 0x27d   :  { %4987 = vmatpush.bf16.msra.mxu2 %v10929_v59  ;;  %v11093_v59 = vor.u32 %v13927_v2, %v11092_v51  ;;  %v11417_v7 = vor.u32 %v14002_v53, %v11414_v58  ;;  %v11294_v51 = vld [vmem:[#allocation2 + $0x12b8] sm:$0xf0] }
 0x27e   :  { %5000 = vmatpush.bf16.msra.mxu3 %v11249_v3  ;;  %v13917_v3 = vld [vmem:[#allocation2 + $0x10d4] sm:$0xf0] }
 0x27f   :  { %4962 = vmatpush.bf16.msra.mxu0 %v10885_v18  ;;  %v13992_v18 = vld [vmem:[#allocation2 + $0x1334] sm:$0xf]  ;;  %v11053_v20 = vor.u32 %v13917_v3, %v11052_v0 }
 0x280   :  { %4975 = vmatpush.bf16.msra.mxu1 %v11205_v24  ;;  %v11373_v24 = vor.u32 %v13997_v32, %v11372_v5  ;;  %v10933_v5 = vor.u32 %v13887_v52, %v10932_v1  ;;  %v14044_v52 = vld [vmem:[#allocation6 + $0xcc] sm:$0xf0] }
 0x281   :  { %4988 = vmatpush.bf16.msra.mxu2 %v10889_v28  ;;  %v11057_v28 = vor.u32 %v13912_v13, %v11054_v17  ;;  %v10892_v17 = vld [vmem:[#allocation2 + $0xf70] sm:$0xf] }
 0x282   :  { %5001 = vmatpush.bf16.msra.mxu3 %v11209_v22  ;;  %v11377_v22 = vor.u32 %v13992_v18, %v11374_v19  ;;  %v13877_v18 = vld [vmem:[#allocation2 + $0xf94] sm:$0xf0]  ;;  %v11212_v19 = vld [vmem:[#allocation2 + $0x11f0] sm:$0xf] }
 0x283   :  { %4963 = vmatpush.bf16.msra.mxu0 %v10845_v38  ;;  %v3786_v10 = vpop.f32.mrf.mxu0  ;;  %v10893_v45 = vor.u32 %v13877_v18, %v10892_v17  ;;  %v14072_v17 = vld [vmem:[#allocation6 + $0x1ac] sm:$0xf0] }
 0x284   :  { %4976 = vmatpush.bf16.msra.mxu1 %v11165_v41  ;;  %v3799_v39 = vpop.f32.mrf.mxu1  ;;  %v13897_v41 = vld [vmem:[#allocation2 + $0x1034] sm:$0xf0] }
 0x285   :  { %4989 = vmatpush.bf16.msra.mxu2 %v10849_v44  ;;  %v3800_v38 = vadd.f32 %v3799_v39, %v3786_v10  ;;  %v11292_v44 = vld [vmem:[#allocation2 + $0x1290] sm:$0xf]  ;;  %v10973_v2 = vor.u32 %v13897_v41, %v10972_v35  ;;  %v10897_v10 = vor.u32 %v13872_v30, %v10894_v34  ;;  %v13947_v39 = vld [vmem:[#allocation2 + $0x11c4] sm:$0xf0]  ;;  %v14048_v35 = vld [vmem:[#allocation6 + $0xec] sm:$0xf0] }
 0x286   :  { %5002 = vmatpush.bf16.msra.mxu3 %v11169_v50  ;;  %4964 = vmatmul.bf16.vlgmr.msra.gmra.mxu0 %v14808_v15  ;;  %v13892_v50 = vld [vmem:[#allocation2 + $0x1014] sm:$0xf]  ;;  %v11293_v60 = vor.u32 %v13977_v49, %v11292_v44  ;;  %v10853_v44 = vor.u32 %v13867_v27, %v10852_v55  ;;  %v14080_v49 = vld [vmem:[#allocation6 + $0x1ec] sm:$0xf0] }
 0x287   :  { %5008 = vmatpush.bf16.msrb.mxu0 %v11133_v25  ;;  %4977 = vmatmul.bf16.vlgmr.msra.gmra.mxu1 %v14810_v16  ;;  %v10974_v25 = vld [vmem:[#allocation2 + $0x1038] sm:$0xf0] }
 0x288   :  { %5021 = vmatpush.bf16.msrb.mxu1 %v11453_v62  ;;  %4990 = vmatmul.bf16.vlgmr.msra.gmra.mxu2 %v14808_v15  ;;  %v14991_v62 = vmax.f32 %v2606_v8, %v3800_v38  ;;  %v11254_v8 = vld [vmem:[#allocation2 + $0x1268] sm:$0xf0]  ;;  %v14104_v30 = vld [vmem:[#allocation6 + $0x2ac] sm:$0xf0] }
 0x289   :  { %5034 = vmatpush.bf16.msrb.mxu2 %v11137_v12  ;;  %5003 = vmatmul.bf16.vlgmr.msra.gmra.mxu3 %v14810_v16  ;;  %v13972_v12 = vld [vmem:[#allocation2 + $0x1294] sm:$0xf]  ;;  %v14136_v55 = vld [vmem:[#allocation6 + $0x3ac] sm:$0xf0] }
 0x28a   :  { %5047 = vmatpush.bf16.msrb.mxu3 %v11457_v14  ;;  %v10977_v14 = vor.u32 %v13892_v50, %v10974_v25  ;;  %v11297_v53 = vor.u32 %v13972_v12, %v11294_v51  ;;  %v11173_v50 = vor.u32 %v13947_v39, %v11172_v40  ;;  %v11508_v39 = vld [vmem:[#allocation6 + $0x60] sm:$0xf] }
 0x28b   :  { %5009 = vmatpush.bf16.msrb.mxu0 %v11093_v59  ;;  %v3812_v58 = vpop.f32.mrf.mxu2  ;;  %v13967_v59 = vld [vmem:[#allocation2 + $0x1264] sm:$0xf0]  ;;  %v3788_v0 = vpop.f32.mrf.mxu0 }
 0x28c   :  { %5022 = vmatpush.bf16.msrb.mxu1 %v11413_v61  ;;  %v13882_v61 = vld [vmem:[#allocation2 + $0xfc4] sm:$0xf]  ;;  %v3825_v57 = vpop.f32.mrf.mxu3  ;;  %v11253_v32 = vor.u32 %v13967_v59, %v11252_v63  ;;  %v11956_v63 = vld [vmem:[#allocation6 + $0x3e0] sm:$0xf]  ;;  %v14076_v59 = vld [vmem:[#allocation6 + $0x1cc] sm:$0xf0] }
 0x28d   :  { %5035 = vmatpush.bf16.msrb.mxu2 %v11097_v31  ;;  %v10934_v31 = vld [vmem:[#allocation2 + $0xfe8] sm:$0xf0]  ;;  %v3826_v3 = vadd.f32 %v3825_v57, %v3812_v58 }
 0x28e   :  { %5048 = vmatpush.bf16.msrb.mxu3 %v11417_v7  ;;  %v3801_v7 = vpop.f32.mrf.mxu1  ;;  %v10937_v13 = vor.u32 %v13882_v61, %v10934_v31  ;;  %v11684_v58 = vld [vmem:[#allocation6 + $0x1c0] sm:$0xf] }
 0x28f   :  { %5010 = vmatpush.bf16.msrb.mxu0 %v11053_v20  ;;  %v14996_v20 = vmax.f32 %v2607_v56, %v3826_v3  ;;  %v10854_v56 = vld [vmem:[#allocation2 + $0xf48] sm:$0xf0]  ;;  %v11685_v3 = vor.u32 %v14076_v59, %v11684_v58  ;;  %v14060_v58 = vld [vmem:[#allocation6 + $0x14c] sm:$0xf0] }
 0x290   :  { %5023 = vmatpush.bf16.msrb.mxu1 %v11373_v24  ;;  %v11257_v24 = vor.u32 %v13962_v54, %v11254_v8  ;;  %v10857_v25 = vor.u32 %v13862_v43, %v10854_v56  ;;  %v11540_v57 = vld [vmem:[#allocation6 + $0xa0] sm:$0xf]  ;;  %v14108_v8 = vld [vmem:[#allocation6 + $0x2cc] sm:$0xf0] }
 0x291   :  { %5036 = vmatpush.bf16.msrb.mxu2 %v11057_v28  ;;  %v13957_v28 = vld [vmem:[#allocation2 + $0x1214] sm:$0xf0]  ;;  %v11812_v54 = vld [vmem:[#allocation6 + $0x2c0] sm:$0xf] }
 0x292   :  { %5049 = vmatpush.bf16.msrb.mxu3 %v11377_v22  ;;  %v11214_v22 = vld [vmem:[#allocation2 + $0x1218] sm:$0xf0]  ;;  %v11213_v42 = vor.u32 %v13957_v28, %v11212_v19  ;;  %v11940_v7 = vld [vmem:[#allocation6 + $0x3c0] sm:$0xf]  ;;  %v11813_v18 = vor.u32 %v14108_v8, %v11812_v54 }
 0x293   :  { %5011 = vmatpush.bf16.msrb.mxu0 %v11013_v48  ;;  %v11217_v21 = vor.u32 %v13952_v36, %v11214_v22  ;;  %v13942_v48 = vld [vmem:[#allocation2 + $0x11a4] sm:$0xf]  ;;  %v3814_v38 = vpop.f32.mrf.mxu2  ;;  %v11796_v28 = vld [vmem:[#allocation6 + $0x2a0] sm:$0xf]  ;;  %v14036_v22 = vld [vmem:[#allocation6 + $0x8c] sm:$0xf0] }
 0x294   :  { %5024 = vmatpush.bf16.msrb.mxu1 %v11333_v23  ;;  %v11174_v23 = vld [vmem:[#allocation2 + $0x11c8] sm:$0xf0]  ;;  %v3827_v41 = vpop.f32.mrf.mxu3  ;;  %v11797_v27 = vor.u32 %v14104_v30, %v11796_v28  ;;  %v14100_v43 = vld [vmem:[#allocation6 + $0x28c] sm:$0xf0] }
 0x295   :  { %5037 = vmatpush.bf16.msrb.mxu2 %v11017_v26  ;;  %v11572_v26 = vld [vmem:[#allocation6 + $0xe0] sm:$0xf]  ;;  %v11177_v12 = vor.u32 %v13942_v48, %v11174_v23  ;;  %v14032_v38 = vld [vmem:[#allocation6 + $0x6c] sm:$0xf0] }
 0x296   :  { %5050 = vmatpush.bf16.msrb.mxu3 %v11337_v47  ;;  %v11700_v47 = vld [vmem:[#allocation6 + $0x1e0] sm:$0xf]  ;;  %v11573_v51 = vor.u32 %v14048_v35, %v11572_v26  ;;  %v14132_v26 = vld [vmem:[#allocation6 + $0x38c] sm:$0xf0] }
 0x297   :  { %5012 = vmatpush.bf16.msrb.mxu0 %v10973_v2  ;;  %v11556_v2 = vld [vmem:[#allocation6 + $0xc0] sm:$0xf]  ;;  %v11701_v1 = vor.u32 %v14080_v49, %v11700_v47  ;;  %v14064_v41 = vld [vmem:[#allocation6 + $0x16c] sm:$0xf0] }
 0x298   :  { %5025 = vmatpush.bf16.msrb.mxu1 %v11293_v60  ;;  %v11828_v60 = vld [vmem:[#allocation6 + $0x2e0] sm:$0xf]  ;;  %v11557_v31 = vor.u32 %v14044_v52, %v11556_v2  ;;  %v14096_v2 = vld [vmem:[#allocation6 + $0x26c] sm:$0xf0] }
 0x299   :  { %5038 = vmatpush.bf16.msrb.mxu2 %v10977_v14  ;;  %v14112_v14 = vld [vmem:[#allocation6 + $0x2ec] sm:$0xf0]  ;;  %v11908_v23 = vld [vmem:[#allocation6 + $0x380] sm:$0xf] }
 0x29a   :  { %5051 = vmatpush.bf16.msrb.mxu3 %v11297_v53  ;;  %v14144_v53 = vld [vmem:[#allocation6 + $0x3ec] sm:$0xf0]  ;;  %v11829_v61 = vor.u32 %v14112_v14, %v11828_v60  ;;  %v11636_v35 = vld [vmem:[#allocation6 + $0x160] sm:$0xf]  ;;  %v11909_v60 = vor.u32 %v14132_v26, %v11908_v23 }
 0x29b   :  { %5013 = vmatpush.bf16.msrb.mxu0 %v10933_v5  ;;  %v11957_v0 = vor.u32 %v14144_v53, %v11956_v63  ;;  %v14040_v5 = vld [vmem:[#allocation6 + $0xac] sm:$0xf0]  ;;  %v11492_v47 = vld [vmem:[#allocation6 + $0x40] sm:$0xf]  ;;  %v11637_v14 = vor.u32 %v14064_v41, %v11636_v35 }
 0x29c   :  { %5026 = vmatpush.bf16.msrb.mxu1 %v11253_v32  ;;  %v14140_v32 = vld [vmem:[#allocation6 + $0x3cc] sm:$0xf0]  ;;  %v11541_v19 = vor.u32 %v14040_v5, %v11540_v57  ;;  %v11620_v53 = vld [vmem:[#allocation6 + $0x140] sm:$0xf] }
 0x29d   :  { %5039 = vmatpush.bf16.msrb.mxu2 %v10937_v13  ;;  %v11668_v13 = vld [vmem:[#allocation6 + $0x1a0] sm:$0xf]  ;;  %v11941_v34 = vor.u32 %v14140_v32, %v11940_v7  ;;  %v14128_v52 = vld [vmem:[#allocation6 + $0x36c] sm:$0xf0] }
 0x29e   :  { %5052 = vmatpush.bf16.msrb.mxu3 %v11257_v24  ;;  %v11524_v24 = vld [vmem:[#allocation6 + $0x80] sm:$0xf]  ;;  %v11669_v36 = vor.u32 %v14072_v17, %v11668_v13  ;;  %v14092_v32 = vld [vmem:[#allocation6 + $0x24c] sm:$0xf0]  ;;  %v11621_v17 = vor.u32 %v14060_v58, %v11620_v53 }
 0x29f   :  { %5014 = vmatpush.bf16.msrb.mxu0 %v10893_v45  ;;  %v11924_v45 = vld [vmem:[#allocation6 + $0x3a0] sm:$0xf]  ;;  %v11525_v40 = vor.u32 %v14036_v22, %v11524_v24  ;;  %v14124_v24 = vld [vmem:[#allocation6 + $0x34c] sm:$0xf0] }
 0x2a0   :  { %5027 = vmatpush.bf16.msrb.mxu1 %v11213_v42  ;;  %v11652_v42 = vld [vmem:[#allocation6 + $0x180] sm:$0xf]  ;;  %v11925_v56 = vor.u32 %v14136_v55, %v11924_v45  ;;  %v14020_v22 = vld [vmem:[#allocation6 + $0xc] sm:$0xf0] }
 0x2a1   :  { %5040 = vmatpush.bf16.msrb.mxu2 %v10897_v10  ;;  %v11748_v7 = vld [vmem:[#allocation6 + $0x240] sm:$0xf]  ;;  %v14176_v23 = vld [vmem:[#allocation6 + $0x4ec] sm:$0xf0] }
 0x2a2   :  { %5053 = vmatpush.bf16.msrb.mxu3 %v11217_v21  ;;  %v11780_v21 = vld [vmem:[#allocation6 + $0x280] sm:$0xf]  ;;  %v11749_v45 = vor.u32 %v14092_v32, %v11748_v7  ;;  %v14084_v41 = vld [vmem:[#allocation6 + $0x20c] sm:$0xf0] }
 0x2a3   :  { %5015 = vmatpush.bf16.msrb.mxu0 %v10853_v44  ;;  %v4809_v10 = vpop.f32.mrf.mxu0  ;;  %v15002_v44 = vld [vmem:[#allocation4] sm:$0xff]  ;;  %v11781_v49 = vor.u32 %v14100_v43, %v11780_v21  ;;  %v14120_v21 = vld [vmem:[#allocation6 + $0x32c] sm:$0xf0]  ;;  %v12324_v32 = vld [vmem:[#allocation6 + $0x6c0] sm:$0xf] }
 0x2a4   :  { %5028 = vmatpush.bf16.msrb.mxu1 %v11173_v50  ;;  %v5074_v59 = vperm.slane %v15002_v44, 0  ;;  %v5075_v30 = vperm.slane %v15002_v44, 1  ;;  %v14116_v58 = vld [vmem:[#allocation6 + $0x30c] sm:$0xf0] }
 0x2a5   :  { %5041 = vmatpush.bf16.msrb.mxu2 %v10857_v25  ;;  %v11509_v25 = vor.u32 %v14032_v38, %v11508_v39  ;;  %v14052_v39 = vld [vmem:[#allocation6 + $0x10c] sm:$0xf0]  ;;  %v12084_v38 = vld [vmem:[#allocation6 + $0x4e0] sm:$0xf] }
 0x2a6   :  { %5054 = vmatpush.bf16.msrb.mxu3 %v11177_v12  ;;  %5016 = vmatmul.bf16.vlgmr.msrb.gmra.mxu0 %v14808_v15  ;;  %v14028_v12 = vld [vmem:[#allocation6 + $0x4c] sm:$0xf0] }
 0x2a7   :  { %7054 = vmatpush.bf16.msra.mxu0 %v11573_v51  ;;  %5029 = vmatmul.bf16.vlgmr.msrb.gmra.mxu1 %v14810_v16  ;;  %v11764_v51 = vld [vmem:[#allocation6 + $0x260] sm:$0xf] }
 0x2a8   :  { %7067 = vmatpush.bf16.msra.mxu1 %v11701_v1  ;;  %5042 = vmatmul.bf16.vlgmr.msrb.gmra.mxu2 %v14808_v15  ;;  %v14068_v15 = vld [vmem:[#allocation6 + $0x18c] sm:$0xf0]  ;;  %v11892_v1 = vld [vmem:[#allocation6 + $0x360] sm:$0xf]  ;;  %v11765_v54 = vor.u32 %v14096_v2, %v11764_v51 }
 0x2a9   :  { %5055 = vmatmul.bf16.vlgmr.msrb.gmra.mxu3 %v14810_v16  ;;  %7080 = vmatpush.bf16.msra.mxu2 %v11829_v61  ;;  %v4822_v16 = vpop.f32.mrf.mxu1  ;;  %v11653_v48 = vor.u32 %v14068_v15, %v11652_v42  ;;  %v11893_v13 = vor.u32 %v14128_v52, %v11892_v1  ;;  %v11588_v15 = vld [vmem:[#allocation6 + $0x100] sm:$0xf]  ;;  %v14240_v2 = vld [vmem:[#allocation6 + $0x6ec] sm:$0xf0] }
 0x2aa   :  { %7093 = vmatpush.bf16.msra.mxu3 %v11957_v0  ;;  %v4823_v50 = vadd.f32 %v4822_v16, %v4809_v10  ;;  %v11732_v10 = vld [vmem:[#allocation6 + $0x220] sm:$0xf]  ;;  %v14172_v52 = vld [vmem:[#allocation6 + $0x4cc] sm:$0xf0] }
 0x2ab   :  { %7055 = vmatpush.bf16.msra.mxu0 %v11557_v31  ;;  %v4835_v63 = vpop.f32.mrf.mxu2  ;;  %v11493_v31 = vor.u32 %v14028_v12, %v11492_v47  ;;  %v4811_v57 = vpop.f32.mrf.mxu0  ;;  %v12212_v47 = vld [vmem:[#allocation6 + $0x5e0] sm:$0xf] }
 0x2ac   :  { %7068 = vmatpush.bf16.msra.mxu1 %v11685_v3  ;;  %v4848_v61 = vpop.f32.mrf.mxu3  ;;  %v5060_v8 = vmax.f32 %v14935_v29, %v4823_v50  ;;  %v11476_v3 = vld [vmem:[#allocation6 + $0x20] sm:$0xf]  ;;  %v14272_v57 = vld [vmem:[#allocation6 + $0x7ec] sm:$0xf0] }
 0x2ad   :  { %7081 = vmatpush.bf16.msra.mxu2 %v11813_v18  ;;  %v4849_v0 = vadd.f32 %v4848_v61, %v4835_v63  ;;  %v14024_v18 = vld [vmem:[#allocation6 + $0x2c] sm:$0xf0]  ;;  %v11460_v29 = vld [vmem:[#allocation6] sm:$0xf] }
 0x2ae   :  { %7094 = vmatpush.bf16.msra.mxu3 %v11941_v34  ;;  %v11604_v34 = vld [vmem:[#allocation6 + $0x120] sm:$0xf]  ;;  %v5094_v55 = vadd.f32 %v5074_v59, %v5060_v8  ;;  %v11477_v42 = vor.u32 %v14024_v18, %v11476_v3  ;;  %v14204_v8 = vld [vmem:[#allocation6 + $0x5cc] sm:$0xf0] }
 0x2af   :  { %7056 = vmatpush.bf16.msra.mxu0 %v11541_v19  ;;  %v11876_v19 = vld [vmem:[#allocation6 + $0x340] sm:$0xf]  ;;  %v5061_v28 = vmax.f32 %v14940_v9, %v4849_v0 }
 0x2b0   :  { %7069 = vmatpush.bf16.msra.mxu1 %v11669_v36  ;;  %v14056_v36 = vld [vmem:[#allocation6 + $0x12c] sm:$0xf0]  ;;  %v11877_v16 = vor.u32 %v14124_v24, %v11876_v19  ;;  %v11860_v9 = vld [vmem:[#allocation6 + $0x320] sm:$0xf]  ;;  %v5104_v50 = vmax.f32 %v5094_v55, 0.0 }
 0x2b1   :  { %7082 = vmatpush.bf16.msra.mxu2 %v11797_v27  ;;  %v4824_v5 = vpop.f32.mrf.mxu1  ;;  %v14088_v27 = vld [vmem:[#allocation6 + $0x22c] sm:$0xf0]  ;;  %v5095_v43 = vadd.f32 %v5075_v30, %v5061_v28  ;;  %v11861_v12 = vor.u32 %v14120_v21, %v11860_v9  ;;  %v12340_v51 = vld [vmem:[#allocation6 + $0x6e0] sm:$0xf] }
 0x2b2   :  { %7095 = vmatpush.bf16.msra.mxu3 %v11925_v56  ;;  %v11733_v35 = vor.u32 %v14088_v27, %v11732_v10  ;;  %v12068_v1 = vld [vmem:[#allocation6 + $0x4c0] sm:$0xf]  ;;  %v12341_v0 = vor.u32 %v14240_v2, %v12340_v51  ;;  %v15008_v3 = vpack.c.bf16 %v5104_v50, %v5104_v50  ;;  %v14168_v19 = vld [vmem:[#allocation6 + $0x4ac] sm:$0xf0] }
 0x2b3   :  { %7057 = vmatpush.bf16.msra.mxu0 %v11525_v40  ;;  %v11605_v40 = vor.u32 %v14056_v36, %v11604_v34  ;;  %v4837_v56 = vpop.f32.mrf.mxu2  ;;  %v11844_v63 = vld [vmem:[#allocation6 + $0x300] sm:$0xf]  ;;  %v5105_v53 = vmax.f32 %v5095_v43, 0.0  ;;  %v12069_v5 = vor.u32 %v14172_v52, %v12068_v1  ;;  %v14268_v34 = vld [vmem:[#allocation6 + $0x7cc] sm:$0xf0] }
 0x2b4   :  { %7070 = vmatpush.bf16.msra.mxu1 %v11653_v48  ;;  %v11716_v48 = vld [vmem:[#allocation6 + $0x200] sm:$0xf]  ;;  %v4850_v26 = vpop.f32.mrf.mxu3  ;;  %v11845_v7 = vor.u32 %v14116_v58, %v11844_v63  ;;  %v14164_v10 = vld [vmem:[#allocation6 + $0x48c] sm:$0xf0] }
 0x2b5   :  { %7083 = vmatpush.bf16.msra.mxu2 %v11781_v49  ;;  %v14208_v49 = vld [vmem:[#allocation6 + $0x5ec] sm:$0xf0]  ;;  %v12468_v61 = vld [vmem:[#allocation6 + $0x7e0] sm:$0xf] }
 0x2b6   :  { %7096 = vmatpush.bf16.msra.mxu3 %v11909_v60  ;;  %v11589_v60 = vor.u32 %v14052_v39, %v11588_v15  ;;  %v12213_v59 = vor.u32 %v14208_v49, %v12212_v47  ;;  %v12052_v18 = vld [vmem:[#allocation6 + $0x4a0] sm:$0xf]  ;;  %v12469_v24 = vor.u32 %v14272_v57, %v12468_v61  ;;  %v14264_v39 = vld [vmem:[#allocation6 + $0x7ac] sm:$0xf0] }
 0x2b7   :  { %7058 = vmatpush.bf16.msra.mxu0 %v11509_v25  ;;  %v11461_v25 = vor.u32 %v14020_v22, %v11460_v29  ;;  %v12452_v30 = vld [vmem:[#allocation6 + $0x7c0] sm:$0xf]  ;;  %v14200_v29 = vld [vmem:[#allocation6 + $0x5ac] sm:$0xf0] }
 0x2b8   :  { %7071 = vmatpush.bf16.msra.mxu1 %v11637_v14  ;;  %v12085_v14 = vor.u32 %v14176_v23, %v12084_v38  ;;  %v12180_v36 = vld [vmem:[#allocation6 + $0x5a0] sm:$0xf]  ;;  %v12453_v27 = vor.u32 %v14268_v34, %v12452_v30  ;;  %v14196_v21 = vld [vmem:[#allocation6 + $0x58c] sm:$0xf0] }
 0x2b9   :  { %7084 = vmatpush.bf16.msra.mxu2 %v11765_v54  ;;  %v12196_v54 = vld [vmem:[#allocation6 + $0x5c0] sm:$0xf]  ;;  %v14228_v26 = vld [vmem:[#allocation6 + $0x68c] sm:$0xf0] }
 0x2ba   :  { %7097 = vmatpush.bf16.msra.mxu3 %v11893_v13  ;;  %v14236_v13 = vld [vmem:[#allocation6 + $0x6cc] sm:$0xf0]  ;;  %v12197_v28 = vor.u32 %v14204_v8, %v12196_v54  ;;  %v12308_v55 = vld [vmem:[#allocation6 + $0x6a0] sm:$0xf] }
 0x2bb   :  { %7059 = vmatpush.bf16.msra.mxu0 %v11493_v31  ;;  %v11717_v31 = vor.u32 %v14084_v41, %v11716_v48  ;;  %v12325_v22 = vor.u32 %v14236_v13, %v12324_v32  ;;  %v12036_v15 = vld [vmem:[#allocation6 + $0x480] sm:$0xf]  ;;  %v5076_v48 = vperm.slane %v15002_v44, 2  ;;  %v14160_v47 = vld [vmem:[#allocation6 + $0x46c] sm:$0xf0] }
 0x2bc   :  { %7072 = vmatpush.bf16.msra.mxu1 %v11621_v17  ;;  %v15010_v17 = vpack.c.bf16 %v5105_v53, %v5105_v53  ;;  %v12164_v9 = vld [vmem:[#allocation6 + $0x580] sm:$0xf]  ;;  %v12037_v38 = vor.u32 %v14164_v10, %v12036_v15  ;;  %v14260_v51 = vld [vmem:[#allocation6 + $0x78c] sm:$0xf0] }
 0x2bd   :  { %7085 = vmatpush.bf16.msra.mxu2 %v11749_v45  ;;  %v12053_v45 = vor.u32 %v14168_v19, %v12052_v18  ;;  %v12292_v23 = vld [vmem:[#allocation6 + $0x680] sm:$0xf]  ;;  %v12165_v50 = vor.u32 %v14196_v21, %v12164_v9  ;;  %v14224_v53 = vld [vmem:[#allocation6 + $0x66c] sm:$0xf0]  ;;  %v5077_v18 = vperm.slane %v15002_v44, 3 }
 0x2be   :  { %7098 = vmatpush.bf16.msra.mxu3 %v11877_v16  ;;  %v12181_v16 = vor.u32 %v14200_v29, %v12180_v36  ;;  %v12020_v41 = vld [vmem:[#allocation6 + $0x460] sm:$0xf]  ;;  %v14256_v8 = vld [vmem:[#allocation6 + $0x76c] sm:$0xf0] }
 0x2bf   :  { %7060 = vmatpush.bf16.msra.mxu0 %v11477_v42  ;;  %v14232_v42 = vld [vmem:[#allocation6 + $0x6ac] sm:$0xf0]  ;;  %v12148_v2 = vld [vmem:[#allocation6 + $0x560] sm:$0xf]  ;;  %v12021_v52 = vor.u32 %v14160_v47, %v12020_v41 }
 0x2c0   :  { %7073 = vmatpush.bf16.msra.mxu1 %v11605_v40  ;;  %v12436_v40 = vld [vmem:[#allocation6 + $0x7a0] sm:$0xf]  ;;  %v12309_v43 = vor.u32 %v14232_v42, %v12308_v55  ;;  %v14220_v30 = vld [vmem:[#allocation6 + $0x64c] sm:$0xf0] }
 0x2c1   :  { %7086 = vmatpush.bf16.msra.mxu2 %v11733_v35  ;;  %v12437_v49 = vor.u32 %v14264_v39, %v12436_v40  ;;  %v12276_v63 = vld [vmem:[#allocation6 + $0x660] sm:$0xf]  ;;  %v14252_v10 = vld [vmem:[#allocation6 + $0x74c] sm:$0xf0] }
 0x2c2   :  { %7099 = vmatpush.bf16.msra.mxu3 %v11861_v12  ;;  %v12004_v58 = vld [vmem:[#allocation6 + $0x440] sm:$0xf]  ;;  %v12277_v32 = vor.u32 %v14224_v53, %v12276_v63  ;;  %v14304_v47 = vld [vmem:[#allocation6 + $0x8ec] sm:$0xf0] }
 0x2c3   :  { %7061 = vmatpush.bf16.msra.mxu0 %v11461_v25  ;;  %v4861_v56 = vpop.f32.mrf.mxu0  ;;  %v12420_v25 = vld [vmem:[#allocation6 + $0x780] sm:$0xf]  ;;  %v14336_v63 = vld [vmem:[#allocation6 + $0x9ec] sm:$0xf0] }
 0x2c4   :  { %7074 = vmatpush.bf16.msra.mxu1 %v11589_v60  ;;  %v4874_v35 = vpop.f32.mrf.mxu1  ;;  %v14192_v60 = vld [vmem:[#allocation6 + $0x56c] sm:$0xf0]  ;;  %v12421_v61 = vor.u32 %v14260_v51, %v12420_v25  ;;  %v12404_v57 = vld [vmem:[#allocation6 + $0x760] sm:$0xf] }
 0x2c5   :  { %7087 = vmatpush.bf16.msra.mxu2 %v11717_v31  ;;  %v4875_v12 = vadd.f32 %v4874_v35, %v4861_v56  ;;  %v12149_v31 = vor.u32 %v14192_v60, %v12148_v2  ;;  %v11988_v29 = vld [vmem:[#allocation6 + $0x420] sm:$0xf]  ;;  %v14180_v2 = vld [vmem:[#allocation6 + $0x50c] sm:$0xf0] }
 0x2c6   :  { %7062 = vmatmul.bf16.vlgmr.msra.gmra.mxu0 %v15008_v3  ;;  %7100 = vmatpush.bf16.msra.mxu3 %v11845_v7  ;;  %v12388_v42 = vld [vmem:[#allocation6 + $0x740] sm:$0xf] }
 0x2c7   :  { %7106 = vmatpush.bf16.msrb.mxu0 %v12085_v14  ;;  %7075 = vmatmul.bf16.vlgmr.msra.gmra.mxu1 %v15010_v17  ;;  %v12293_v14 = vor.u32 %v14228_v26, %v12292_v23  ;;  %v5062_v1 = vmax.f32 %v14949_v33, %v4875_v12  ;;  %v12244_v21 = vld [vmem:[#allocation6 + $0x620] sm:$0xf]  ;;  %v12389_v23 = vor.u32 %v14252_v10, %v12388_v42  ;;  %v14074_v42 = vld [vmem:[#allocation6 + $0x1c4] sm:$0xf]  ;;  %v11686_v10 = vld [vmem:[#allocation6 + $0x1d0] sm:$0xf0] }
 0x2c8   :  { %7119 = vmatpush.bf16.msrb.mxu1 %v12213_v59  ;;  %v14156_v59 = vld [vmem:[#allocation6 + $0x44c] sm:$0xf0]  ;;  %v12596_v35 = vld [vmem:[#allocation6 + $0x8e0] sm:$0xf] }
 0x2c9   :  { %7132 = vmatpush.bf16.msrb.mxu2 %v12341_v0  ;;  %v5096_v54 = vadd.f32 %v5076_v48, %v5062_v1  ;;  %v12132_v0 = vld [vmem:[#allocation6 + $0x540] sm:$0xf]  ;;  %v14212_v1 = vld [vmem:[#allocation6 + $0x60c] sm:$0xf0] }
 0x2ca   :  { %7145 = vmatpush.bf16.msrb.mxu3 %v12469_v24  ;;  %v12005_v24 = vor.u32 %v14156_v59, %v12004_v58  ;;  %v11972_v48 = vld [vmem:[#allocation6 + $0x400] sm:$0xf]  ;;  %v12597_v58 = vor.u32 %v14304_v47, %v12596_v35  ;;  %v14046_v59 = vld [vmem:[#allocation6 + $0xe4] sm:$0xf]  ;;  %v14324_v47 = vld [vmem:[#allocation6 + $0x98c] sm:$0xf0] }
 0x2cb   :  { %7107 = vmatpush.bf16.msrb.mxu0 %v12069_v5  ;;  %v14188_v5 = vld [vmem:[#allocation6 + $0x54c] sm:$0xf0]  ;;  %v4887_v7 = vpop.f32.mrf.mxu2  ;;  %v5106_v13 = vmax.f32 %v5096_v54, 0.0  ;;  %v4863_v19 = vpop.f32.mrf.mxu0  ;;  %v12228_v41 = vld [vmem:[#allocation6 + $0x600] sm:$0xf] }
 0x2cc   :  { %7120 = vmatpush.bf16.msrb.mxu1 %v12197_v28  ;;  %v4900_v33 = vpop.f32.mrf.mxu3  ;;  %v12260_v28 = vld [vmem:[#allocation6 + $0x640] sm:$0xf]  ;;  %v4876_v36 = vpop.f32.mrf.mxu1  ;;  %v12133_v55 = vor.u32 %v14188_v5, %v12132_v0  ;;  %v14244_v5 = vld [vmem:[#allocation6 + $0x70c] sm:$0xf0] }
 0x2cd   :  { %7133 = vmatpush.bf16.msrb.mxu2 %v12325_v22  ;;  %v4901_v34 = vadd.f32 %v4900_v33, %v4887_v7  ;;  %v14152_v22 = vld [vmem:[#allocation6 + $0x42c] sm:$0xf0]  ;;  %v15017_v15 = vpack.c.bf16 %v5106_v13, %v5106_v13  ;;  %v12261_v39 = vor.u32 %v14220_v30, %v12260_v28  ;;  %v12100_v51 = vld [vmem:[#allocation6 + $0x500] sm:$0xf]  ;;  %v12229_v7 = vor.u32 %v14212_v1, %v12228_v41  ;;  %v14078_v13 = vld [vmem:[#allocation6 + $0x1e4] sm:$0xf] }
 0x2ce   :  { %7146 = vmatpush.bf16.msrb.mxu3 %v12453_v27  ;;  %v12116_v27 = vld [vmem:[#allocation6 + $0x520] sm:$0xf]  ;;  %v11989_v9 = vor.u32 %v14152_v22, %v11988_v29  ;;  %v12101_v54 = vor.u32 %v14180_v2, %v12100_v51  ;;  %v11702_v33 = vld [vmem:[#allocation6 + $0x1f0] sm:$0xf0]  ;;  %v14042_v30 = vld [vmem:[#allocation6 + $0xc4] sm:$0xf] }
 0x2cf   :  { %7108 = vmatpush.bf16.msrb.mxu0 %v12053_v45  ;;  %v12405_v45 = vor.u32 %v14256_v8, %v12404_v57  ;;  %v5063_v40 = vmax.f32 %v14954_v4, %v4901_v34  ;;  %7088 = vmatmul.bf16.vlgmr.msra.gmra.mxu2 %v15017_v15  ;;  %v14248_v4 = vld [vmem:[#allocation6 + $0x72c] sm:$0xf0]  ;;  %v12580_v57 = vld [vmem:[#allocation6 + $0x8c0] sm:$0xf]  ;;  %v11558_v34 = vld [vmem:[#allocation6 + $0xd0] sm:$0xf0]  ;;  %v11705_v29 = vor.u32 %v14078_v13, %v11702_v33 }
 0x2d0   :  { %7121 = vmatpush.bf16.msrb.mxu1 %v12181_v16  ;;  %v14184_v16 = vld [vmem:[#allocation6 + $0x52c] sm:$0xf0]  ;;  %v12356_v0 = vld [vmem:[#allocation6 + $0x700] sm:$0xf]  ;;  %v14066_v1 = vld [vmem:[#allocation6 + $0x184] sm:$0xf] }
 0x2d1   :  { %7134 = vmatpush.bf16.msrb.mxu2 %v12309_v43  ;;  %v14216_v43 = vld [vmem:[#allocation6 + $0x62c] sm:$0xf0]  ;;  %v5097_v56 = vadd.f32 %v5077_v18, %v5063_v40  ;;  %v12117_v26 = vor.u32 %v14184_v16, %v12116_v27  ;;  %v12708_v19 = vld [vmem:[#allocation6 + $0x9c0] sm:$0xf]  ;;  %v12357_v36 = vor.u32 %v14244_v5, %v12356_v0  ;;  %v11561_v27 = vor.u32 %v14042_v30, %v11558_v34  ;;  %v14062_v33 = vld [vmem:[#allocation6 + $0x164] sm:$0xf] }
 0x2d2   :  { %7147 = vmatpush.bf16.msrb.mxu3 %v12437_v49  ;;  %v12372_v49 = vld [vmem:[#allocation6 + $0x720] sm:$0xf]  ;;  %v12245_v12 = vor.u32 %v14216_v43, %v12244_v21  ;;  %v14300_v8 = vld [vmem:[#allocation6 + $0x8cc] sm:$0xf0]  ;;  %v11542_v21 = vld [vmem:[#allocation6 + $0xb0] sm:$0xf0]  ;;  %v11689_v43 = vor.u32 %v14074_v42, %v11686_v10 }
 0x2d3   :  { %7109 = vmatpush.bf16.msrb.mxu0 %v12037_v38  ;;  %v14148_v38 = vld [vmem:[#allocation6 + $0x40c] sm:$0xf0]  ;;  %v4889_v25 = vpop.f32.mrf.mxu2  ;;  %v12581_v28 = vor.u32 %v14300_v8, %v12580_v57  ;;  %v12564_v22 = vld [vmem:[#allocation6 + $0x8a0] sm:$0xf]  ;;  %v11510_v8 = vld [vmem:[#allocation6 + $0x70] sm:$0xf0] }
 0x2d4   :  { %7122 = vmatpush.bf16.msrb.mxu1 %v12165_v50  ;;  %v5107_v50 = vmax.f32 %v5097_v56, 0.0  ;;  %v4902_v60 = vpop.f32.mrf.mxu3  ;;  %v12692_v16 = vld [vmem:[#allocation6 + $0x9a0] sm:$0xf]  ;;  %v14328_v40 = vld [vmem:[#allocation6 + $0x9ac] sm:$0xf0] }
 0x2d5   :  { %7135 = vmatpush.bf16.msrb.mxu2 %v12293_v14  ;;  %v11973_v14 = vor.u32 %v14148_v38, %v11972_v48  ;;  %v12548_v56 = vld [vmem:[#allocation6 + $0x880] sm:$0xf]  ;;  %v14292_v48 = vld [vmem:[#allocation6 + $0x88c] sm:$0xf0]  ;;  %v12693_v38 = vor.u32 %v14328_v40, %v12692_v16  ;;  %v5079_v40 = vperm.slane %v15002_v44, 5 }
 0x2d6   :  { %7148 = vmatpush.bf16.msrb.mxu3 %v12421_v61  ;;  %v15021_v53 = vpack.c.bf16 %v5107_v50, %v5107_v50  ;;  %v11574_v61 = vld [vmem:[#allocation6 + $0xf0] sm:$0xf0]  ;;  %v12676_v41 = vld [vmem:[#allocation6 + $0x980] sm:$0xf]  ;;  %v14288_v2 = vld [vmem:[#allocation6 + $0x86c] sm:$0xf0] }
 0x2d7   :  { %7110 = vmatpush.bf16.msrb.mxu0 %v12021_v52  ;;  %v12724_v52 = vld [vmem:[#allocation6 + $0x9e0] sm:$0xf]  ;;  %v11577_v18 = vor.u32 %v14046_v59, %v11574_v61  ;;  %v11526_v50 = vld [vmem:[#allocation6 + $0x90] sm:$0xf0]  ;;  %v14316_v30 = vld [vmem:[#allocation6 + $0x94c] sm:$0xf0] }
 0x2d8   :  { %7123 = vmatpush.bf16.msrb.mxu1 %v12149_v31  ;;  %v12373_v31 = vor.u32 %v14248_v4, %v12372_v49  ;;  %7101 = vmatmul.bf16.vlgmr.msra.gmra.mxu3 %v15021_v53  ;;  %v12549_v49 = vor.u32 %v14292_v48, %v12548_v56  ;;  %v14034_v4 = vld [vmem:[#allocation6 + $0x84] sm:$0xf]  ;;  %v12532_v51 = vld [vmem:[#allocation6 + $0x860] sm:$0xf] }
 0x2d9   :  { %7136 = vmatpush.bf16.msrb.mxu2 %v12277_v32  ;;  %v12725_v32 = vor.u32 %v14336_v63, %v12724_v52  ;;  %v11654_v52 = vld [vmem:[#allocation6 + $0x190] sm:$0xf0]  ;;  %v11529_v59 = vor.u32 %v14034_v4, %v11526_v50  ;;  %v12660_v61 = vld [vmem:[#allocation6 + $0x960] sm:$0xf]  ;;  %v12533_v57 = vor.u32 %v14288_v2, %v12532_v51  ;;  %v14276_v50 = vld [vmem:[#allocation6 + $0x80c] sm:$0xf0] }
 0x2da   :  { %7149 = vmatpush.bf16.msrb.mxu3 %v12405_v45  ;;  %v14296_v45 = vld [vmem:[#allocation6 + $0x8ac] sm:$0xf0]  ;;  %v11657_v5 = vor.u32 %v14066_v1, %v11654_v52  ;;  %v12500_v10 = vld [vmem:[#allocation6 + $0x820] sm:$0xf]  ;;  %v14018_v51 = vld [vmem:[#allocation6 + $0x4] sm:$0xf] }
 0x2db   :  { %7111 = vmatpush.bf16.msrb.mxu0 %v12005_v24  ;;  %v14332_v24 = vld [vmem:[#allocation6 + $0x9cc] sm:$0xf0]  ;;  %v12484_v4 = vld [vmem:[#allocation6 + $0x800] sm:$0xf]  ;;  %v11830_v2 = vld [vmem:[#allocation6 + $0x2f0] sm:$0xf0] }
 0x2dc   :  { %7124 = vmatpush.bf16.msrb.mxu1 %v12133_v55  ;;  %v12709_v55 = vor.u32 %v14332_v24, %v12708_v19  ;;  %v11606_v1 = vld [vmem:[#allocation6 + $0x130] sm:$0xf0] }
 0x2dd   :  { %7137 = vmatpush.bf16.msrb.mxu2 %v12261_v39  ;;  %v12565_v39 = vor.u32 %v14296_v45, %v12564_v22  ;;  %v11494_v22 = vld [vmem:[#allocation6 + $0x50] sm:$0xf0] }
 0x2de   :  { %7150 = vmatpush.bf16.msrb.mxu3 %v12389_v23  ;;  %v14070_v23 = vld [vmem:[#allocation6 + $0x1a4] sm:$0xf]  ;;  %v11462_v52 = vld [vmem:[#allocation6 + $0x10] sm:$0xf0] }
 0x2df   :  { %7112 = vmatpush.bf16.msrb.mxu0 %v11989_v9  ;;  %v14038_v9 = vld [vmem:[#allocation6 + $0xa4] sm:$0xf] }
 0x2e0   :  { %7125 = vmatpush.bf16.msrb.mxu1 %v12117_v26  ;;  %v11670_v26 = vld [vmem:[#allocation6 + $0x1b0] sm:$0xf0]  ;;  %v11545_v35 = vor.u32 %v14038_v9, %v11542_v21  ;;  %v14058_v21 = vld [vmem:[#allocation6 + $0x144] sm:$0xf] }
 0x2e1   :  { %7138 = vmatpush.bf16.msrb.mxu2 %v12245_v12  ;;  %v11673_v12 = vor.u32 %v14070_v23, %v11670_v26  ;;  %v14312_v23 = vld [vmem:[#allocation6 + $0x92c] sm:$0xf0] }
 0x2e2   :  { %7151 = vmatpush.bf16.msrb.mxu3 %v12373_v31  ;;  %v14320_v31 = vld [vmem:[#allocation6 + $0x96c] sm:$0xf0] }
 0x2e3   :  { %7113 = vmatpush.bf16.msrb.mxu0 %v11973_v14  ;;  %v4913_v25 = vpop.f32.mrf.mxu0  ;;  %v12677_v14 = vor.u32 %v14324_v47, %v12676_v41  ;;  %v12661_v13 = vor.u32 %v14320_v31, %v12660_v61  ;;  %v14022_v41 = vld [vmem:[#allocation6 + $0x24] sm:$0xf]  ;;  %v11478_v47 = vld [vmem:[#allocation6 + $0x30] sm:$0xf0]  ;;  %v12485_v31 = vor.u32 %v14276_v50, %v12484_v4 }
 0x2e4   :  { %7126 = vmatpush.bf16.msrb.mxu1 %v12101_v54  ;;  %v4926_v60 = vpop.f32.mrf.mxu1  ;;  %v14030_v54 = vld [vmem:[#allocation6 + $0x64] sm:$0xf] }
 0x2e5   :  { %7139 = vmatpush.bf16.msrb.mxu2 %v12229_v7  ;;  %v4927_v63 = vadd.f32 %v4926_v60, %v4913_v25  ;;  %v12516_v7 = vld [vmem:[#allocation6 + $0x840] sm:$0xf]  ;;  %v11513_v24 = vor.u32 %v14030_v54, %v11510_v8  ;;  %v14110_v25 = vld [vmem:[#allocation6 + $0x2e4] sm:$0xf]  ;;  %v11958_v54 = vld [vmem:[#allocation6 + $0x3f0] sm:$0xf0] }
 0x2e6   :  { %7152 = vmatpush.bf16.msrb.mxu3 %v12357_v36  ;;  %v14090_v50 = vld [vmem:[#allocation6 + $0x244] sm:$0xf] }
 0x2e7   :  { %7158 = vmatpush.bf16.msra.mxu0 %v12597_v58  ;;  %v5078_v58 = vperm.slane %v15002_v44, 4  ;;  %v5064_v0 = vmax.f32 %v14963_v6, %v4927_v63  ;;  %v12612_v63 = vld [vmem:[#allocation6 + $0x900] sm:$0xf] }
 0x2e8   :  { %7171 = vmatpush.bf16.msra.mxu1 %v12725_v32  ;;  %v14284_v32 = vld [vmem:[#allocation6 + $0x84c] sm:$0xf0] }
 0x2e9   :  { %7184 = vmatpush.bf16.msra.mxu2 %v11577_v18  ;;  %v11638_v18 = vld [vmem:[#allocation6 + $0x170] sm:$0xf0]  ;;  %v5098_v19 = vadd.f32 %v5078_v58, %v5064_v0  ;;  %v12517_v36 = vor.u32 %v14284_v32, %v12516_v7  ;;  %v14308_v58 = vld [vmem:[#allocation6 + $0x90c] sm:$0xf0]  ;;  %v11833_v0 = vor.u32 %v14110_v25, %v11830_v2  ;;  %v14106_v7 = vld [vmem:[#allocation6 + $0x2c4] sm:$0xf] }
 0x2ea   :  { %7197 = vmatpush.bf16.msra.mxu3 %v11705_v29  ;;  %v14026_v29 = vld [vmem:[#allocation6 + $0x44] sm:$0xf]  ;;  %v11641_v42 = vor.u32 %v14062_v33, %v11638_v18  ;;  %v12613_v33 = vor.u32 %v14308_v58, %v12612_v63  ;;  %v11750_v25 = vld [vmem:[#allocation6 + $0x250] sm:$0xf0] }
 0x2eb   :  { %7159 = vmatpush.bf16.msra.mxu0 %v12581_v28  ;;  %v12644_v28 = vld [vmem:[#allocation6 + $0x940] sm:$0xf]  ;;  %v4939_v34 = vpop.f32.mrf.mxu2  ;;  %v5108_v45 = vmax.f32 %v5098_v19, 0.0  ;;  %v11497_v48 = vor.u32 %v14026_v29, %v11494_v22  ;;  %v14050_v18 = vld [vmem:[#allocation6 + $0x104] sm:$0xf] }
 0x2ec   :  { %7172 = vmatpush.bf16.msra.mxu1 %v12709_v55  ;;  %v4952_v6 = vpop.f32.mrf.mxu3  ;;  %v4915_v55 = vpop.f32.mrf.mxu0  ;;  %v12645_v9 = vor.u32 %v14316_v30, %v12644_v28  ;;  %v11590_v19 = vld [vmem:[#allocation6 + $0x110] sm:$0xf0]  ;;  %v14138_v30 = vld [vmem:[#allocation6 + $0x3c4] sm:$0xf] }
 0x2ed   :  { %7185 = vmatpush.bf16.msra.mxu2 %v11561_v27  ;;  %v14280_v27 = vld [vmem:[#allocation6 + $0x82c] sm:$0xf0]  ;;  %v4953_v16 = vadd.f32 %v4952_v6, %v4939_v34  ;;  %v15027_v56 = vpack.c.bf16 %v5108_v45, %v5108_v45  ;;  %v11942_v34 = vld [vmem:[#allocation6 + $0x3d0] sm:$0xf0]  ;;  %v11593_v29 = vor.u32 %v14050_v18, %v11590_v19  ;;  %v14102_v22 = vld [vmem:[#allocation6 + $0x2a4] sm:$0xf] }
 0x2ee   :  { %7198 = vmatpush.bf16.msra.mxu3 %v11689_v43  ;;  %v11622_v43 = vld [vmem:[#allocation6 + $0x150] sm:$0xf0]  ;;  %v11945_v6 = vor.u32 %v14138_v30, %v11942_v34  ;;  %v14134_v55 = vld [vmem:[#allocation6 + $0x3a4] sm:$0xf] }
 0x2ef   :  { %7160 = vmatpush.bf16.msra.mxu0 %v12565_v39  ;;  %v4928_v39 = vpop.f32.mrf.mxu1  ;;  %v5065_v26 = vmax.f32 %v14968_v46, %v4953_v16  ;;  %v11481_v46 = vor.u32 %v14022_v41, %v11478_v47  ;;  %v11798_v45 = vld [vmem:[#allocation6 + $0x2b0] sm:$0xf0]  ;;  %v14122_v2 = vld [vmem:[#allocation6 + $0x344] sm:$0xf] }
 0x2f0   :  { %7173 = vmatpush.bf16.msra.mxu1 %v12693_v38  ;;  %v12628_v38 = vld [vmem:[#allocation6 + $0x920] sm:$0xf]  ;;  %7114 = vmatmul.bf16.vlgmr.msrb.gmra.mxu0 %v15027_v56  ;;  %v11782_v16 = vld [vmem:[#allocation6 + $0x290] sm:$0xf0]  ;;  %v14130_v39 = vld [vmem:[#allocation6 + $0x384] sm:$0xf] }
 0x2f1   :  { %7186 = vmatpush.bf16.msra.mxu2 %v11545_v35  ;;  %v12501_v35 = vor.u32 %v14280_v27, %v12500_v10  ;;  %v12629_v60 = vor.u32 %v14312_v23, %v12628_v38  ;;  %v11801_v10 = vor.u32 %v14102_v22, %v11798_v45  ;;  %v14098_v27 = vld [vmem:[#allocation6 + $0x284] sm:$0xf]  ;;  %v11894_v41 = vld [vmem:[#allocation6 + $0x370] sm:$0xf0] }
 0x2f2   :  { %7199 = vmatpush.bf16.msra.mxu3 %v11673_v12  ;;  %v5099_v12 = vadd.f32 %v5079_v40, %v5065_v26  ;;  %v14086_v58 = vld [vmem:[#allocation6 + $0x224] sm:$0xf]  ;;  %v11718_v34 = vld [vmem:[#allocation6 + $0x210] sm:$0xf0] }
 0x2f3   :  { %7161 = vmatpush.bf16.msra.mxu0 %v12549_v49  ;;  %v11625_v49 = vor.u32 %v14058_v21, %v11622_v43  ;;  %v4941_v61 = vpop.f32.mrf.mxu2  ;;  %v11785_v21 = vor.u32 %v14098_v27, %v11782_v16  ;;  %v14094_v43 = vld [vmem:[#allocation6 + $0x264] sm:$0xf]  ;;  %v12214_v45 = vld [vmem:[#allocation6 + $0x5f0] sm:$0xf0] }
 0x2f4   :  { %7174 = vmatpush.bf16.msra.mxu1 %v12677_v14  ;;  %v14054_v14 = vld [vmem:[#allocation6 + $0x124] sm:$0xf]  ;;  %v4954_v8 = vpop.f32.mrf.mxu3 }
 0x2f5   :  { %7187 = vmatpush.bf16.msra.mxu2 %v11529_v59  ;;  %v5109_v59 = vmax.f32 %v5099_v12, 0.0  ;;  %v14118_v19 = vld [vmem:[#allocation6 + $0x324] sm:$0xf] }
 0x2f6   :  { %7200 = vmatpush.bf16.msra.mxu3 %v11657_v5  ;;  %v11609_v5 = vor.u32 %v14054_v14, %v11606_v1  ;;  %v14174_v1 = vld [vmem:[#allocation6 + $0x4e4] sm:$0xf] }
 0x2f7   :  { %7162 = vmatpush.bf16.msra.mxu0 %v12533_v57  ;;  %v14142_v57 = vld [vmem:[#allocation6 + $0x3e4] sm:$0xf]  ;;  %v15031_v32 = vpack.c.bf16 %v5109_v59, %v5109_v59  ;;  %v11734_v59 = vld [vmem:[#allocation6 + $0x230] sm:$0xf0] }
 0x2f8   :  { %7175 = vmatpush.bf16.msra.mxu1 %v12661_v13  ;;  %v11814_v13 = vld [vmem:[#allocation6 + $0x2d0] sm:$0xf0]  ;;  %v11961_v28 = vor.u32 %v14142_v57, %v11958_v54  ;;  %v11737_v18 = vor.u32 %v14086_v58, %v11734_v59  ;;  %v14082_v30 = vld [vmem:[#allocation6 + $0x204] sm:$0xf] }
 0x2f9   :  { %7188 = vmatpush.bf16.msra.mxu2 %v11513_v24  ;;  %v11465_v24 = vor.u32 %v14018_v51, %v11462_v52  ;;  %7127 = vmatmul.bf16.vlgmr.msrb.gmra.mxu1 %v15031_v32  ;;  %v11753_v52 = vor.u32 %v14090_v50, %v11750_v25  ;;  %v11721_v27 = vor.u32 %v14082_v30, %v11718_v34  ;;  %v12022_v50 = vld [vmem:[#allocation6 + $0x470] sm:$0xf0]  ;;  %v14190_v58 = vld [vmem:[#allocation6 + $0x564] sm:$0xf] }
 0x2fa   :  { %7201 = vmatpush.bf16.msra.mxu3 %v11641_v42  ;;  %v11926_v42 = vld [vmem:[#allocation6 + $0x3b0] sm:$0xf0]  ;;  %v14302_v34 = vld [vmem:[#allocation6 + $0x8e4] sm:$0xf] }
 0x2fb   :  { %7163 = vmatpush.bf16.msra.mxu0 %v12517_v36  ;;  %v11817_v36 = vor.u32 %v14106_v7, %v11814_v13  ;;  %v11929_v40 = vor.u32 %v14134_v55, %v11926_v42  ;;  %v14170_v7 = vld [vmem:[#allocation6 + $0x4c4] sm:$0xf]  ;;  %v11846_v55 = vld [vmem:[#allocation6 + $0x310] sm:$0xf0] }
 0x2fc   :  { %7176 = vmatpush.bf16.msra.mxu1 %v12645_v9  ;;  %v11910_v9 = vld [vmem:[#allocation6 + $0x390] sm:$0xf0]  ;;  %v14166_v42 = vld [vmem:[#allocation6 + $0x4a4] sm:$0xf] }
 0x2fd   :  { %7189 = vmatpush.bf16.msra.mxu2 %v11497_v48  ;;  %v11766_v48 = vld [vmem:[#allocation6 + $0x270] sm:$0xf0]  ;;  %v11913_v23 = vor.u32 %v14130_v39, %v11910_v9 }
 0x2fe   :  { %7202 = vmatpush.bf16.msra.mxu3 %v11625_v49  ;;  %v5080_v49 = vperm.slane %v15002_v44, 6  ;;  %v11769_v4 = vor.u32 %v14094_v43, %v11766_v48  ;;  %v14202_v48 = vld [vmem:[#allocation6 + $0x5c4] sm:$0xf]  ;;  %v12150_v59 = vld [vmem:[#allocation6 + $0x570] sm:$0xf0] }
 0x2ff   :  { %7164 = vmatpush.bf16.msra.mxu0 %v12501_v35  ;;  %v14126_v35 = vld [vmem:[#allocation6 + $0x364] sm:$0xf]  ;;  %v12342_v30 = vld [vmem:[#allocation6 + $0x6f0] sm:$0xf0] }
 0x300   :  { %7177 = vmatpush.bf16.msra.mxu1 %v12629_v60  ;;  %v11897_v51 = vor.u32 %v14126_v35, %v11894_v41  ;;  %v11878_v60 = vld [vmem:[#allocation6 + $0x350] sm:$0xf0] }
 0x301   :  { %7190 = vmatpush.bf16.msra.mxu2 %v11481_v46  ;;  %v12086_v46 = vld [vmem:[#allocation6 + $0x4f0] sm:$0xf0]  ;;  %v11881_v54 = vor.u32 %v14122_v2, %v11878_v60  ;;  %v14154_v60 = vld [vmem:[#allocation6 + $0x444] sm:$0xf] }
 0x302   :  { %7203 = vmatpush.bf16.msra.mxu3 %v11609_v5  ;;  %v12089_v5 = vor.u32 %v14174_v1, %v12086_v46  ;;  %v12166_v2 = vld [vmem:[#allocation6 + $0x590] sm:$0xf0]  ;;  %v5071_v1 = vld [vmem:[#allocation4 + $0x8] sm:$0x3] }
 0x303   :  { %7165 = vmatpush.bf16.msra.mxu0 %v12485_v31  ;;  %v4965_v38 = vpop.f32.mrf.mxu0 }
 0x304   :  { %7178 = vmatpush.bf16.msra.mxu1 %v12613_v33  ;;  %v4978_v26 = vpop.f32.mrf.mxu1  ;;  %v12070_v33 = vld [vmem:[#allocation6 + $0x4d0] sm:$0xf0] }
 0x305   :  { %7191 = vmatpush.bf16.msra.mxu2 %v11465_v24  ;;  %v4979_v47 = vadd.f32 %v4978_v26, %v4965_v38  ;;  %v11862_v24 = vld [vmem:[#allocation6 + $0x330] sm:$0xf0]  ;;  %v12073_v22 = vor.u32 %v14170_v7, %v12070_v33  ;;  %v14186_v7 = vld [vmem:[#allocation6 + $0x544] sm:$0xf] }
 0x306   :  { %7204 = vmatpush.bf16.msra.mxu3 %v11593_v29  ;;  %v11865_v29 = vor.u32 %v14118_v19, %v11862_v24  ;;  %v12198_v38 = vld [vmem:[#allocation6 + $0x5d0] sm:$0xf0]  ;;  %v14238_v24 = vld [vmem:[#allocation6 + $0x6e4] sm:$0xf] }
 0x307   :  { %7210 = vmatpush.bf16.msrb.mxu0 %v11833_v0  ;;  %v5066_v12 = vmax.f32 %v14977_v37, %v4979_v47  ;;  %v5081_v37 = vperm.slane %v15002_v44, 7  ;;  %v12038_v26 = vld [vmem:[#allocation6 + $0x490] sm:$0xf0]  ;;  %v12201_v35 = vor.u32 %v14202_v48, %v12198_v38  ;;  %v14198_v47 = vld [vmem:[#allocation6 + $0x5a4] sm:$0xf] }
 0x308   :  { %7223 = vmatpush.bf16.msrb.mxu1 %v11961_v28  ;;  %v12134_v33 = vld [vmem:[#allocation6 + $0x550] sm:$0xf0]  ;;  %v14298_v48 = vld [vmem:[#allocation6 + $0x8c4] sm:$0xf] }
 0x309   :  { %v5100_v14 = vadd.f32 %v5080_v49, %v5066_v12  ;;  %v12182_v49 = vld [vmem:[#allocation6 + $0x5b0] sm:$0xf0] }
 0x30a   :  { %v12185_v25 = vor.u32 %v14198_v47, %v12182_v49  ;;  %v11974_v19 = vld [vmem:[#allocation6 + $0x410] sm:$0xf0]  ;;  %v14270_v47 = vld [vmem:[#allocation6 + $0x7e4] sm:$0xf] }
 0x30b   :  { %7211 = vmatpush.bf16.msrb.mxu0 %v11817_v36  ;;  %v4991_v63 = vpop.f32.mrf.mxu2  ;;  %v5110_v61 = vmax.f32 %v5100_v14, 0.0  ;;  %v4967_v57 = vpop.f32.mrf.mxu0  ;;  %v14206_v36 = vld [vmem:[#allocation6 + $0x5e4] sm:$0xf]  ;;  %v12006_v14 = vld [vmem:[#allocation6 + $0x450] sm:$0xf0] }
 0x30c   :  { %7224 = vmatpush.bf16.msrb.mxu1 %v11945_v6  ;;  %v5004_v31 = vpop.f32.mrf.mxu3  ;;  %v4980_v0 = vpop.f32.mrf.mxu1  ;;  %v14114_v6 = vld [vmem:[#allocation6 + $0x304] sm:$0xf]  ;;  %v12217_v39 = vor.u32 %v14206_v36, %v12214_v45  ;;  %v11990_v57 = vld [vmem:[#allocation6 + $0x430] sm:$0xf0] }
 0x30d   :  { %v5005_v8 = vadd.f32 %v5004_v31, %v4991_v63  ;;  %v15037_v13 = vpack.c.bf16 %v5110_v61, %v5110_v61  ;;  %v11849_v9 = vor.u32 %v14114_v6, %v11846_v55  ;;  %v12009_v63 = vor.u32 %v14154_v60, %v12006_v14  ;;  %v14150_v31 = vld [vmem:[#allocation6 + $0x424] sm:$0xf]  ;;  %v12598_v36 = vld [vmem:[#allocation6 + $0x8f0] sm:$0xf0] }
 0x30e   :  { %v14182_v55 = vld [vmem:[#allocation6 + $0x524] sm:$0xf]  ;;  %v12582_v38 = vld [vmem:[#allocation6 + $0x8d0] sm:$0xf0] }
 0x30f   :  { %7212 = vmatpush.bf16.msrb.mxu0 %v11801_v10  ;;  %v5067_v28 = vmax.f32 %v14982_v11, %v5005_v8  ;;  %7140 = vmatmul.bf16.vlgmr.msrb.gmra.mxu2 %v15037_v13  ;;  %v12054_v10 = vld [vmem:[#allocation6 + $0x4b0] sm:$0xf0]  ;;  %v5082_v8 = vperm.slane %v5071_v1, 0  ;;  %v14294_v14 = vld [vmem:[#allocation6 + $0x8a4] sm:$0xf] }
 0x310   :  { %7225 = vmatpush.bf16.msrb.mxu1 %v11929_v40  ;;  %7236 = vmatpush.bf16.msrb.mxu2 %v12089_v5  ;;  %v12057_v43 = vor.u32 %v14166_v42, %v12054_v10  ;;  %v11993_v5 = vor.u32 %v14150_v31, %v11990_v57  ;;  %v12118_v42 = vld [vmem:[#allocation6 + $0x530] sm:$0xf0] }
 0x311   :  { %v5101_v44 = vadd.f32 %v5081_v37, %v5067_v28  ;;  %v12153_v37 = vor.u32 %v14190_v58, %v12150_v59  ;;  %v12470_v49 = vld [vmem:[#allocation6 + $0x7f0] sm:$0xf0] }
 0x312   :  { %v12310_v60 = vld [vmem:[#allocation6 + $0x6b0] sm:$0xf0]  ;;  %v12473_v58 = vor.u32 %v14270_v47, %v12470_v49  ;;  %v14254_v49 = vld [vmem:[#allocation6 + $0x764] sm:$0xf] }
 0x313   :  { %7213 = vmatpush.bf16.msrb.mxu0 %v11785_v21  ;;  %v5111_v16 = vmax.f32 %v5101_v44, 0.0  ;;  %v4993_v40 = vpop.f32.mrf.mxu2  ;;  %v12137_v44 = vor.u32 %v14186_v7, %v12134_v33  ;;  %v12454_v31 = vld [vmem:[#allocation6 + $0x7d0] sm:$0xf0]  ;;  %v14290_v33 = vld [vmem:[#allocation6 + $0x884] sm:$0xf] }
 0x314   :  { %7226 = vmatpush.bf16.msrb.mxu1 %v11913_v23  ;;  %v5006_v11 = vpop.f32.mrf.mxu3  ;;  %7237 = vmatpush.bf16.msrb.mxu2 %v12073_v22  ;;  %v14162_v23 = vld [vmem:[#allocation6 + $0x484] sm:$0xf]  ;;  %v12345_v40 = vor.u32 %v14238_v24, %v12342_v30  ;;  %v12294_v7 = vld [vmem:[#allocation6 + $0x690] sm:$0xf0] }
 0x315   :  { %v15041_v21 = vpack.c.bf16 %v5111_v16, %v5111_v16  ;;  %v12041_v41 = vor.u32 %v14162_v23, %v12038_v26  ;;  %v12601_v11 = vor.u32 %v14302_v34, %v12598_v36  ;;  %v12121_v26 = vor.u32 %v14182_v55, %v12118_v42  ;;  %v12438_v36 = vld [vmem:[#allocation6 + $0x7b0] sm:$0xf0] }
 0x317   :  { %7214 = vmatpush.bf16.msrb.mxu0 %v11769_v4  ;;  %7153 = vmatmul.bf16.vlgmr.msrb.gmra.mxu3 %v15041_v21  ;;  %v14158_v4 = vld [vmem:[#allocation6 + $0x464] sm:$0xf] }
 0x318   :  { %7227 = vmatpush.bf16.msrb.mxu1 %v11897_v51  ;;  %7249 = vmatpush.bf16.msrb.mxu3 %v12217_v39  ;;  %v12025_v12 = vor.u32 %v14158_v4, %v12022_v50  ;;  %v14194_v51 = vld [vmem:[#allocation6 + $0x584] sm:$0xf] }
 0x319   :  { %7238 = vmatpush.bf16.msrb.mxu2 %v12057_v43  ;;  %v12169_v46 = vor.u32 %v14194_v51, %v12166_v2  ;;  %v14234_v39 = vld [vmem:[#allocation6 + $0x6c4] sm:$0xf]  ;;  %v12326_v43 = vld [vmem:[#allocation6 + $0x6d0] sm:$0xf0] }
 0x31a   :  { %v12329_v50 = vor.u32 %v14234_v39, %v12326_v43  ;;  %v12726_v51 = vld [vmem:[#allocation6 + $0x9f0] sm:$0xf0]  ;;  %v14230_v2 = vld [vmem:[#allocation6 + $0x6a4] sm:$0xf] }
 0x31b   :  { %7215 = vmatpush.bf16.msrb.mxu0 %v11753_v52  ;;  %v12678_v39 = vld [vmem:[#allocation6 + $0x990] sm:$0xf0] }
 0x31c   :  { %7228 = vmatpush.bf16.msrb.mxu1 %v11881_v54  ;;  %7250 = vmatpush.bf16.msrb.mxu3 %v12201_v35  ;;  %v14178_v35 = vld [vmem:[#allocation6 + $0x504] sm:$0xf] }
 0x31d   :  { %7239 = vmatpush.bf16.msrb.mxu2 %v12041_v41  ;;  %v12102_v41 = vld [vmem:[#allocation6 + $0x510] sm:$0xf0] }
 0x31f   :  { %7216 = vmatpush.bf16.msrb.mxu0 %v11737_v18  ;;  %7192 = vmatmul.bf16.vlgmr.msra.gmra.mxu2 %v15008_v3  ;;  %v14146_v18 = vld [vmem:[#allocation6 + $0x404] sm:$0xf] }
 0x320   :  { %7229 = vmatpush.bf16.msrb.mxu1 %v11865_v29  ;;  %7251 = vmatpush.bf16.msrb.mxu3 %v12185_v25  ;;  %v11977_v6 = vor.u32 %v14146_v18, %v11974_v19  ;;  %v12585_v25 = vor.u32 %v14298_v48, %v12582_v38  ;;  %v12550_v18 = vld [vmem:[#allocation6 + $0x890] sm:$0xf0]  ;;  %v14282_v48 = vld [vmem:[#allocation6 + $0x844] sm:$0xf] }
 0x321   :  { %7240 = vmatpush.bf16.msrb.mxu2 %v12025_v12  ;;  %v14334_v12 = vld [vmem:[#allocation6 + $0x9e4] sm:$0xf]  ;;  %v12553_v34 = vor.u32 %v14290_v33, %v12550_v18  ;;  %v12518_v38 = vld [vmem:[#allocation6 + $0x850] sm:$0xf0] }
 0x322   :  { %v12729_v59 = vor.u32 %v14334_v12, %v12726_v51  ;;  %v12662_v12 = vld [vmem:[#allocation6 + $0x970] sm:$0xf0] }
 0x323   :  { %7217 = vmatpush.bf16.msrb.mxu0 %v11721_v27  ;;  %v5017_v52 = vpop.f32.mrf.mxu0  ;;  %v5083_v27 = vperm.slane %v5071_v1, 1  ;;  %v12486_v33 = vld [vmem:[#allocation6 + $0x810] sm:$0xf0] }
 0x324   :  { %7230 = vmatpush.bf16.msrb.mxu1 %v11849_v9  ;;  %v5030_v61 = vpop.f32.mrf.mxu1  ;;  %7252 = vmatpush.bf16.msrb.mxu3 %v12169_v46  ;;  %v12230_v18 = vld [vmem:[#allocation6 + $0x610] sm:$0xf0] }
 0x325   :  { %v5031_v54 = vadd.f32 %v5030_v61, %v5017_v52  ;;  %7241 = vmatpush.bf16.msrb.mxu2 %v12009_v63  ;;  %v12105_v52 = vor.u32 %v14178_v35, %v12102_v41  ;;  %v14266_v61 = vld [vmem:[#allocation6 + $0x7c4] sm:$0xf]  ;;  %v12262_v35 = vld [vmem:[#allocation6 + $0x650] sm:$0xf0] }
 0x326   :  { %v12457_v19 = vor.u32 %v14266_v61, %v12454_v31 }
 0x327   :  { %v5068_v0 = vmax.f32 %v14991_v62, %v5031_v54  ;;  %7205 = vmatmul.bf16.vlgmr.msra.gmra.mxu3 %v15010_v17  ;;  %v12313_v54 = vor.u32 %v14230_v2, %v12310_v60  ;;  %v14278_v60 = vld [vmem:[#allocation6 + $0x824] sm:$0xf] }
 0x328   :  { %7253 = vmatpush.bf16.msrb.mxu3 %v12153_v37  ;;  %v14330_v37 = vld [vmem:[#allocation6 + $0x9c4] sm:$0xf] }
 0x329   :  { %v5102_v28 = vadd.f32 %v5082_v8, %v5068_v0  ;;  %7242 = vmatpush.bf16.msrb.mxu2 %v11993_v5  ;;  %v12710_v0 = vld [vmem:[#allocation6 + $0x9d0] sm:$0xf0]  ;;  %v14226_v5 = vld [vmem:[#allocation6 + $0x684] sm:$0xf] }
 0x32a   :  { %v12713_v24 = vor.u32 %v14330_v37, %v12710_v0  ;;  %v12297_v30 = vor.u32 %v14226_v5, %v12294_v7  ;;  %v12646_v37 = vld [vmem:[#allocation6 + $0x950] sm:$0xf0]  ;;  %v14210_v5 = vld [vmem:[#allocation6 + $0x604] sm:$0xf] }
 0x32b   :  { %v5043_v29 = vpop.f32.mrf.mxu2  ;;  %v5112_v22 = vmax.f32 %v5102_v28, 0.0  ;;  %v5019_v62 = vpop.f32.mrf.mxu0  ;;  %v14262_v28 = vld [vmem:[#allocation6 + $0x7a4] sm:$0xf] }
 0x32c   :  { %v5056_v45 = vpop.f32.mrf.mxu3  ;;  %v5032_v16 = vpop.f32.mrf.mxu1  ;;  %7254 = vmatpush.bf16.msrb.mxu3 %v12137_v44  ;;  %v12694_v44 = vld [vmem:[#allocation6 + $0x9b0] sm:$0xf0]  ;;  %v14222_v62 = vld [vmem:[#allocation6 + $0x664] sm:$0xf]  ;;  %v12441_v55 = vor.u32 %v14262_v28, %v12438_v36  ;;  %v14049_v36 = vld [vmem:[#allocation6 + $0xf4] sm:$0xf0] }
 0x32d   :  { %v5057_v10 = vadd.f32 %v5056_v45, %v5043_v29  ;;  %v15047_v9 = vpack.c.bf16 %v5112_v22, %v5112_v22  ;;  %7243 = vmatpush.bf16.msrb.mxu2 %v11977_v6  ;;  %v14326_v29 = vld [vmem:[#allocation6 + $0x9a4] sm:$0xf]  ;;  %v12534_v45 = vld [vmem:[#allocation6 + $0x870] sm:$0xf0] }
 0x32e   :  { %v14286_v22 = vld [vmem:[#allocation6 + $0x864] sm:$0xf]  ;;  %v12278_v6 = vld [vmem:[#allocation6 + $0x670] sm:$0xf0]  ;;  %v12697_v42 = vor.u32 %v14326_v29, %v12694_v44 }
 0x32f   :  { %v5069_v23 = vmax.f32 %v14996_v20, %v5057_v10  ;;  %7166 = vmatmul.bf16.vlgmr.msra.gmra.mxu0 %v15047_v9  ;;  %v12566_v20 = vld [vmem:[#allocation6 + $0x8b0] sm:$0xf0]  ;;  %v5444_v10 = vld [vmem:[#allocation7] sm:$0xf]  ;;  %v12537_v16 = vor.u32 %v14286_v22, %v12534_v45  ;;  %v12281_v43 = vor.u32 %v14222_v62, %v12278_v6  ;;  %v14274_v7 = vld [vmem:[#allocation6 + $0x804] sm:$0xf] }
 0x330   :  { %7262 = vmatpush.bf16.msra.mxu0 %v12345_v40  ;;  %7255 = vmatpush.bf16.msrb.mxu3 %v12121_v26  ;;  %v12569_v8 = vor.u32 %v14294_v14, %v12566_v20  ;;  %v12422_v40 = vld [vmem:[#allocation6 + $0x790] sm:$0xf0]  ;;  %v14218_v26 = vld [vmem:[#allocation6 + $0x644] sm:$0xf]  ;;  %v12489_v44 = vor.u32 %v14274_v7, %v12486_v33 }
 0x331   :  { %v5103_v4 = vadd.f32 %v5083_v27, %v5069_v23  ;;  %7288 = vmatpush.bf16.msra.mxu2 %v12601_v11  ;;  %v14258_v27 = vld [vmem:[#allocation6 + $0x784] sm:$0xf]  ;;  %v5446_v23 = vperm.slane %v5444_v10, 0  ;;  %v12265_v2 = vor.u32 %v14218_v26, %v12262_v35  ;;  %v12502_v14 = vld [vmem:[#allocation6 + $0x830] sm:$0xf0] }
 0x332   :  { %7244 = vmatmul.bf16.vlgmr.msrb.gmra.mxu2 %v15027_v56  ;;  %v14322_v11 = vld [vmem:[#allocation6 + $0x984] sm:$0xf]  ;;  %v12425_v41 = vor.u32 %v14258_v27, %v12422_v40  ;;  %v12505_v31 = vor.u32 %v14278_v60, %v12502_v14  ;;  %v12374_v22 = vld [vmem:[#allocation6 + $0x730] sm:$0xf0]  ;;  %v11820_v40 = vld [vmem:[#allocation6 + $0x2c8] sm:$0xf] }
 0x333   :  { %v5113_v1 = vmax.f32 %v5103_v4, 0.0  ;;  %v5045_v46 = vpop.f32.mrf.mxu2  ;;  %v12681_v47 = vor.u32 %v14322_v11, %v12678_v39  ;;  %v12521_v4 = vor.u32 %v14282_v48, %v12518_v38  ;;  %v14246_v29 = vld [vmem:[#allocation6 + $0x724] sm:$0xf]  ;;  %v12630_v62 = vld [vmem:[#allocation6 + $0x930] sm:$0xf0] }
 0x334   :  { %v5058_v63 = vpop.f32.mrf.mxu3  ;;  %7263 = vmatpush.bf16.msra.mxu0 %v12329_v50  ;;  %7256 = vmatpush.bf16.msrb.mxu3 %v12105_v52  ;;  %v12406_v50 = vld [vmem:[#allocation6 + $0x770] sm:$0xf0]  ;;  %v14214_v46 = vld [vmem:[#allocation6 + $0x624] sm:$0xf]  ;;  %v14109_v11 = vld [vmem:[#allocation6 + $0x2d4] sm:$0xf0]  ;;  %v12377_v39 = vor.u32 %v14246_v29, %v12374_v22 }
 0x335   :  { %v15052_v57 = vpack.c.bf16 %v5113_v1, %v5113_v1  ;;  %7289 = vmatpush.bf16.msra.mxu2 %v12585_v25  ;;  %v14318_v25 = vld [vmem:[#allocation6 + $0x964] sm:$0xf]  ;;  %v12246_v52 = vld [vmem:[#allocation6 + $0x630] sm:$0xf0]  ;;  %v12409_v63 = vor.u32 %v14254_v49, %v12406_v50  ;;  %v14045_v48 = vld [vmem:[#allocation6 + $0xd4] sm:$0xf0] }
 0x336   :  { %v12249_v0 = vor.u32 %v14214_v46, %v12246_v52  ;;  %v14310_v45 = vld [vmem:[#allocation6 + $0x924] sm:$0xf]  ;;  %v12614_v35 = vld [vmem:[#allocation6 + $0x910] sm:$0xf0]  ;;  %v14081_v49 = vld [vmem:[#allocation6 + $0x1f4] sm:$0xf0] }
 0x337   :  { %7179 = vmatmul.bf16.vlgmr.msra.gmra.mxu1 %v15052_v57  ;;  %7257 = vmatmul.bf16.vlgmr.msrb.gmra.mxu3 %v15031_v32  ;;  %v14242_v38 = vld [vmem:[#allocation6 + $0x704] sm:$0xf]  ;;  %v14145_v50 = vld [vmem:[#allocation6 + $0x3f4] sm:$0xf0]  ;;  %v11548_v14 = vld [vmem:[#allocation6 + $0xa8] sm:$0xf] }
 0x338   :  { %7275 = vmatpush.bf16.msra.mxu1 %v12473_v58  ;;  %7301 = vmatpush.bf16.msra.mxu3 %v12729_v59  ;;  %v12665_v58 = vor.u32 %v14318_v25, %v12662_v12  ;;  %v14250_v59 = vld [vmem:[#allocation6 + $0x744] sm:$0xf]  ;;  %v11804_v12 = vld [vmem:[#allocation6 + $0x2a8] sm:$0xf]  ;;  %v14097_v29 = vld [vmem:[#allocation6 + $0x274] sm:$0xf0] }
 0x339   :  { %7264 = vmatpush.bf16.msra.mxu0 %v12313_v54  ;;  %7290 = vmatpush.bf16.msra.mxu2 %v12569_v8  ;;  %v12390_v54 = vld [vmem:[#allocation6 + $0x750] sm:$0xf0]  ;;  %v14314_v8 = vld [vmem:[#allocation6 + $0x944] sm:$0xf]  ;;  %v11692_v52 = vld [vmem:[#allocation6 + $0x1c8] sm:$0xf] }
 0x33a   :  { %v12393_v28 = vor.u32 %v14250_v59, %v12390_v54  ;;  %v14306_v26 = vld [vmem:[#allocation6 + $0x904] sm:$0xf]  ;;  %v11948_v59 = vld [vmem:[#allocation6 + $0x3c8] sm:$0xf]  ;;  %v14033_v22 = vld [vmem:[#allocation6 + $0x74] sm:$0xf0] }
 0x33b   :  { %v12617_v60 = vor.u32 %v14306_v26, %v12614_v35  ;;  %v11644_v35 = vld [vmem:[#allocation6 + $0x168] sm:$0xf] }
 0x33c   :  { %7276 = vmatpush.bf16.msra.mxu1 %v12457_v19  ;;  %7302 = vmatpush.bf16.msra.mxu3 %v12713_v24  ;;  %v11836_v19 = vld [vmem:[#allocation6 + $0x2e8] sm:$0xf]  ;;  %v14113_v24 = vld [vmem:[#allocation6 + $0x2f4] sm:$0xf0] }
 0x33d   :  { %7265 = vmatpush.bf16.msra.mxu0 %v12297_v30  ;;  %7291 = vmatpush.bf16.msra.mxu2 %v12553_v34  ;;  %v12649_v30 = vor.u32 %v14314_v8, %v12646_v37  ;;  %v11580_v34 = vld [vmem:[#allocation6 + $0xe8] sm:$0xf]  ;;  %v14101_v37 = vld [vmem:[#allocation6 + $0x294] sm:$0xf0] }
 0x33e   :  { %v11581_v27 = vor.u32 %v14049_v36, %v11580_v34  ;;  %v11788_v8 = vld [vmem:[#allocation6 + $0x288] sm:$0xf] }
 0x33f   :  { %7218 = vmatmul.bf16.vlgmr.msrb.gmra.mxu0 %v15017_v15  ;;  %v11772_v36 = vld [vmem:[#allocation6 + $0x268] sm:$0xf] }
 0x340   :  { %7277 = vmatpush.bf16.msra.mxu1 %v12441_v55  ;;  %7303 = vmatpush.bf16.msra.mxu3 %v12697_v42  ;;  %v12233_v55 = vor.u32 %v14210_v5, %v12230_v18  ;;  %v11837_v42 = vor.u32 %v14113_v24, %v11836_v19  ;;  %v14037_v5 = vld [vmem:[#allocation6 + $0x94] sm:$0xf0]  ;;  %v11676_v18 = vld [vmem:[#allocation6 + $0x1a8] sm:$0xf]  ;;  %v11789_v19 = vor.u32 %v14101_v37, %v11788_v8 }
 0x341   :  { %7292 = vmatpush.bf16.msra.mxu2 %v12537_v16  ;;  %7266 = vmatpush.bf16.msra.mxu0 %v12281_v43  ;;  %v11564_v16 = vld [vmem:[#allocation6 + $0xc8] sm:$0xf]  ;;  %v12633_v43 = vor.u32 %v14310_v45, %v12630_v62  ;;  %v14073_v24 = vld [vmem:[#allocation6 + $0x1b4] sm:$0xf0] }
 0x342   :  { %v11565_v25 = vor.u32 %v14045_v48, %v11564_v16  ;;  %v11677_v45 = vor.u32 %v14073_v24, %v11676_v18  ;;  %v14133_v16 = vld [vmem:[#allocation6 + $0x394] sm:$0xf0]  ;;  %v11500_v48 = vld [vmem:[#allocation6 + $0x48] sm:$0xf] }
 0x343   :  { %v7063_v51 = vpop.f32.mrf.mxu0  ;;  %v11724_v8 = vld [vmem:[#allocation6 + $0x208] sm:$0xf]  ;;  %v14085_v37 = vld [vmem:[#allocation6 + $0x214] sm:$0xf0] }
 0x344   :  { %v7064_v20 = vadd.f32 %v7063_v51, %v5446_v23  ;;  %v7076_v1 = vpop.f32.mrf.mxu1  ;;  %7278 = vmatpush.bf16.msra.mxu1 %v12425_v41  ;;  %7304 = vmatpush.bf16.msra.mxu3 %v12681_v47  ;;  %v12358_v23 = vld [vmem:[#allocation6 + $0x710] sm:$0xf0]  ;;  %v11708_v41 = vld [vmem:[#allocation6 + $0x1e8] sm:$0xf]  ;;  %v11821_v47 = vor.u32 %v14109_v11, %v11820_v40  ;;  %v14105_v51 = vld [vmem:[#allocation6 + $0x2b4] sm:$0xf0] }
 0x345   :  { %7293 = vmatpush.bf16.msra.mxu2 %v12521_v4  ;;  %7267 = vmatpush.bf16.msra.mxu0 %v12265_v2  ;;  %v11964_v4 = vld [vmem:[#allocation6 + $0x3e8] sm:$0xf]  ;;  %v12361_v2 = vor.u32 %v14242_v38, %v12358_v23  ;;  %v14029_v38 = vld [vmem:[#allocation6 + $0x54] sm:$0xf0] }
 0x346   :  { %v15057_v61 = vadd.f32 %v7076_v1, %v7064_v20  ;;  %v14041_v20 = vld [vmem:[#allocation6 + $0xb4] sm:$0xf0]  ;;  %v11709_v1 = vor.u32 %v14081_v49, %v11708_v41  ;;  %v11965_v46 = vor.u32 %v14145_v50, %v11964_v4  ;;  %v11900_v49 = vld [vmem:[#allocation6 + $0x368] sm:$0xf]  ;;  %v11501_v50 = vor.u32 %v14029_v38, %v11500_v48 }
 0x347   :  { %7231 = vmatmul.bf16.vlgmr.msrb.gmra.mxu1 %v15021_v53  ;;  %v11549_v54 = vor.u32 %v14041_v20, %v11548_v14  ;;  %v14129_v4 = vld [vmem:[#allocation6 + $0x374] sm:$0xf0]  ;;  %v11628_v20 = vld [vmem:[#allocation6 + $0x148] sm:$0xf] }
 0x348   :  { %7279 = vmatpush.bf16.msra.mxu1 %v12409_v63  ;;  %7305 = vmatpush.bf16.msra.mxu3 %v12665_v58  ;;  %v11805_v63 = vor.u32 %v14105_v51, %v11804_v12  ;;  %v14077_v58 = vld [vmem:[#allocation6 + $0x1d4] sm:$0xf0]  ;;  %v11901_v14 = vor.u32 %v14129_v4, %v11900_v49  ;;  %v12220_v48 = vld [vmem:[#allocation6 + $0x5e8] sm:$0xf] }
 0x349   :  { %7294 = vmatpush.bf16.msra.mxu2 %v12505_v31  ;;  %7268 = vmatpush.bf16.msra.mxu0 %v12249_v0  ;;  %v14141_v31 = vld [vmem:[#allocation6 + $0x3d4] sm:$0xf0]  ;;  %v11532_v0 = vld [vmem:[#allocation6 + $0x88] sm:$0xf]  ;;  %v11693_v7 = vor.u32 %v14077_v58, %v11692_v52 }
 0x34a   :  { %v11949_v33 = vor.u32 %v14141_v31, %v11948_v59  ;;  %v11533_v34 = vor.u32 %v14037_v5, %v11532_v0  ;;  %v14089_v12 = vld [vmem:[#allocation6 + $0x234] sm:$0xf0]  ;;  %v11884_v58 = vld [vmem:[#allocation6 + $0x348] sm:$0xf] }
 0x34b   :  { %v7065_v6 = vpop.f32.mrf.mxu0  ;;  %v14025_v51 = vld [vmem:[#allocation6 + $0x34] sm:$0xf0]  ;;  %v12348_v5 = vld [vmem:[#allocation6 + $0x6e8] sm:$0xf] }
 0x34c   :  { %v7078_v10 = vpop.f32.mrf.mxu1  ;;  %7280 = vmatpush.bf16.msra.mxu1 %v12393_v28  ;;  %7306 = vmatpush.bf16.msra.mxu3 %v12649_v30  ;;  %v11932_v28 = vld [vmem:[#allocation6 + $0x3a8] sm:$0xf]  ;;  %v14137_v30 = vld [vmem:[#allocation6 + $0x3b4] sm:$0xf0] }
 0x34d   :  { %7295 = vmatpush.bf16.msra.mxu2 %v12489_v44  ;;  %7269 = vmatpush.bf16.msra.mxu0 %v12233_v55  ;;  %v11516_v44 = vld [vmem:[#allocation6 + $0x68] sm:$0xf]  ;;  %v11933_v62 = vor.u32 %v14137_v30, %v11932_v28  ;;  %v14069_v10 = vld [vmem:[#allocation6 + $0x194] sm:$0xf0]  ;;  %v11725_v30 = vor.u32 %v14085_v37, %v11724_v8 }
 0x34e   :  { %v11660_v6 = vld [vmem:[#allocation6 + $0x188] sm:$0xf]  ;;  %v11517_v11 = vor.u32 %v14033_v22, %v11516_v44  ;;  %v14125_v59 = vld [vmem:[#allocation6 + $0x354] sm:$0xf0] }
 0x34f   :  { %v11661_v23 = vor.u32 %v14069_v10, %v11660_v6  ;;  %v14021_v0 = vld [vmem:[#allocation6 + $0x14] sm:$0xf0]  ;;  %v11885_v18 = vor.u32 %v14125_v59, %v11884_v58  ;;  %v11612_v28 = vld [vmem:[#allocation6 + $0x128] sm:$0xf] }
 0x350   :  { %7281 = vmatpush.bf16.msra.mxu1 %v12377_v39  ;;  %7307 = vmatpush.bf16.msra.mxu3 %v12633_v43  ;;  %v11756_v39 = vld [vmem:[#allocation6 + $0x248] sm:$0xf]  ;;  %v14093_v43 = vld [vmem:[#allocation6 + $0x254] sm:$0xf0] }
 0x351   :  { %7340 = vmatpush.bf16.msrb.mxu2 %v11837_v42  ;;  %7314 = vmatpush.bf16.msrb.mxu0 %v11581_v27  ;;  %v11773_v42 = vor.u32 %v14097_v29, %v11772_v36  ;;  %v11916_v27 = vld [vmem:[#allocation6 + $0x388] sm:$0xf]  ;;  %v11757_v41 = vor.u32 %v14093_v43, %v11756_v39  ;;  %v14177_v24 = vld [vmem:[#allocation6 + $0x4f4] sm:$0xf0] }
 0x352   :  { %7296 = vmatmul.bf16.vlgmr.msra.gmra.mxu2 %v15047_v9  ;;  %7270 = vmatmul.bf16.vlgmr.msra.gmra.mxu0 %v15037_v13  ;;  %v7089_v55 = vpop.f32.mrf.mxu2  ;;  %v11917_v26 = vor.u32 %v14133_v16, %v11916_v27  ;;  %v11868_v36 = vld [vmem:[#allocation6 + $0x328] sm:$0xf]  ;;  %v14121_v29 = vld [vmem:[#allocation6 + $0x334] sm:$0xf0] }
 0x353   :  { %v7090_v40 = vadd.f32 %v7089_v55, %v15057_v61  ;;  %v11484_v61 = vld [vmem:[#allocation6 + $0x28] sm:$0xf]  ;;  %v14237_v55 = vld [vmem:[#allocation6 + $0x6d4] sm:$0xf0]  ;;  %v11869_v27 = vor.u32 %v14121_v29, %v11868_v36 }
 0x354   :  { %7282 = vmatpush.bf16.msra.mxu1 %v12361_v2  ;;  %7308 = vmatpush.bf16.msra.mxu3 %v12617_v60  ;;  %v11485_v31 = vor.u32 %v14025_v51, %v11484_v61  ;;  %v12332_v6 = vld [vmem:[#allocation6 + $0x6c8] sm:$0xf]  ;;  %v14173_v16 = vld [vmem:[#allocation6 + $0x4d4] sm:$0xf0] }
 0x355   :  { %7341 = vmatpush.bf16.msrb.mxu2 %v11821_v47  ;;  %7315 = vmatpush.bf16.msrb.mxu0 %v11565_v25  ;;  %v14065_v47 = vld [vmem:[#allocation6 + $0x174] sm:$0xf0]  ;;  %v11740_v25 = vld [vmem:[#allocation6 + $0x228] sm:$0xf]  ;;  %v12333_v38 = vor.u32 %v14237_v55, %v12332_v6 }
 0x356   :  { %v11645_v60 = vor.u32 %v14065_v47, %v11644_v35  ;;  %v11741_v52 = vor.u32 %v14089_v12, %v11740_v25  ;;  %v11852_v39 = vld [vmem:[#allocation6 + $0x308] sm:$0xf]  ;;  %v14117_v43 = vld [vmem:[#allocation6 + $0x314] sm:$0xf0] }
 0x357   :  { %7309 = vmatmul.bf16.vlgmr.msra.gmra.mxu3 %v15052_v57  ;;  %7283 = vmatmul.bf16.vlgmr.msra.gmra.mxu1 %v15041_v21  ;;  %v14273_v35 = vld [vmem:[#allocation6 + $0x7f4] sm:$0xf0]  ;;  %v12316_v47 = vld [vmem:[#allocation6 + $0x6a8] sm:$0xf] }
 0x358   :  { %7327 = vmatpush.bf16.msrb.mxu1 %v11709_v1  ;;  %7353 = vmatpush.bf16.msrb.mxu3 %v11965_v46  ;;  %v14233_v49 = vld [vmem:[#allocation6 + $0x6b4] sm:$0xf0]  ;;  %v12060_v61 = vld [vmem:[#allocation6 + $0x4a8] sm:$0xf] }
 0x359   :  { %7342 = vmatpush.bf16.msrb.mxu2 %v11805_v63  ;;  %7316 = vmatpush.bf16.msrb.mxu0 %v11549_v54  ;;  %v14061_v63 = vld [vmem:[#allocation6 + $0x154] sm:$0xf0]  ;;  %v11468_v54 = vld [vmem:[#allocation6 + $0x8] sm:$0xf] }
 0x35a   :  { %v7091_v46 = vpop.f32.mrf.mxu2  ;;  %v11469_v44 = vor.u32 %v14021_v0, %v11468_v54  ;;  %v14169_v51 = vld [vmem:[#allocation6 + $0x4b4] sm:$0xf0]  ;;  %v12044_v8 = vld [vmem:[#allocation6 + $0x488] sm:$0xf] }
 0x35b   :  { %v7102_v2 = vpop.f32.mrf.mxu3  ;;  %v14269_v46 = vld [vmem:[#allocation6 + $0x7d4] sm:$0xf0]  ;;  %v12061_v58 = vor.u32 %v14169_v51, %v12060_v61  ;;  %v12188_v0 = vld [vmem:[#allocation6 + $0x5a8] sm:$0xf] }
 0x35c   :  { %7328 = vmatpush.bf16.msrb.mxu1 %v11693_v7  ;;  %7354 = vmatpush.bf16.msrb.mxu3 %v11949_v33  ;;  %v15065_v1 = vadd.f32 %v7102_v2, %v7090_v40  ;;  %v14241_v7 = vld [vmem:[#allocation6 + $0x6f4] sm:$0xf0]  ;;  %v11629_v33 = vor.u32 %v14061_v63, %v11628_v20  ;;  %v11596_v40 = vld [vmem:[#allocation6 + $0x108] sm:$0xf] }
 0x35d   :  { %7343 = vmatpush.bf16.msrb.mxu2 %v11789_v19  ;;  %7317 = vmatpush.bf16.msrb.mxu0 %v11533_v34  ;;  %v12092_v19 = vld [vmem:[#allocation6 + $0x4e8] sm:$0xf]  ;;  %v14057_v34 = vld [vmem:[#allocation6 + $0x134] sm:$0xf0]  ;;  %v12349_v22 = vor.u32 %v14241_v7, %v12348_v5 }
 0x35e   :  { %v11613_v10 = vor.u32 %v14057_v34, %v11612_v28  ;;  %v12204_v2 = vld [vmem:[#allocation6 + $0x5c8] sm:$0xf]  ;;  %v14229_v63 = vld [vmem:[#allocation6 + $0x694] sm:$0xf0] }
 0x35f   :  { %v12460_v20 = vld [vmem:[#allocation6 + $0x7c8] sm:$0xf]  ;;  %v14165_v37 = vld [vmem:[#allocation6 + $0x494] sm:$0xf0] }
 0x360   :  { %7329 = vmatpush.bf16.msrb.mxu1 %v11677_v45  ;;  %7355 = vmatpush.bf16.msrb.mxu3 %v11933_v62  ;;  %v12093_v45 = vor.u32 %v14177_v24, %v12092_v19  ;;  %v12076_v62 = vld [vmem:[#allocation6 + $0x4c8] sm:$0xf]  ;;  %v12461_v54 = vor.u32 %v14269_v46, %v12460_v20  ;;  %v14265_v19 = vld [vmem:[#allocation6 + $0x7b4] sm:$0xf0] }
 0x361   :  { %7344 = vmatpush.bf16.msrb.mxu2 %v11773_v42  ;;  %7318 = vmatpush.bf16.msrb.mxu0 %v11517_v11  ;;  %v14053_v11 = vld [vmem:[#allocation6 + $0x114] sm:$0xf0]  ;;  %v12284_v24 = vld [vmem:[#allocation6 + $0x668] sm:$0xf] }
 0x362   :  { %v11597_v4 = vor.u32 %v14053_v11, %v11596_v40  ;;  %v14225_v28 = vld [vmem:[#allocation6 + $0x674] sm:$0xf0]  ;;  %v12028_v29 = vld [vmem:[#allocation6 + $0x468] sm:$0xf] }
 0x363   :  { %v7104_v42 = vpop.f32.mrf.mxu3  ;;  %v14261_v6 = vld [vmem:[#allocation6 + $0x794] sm:$0xf0]  ;;  %v12268_v55 = vld [vmem:[#allocation6 + $0x648] sm:$0xf] }
 0x364   :  { %7330 = vmatpush.bf16.msrb.mxu1 %v11661_v23  ;;  %7356 = vmatpush.bf16.msrb.mxu3 %v11917_v26  ;;  %v14209_v23 = vld [vmem:[#allocation6 + $0x5f4] sm:$0xf0]  ;;  %v12476_v26 = vld [vmem:[#allocation6 + $0x7e8] sm:$0xf] }
 0x365   :  { %7345 = vmatpush.bf16.msrb.mxu2 %v11757_v41  ;;  %7319 = vmatpush.bf16.msrb.mxu0 %v11501_v50  ;;  %v12077_v41 = vor.u32 %v14173_v16, %v12076_v62  ;;  %v11853_v50 = vor.u32 %v14117_v43, %v11852_v39  ;;  %v12221_v25 = vor.u32 %v14209_v23, %v12220_v48  ;;  %v12428_v62 = vld [vmem:[#allocation6 + $0x788] sm:$0xf]  ;;  %v14221_v42 = vld [vmem:[#allocation6 + $0x654] sm:$0xf0] }
 0x366   :  { %v12477_v12 = vor.u32 %v14273_v35, %v12476_v26  ;;  %v12429_v39 = vor.u32 %v14261_v6, %v12428_v62  ;;  %v12012_v43 = vld [vmem:[#allocation6 + $0x448] sm:$0xf]  ;;  %v14157_v48 = vld [vmem:[#allocation6 + $0x454] sm:$0xf0]  ;;  %v12269_v23 = vor.u32 %v14221_v42, %v12268_v55 }
 0x367   :  { %v14193_v26 = vld [vmem:[#allocation6 + $0x574] sm:$0xf0]  ;;  %v12412_v35 = vld [vmem:[#allocation6 + $0x768] sm:$0xf] }
 0x368   :  { %7331 = vmatpush.bf16.msrb.mxu1 %v11645_v60  ;;  %7357 = vmatpush.bf16.msrb.mxu3 %v11901_v14  ;;  %v12317_v60 = vor.u32 %v14233_v49, %v12316_v47  ;;  %v14205_v14 = vld [vmem:[#allocation6 + $0x5d4] sm:$0xf0]  ;;  %v12252_v47 = vld [vmem:[#allocation6 + $0x628] sm:$0xf] }
 0x369   :  { %7346 = vmatpush.bf16.msrb.mxu2 %v11741_v52  ;;  %7320 = vmatpush.bf16.msrb.mxu0 %v11485_v31  ;;  %v12300_v52 = vld [vmem:[#allocation6 + $0x688] sm:$0xf]  ;;  %v12205_v31 = vor.u32 %v14205_v14, %v12204_v2  ;;  %v14217_v49 = vld [vmem:[#allocation6 + $0x634] sm:$0xf0] }
 0x36a   :  { %v12301_v7 = vor.u32 %v14229_v63, %v12300_v52  ;;  %v14153_v61 = vld [vmem:[#allocation6 + $0x434] sm:$0xf0]  ;;  %v12140_v51 = vld [vmem:[#allocation6 + $0x548] sm:$0xf]  ;;  %v12253_v2 = vor.u32 %v14217_v49, %v12252_v47 }
 0x36b   :  { %v12396_v14 = vld [vmem:[#allocation6 + $0x748] sm:$0xf]  ;;  %v14253_v20 = vld [vmem:[#allocation6 + $0x754] sm:$0xf0] }
 0x36c   :  { %7332 = vmatpush.bf16.msrb.mxu1 %v11629_v33  ;;  %7358 = vmatpush.bf16.msrb.mxu3 %v11885_v18  ;;  %v14201_v33 = vld [vmem:[#allocation6 + $0x5b4] sm:$0xf0]  ;;  %v12444_v18 = vld [vmem:[#allocation6 + $0x7a8] sm:$0xf] }
 0x36d   :  { %7347 = vmatpush.bf16.msrb.mxu2 %v11725_v30  ;;  %7321 = vmatpush.bf16.msrb.mxu0 %v11469_v44  ;;  %v7115_v59 = vpop.f32.mrf.mxu0  ;;  %v12045_v30 = vor.u32 %v14165_v37, %v12044_v8  ;;  %v12189_v34 = vor.u32 %v14201_v33, %v12188_v0  ;;  %v12445_v36 = vor.u32 %v14265_v19, %v12444_v18  ;;  %v14161_v44 = vld [vmem:[#allocation6 + $0x474] sm:$0xf0]  ;;  %v12236_v46 = vld [vmem:[#allocation6 + $0x608] sm:$0xf] }
 0x36e   :  { %v7116_v5 = vadd.f32 %v7115_v59, %v15065_v1  ;;  %v12285_v1 = vor.u32 %v14225_v28, %v12284_v24  ;;  %v14213_v52 = vld [vmem:[#allocation6 + $0x614] sm:$0xf0]  ;;  %v14047_v59 = vld [vmem:[#allocation6 + $0xec] sm:$0xf]  ;;  %v12397_v8 = vor.u32 %v14253_v20, %v12396_v14  ;;  %v11980_v37 = vld [vmem:[#allocation6 + $0x408] sm:$0xf] }
 0x36f   :  { %v14149_v0 = vld [vmem:[#allocation6 + $0x414] sm:$0xf0]  ;;  %v12124_v18 = vld [vmem:[#allocation6 + $0x528] sm:$0xf] }
 0x370   :  { %7333 = vmatpush.bf16.msrb.mxu1 %v11613_v10  ;;  %7359 = vmatpush.bf16.msrb.mxu3 %v11869_v27  ;;  %v12029_v27 = vor.u32 %v14161_v44, %v12028_v29  ;;  %v14305_v33 = vld [vmem:[#allocation6 + $0x8f4] sm:$0xf0]  ;;  %v12380_v28 = vld [vmem:[#allocation6 + $0x728] sm:$0xf]  ;;  %v11566_v29 = vld [vmem:[#allocation6 + $0xd8] sm:$0xf0] }
 0x371   :  { %7392 = vmatpush.bf16.msra.mxu2 %v12349_v22  ;;  %7366 = vmatpush.bf16.msra.mxu0 %v12093_v45  ;;  %v12172_v22 = vld [vmem:[#allocation6 + $0x588] sm:$0xf]  ;;  %v14197_v45 = vld [vmem:[#allocation6 + $0x594] sm:$0xf0] }
 0x372   :  { %7322 = vmatmul.bf16.vlgmr.msrb.gmra.mxu0 %v15008_v3  ;;  %7348 = vmatmul.bf16.vlgmr.msrb.gmra.mxu2 %v15017_v15  ;;  %v12173_v11 = vor.u32 %v14197_v45, %v12172_v22  ;;  %v14185_v19 = vld [vmem:[#allocation6 + $0x534] sm:$0xf0]  ;;  %v12108_v62 = vld [vmem:[#allocation6 + $0x508] sm:$0xf] }
 0x373   :  { %v12125_v22 = vor.u32 %v14185_v19, %v12124_v18  ;;  %v14301_v45 = vld [vmem:[#allocation6 + $0x8d4] sm:$0xf0]  ;;  %v12364_v42 = vld [vmem:[#allocation6 + $0x708] sm:$0xf] }
 0x374   :  { %7334 = vmatpush.bf16.msrb.mxu1 %v11597_v4  ;;  %7360 = vmatpush.bf16.msrb.mxu3 %v11853_v50  ;;  %v12013_v4 = vor.u32 %v14157_v48, %v12012_v43  ;;  %v14181_v55 = vld [vmem:[#allocation6 + $0x514] sm:$0xf0]  ;;  %v11710_v43 = vld [vmem:[#allocation6 + $0x1f8] sm:$0xf0]  ;;  %v14039_v48 = vld [vmem:[#allocation6 + $0xac] sm:$0xf] }
 0x375   :  { %7393 = vmatpush.bf16.msra.mxu2 %v12333_v38  ;;  %7367 = vmatpush.bf16.msra.mxu0 %v12077_v41  ;;  %v7117_v40 = vpop.f32.mrf.mxu0  ;;  %v12156_v38 = vld [vmem:[#allocation6 + $0x568] sm:$0xf]  ;;  %v14257_v41 = vld [vmem:[#allocation6 + $0x774] sm:$0xf0] }
 0x376   :  { %v7128_v10 = vpop.f32.mrf.mxu1  ;;  %v12157_v50 = vor.u32 %v14193_v26, %v12156_v38  ;;  %v12732_v40 = vld [vmem:[#allocation6 + $0x9e8] sm:$0xf]  ;;  %v11550_v38 = vld [vmem:[#allocation6 + $0xb8] sm:$0xf0]  ;;  %v12109_v26 = vor.u32 %v14181_v55, %v12108_v62  ;;  %v14297_v49 = vld [vmem:[#allocation6 + $0x8b4] sm:$0xf0] }
 0x377   :  { %7335 = vmatmul.bf16.vlgmr.msrb.gmra.mxu1 %v15010_v17  ;;  %7361 = vmatmul.bf16.vlgmr.msrb.gmra.mxu3 %v15021_v53  ;;  %v15072_v16 = vadd.f32 %v7128_v10, %v7116_v5  ;;  %v12604_v5 = vld [vmem:[#allocation6 + $0x8e8] sm:$0xf]  ;;  %v14245_v10 = vld [vmem:[#allocation6 + $0x714] sm:$0xf0] }
 0x378   :  { %7379 = vmatpush.bf16.msra.mxu1 %v12221_v25  ;;  %7405 = vmatpush.bf16.msra.mxu3 %v12477_v12  ;;  %v12413_v25 = vor.u32 %v14257_v41, %v12412_v35  ;;  %v11996_v12 = vld [vmem:[#allocation6 + $0x428] sm:$0xf]  ;;  %v12605_v44 = vor.u32 %v14305_v33, %v12604_v5  ;;  %v12365_v35 = vor.u32 %v14245_v10, %v12364_v42  ;;  %v14289_v18 = vld [vmem:[#allocation6 + $0x874] sm:$0xf0] }
 0x379   :  { %7394 = vmatpush.bf16.msra.mxu2 %v12317_v60  ;;  %7368 = vmatpush.bf16.msra.mxu0 %v12061_v58  ;;  %v14189_v60 = vld [vmem:[#allocation6 + $0x554] sm:$0xf0]  ;;  %v11997_v58 = vor.u32 %v14153_v61, %v11996_v12  ;;  %v12572_v47 = vld [vmem:[#allocation6 + $0x8a8] sm:$0xf]  ;;  %v14075_v61 = vld [vmem:[#allocation6 + $0x1cc] sm:$0xf] }
 0x37a   :  { %v14333_v12 = vld [vmem:[#allocation6 + $0x9d4] sm:$0xf0]  ;;  %v12573_v14 = vor.u32 %v14297_v49, %v12572_v47  ;;  %v12540_v33 = vld [vmem:[#allocation6 + $0x868] sm:$0xf] }
 0x37b   :  { %v14285_v55 = vld [vmem:[#allocation6 + $0x854] sm:$0xf0]  ;;  %v12652_v47 = vld [vmem:[#allocation6 + $0x948] sm:$0xf] }
 0x37c   :  { %7380 = vmatpush.bf16.msra.mxu1 %v12205_v31  ;;  %7406 = vmatpush.bf16.msra.mxu3 %v12461_v54  ;;  %v11582_v31 = vld [vmem:[#allocation6 + $0xf8] sm:$0xf0]  ;;  %v12141_v54 = vor.u32 %v14189_v60, %v12140_v51  ;;  %v14317_v49 = vld [vmem:[#allocation6 + $0x954] sm:$0xf0] }
 0x37d   :  { %7395 = vmatpush.bf16.msra.mxu2 %v12301_v7  ;;  %7369 = vmatpush.bf16.msra.mxu0 %v12045_v30  ;;  %v12237_v7 = vor.u32 %v14213_v52, %v12236_v46  ;;  %v11585_v24 = vor.u32 %v14047_v59, %v11582_v31  ;;  %v14249_v30 = vld [vmem:[#allocation6 + $0x734] sm:$0xf0]  ;;  %v11694_v51 = vld [vmem:[#allocation6 + $0x1d8] sm:$0xf0]  ;;  %v12556_v46 = vld [vmem:[#allocation6 + $0x888] sm:$0xf] }
 0x37e   :  { %v7130_v63 = vpop.f32.mrf.mxu1  ;;  %v12381_v6 = vor.u32 %v14249_v30, %v12380_v28  ;;  %v11534_v60 = vld [vmem:[#allocation6 + $0x98] sm:$0xf0]  ;;  %v14293_v52 = vld [vmem:[#allocation6 + $0x894] sm:$0xf0]  ;;  %v12700_v59 = vld [vmem:[#allocation6 + $0x9a8] sm:$0xf] }
 0x37f   :  { %v11697_v63 = vor.u32 %v14075_v61, %v11694_v51  ;;  %v14329_v31 = vld [vmem:[#allocation6 + $0x9b4] sm:$0xf0]  ;;  %v12557_v5 = vor.u32 %v14293_v52, %v12556_v46  ;;  %v12684_v28 = vld [vmem:[#allocation6 + $0x988] sm:$0xf]  ;;  %v11470_v61 = vld [vmem:[#allocation6 + $0x18] sm:$0xf0]  ;;  %v12653_v46 = vor.u32 %v14317_v49, %v12652_v47 }
 0x380   :  { %7381 = vmatpush.bf16.msra.mxu1 %v12189_v34  ;;  %7407 = vmatpush.bf16.msra.mxu3 %v12445_v36  ;;  %v11981_v34 = vor.u32 %v14149_v0, %v11980_v37  ;;  %v14043_v36 = vld [vmem:[#allocation6 + $0xcc] sm:$0xf]  ;;  %v11518_v0 = vld [vmem:[#allocation6 + $0x78] sm:$0xf0]  ;;  %v14325_v30 = vld [vmem:[#allocation6 + $0x994] sm:$0xf0] }
 0x381   :  { %7396 = vmatpush.bf16.msra.mxu2 %v12285_v1  ;;  %7370 = vmatpush.bf16.msra.mxu0 %v12029_v27  ;;  %v12588_v1 = vld [vmem:[#allocation6 + $0x8c8] sm:$0xf]  ;;  %v11569_v27 = vor.u32 %v14043_v36, %v11566_v29  ;;  %v14031_v37 = vld [vmem:[#allocation6 + $0x6c] sm:$0xf]  ;;  %v11662_v36 = vld [vmem:[#allocation6 + $0x198] sm:$0xf0]  ;;  %v12685_v62 = vor.u32 %v14325_v30, %v12684_v28 }
 0x382   :  { %v14027_v29 = vld [vmem:[#allocation6 + $0x4c] sm:$0xf]  ;;  %v12492_v52 = vld [vmem:[#allocation6 + $0x808] sm:$0xf] }
 0x383   :  { %v14107_v30 = vld [vmem:[#allocation6 + $0x2cc] sm:$0xf] }
 0x384   :  { %7382 = vmatpush.bf16.msra.mxu1 %v12173_v11  ;;  %7408 = vmatpush.bf16.msra.mxu3 %v12429_v39  ;;  %v14337_v11 = vld [vmem:[#allocation6 + $0x9f4] sm:$0xf0]  ;;  %v14079_v39 = vld [vmem:[#allocation6 + $0x1ec] sm:$0xf] }
 0x385   :  { %7397 = vmatpush.bf16.msra.mxu2 %v12269_v23  ;;  %7371 = vmatpush.bf16.msra.mxu0 %v12013_v4  ;;  %v12589_v23 = vor.u32 %v14301_v45, %v12588_v1  ;;  %v12733_v41 = vor.u32 %v14337_v11, %v12732_v40  ;;  %v11713_v4 = vor.u32 %v14079_v39, %v11710_v43  ;;  %v14321_v40 = vld [vmem:[#allocation6 + $0x974] sm:$0xf0]  ;;  %v14063_v11 = vld [vmem:[#allocation6 + $0x16c] sm:$0xf]  ;;  %v11646_v39 = vld [vmem:[#allocation6 + $0x178] sm:$0xf0] }
 0x386   :  { %v12541_v1 = vor.u32 %v14289_v18, %v12540_v33  ;;  %v14023_v43 = vld [vmem:[#allocation6 + $0x2c] sm:$0xf] }
 0x387   :  { %v14171_v18 = vld [vmem:[#allocation6 + $0x4cc] sm:$0xf] }
 0x388   :  { %7383 = vmatpush.bf16.msra.mxu1 %v12157_v50  ;;  %7409 = vmatpush.bf16.msra.mxu3 %v12413_v25  ;;  %v11553_v50 = vor.u32 %v14039_v48, %v11550_v38  ;;  %v12716_v25 = vld [vmem:[#allocation6 + $0x9c8] sm:$0xf]  ;;  %v11486_v48 = vld [vmem:[#allocation6 + $0x38] sm:$0xf0]  ;;  %v14139_v49 = vld [vmem:[#allocation6 + $0x3cc] sm:$0xf] }
 0x389   :  { %7398 = vmatpush.bf16.msra.mxu2 %v12253_v2  ;;  %7372 = vmatpush.bf16.msra.mxu0 %v11997_v58  ;;  %v14035_v2 = vld [vmem:[#allocation6 + $0x8c] sm:$0xf]  ;;  %v12717_v20 = vor.u32 %v14333_v12, %v12716_v25  ;;  %v11630_v25 = vld [vmem:[#allocation6 + $0x158] sm:$0xf0] }
 0x38a   :  { %v11537_v58 = vor.u32 %v14035_v2, %v11534_v60  ;;  %v14019_v12 = vld [vmem:[#allocation6 + $0xc] sm:$0xf] }
 0x38c   :  { %7384 = vmatpush.bf16.msra.mxu1 %v12141_v54  ;;  %7410 = vmatpush.bf16.msra.mxu3 %v12397_v8  ;;  %v14071_v54 = vld [vmem:[#allocation6 + $0x1ac] sm:$0xf]  ;;  %v11678_v8 = vld [vmem:[#allocation6 + $0x1b8] sm:$0xf0] }
 0x38d   :  { %7399 = vmatpush.bf16.msra.mxu2 %v12237_v7  ;;  %7373 = vmatpush.bf16.msra.mxu0 %v11981_v34  ;;  %v12701_v7 = vor.u32 %v14329_v31, %v12700_v59  ;;  %v11681_v19 = vor.u32 %v14071_v54, %v11678_v8  ;;  %v14067_v34 = vld [vmem:[#allocation6 + $0x18c] sm:$0xf]  ;;  %v11473_v31 = vor.u32 %v14019_v12, %v11470_v61  ;;  %v11838_v54 = vld [vmem:[#allocation6 + $0x2f8] sm:$0xf0]  ;;  %v12636_v8 = vld [vmem:[#allocation6 + $0x928] sm:$0xf] }
 0x38e   :  { %v11665_v42 = vor.u32 %v14067_v34, %v11662_v36  ;;  %v11822_v34 = vld [vmem:[#allocation6 + $0x2d8] sm:$0xf0]  ;;  %v12620_v36 = vld [vmem:[#allocation6 + $0x908] sm:$0xf]  ;;  %v14163_v12 = vld [vmem:[#allocation6 + $0x48c] sm:$0xf] }
 0x38f   :  { %v12046_v61 = vld [vmem:[#allocation6 + $0x498] sm:$0xf0] }
 0x390   :  { %7385 = vmatpush.bf16.msra.mxu1 %v12125_v22  ;;  %7411 = vmatpush.bf16.msra.mxu3 %v12381_v6  ;;  %v12524_v6 = vld [vmem:[#allocation6 + $0x848] sm:$0xf] }
 0x391   :  { %7444 = vmatpush.bf16.msrb.mxu2 %v11585_v24  ;;  %7418 = vmatpush.bf16.msrb.mxu0 %v12605_v44  ;;  %v11521_v24 = vor.u32 %v14031_v37, %v11518_v0  ;;  %v11502_v44 = vld [vmem:[#allocation6 + $0x58] sm:$0xf0]  ;;  %v12525_v38 = vor.u32 %v14285_v55, %v12524_v6  ;;  %v14313_v37 = vld [vmem:[#allocation6 + $0x934] sm:$0xf0]  ;;  %v14143_v6 = vld [vmem:[#allocation6 + $0x3ec] sm:$0xf] }
 0x392   :  { %7400 = vmatmul.bf16.vlgmr.msra.gmra.mxu2 %v15037_v13  ;;  %7374 = vmatmul.bf16.vlgmr.msra.gmra.mxu0 %v15027_v56  ;;  %v7141_v22 = vpop.f32.mrf.mxu2  ;;  %v11505_v10 = vor.u32 %v14027_v29, %v11502_v44  ;;  %v12637_v28 = vor.u32 %v14313_v37, %v12636_v8  ;;  %v14309_v44 = vld [vmem:[#allocation6 + $0x914] sm:$0xf0]  ;;  %v11966_v55 = vld [vmem:[#allocation6 + $0x3f8] sm:$0xf0] }
 0x393   :  { %v7142_v45 = vadd.f32 %v7141_v22, %v15072_v16  ;;  %v11649_v16 = vor.u32 %v14063_v11, %v11646_v39  ;;  %v14051_v22 = vld [vmem:[#allocation6 + $0x10c] sm:$0xf]  ;;  %v12062_v11 = vld [vmem:[#allocation6 + $0x4b8] sm:$0xf0]  ;;  %v11825_v39 = vor.u32 %v14107_v30, %v11822_v34 }
 0x394   :  { %7386 = vmatpush.bf16.msra.mxu1 %v12109_v26  ;;  %7412 = vmatpush.bf16.msra.mxu3 %v12365_v35  ;;  %v12508_v26 = vld [vmem:[#allocation6 + $0x828] sm:$0xf]  ;;  %v14281_v35 = vld [vmem:[#allocation6 + $0x834] sm:$0xf0] }
 0x395   :  { %7445 = vmatpush.bf16.msrb.mxu2 %v11569_v27  ;;  %7419 = vmatpush.bf16.msrb.mxu0 %v12589_v23  ;;  %v12668_v27 = vld [vmem:[#allocation6 + $0x968] sm:$0xf]  ;;  %v12509_v60 = vor.u32 %v14281_v35, %v12508_v26  ;;  %v11969_v26 = vor.u32 %v14143_v6, %v11966_v55  ;;  %v14103_v35 = vld [vmem:[#allocation6 + $0x2ac] sm:$0xf]  ;;  %v11758_v55 = vld [vmem:[#allocation6 + $0x258] sm:$0xf0] }
 0x396   :  { %v12669_v23 = vor.u32 %v14321_v40, %v12668_v27  ;;  %v12222_v27 = vld [vmem:[#allocation6 + $0x5f8] sm:$0xf0]  ;;  %v14167_v40 = vld [vmem:[#allocation6 + $0x4ac] sm:$0xf] }
 0x397   :  { %7387 = vmatmul.bf16.vlgmr.msra.gmra.mxu1 %v15031_v32  ;;  %7413 = vmatmul.bf16.vlgmr.msra.gmra.mxu3 %v15041_v21  ;;  %v12065_v47 = vor.u32 %v14167_v40, %v12062_v11  ;;  %v14091_v6 = vld [vmem:[#allocation6 + $0x24c] sm:$0xf] }
 0x398   :  { %7431 = vmatpush.bf16.msrb.mxu1 %v12733_v41  ;;  %7457 = vmatpush.bf16.msrb.mxu3 %v11713_v4  ;;  %v11489_v41 = vor.u32 %v14023_v43, %v11486_v48  ;;  %v14059_v4 = vld [vmem:[#allocation6 + $0x14c] sm:$0xf]  ;;  %v12621_v43 = vor.u32 %v14309_v44, %v12620_v36  ;;  %v15081_v48 = vld [vmem:[#allocation7] sm:$0xf] }
 0x399   :  { %7446 = vmatpush.bf16.msrb.mxu2 %v11553_v50  ;;  %7420 = vmatpush.bf16.msrb.mxu0 %v12573_v14  ;;  %v14175_v14 = vld [vmem:[#allocation6 + $0x4ec] sm:$0xf]  ;;  %v11633_v59 = vor.u32 %v14059_v4, %v11630_v25  ;;  %v11950_v4 = vld [vmem:[#allocation6 + $0x3d8] sm:$0xf0] }
 0x39a   :  { %v7154_v50 = vpop.f32.mrf.mxu3  ;;  %v7143_v2 = vpop.f32.mrf.mxu2  ;;  %v12206_v25 = vld [vmem:[#allocation6 + $0x5d8] sm:$0xf0]  ;;  %v14131_v36 = vld [vmem:[#allocation6 + $0x38c] sm:$0xf] }
 0x39b   :  { %v15079_v51 = vadd.f32 %v7154_v50, %v7142_v45  ;;  %v14203_v50 = vld [vmem:[#allocation6 + $0x5cc] sm:$0xf] }
 0x39c   :  { %7432 = vmatpush.bf16.msrb.mxu1 %v12717_v20  ;;  %7458 = vmatpush.bf16.msrb.mxu3 %v11697_v63  ;;  %v12094_v20 = vld [vmem:[#allocation6 + $0x4f8] sm:$0xf0]  ;;  %v14277_v63 = vld [vmem:[#allocation6 + $0x814] sm:$0xf0]  ;;  %v14195_v44 = vld [vmem:[#allocation6 + $0x58c] sm:$0xf] }
 0x39d   :  { %7447 = vmatpush.bf16.msrb.mxu2 %v11537_v58  ;;  %7421 = vmatpush.bf16.msrb.mxu0 %v12557_v5  ;;  %v14111_v58 = vld [vmem:[#allocation6 + $0x2ec] sm:$0xf]  ;;  %v12097_v0 = vor.u32 %v14175_v14, %v12094_v20  ;;  %v12493_v33 = vor.u32 %v14277_v63, %v12492_v52  ;;  %v11790_v20 = vld [vmem:[#allocation6 + $0x298] sm:$0xf0]  ;;  %v12209_v63 = vor.u32 %v14203_v50, %v12206_v25 }
 0x39e   :  { %v14055_v5 = vld [vmem:[#allocation6 + $0x12c] sm:$0xf] }
 0x39f   :  { %v14099_v14 = vld [vmem:[#allocation6 + $0x28c] sm:$0xf] }
 0x3a0   :  { %7433 = vmatpush.bf16.msrb.mxu1 %v12701_v7  ;;  %7459 = vmatpush.bf16.msrb.mxu3 %v11681_v19  ;;  %v11614_v7 = vld [vmem:[#allocation6 + $0x138] sm:$0xf0] }
 0x3a1   :  { %7448 = vmatpush.bf16.msrb.mxu2 %v11521_v24  ;;  %7422 = vmatpush.bf16.msrb.mxu0 %v12541_v1  ;;  %v12078_v19 = vld [vmem:[#allocation6 + $0x4d8] sm:$0xf0]  ;;  %v11841_v24 = vor.u32 %v14111_v58, %v11838_v54  ;;  %v11617_v29 = vor.u32 %v14055_v5, %v11614_v7  ;;  %v12049_v58 = vor.u32 %v14163_v12, %v12046_v61  ;;  %v14199_v54 = vld [vmem:[#allocation6 + $0x5ac] sm:$0xf] }
 0x3a2   :  { %v11598_v1 = vld [vmem:[#allocation6 + $0x118] sm:$0xf0]  ;;  %v7156_v45 = vpop.f32.mrf.mxu3  ;;  %v14159_v7 = vld [vmem:[#allocation6 + $0x46c] sm:$0xf] }
 0x3a3   :  { %v12190_v5 = vld [vmem:[#allocation6 + $0x5b8] sm:$0xf0]  ;;  %v14123_v12 = vld [vmem:[#allocation6 + $0x34c] sm:$0xf] }
 0x3a4   :  { %7434 = vmatpush.bf16.msrb.mxu1 %v12685_v62  ;;  %7460 = vmatpush.bf16.msrb.mxu3 %v11665_v42  ;;  %v12081_v62 = vor.u32 %v14171_v18, %v12078_v19  ;;  %v14207_v42 = vld [vmem:[#allocation6 + $0x5ec] sm:$0xf]  ;;  %v11793_v18 = vor.u32 %v14099_v14, %v11790_v20  ;;  %v12193_v30 = vor.u32 %v14199_v54, %v12190_v5  ;;  %v11886_v61 = vld [vmem:[#allocation6 + $0x358] sm:$0xf0] }
 0x3a5   :  { %7449 = vmatpush.bf16.msrb.mxu2 %v11505_v10  ;;  %7423 = vmatpush.bf16.msrb.mxu0 %v12525_v38  ;;  %v7193_v10 = vpop.f32.mrf.mxu2  ;;  %v5447_v38 = vperm.slane %v15081_v48, 1  ;;  %v11982_v14 = vld [vmem:[#allocation6 + $0x418] sm:$0xf0]  ;;  %v14239_v54 = vld [vmem:[#allocation6 + $0x6ec] sm:$0xf] }
 0x3a8   :  { %7435 = vmatpush.bf16.msrb.mxu1 %v12669_v23  ;;  %7461 = vmatpush.bf16.msrb.mxu3 %v11649_v16  ;;  %v11601_v23 = vor.u32 %v14051_v22, %v11598_v1  ;;  %v11806_v16 = vld [vmem:[#allocation6 + $0x2b8] sm:$0xf0]  ;;  %v14155_v22 = vld [vmem:[#allocation6 + $0x44c] sm:$0xf] }
 0x3a9   :  { %7450 = vmatpush.bf16.msrb.mxu2 %v11489_v41  ;;  %7424 = vmatpush.bf16.msrb.mxu0 %v12509_v60  ;;  %v12225_v41 = vor.u32 %v14207_v42, %v12222_v27  ;;  %v11809_v2 = vor.u32 %v14103_v35, %v11806_v16  ;;  %v7194_v60 = vadd.f32 %v7193_v10, %v5447_v38  ;;  %v12014_v1 = vld [vmem:[#allocation6 + $0x458] sm:$0xf0]  ;;  %v14191_v38 = vld [vmem:[#allocation6 + $0x56c] sm:$0xf] }
 0x3aa   :  { %v12017_v11 = vor.u32 %v14155_v22, %v12014_v1  ;;  %v14151_v35 = vld [vmem:[#allocation6 + $0x42c] sm:$0xf]  ;;  %v11998_v16 = vld [vmem:[#allocation6 + $0x438] sm:$0xf0] }
 0x3ab   :  { %v12001_v25 = vor.u32 %v14151_v35, %v11998_v16  ;;  %v14235_v1 = vld [vmem:[#allocation6 + $0x6cc] sm:$0xf] }
 0x3ac   :  { %7436 = vmatpush.bf16.msrb.mxu1 %v12653_v46  ;;  %7462 = vmatpush.bf16.msrb.mxu3 %v11633_v59  ;;  %v7206_v46 = vpop.f32.mrf.mxu3  ;;  %v7167_v52 = vpop.f32.mrf.mxu0  ;;  %v14135_v59 = vld [vmem:[#allocation6 + $0x3ac] sm:$0xf] }
 0x3ad   :  { %7451 = vmatpush.bf16.msrb.mxu2 %v11473_v31  ;;  %7425 = vmatpush.bf16.msrb.mxu0 %v12493_v33  ;;  %v11934_v31 = vld [vmem:[#allocation6 + $0x3b8] sm:$0xf0]  ;;  %v15086_v8 = vadd.f32 %v7206_v46, %v7194_v60  ;;  %v7168_v37 = vadd.f32 %v7167_v52, %v15079_v51  ;;  %v14303_v46 = vld [vmem:[#allocation6 + $0x8ec] sm:$0xf] }
 0x3ae   :  { %v12030_v33 = vld [vmem:[#allocation6 + $0x478] sm:$0xf0]  ;;  %v11937_v19 = vor.u32 %v14135_v59, %v11934_v31  ;;  %v14083_v59 = vld [vmem:[#allocation6 + $0x20c] sm:$0xf] }
 0x3af   :  { %v12033_v34 = vor.u32 %v14159_v7, %v12030_v33  ;;  %v12174_v51 = vld [vmem:[#allocation6 + $0x598] sm:$0xf0]  ;;  %v14119_v33 = vld [vmem:[#allocation6 + $0x32c] sm:$0xf] }
 0x3b0   :  { %7437 = vmatpush.bf16.msrb.mxu1 %v12637_v28  ;;  %7463 = vmatpush.bf16.msrb.mxu3 %v11617_v29  ;;  %v11774_v28 = vld [vmem:[#allocation6 + $0x278] sm:$0xf0]  ;;  %v12177_v40 = vor.u32 %v14195_v44, %v12174_v51 }
 0x3b1   :  { %7496 = vmatpush.bf16.msra.mxu2 %v12097_v0  ;;  %7470 = vmatpush.bf16.msra.mxu0 %v11841_v24  ;;  %v7195_v0 = vpop.f32.mrf.mxu2  ;;  %v14095_v24 = vld [vmem:[#allocation6 + $0x26c] sm:$0xf]  ;;  %v11918_v29 = vld [vmem:[#allocation6 + $0x398] sm:$0xf0] }
 0x3b2   :  { %7452 = vmatmul.bf16.vlgmr.msrb.gmra.mxu2 %v15008_v3  ;;  %7426 = vmatmul.bf16.vlgmr.msrb.gmra.mxu0 %v15047_v9  ;;  %v11953_v3 = vor.u32 %v14139_v49, %v11950_v4  ;;  %v11777_v45 = vor.u32 %v14095_v24, %v11774_v28  ;;  %v14087_v49 = vld [vmem:[#allocation6 + $0x22c] sm:$0xf]  ;;  %v11742_v4 = vld [vmem:[#allocation6 + $0x238] sm:$0xf0] }
 0x3b3   :  { %v12142_v60 = vld [vmem:[#allocation6 + $0x558] sm:$0xf0]  ;;  %v11745_v20 = vor.u32 %v14087_v49, %v11742_v4 }
 0x3b4   :  { %7438 = vmatpush.bf16.msrb.mxu1 %v12621_v43  ;;  %7464 = vmatpush.bf16.msrb.mxu3 %v11601_v23  ;;  %v7208_v10 = vpop.f32.mrf.mxu3  ;;  %v7169_v27 = vpop.f32.mrf.mxu0  ;;  %v11902_v43 = vld [vmem:[#allocation6 + $0x378] sm:$0xf0] }
 0x3b5   :  { %7497 = vmatpush.bf16.msra.mxu2 %v12081_v62  ;;  %7471 = vmatpush.bf16.msra.mxu0 %v11825_v39  ;;  %v11921_v62 = vor.u32 %v14131_v36, %v11918_v29  ;;  %v14127_v39 = vld [vmem:[#allocation6 + $0x36c] sm:$0xf]  ;;  %v12606_v52 = vld [vmem:[#allocation6 + $0x8f8] sm:$0xf0] }
 0x3b6   :  { %v11726_v31 = vld [vmem:[#allocation6 + $0x218] sm:$0xf0]  ;;  %v12609_v28 = vor.u32 %v14303_v46, %v12606_v52  ;;  %v14299_v29 = vld [vmem:[#allocation6 + $0x8cc] sm:$0xf] }
 0x3b7   :  { %7439 = vmatmul.bf16.vlgmr.msrb.gmra.mxu1 %v15052_v57  ;;  %7465 = vmatmul.bf16.vlgmr.msrb.gmra.mxu3 %v15010_v17  ;;  %v7180_v17 = vpop.f32.mrf.mxu1  ;;  %v12350_v7 = vld [vmem:[#allocation6 + $0x6f8] sm:$0xf0]  ;;  %v11729_v36 = vor.u32 %v14083_v59, %v11726_v31  ;;  %v14291_v46 = vld [vmem:[#allocation6 + $0x88c] sm:$0xf] }
 0x3b8   :  { %7483 = vmatpush.bf16.msra.mxu1 %v11969_v26  ;;  %7509 = vmatpush.bf16.msra.mxu3 %v12225_v41  ;;  %v15091_v42 = vadd.f32 %v7180_v17, %v7168_v37  ;;  %v12158_v26 = vld [vmem:[#allocation6 + $0x578] sm:$0xf0]  ;;  %v11761_v41 = vor.u32 %v14091_v6, %v11758_v55  ;;  %v12353_v51 = vor.u32 %v14239_v54, %v12350_v7  ;;  %v14115_v17 = vld [vmem:[#allocation6 + $0x30c] sm:$0xf] }
 0x3b9   :  { %7498 = vmatpush.bf16.msra.mxu2 %v12065_v47  ;;  %7472 = vmatpush.bf16.msra.mxu0 %v11809_v2  ;;  %v15093_v23 = vpop.f32.mrf.mxu2  ;;  %v11905_v47 = vor.u32 %v14127_v39, %v11902_v43  ;;  %v12161_v50 = vor.u32 %v14191_v38, %v12158_v26  ;;  %v14187_v2 = vld [vmem:[#allocation6 + $0x54c] sm:$0xf]  ;;  %v12590_v44 = vld [vmem:[#allocation6 + $0x8d8] sm:$0xf0] }
 0x3ba   :  { %v12145_v0 = vor.u32 %v14187_v2, %v12142_v60  ;;  %v11854_v6 = vld [vmem:[#allocation6 + $0x318] sm:$0xf0]  ;;  %v14179_v55 = vld [vmem:[#allocation6 + $0x50c] sm:$0xf]  ;;  %v12593_v27 = vor.u32 %v14299_v29, %v12590_v44 }
 0x3bb   :  { %v12110_v10 = vld [vmem:[#allocation6 + $0x518] sm:$0xf0]  ;;  %v14335_v39 = vld [vmem:[#allocation6 + $0x9ec] sm:$0xf] }
 0x3bc   :  { %7484 = vmatpush.bf16.msra.mxu1 %v11953_v3  ;;  %7510 = vmatpush.bf16.msra.mxu3 %v12209_v63  ;;  %v14147_v3 = vld [vmem:[#allocation6 + $0x40c] sm:$0xf]  ;;  %v15095_v37 = vpop.f32.mrf.mxu3  ;;  %v12734_v43 = vld [vmem:[#allocation6 + $0x9f8] sm:$0xf0]  ;;  %v12113_v49 = vor.u32 %v14179_v55, %v12110_v10 }
 0x3bd   :  { %7499 = vmatpush.bf16.msra.mxu2 %v12049_v58  ;;  %7473 = vmatpush.bf16.msra.mxu0 %v11793_v18  ;;  %v11889_v58 = vor.u32 %v14123_v12, %v11886_v61  ;;  %v11985_v5 = vor.u32 %v14147_v3, %v11982_v14  ;;  %v11870_v18 = vld [vmem:[#allocation6 + $0x338] sm:$0xf0]  ;;  %v14295_v38 = vld [vmem:[#allocation6 + $0x8ac] sm:$0xf]  ;;  %v12737_v61 = vor.u32 %v14335_v39, %v12734_v43 }
 0x3be   :  { %v11873_v22 = vor.u32 %v14119_v33, %v11870_v18  ;;  %v12574_v26 = vld [vmem:[#allocation6 + $0x8b8] sm:$0xf0]  ;;  %v14267_v60 = vld [vmem:[#allocation6 + $0x7cc] sm:$0xf] }
 0x3bf   :  { %v7182_v63 = vpop.f32.mrf.mxu1  ;;  %v12577_v2 = vor.u32 %v14295_v38, %v12574_v26  ;;  %v12462_v3 = vld [vmem:[#allocation6 + $0x7d8] sm:$0xf0]  ;;  %v14331_v14 = vld [vmem:[#allocation6 + $0x9cc] sm:$0xf] }
 0x3c0   :  { %7485 = vmatpush.bf16.msra.mxu1 %v11937_v19  ;;  %7511 = vmatpush.bf16.msra.mxu3 %v12193_v30  ;;  %v15097_v19 = vpop.f32.mrf.mxu0  ;;  %v14183_v30 = vld [vmem:[#allocation6 + $0x52c] sm:$0xf]  ;;  %v12558_v52 = vld [vmem:[#allocation6 + $0x898] sm:$0xf0]  ;;  %v12465_v63 = vor.u32 %v14267_v60, %v12462_v3 }
 0x3c1   :  { %7500 = vmatpush.bf16.msra.mxu2 %v12033_v34  ;;  %7474 = vmatpush.bf16.msra.mxu0 %v11777_v45  ;;  %v7247_v24 = vpop.f32.mrf.mxu2  ;;  %v12126_v34 = vld [vmem:[#allocation6 + $0x538] sm:$0xf0]  ;;  %v12561_v31 = vor.u32 %v14291_v46, %v12558_v52  ;;  %v14263_v54 = vld [vmem:[#allocation6 + $0x7ac] sm:$0xf] }
 0x3c2   :  { %v12334_v45 = vld [vmem:[#allocation6 + $0x6d8] sm:$0xf0]  ;;  %v14287_v33 = vld [vmem:[#allocation6 + $0x86c] sm:$0xf] }
 0x3c3   :  { %v12337_v16 = vor.u32 %v14235_v1, %v12334_v45  ;;  %v12302_v59 = vld [vmem:[#allocation6 + $0x698] sm:$0xf0]  ;;  %v14323_v1 = vld [vmem:[#allocation6 + $0x98c] sm:$0xf] }
 0x3c4   :  { %7486 = vmatpush.bf16.msra.mxu1 %v11921_v62  ;;  %7512 = vmatpush.bf16.msra.mxu3 %v12177_v40  ;;  %v12129_v62 = vor.u32 %v14183_v30, %v12126_v34  ;;  %v14271_v40 = vld [vmem:[#allocation6 + $0x7ec] sm:$0xf]  ;;  %v12702_v7 = vld [vmem:[#allocation6 + $0x9b8] sm:$0xf0] }
 0x3c5   :  { %7501 = vmatpush.bf16.msra.mxu2 %v12017_v11  ;;  %7475 = vmatpush.bf16.msra.mxu0 %v11761_v41  ;;  %v12478_v11 = vld [vmem:[#allocation6 + $0x7f8] sm:$0xf0]  ;;  %v11857_v41 = vor.u32 %v14115_v17, %v11854_v6  ;;  %v14223_v34 = vld [vmem:[#allocation6 + $0x66c] sm:$0xf] }
 0x3c6   :  { %v12481_v4 = vor.u32 %v14271_v40, %v12478_v11  ;;  %v12542_v18 = vld [vmem:[#allocation6 + $0x878] sm:$0xf0]  ;;  %v14283_v17 = vld [vmem:[#allocation6 + $0x84c] sm:$0xf] }
 0x3c7   :  { %v15099_v35 = vpop.f32.mrf.mxu1  ;;  %v12686_v45 = vld [vmem:[#allocation6 + $0x998] sm:$0xf0]  ;;  %v14219_v55 = vld [vmem:[#allocation6 + $0x64c] sm:$0xf] }
 0x3c8   :  { %7487 = vmatpush.bf16.msra.mxu1 %v11905_v47  ;;  %7513 = vmatpush.bf16.msra.mxu3 %v12161_v50  ;;  %v7260_v47 = vpop.f32.mrf.mxu3  ;;  %v14231_v50 = vld [vmem:[#allocation6 + $0x6ac] sm:$0xf]  ;;  %v7221_v12 = vpop.f32.mrf.mxu0  ;;  %v12270_v10 = vld [vmem:[#allocation6 + $0x658] sm:$0xf0] }
 0x3c9   :  { %7502 = vmatpush.bf16.msra.mxu2 %v12001_v25  ;;  %7476 = vmatpush.bf16.msra.mxu0 %v11745_v20  ;;  %v12318_v25 = vld [vmem:[#allocation6 + $0x6b8] sm:$0xf0]  ;;  %v14255_v11 = vld [vmem:[#allocation6 + $0x76c] sm:$0xf]  ;;  %v12273_v47 = vor.u32 %v14219_v55, %v12270_v10 }
 0x3ca   :  { %v12718_v20 = vld [vmem:[#allocation6 + $0x9d8] sm:$0xf0]  ;;  %v14319_v43 = vld [vmem:[#allocation6 + $0x96c] sm:$0xf] }
 0x3cb   :  { %v12414_v39 = vld [vmem:[#allocation6 + $0x778] sm:$0xf0]  ;;  %v14279_v26 = vld [vmem:[#allocation6 + $0x82c] sm:$0xf] }
 0x3cc   :  { %7488 = vmatpush.bf16.msra.mxu1 %v11889_v58  ;;  %7514 = vmatpush.bf16.msra.mxu3 %v12145_v0  ;;  %v14227_v58 = vld [vmem:[#allocation6 + $0x68c] sm:$0xf]  ;;  %v12446_v0 = vld [vmem:[#allocation6 + $0x7b8] sm:$0xf0] }
 0x3cd   :  { %7503 = vmatpush.bf16.msra.mxu2 %v11985_v5  ;;  %7477 = vmatpush.bf16.msra.mxu0 %v11729_v36  ;;  %v14327_v5 = vld [vmem:[#allocation6 + $0x9ac] sm:$0xf]  ;;  %v12449_v30 = vor.u32 %v14263_v54, %v12446_v0  ;;  %v12286_v36 = vld [vmem:[#allocation6 + $0x678] sm:$0xf0]  ;;  %v12852_v54 = vld [vmem:[#allocation9 + $0xe0] sm:$0xf] }
 0x3ce   :  { %v12705_v44 = vor.u32 %v14327_v5, %v12702_v7  ;;  %v12670_v38 = vld [vmem:[#allocation6 + $0x978] sm:$0xf0]  ;;  %v14251_v60 = vld [vmem:[#allocation6 + $0x74c] sm:$0xf] }
 0x3cf   :  { %v7234_v24 = vpop.f32.mrf.mxu1  ;;  %v12398_v3 = vld [vmem:[#allocation6 + $0x758] sm:$0xf0]  ;;  %v14275_v46 = vld [vmem:[#allocation6 + $0x80c] sm:$0xf] }
 0x3d0   :  { %7489 = vmatpush.bf16.msra.mxu1 %v11873_v22  ;;  %7515 = vmatpush.bf16.msra.mxu3 %v12129_v62  ;;  %v15105_v29 = vpop.f32.mrf.mxu0  ;;  %v14259_v22 = vld [vmem:[#allocation6 + $0x78c] sm:$0xf]  ;;  %v12526_v62 = vld [vmem:[#allocation6 + $0x858] sm:$0xf0] }
 0x3d1   :  { %7548 = vmatpush.bf16.msrb.mxu2 %v12609_v28  ;;  %7522 = vmatpush.bf16.msrb.mxu0 %v12353_v51  ;;  %v12305_v28 = vor.u32 %v14227_v58, %v12302_v59  ;;  %v12545_v51 = vor.u32 %v14287_v33, %v12542_v18  ;;  %v12529_v40 = vor.u32 %v14283_v17, %v12526_v62  ;;  %v12494_v52 = vld [vmem:[#allocation6 + $0x818] sm:$0xf0]  ;;  %v14432_v58 = vld [vmem:[#allocation9 + $0x2ec] sm:$0xf0]  ;;  %v14247_v18 = vld [vmem:[#allocation6 + $0x72c] sm:$0xf] }
 0x3d2   :  { %7504 = vmatmul.bf16.vlgmr.msra.gmra.mxu2 %v15027_v56  ;;  %7478 = vmatmul.bf16.vlgmr.msra.gmra.mxu0 %v15017_v15  ;;  %v12321_v56 = vor.u32 %v14231_v50, %v12318_v25  ;;  %v12721_v15 = vor.u32 %v14331_v14, %v12718_v20  ;;  %v14215_v50 = vld [vmem:[#allocation6 + $0x62c] sm:$0xf]  ;;  %v12254_v25 = vld [vmem:[#allocation6 + $0x638] sm:$0xf0]  ;;  %v12401_v59 = vor.u32 %v14251_v60, %v12398_v3  ;;  %v14368_v33 = vld [vmem:[#allocation9 + $0xec] sm:$0xf0] }
 0x3d3   :  { %v14315_v14 = vld [vmem:[#allocation6 + $0x94c] sm:$0xf]  ;;  %v12654_v20 = vld [vmem:[#allocation6 + $0x958] sm:$0xf0]  ;;  %v12497_v7 = vor.u32 %v14275_v46, %v12494_v52  ;;  %v12836_v17 = vld [vmem:[#allocation9 + $0xc0] sm:$0xf] }
 0x3d4   :  { %7490 = vmatpush.bf16.msra.mxu1 %v11857_v41  ;;  %7516 = vmatpush.bf16.msra.mxu3 %v12113_v49  ;;  %v12657_v5 = vor.u32 %v14315_v14, %v12654_v20  ;;  %v12382_v24 = vld [vmem:[#allocation6 + $0x738] sm:$0xf0]  ;;  %v14364_v62 = vld [vmem:[#allocation9 + $0xcc] sm:$0xf0]  ;;  %v14307_v10 = vld [vmem:[#allocation6 + $0x90c] sm:$0xf]  ;;  %v7220_v20 = vadd.f32 %v15097_v19, %v15086_v8 }
 0x3d5   :  { %7549 = vmatpush.bf16.msrb.mxu2 %v12593_v27  ;;  %7523 = vmatpush.bf16.msrb.mxu0 %v12337_v16  ;;  %v12689_v27 = vor.u32 %v14323_v1, %v12686_v45  ;;  %v12510_v16 = vld [vmem:[#allocation6 + $0x838] sm:$0xf0]  ;;  %v15107_v41 = vpop.f32.mrf.mxu2  ;;  %v12853_v1 = vor.u32 %v14368_v33, %v12852_v54  ;;  %v12385_v45 = vor.u32 %v14247_v18, %v12382_v24  ;;  %v13060_v3 = vld [vmem:[#allocation9 + $0x280] sm:$0xf]  ;;  %v14420_v14 = vld [vmem:[#allocation9 + $0x28c] sm:$0xf0] }
 0x3d6   :  { %v12366_v55 = vld [vmem:[#allocation6 + $0x718] sm:$0xf0]  ;;  %v12804_v52 = vld [vmem:[#allocation9 + $0x80] sm:$0xf]  ;;  %v14388_v18 = vld [vmem:[#allocation9 + $0x18c] sm:$0xf0] }
 0x3d7   :  { %7491 = vmatmul.bf16.vlgmr.msra.gmra.mxu1 %v15021_v53  ;;  %7517 = vmatmul.bf16.vlgmr.msra.gmra.mxu3 %v15031_v32  ;;  %v12430_v53 = vld [vmem:[#allocation6 + $0x798] sm:$0xf0]  ;;  %v12289_v32 = vor.u32 %v14223_v34, %v12286_v36  ;;  %v15109_v49 = vpop.f32.mrf.mxu1  ;;  %v12788_v54 = vld [vmem:[#allocation9 + $0x60] sm:$0xf] }
 0x3d8   :  { %7535 = vmatpush.bf16.msrb.mxu1 %v12481_v4  ;;  %7561 = vmatpush.bf16.msrb.mxu3 %v12737_v61  ;;  %v12433_v6 = vor.u32 %v14259_v22, %v12430_v53  ;;  %v12417_v4 = vor.u32 %v14255_v11, %v12414_v39  ;;  %v7273_v12 = vpop.f32.mrf.mxu0  ;;  %v12673_v61 = vor.u32 %v14319_v43, %v12670_v38  ;;  %v14428_v22 = vld [vmem:[#allocation9 + $0x2cc] sm:$0xf0]  ;;  %v13076_v43 = vld [vmem:[#allocation9 + $0x2a0] sm:$0xf] }
 0x3d9   :  { %7550 = vmatpush.bf16.msrb.mxu2 %v12577_v2  ;;  %7524 = vmatpush.bf16.msrb.mxu0 %v12321_v56  ;;  %v12513_v2 = vor.u32 %v14279_v26, %v12510_v16  ;;  %v12257_v56 = vor.u32 %v14215_v50, %v12254_v25  ;;  %v14400_v11 = vld [vmem:[#allocation9 + $0x1ec] sm:$0xf0]  ;;  %v12837_v26 = vor.u32 %v14364_v62, %v12836_v17  ;;  %v12820_v25 = vld [vmem:[#allocation9 + $0xa0] sm:$0xf] }
 0x3da   :  { %v15111_v0 = vpop.f32.mrf.mxu3  ;;  %v14424_v38 = vld [vmem:[#allocation9 + $0x2ac] sm:$0xf0] }
 0x3db   :  { %v14360_v12 = vld [vmem:[#allocation9 + $0xac] sm:$0xf0]  ;;  %v13077_v60 = vor.u32 %v14424_v38, %v13076_v43  ;;  %v12996_v43 = vld [vmem:[#allocation9 + $0x200] sm:$0xf] }
 0x3dc   :  { %7536 = vmatpush.bf16.msrb.mxu1 %v12465_v63  ;;  %7562 = vmatpush.bf16.msrb.mxu3 %v12721_v15  ;;  %v13108_v63 = vld [vmem:[#allocation9 + $0x2e0] sm:$0xf]  ;;  %v14211_v15 = vld [vmem:[#allocation6 + $0x60c] sm:$0xf]  ;;  %v12821_v46 = vor.u32 %v14360_v12, %v12820_v25  ;;  %v14404_v38 = vld [vmem:[#allocation9 + $0x20c] sm:$0xf0] }
 0x3dd   :  { %7551 = vmatpush.bf16.msrb.mxu2 %v12561_v31  ;;  %7525 = vmatpush.bf16.msrb.mxu0 %v12305_v28  ;;  %v12238_v31 = vld [vmem:[#allocation6 + $0x618] sm:$0xf0]  ;;  %v14311_v28 = vld [vmem:[#allocation6 + $0x92c] sm:$0xf]  ;;  %v13109_v34 = vor.u32 %v14432_v58, %v13108_v63  ;;  %v7299_v36 = vpop.f32.mrf.mxu2  ;;  %v7233_v63 = vadd.f32 %v15099_v35, %v7220_v20  ;;  %v14392_v58 = vld [vmem:[#allocation9 + $0x1ac] sm:$0xf0] }
 0x3de   :  { %v12932_v35 = vld [vmem:[#allocation9 + $0x180] sm:$0xf]  ;;  %v14348_v36 = vld [vmem:[#allocation9 + $0x4c] sm:$0xf0]  ;;  %v14366_v25 = vld [vmem:[#allocation9 + $0xe4] sm:$0xf] }
 0x3df   :  { %v7286_v53 = vpop.f32.mrf.mxu1 }
 0x3e0   :  { %7537 = vmatpush.bf16.msrb.mxu1 %v12449_v30  ;;  %7563 = vmatpush.bf16.msrb.mxu3 %v12705_v44  ;;  %v12638_v30 = vld [vmem:[#allocation6 + $0x938] sm:$0xf0]  ;;  %v12241_v44 = vor.u32 %v14211_v15, %v12238_v31  ;;  %v13044_v15 = vld [vmem:[#allocation9 + $0x260] sm:$0xf]  ;;  %v14416_v31 = vld [vmem:[#allocation9 + $0x26c] sm:$0xf0] }
 0x3e1   :  { %7552 = vmatpush.bf16.msrb.mxu2 %v12545_v51  ;;  %7526 = vmatpush.bf16.msrb.mxu0 %v12289_v32  ;;  %v13092_v51 = vld [vmem:[#allocation9 + $0x2c0] sm:$0xf]  ;;  %v12641_v32 = vor.u32 %v14311_v28, %v12638_v30  ;;  %v13045_v24 = vor.u32 %v14416_v31, %v13044_v15  ;;  %v12838_v15 = vld [vmem:[#allocation9 + $0xd0] sm:$0xf0] }
 0x3e2   :  { %v13093_v39 = vor.u32 %v14428_v22, %v13092_v51  ;;  %v13028_v28 = vld [vmem:[#allocation9 + $0x240] sm:$0xf]  ;;  %v14384_v22 = vld [vmem:[#allocation9 + $0x16c] sm:$0xf0] }
 0x3e3   :  { %v12916_v51 = vld [vmem:[#allocation9 + $0x160] sm:$0xf] }
 0x3e4   :  { %7538 = vmatpush.bf16.msrb.mxu1 %v12433_v6  ;;  %7564 = vmatpush.bf16.msrb.mxu3 %v12689_v27  ;;  %v14243_v6 = vld [vmem:[#allocation6 + $0x70c] sm:$0xf]  ;;  %v12622_v27 = vld [vmem:[#allocation6 + $0x918] sm:$0xf0]  ;;  %v13012_v53 = vld [vmem:[#allocation9 + $0x220] sm:$0xf] }
 0x3e5   :  { %7553 = vmatpush.bf16.msrb.mxu2 %v12529_v40  ;;  %7527 = vmatpush.bf16.msrb.mxu0 %v12273_v47  ;;  %v12980_v40 = vld [vmem:[#allocation9 + $0x1e0] sm:$0xf]  ;;  %v12369_v16 = vor.u32 %v14243_v6, %v12366_v55  ;;  %v7312_v47 = vpop.f32.mrf.mxu3  ;;  %v12917_v6 = vor.u32 %v14384_v22, %v12916_v51  ;;  %v14418_v51 = vld [vmem:[#allocation9 + $0x284] sm:$0xf]  ;;  %v13062_v22 = vld [vmem:[#allocation9 + $0x290] sm:$0xf0] }
 0x3e6   :  { %v12981_v50 = vor.u32 %v14400_v11, %v12980_v40  ;;  %v12756_v55 = vld [vmem:[#allocation9 + $0x20] sm:$0xf]  ;;  %v14380_v11 = vld [vmem:[#allocation9 + $0x14c] sm:$0xf0] }
 0x3e7   :  { %v12900_v40 = vld [vmem:[#allocation9 + $0x140] sm:$0xf] }
 0x3e8   :  { %7539 = vmatpush.bf16.msrb.mxu1 %v12417_v4  ;;  %7565 = vmatpush.bf16.msrb.mxu3 %v12673_v61  ;;  %v12625_v4 = vor.u32 %v14307_v10, %v12622_v27  ;;  %v12964_v61 = vld [vmem:[#allocation9 + $0x1c0] sm:$0xf]  ;;  %v14344_v10 = vld [vmem:[#allocation9 + $0x2c] sm:$0xf0]  ;;  %v12901_v47 = vor.u32 %v14380_v11, %v12900_v40 }
 0x3e9   :  { %7554 = vmatpush.bf16.msrb.mxu2 %v12513_v2  ;;  %7528 = vmatpush.bf16.msrb.mxu0 %v12257_v56  ;;  %v14396_v2 = vld [vmem:[#allocation9 + $0x1cc] sm:$0xf0]  ;;  %v12868_v31 = vld [vmem:[#allocation9 + $0x100] sm:$0xf] }
 0x3ea   :  { %v14356_v56 = vld [vmem:[#allocation9 + $0x8c] sm:$0xf0] }
 0x3eb   :  { %v12805_v8 = vor.u32 %v14356_v56, %v12804_v52  ;;  %v14426_v52 = vld [vmem:[#allocation9 + $0x2c4] sm:$0xf]  ;;  %v13094_v56 = vld [vmem:[#allocation9 + $0x2d0] sm:$0xf0] }
 0x3ec   :  { %7540 = vmatpush.bf16.msrb.mxu1 %v12401_v59  ;;  %7566 = vmatpush.bf16.msrb.mxu3 %v12657_v5  ;;  %v13061_v59 = vor.u32 %v14420_v14, %v13060_v3  ;;  %v14352_v5 = vld [vmem:[#allocation9 + $0x6c] sm:$0xf0]  ;;  %v12997_v3 = vor.u32 %v14404_v38, %v12996_v43  ;;  %v12790_v43 = vld [vmem:[#allocation9 + $0x70] sm:$0xf0]  ;;  %v14386_v38 = vld [vmem:[#allocation9 + $0x184] sm:$0xf] }
 0x3ed   :  { %7555 = vmatpush.bf16.msrb.mxu2 %v12497_v7  ;;  %7529 = vmatpush.bf16.msrb.mxu0 %v12241_v44  ;;  %v7246_v7 = vadd.f32 %v15093_v23, %v7233_v63  ;;  %v12789_v30 = vor.u32 %v14352_v5, %v12788_v54  ;;  %v7574_v63 = vmax.f32 %v15091_v42, 0.0  ;;  %v12982_v54 = vld [vmem:[#allocation9 + $0x1f0] sm:$0xf0]  ;;  %v13097_v5 = vor.u32 %v14426_v52, %v13094_v56 }
 0x3ef   :  { %v15121_v33 = vpop.f32.mrf.mxu0  ;;  %v7259_v44 = vadd.f32 %v15095_v37, %v7246_v7  ;;  %v14422_v7 = vld [vmem:[#allocation9 + $0x2a4] sm:$0xf] }
 0x3f0   :  { %7541 = vmatpush.bf16.msrb.mxu1 %v12385_v45  ;;  %7567 = vmatpush.bf16.msrb.mxu3 %v12641_v32 }
 0x3f1   :  { %8386 = vmatpush.bf16.msra.mxu2 %v13109_v34  ;;  %8360 = vmatpush.bf16.msra.mxu0 %v12853_v1  ;;  %v12772_v34 = vld [vmem:[#allocation9 + $0x40] sm:$0xf]  ;;  %v14408_v1 = vld [vmem:[#allocation9 + $0x22c] sm:$0xf0]  ;;  %v7272_v45 = vadd.f32 %v15105_v29, %v7259_v44  ;;  %v12757_v29 = vor.u32 %v14344_v10, %v12756_v55  ;;  %v12950_v55 = vld [vmem:[#allocation9 + $0x1b0] sm:$0xf0]  ;;  %v13065_v10 = vor.u32 %v14418_v51, %v13062_v22 }
 0x3f2   :  { %7556 = vmatmul.bf16.vlgmr.msrb.gmra.mxu2 %v15047_v9  ;;  %7530 = vmatmul.bf16.vlgmr.msrb.gmra.mxu0 %v15037_v13  ;;  %v12965_v9 = vor.u32 %v14396_v2, %v12964_v61  ;;  %v12948_v13 = vld [vmem:[#allocation9 + $0x1a0] sm:$0xf]  ;;  %v12773_v32 = vor.u32 %v14348_v36, %v12772_v34  ;;  %v14394_v34 = vld [vmem:[#allocation9 + $0x1c4] sm:$0xf]  ;;  %v12966_v36 = vld [vmem:[#allocation9 + $0x1d0] sm:$0xf0] }
 0x3f3   :  { %v12949_v19 = vor.u32 %v14392_v58, %v12948_v13  ;;  %v7285_v37 = vadd.f32 %v15109_v49, %v7272_v45  ;;  %v12854_v49 = vld [vmem:[#allocation9 + $0xf0] sm:$0xf0]  ;;  %v12884_v2 = vld [vmem:[#allocation9 + $0x120] sm:$0xf]  ;;  %v14354_v45 = vld [vmem:[#allocation9 + $0x84] sm:$0xf] }
 0x3f4   :  { %7542 = vmatpush.bf16.msrb.mxu1 %v12369_v16  ;;  %7568 = vmatpush.bf16.msrb.mxu3 %v12625_v4  ;;  %v15125_v17 = vpop.f32.mrf.mxu1  ;;  %v13110_v16 = vld [vmem:[#allocation9 + $0x2f0] sm:$0xf0]  ;;  %v12740_v4 = vld [vmem:[#allocation9] sm:$0xf]  ;;  %v12857_v13 = vor.u32 %v14366_v25, %v12854_v49  ;;  %v14464_v51 = vld [vmem:[#allocation9 + $0x3ec] sm:$0xf0] }
 0x3f5   :  { %8387 = vmatpush.bf16.msra.mxu2 %v13093_v39  ;;  %8361 = vmatpush.bf16.msra.mxu0 %v12837_v26  ;;  %v15127_v62 = vpop.f32.mrf.mxu2  ;;  %v13013_v39 = vor.u32 %v14408_v1, %v13012_v53  ;;  %v14430_v26 = vld [vmem:[#allocation9 + $0x2e4] sm:$0xf]  ;;  %v7298_v12 = vadd.f32 %v15107_v41, %v7285_v37  ;;  %v12969_v1 = vor.u32 %v14394_v34, %v12966_v36  ;;  %v12774_v49 = vld [vmem:[#allocation9 + $0x50] sm:$0xf0] }
 0x3f6   :  { %v13113_v14 = vor.u32 %v14430_v26, %v13110_v16  ;;  %v14362_v41 = vld [vmem:[#allocation9 + $0xc4] sm:$0xf] }
 0x3f7   :  { %7543 = vmatmul.bf16.vlgmr.msrb.gmra.mxu1 %v15041_v21  ;;  %7569 = vmatmul.bf16.vlgmr.msrb.gmra.mxu3 %v15052_v57  ;;  %v14412_v21 = vld [vmem:[#allocation9 + $0x24c] sm:$0xf0]  ;;  %v12933_v57 = vor.u32 %v14388_v18, %v12932_v35  ;;  %v7325_v27 = vpop.f32.mrf.mxu0  ;;  %v13078_v35 = vld [vmem:[#allocation9 + $0x2b0] sm:$0xf0]  ;;  %v15135_v18 = vpack.c.bf16 %v7574_v63, %v7574_v63  ;;  %v12841_v42 = vor.u32 %v14362_v41, %v12838_v15  ;;  %v14414_v37 = vld [vmem:[#allocation9 + $0x264] sm:$0xf] }
 0x3f8   :  { %8373 = vmatpush.bf16.msra.mxu1 %v12981_v50  ;;  %v13029_v23 = vor.u32 %v14412_v21, %v13028_v28  ;;  %v14340_v50 = vld [vmem:[#allocation9 + $0xc] sm:$0xf0]  ;;  %v13081_v44 = vor.u32 %v14422_v7, %v13078_v35  ;;  %v13046_v27 = vld [vmem:[#allocation9 + $0x270] sm:$0xf0]  ;;  %v14342_v63 = vld [vmem:[#allocation9 + $0x24] sm:$0xf] }
 0x3f9   :  { %8388 = vmatpush.bf16.msra.mxu2 %v13077_v60  ;;  %8362 = vmatpush.bf16.msra.mxu0 %v12821_v46  ;;  %v14376_v60 = vld [vmem:[#allocation9 + $0x12c] sm:$0xf0]  ;;  %v13049_v26 = vor.u32 %v14414_v37, %v13046_v27  ;;  %v12902_v41 = vld [vmem:[#allocation9 + $0x150] sm:$0xf0]  ;;  %v14338_v7 = vld [vmem:[#allocation9 + $0x4] sm:$0xf] }
 0x3fa   :  { %v15131_v61 = vpop.f32.mrf.mxu3  ;;  %v12885_v58 = vor.u32 %v14376_v60, %v12884_v2  ;;  %v14382_v2 = vld [vmem:[#allocation9 + $0x164] sm:$0xf]  ;;  %v12918_v60 = vld [vmem:[#allocation9 + $0x170] sm:$0xf0]  ;;  %v12988_v37 = vld [vmem:[#allocation9 + $0x1e8] sm:$0xf] }
 0x3fb   :  { %v12921_v56 = vor.u32 %v14382_v2, %v12918_v60  ;;  %v12742_v35 = vld [vmem:[#allocation9 + $0x10] sm:$0xf0]  ;;  %v14401_v27 = vld [vmem:[#allocation9 + $0x1f4] sm:$0xf0] }
 0x3fc   :  { %8374 = vmatpush.bf16.msra.mxu1 %v12965_v9  ;;  %v7338_v20 = vpop.f32.mrf.mxu1  ;;  %v12741_v9 = vor.u32 %v14340_v50, %v12740_v4  ;;  %v13030_v4 = vld [vmem:[#allocation9 + $0x250] sm:$0xf0] }
 0x3fd   :  { %8389 = vmatpush.bf16.msra.mxu2 %v13061_v59  ;;  %8363 = vmatpush.bf16.msra.mxu0 %v12805_v8  ;;  %v7351_v46 = vpop.f32.mrf.mxu2  ;;  %v7311_v59 = vadd.f32 %v15111_v0, %v7298_v12  ;;  %v14372_v8 = vld [vmem:[#allocation9 + $0x10c] sm:$0xf0]  ;;  %v14346_v12 = vld [vmem:[#allocation9 + $0x44] sm:$0xf]  ;;  %v13014_v20 = vld [vmem:[#allocation9 + $0x230] sm:$0xf0] }
 0x3fe   :  { %v12777_v52 = vor.u32 %v14346_v12, %v12774_v49  ;;  %v13204_v12 = vld [vmem:[#allocation9 + $0x3a0] sm:$0xf]  ;;  %v14456_v49 = vld [vmem:[#allocation9 + $0x3ac] sm:$0xf0] }
 0x3ff   :  { %v7575_v28 = vmax.f32 %v7311_v59, 0.0  ;;  %v13205_v60 = vor.u32 %v14456_v49, %v13204_v12  ;;  %v12892_v12 = vld [vmem:[#allocation9 + $0x128] sm:$0xf]  ;;  %v14377_v49 = vld [vmem:[#allocation9 + $0x134] sm:$0xf0] }
 0x400   :  { %8375 = vmatpush.bf16.msra.mxu1 %v12949_v19  ;;  %v14398_v19 = vld [vmem:[#allocation9 + $0x1e4] sm:$0xf] }
 0x401   :  { %8390 = vmatpush.bf16.msra.mxu2 %v13045_v24  ;;  %8364 = vmatpush.bf16.msra.mxu0 %v12789_v30  ;;  %v12869_v24 = vor.u32 %v14372_v8, %v12868_v31  ;;  %v12985_v0 = vor.u32 %v14398_v19, %v12982_v54  ;;  %v14358_v30 = vld [vmem:[#allocation9 + $0xa4] sm:$0xf]  ;;  %v15138_v53 = vpack.c.bf16 %v7575_v28, %v7575_v28  ;;  %v12998_v8 = vld [vmem:[#allocation9 + $0x210] sm:$0xf0]  ;;  %v5448_v19 = vperm.slane %v15081_v48, 2 }
 0x402   :  { %v7364_v21 = vpop.f32.mrf.mxu3  ;;  %v14402_v31 = vld [vmem:[#allocation9 + $0x204] sm:$0xf]  ;;  %v12745_v48 = vor.u32 %v14338_v7, %v12742_v35  ;;  %v14448_v7 = vld [vmem:[#allocation9 + $0x36c] sm:$0xf0] }
 0x403   :  { %v14374_v28 = vld [vmem:[#allocation9 + $0x124] sm:$0xf]  ;;  %v12886_v21 = vld [vmem:[#allocation9 + $0x130] sm:$0xf0] }
 0x404   :  { %8376 = vmatpush.bf16.msra.mxu1 %v12933_v57  ;;  %v12822_v57 = vld [vmem:[#allocation9 + $0xb0] sm:$0xf0] }
 0x405   :  { %8391 = vmatpush.bf16.msra.mxu2 %v13029_v23  ;;  %8365 = vmatpush.bf16.msra.mxu0 %v12773_v32  ;;  %v12825_v23 = vor.u32 %v14358_v30, %v12822_v57  ;;  %v12806_v32 = vld [vmem:[#allocation9 + $0x90] sm:$0xf0]  ;;  %v7324_v57 = vadd.f32 %v15121_v33, %v5448_v19  ;;  %v13220_v33 = vld [vmem:[#allocation9 + $0x3c0] sm:$0xf] }
 0x406   :  { %v12809_v40 = vor.u32 %v14354_v45, %v12806_v32 }
 0x407   :  { %v7337_v32 = vadd.f32 %v15125_v17, %v7324_v57  ;;  %v14361_v17 = vld [vmem:[#allocation9 + $0xb4] sm:$0xf0] }
 0x408   :  { %8377 = vmatpush.bf16.msra.mxu1 %v12917_v6  ;;  %v14390_v6 = vld [vmem:[#allocation9 + $0x1a4] sm:$0xf]  ;;  %v14385_v57 = vld [vmem:[#allocation9 + $0x174] sm:$0xf0] }
 0x409   :  { %8392 = vmatpush.bf16.msra.mxu2 %v13013_v39  ;;  %8366 = vmatpush.bf16.msra.mxu0 %v12757_v29  ;;  %v12953_v11 = vor.u32 %v14390_v6, %v12950_v55  ;;  %v14350_v39 = vld [vmem:[#allocation9 + $0x64] sm:$0xf]  ;;  %v12934_v29 = vld [vmem:[#allocation9 + $0x190] sm:$0xf0]  ;;  %v14365_v6 = vld [vmem:[#allocation9 + $0xd4] sm:$0xf0] }
 0x40a   :  { %v12793_v50 = vor.u32 %v14350_v39, %v12790_v43  ;;  %v12937_v25 = vor.u32 %v14386_v38, %v12934_v29  ;;  %v14370_v55 = vld [vmem:[#allocation9 + $0x104] sm:$0xf]  ;;  %v7350_v38 = vadd.f32 %v15127_v62, %v7337_v32  ;;  %v12989_v29 = vor.u32 %v14401_v27, %v12988_v37  ;;  %v13116_v32 = vld [vmem:[#allocation9 + $0x2e8] sm:$0xf] }
 0x40c   :  { %8378 = vmatpush.bf16.msra.mxu1 %v12901_v47  ;;  %v14410_v47 = vld [vmem:[#allocation9 + $0x244] sm:$0xf] }
 0x40d   :  { %8393 = vmatpush.bf16.msra.mxu2 %v12997_v3  ;;  %8367 = vmatpush.bf16.msra.mxu0 %v12741_v9  ;;  %v13033_v3 = vor.u32 %v14410_v47, %v13030_v4  ;;  %v12972_v4 = vld [vmem:[#allocation9 + $0x1c8] sm:$0xf] }
 0x40f   :  { %v15141_v16 = vpop.f32.mrf.mxu0 }
 0x410   :  { %8379 = vmatpush.bf16.msra.mxu1 %v12885_v58  ;;  %8368 = vmatmul.bf16.vlgmr.msra.gmra.mxu0 %v15135_v18  ;;  %v14378_v58 = vld [vmem:[#allocation9 + $0x144] sm:$0xf] }
 0x411   :  { %8438 = vmatpush.bf16.msrb.mxu2 %v13113_v14  ;;  %8412 = vmatpush.bf16.msrb.mxu0 %v12857_v13  ;;  %v14406_v14 = vld [vmem:[#allocation9 + $0x224] sm:$0xf]  ;;  %v12758_v13 = vld [vmem:[#allocation9 + $0x30] sm:$0xf0] }
 0x412   :  { %v13017_v59 = vor.u32 %v14406_v14, %v13014_v20  ;;  %v12761_v54 = vor.u32 %v14342_v63, %v12758_v13  ;;  %v12812_v14 = vld [vmem:[#allocation9 + $0x88] sm:$0xf]  ;;  %v14357_v20 = vld [vmem:[#allocation9 + $0x94] sm:$0xf0]  ;;  %v14452_v13 = vld [vmem:[#allocation9 + $0x38c] sm:$0xf0] }
 0x414   :  { %8380 = vmatpush.bf16.msra.mxu1 %v12869_v24  ;;  %v15143_v46 = vpop.f32.mrf.mxu1  ;;  %v14369_v24 = vld [vmem:[#allocation9 + $0xf4] sm:$0xf0] }
 0x415   :  { %8439 = vmatpush.bf16.msrb.mxu2 %v13097_v5  ;;  %8413 = vmatpush.bf16.msrb.mxu0 %v12841_v42  ;;  %v15145_v9 = vpop.f32.mrf.mxu2  ;;  %v12905_v5 = vor.u32 %v14378_v58, %v12902_v41  ;;  %v12860_v42 = vld [vmem:[#allocation9 + $0xe8] sm:$0xf]  ;;  %v12813_v58 = vor.u32 %v14357_v20, %v12812_v14 }
 0x416   :  { %v12861_v22 = vor.u32 %v14369_v24, %v12860_v42 }
 0x417   :  { %8381 = vmatmul.bf16.vlgmr.msra.gmra.mxu1 %v15138_v53  ;;  %v7377_v15 = vpop.f32.mrf.mxu0 }
 0x418   :  { %8425 = vmatpush.bf16.msrb.mxu1 %v12985_v0  ;;  %v13001_v0 = vor.u32 %v14402_v31, %v12998_v8  ;;  %v12796_v15 = vld [vmem:[#allocation9 + $0x68] sm:$0xf]  ;;  %v14389_v8 = vld [vmem:[#allocation9 + $0x194] sm:$0xf0] }
 0x419   :  { %8440 = vmatpush.bf16.msrb.mxu2 %v13081_v44  ;;  %8414 = vmatpush.bf16.msrb.mxu0 %v12825_v23  ;;  %v13236_v44 = vld [vmem:[#allocation9 + $0x3e0] sm:$0xf]  ;;  %v12889_v23 = vor.u32 %v14374_v28, %v12886_v21  ;;  %v12940_v31 = vld [vmem:[#allocation9 + $0x188] sm:$0xf]  ;;  %v14349_v21 = vld [vmem:[#allocation9 + $0x54] sm:$0xf0] }
 0x41a   :  { %v15148_v30 = vpop.f32.mrf.mxu3  ;;  %v13237_v45 = vor.u32 %v14464_v51, %v13236_v44  ;;  %v12941_v24 = vor.u32 %v14389_v8, %v12940_v31  ;;  %v12780_v28 = vld [vmem:[#allocation9 + $0x48] sm:$0xf]  ;;  %v14373_v8 = vld [vmem:[#allocation9 + $0x114] sm:$0xf0] }
 0x41b   :  { %v12781_v51 = vor.u32 %v14349_v21, %v12780_v28  ;;  %v12876_v31 = vld [vmem:[#allocation9 + $0x108] sm:$0xf]  ;;  %v14421_v21 = vld [vmem:[#allocation9 + $0x294] sm:$0xf0] }
 0x41c   :  { %8426 = vmatpush.bf16.msrb.mxu1 %v12969_v1  ;;  %v7390_v34 = vpop.f32.mrf.mxu1  ;;  %v12844_v1 = vld [vmem:[#allocation9 + $0xc8] sm:$0xf]  ;;  %8399 = vmatpush.bf16.msra.mxu3 %v13237_v45  ;;  %v14345_v45 = vld [vmem:[#allocation9 + $0x34] sm:$0xf0] }
 0x41d   :  { %8441 = vmatpush.bf16.msrb.mxu2 %v13065_v10  ;;  %8415 = vmatpush.bf16.msrb.mxu0 %v12809_v40  ;;  %v7403_v36 = vpop.f32.mrf.mxu2  ;;  %v12870_v10 = vld [vmem:[#allocation9 + $0x110] sm:$0xf0]  ;;  %v14460_v40 = vld [vmem:[#allocation9 + $0x3cc] sm:$0xf0]  ;;  %v13068_v28 = vld [vmem:[#allocation9 + $0x288] sm:$0xf] }
 0x41e   :  { %v12873_v39 = vor.u32 %v14370_v55, %v12870_v10  ;;  %v13221_v43 = vor.u32 %v14460_v40, %v13220_v33  ;;  %v13156_v36 = vld [vmem:[#allocation9 + $0x340] sm:$0xf]  ;;  %v12908_v55 = vld [vmem:[#allocation9 + $0x148] sm:$0xf]  ;;  %v14381_v10 = vld [vmem:[#allocation9 + $0x154] sm:$0xf0] }
 0x41f   :  { %v13140_v33 = vld [vmem:[#allocation9 + $0x320] sm:$0xf] }
 0x420   :  { %8427 = vmatpush.bf16.msrb.mxu1 %v12953_v11  ;;  %v12845_v11 = vor.u32 %v14365_v6, %v12844_v1  ;;  %8400 = vmatpush.bf16.msra.mxu3 %v13221_v43  ;;  %v14433_v6 = vld [vmem:[#allocation9 + $0x2f4] sm:$0xf0] }
 0x421   :  { %8442 = vmatpush.bf16.msrb.mxu2 %v13049_v26  ;;  %8416 = vmatpush.bf16.msrb.mxu0 %v12793_v50  ;;  %v12828_v26 = vld [vmem:[#allocation9 + $0xa8] sm:$0xf]  ;;  %v14397_v50 = vld [vmem:[#allocation9 + $0x1d4] sm:$0xf0] }
 0x422   :  { %v7416_v47 = vpop.f32.mrf.mxu3  ;;  %v12829_v2 = vor.u32 %v14361_v17, %v12828_v26  ;;  %v12973_v62 = vor.u32 %v14397_v50, %v12972_v4  ;;  %v14341_v43 = vld [vmem:[#allocation9 + $0x14] sm:$0xf0]  ;;  %v12909_v26 = vor.u32 %v14381_v10, %v12908_v55  ;;  %v13100_v17 = vld [vmem:[#allocation9 + $0x2c8] sm:$0xf]  ;;  %v14367_v4 = vld [vmem:[#allocation9 + $0xec] sm:$0xf] }
 0x423   :  { %v14429_v47 = vld [vmem:[#allocation9 + $0x2d4] sm:$0xf0]  ;;  %v14355_v55 = vld [vmem:[#allocation9 + $0x8c] sm:$0xf]  ;;  %v12814_v10 = vld [vmem:[#allocation9 + $0x98] sm:$0xf0] }
 0x424   :  { %8428 = vmatpush.bf16.msrb.mxu1 %v12937_v25  ;;  %v7363_v25 = vadd.f32 %v15131_v61, %v7350_v38  ;;  %8401 = vmatpush.bf16.msra.mxu3 %v13205_v60  ;;  %v13188_v61 = vld [vmem:[#allocation9 + $0x380] sm:$0xf]  ;;  %v14440_v38 = vld [vmem:[#allocation9 + $0x32c] sm:$0xf0] }
 0x425   :  { %8443 = vmatpush.bf16.msrb.mxu2 %v13033_v3  ;;  %8417 = vmatpush.bf16.msrb.mxu0 %v12777_v52  ;;  %v12956_v52 = vld [vmem:[#allocation9 + $0x1a8] sm:$0xf]  ;;  %v13189_v41 = vor.u32 %v14452_v13, %v13188_v61  ;;  %v13141_v50 = vor.u32 %v14440_v38, %v13140_v33  ;;  %v13124_v60 = vld [vmem:[#allocation9 + $0x300] sm:$0xf]  ;;  %v13238_v61 = vld [vmem:[#allocation9 + $0x3f0] sm:$0xf0] }
 0x426   :  { %v7376_v3 = vadd.f32 %v15141_v16, %v7363_v25  ;;  %v14353_v16 = vld [vmem:[#allocation9 + $0x74] sm:$0xf0]  ;;  %v12862_v25 = vld [vmem:[#allocation9 + $0xf8] sm:$0xf0]  ;;  %v13036_v38 = vld [vmem:[#allocation9 + $0x248] sm:$0xf] }
 0x427   :  { %v12865_v13 = vor.u32 %v14367_v4, %v12862_v25  ;;  %v12958_v33 = vld [vmem:[#allocation9 + $0x1b8] sm:$0xf0]  ;;  %v14387_v25 = vld [vmem:[#allocation9 + $0x18c] sm:$0xf] }
 0x428   :  { %8429 = vmatpush.bf16.msrb.mxu1 %v12921_v56  ;;  %v14393_v56 = vld [vmem:[#allocation9 + $0x1b4] sm:$0xf0]  ;;  %v7389_v63 = vadd.f32 %v15143_v46, %v7376_v3  ;;  %8402 = vmatpush.bf16.msra.mxu3 %v13189_v41  ;;  %v12797_v46 = vor.u32 %v14353_v16, %v12796_v15  ;;  %v14436_v3 = vld [vmem:[#allocation9 + $0x30c] sm:$0xf0]  ;;  %v13084_v41 = vld [vmem:[#allocation9 + $0x2a8] sm:$0xf] }
 0x429   :  { %8444 = vmatpush.bf16.msrb.mxu2 %v13017_v59  ;;  %8418 = vmatpush.bf16.msrb.mxu0 %v12761_v54  ;;  %v12957_v59 = vor.u32 %v14393_v56, %v12956_v52  ;;  %v13101_v52 = vor.u32 %v14429_v47, %v13100_v17  ;;  %v13125_v56 = vor.u32 %v14436_v3, %v13124_v60  ;;  %v14363_v15 = vld [vmem:[#allocation9 + $0xcc] sm:$0xf]  ;;  %v12846_v16 = vld [vmem:[#allocation9 + $0xd8] sm:$0xf0]  ;;  %v14446_v3 = vld [vmem:[#allocation9 + $0x364] sm:$0xf] }
 0x42a   :  { %v7402_v19 = vadd.f32 %v15145_v9, %v7389_v63  ;;  %v14462_v63 = vld [vmem:[#allocation9 + $0x3e4] sm:$0xf]  ;;  %v14351_v47 = vld [vmem:[#allocation9 + $0x6c] sm:$0xf]  ;;  %v12798_v4 = vld [vmem:[#allocation9 + $0x78] sm:$0xf0] }
 0x42c   :  { %8430 = vmatpush.bf16.msrb.mxu1 %v12905_v5  ;;  %v13172_v5 = vld [vmem:[#allocation9 + $0x360] sm:$0xf]  ;;  %v7415_v42 = vadd.f32 %v15148_v30, %v7402_v19  ;;  %v13241_v19 = vor.u32 %v14462_v63, %v13238_v61  ;;  %v14347_v63 = vld [vmem:[#allocation9 + $0x4c] sm:$0xf]  ;;  %v12782_v61 = vld [vmem:[#allocation9 + $0x58] sm:$0xf0] }
 0x42d   :  { %8445 = vmatpush.bf16.msrb.mxu2 %v13001_v0  ;;  %8419 = vmatpush.bf16.msrb.mxu0 %v12745_v48  ;;  %v13173_v35 = vor.u32 %v14448_v7, %v13172_v5  ;;  %v12924_v0 = vld [vmem:[#allocation9 + $0x168] sm:$0xf]  ;;  %v14444_v48 = vld [vmem:[#allocation9 + $0x34c] sm:$0xf0]  ;;  %v12990_v5 = vld [vmem:[#allocation9 + $0x1f8] sm:$0xf0] }
 0x42e   :  { %v12925_v30 = vor.u32 %v14385_v57, %v12924_v0  ;;  %v14359_v57 = vld [vmem:[#allocation9 + $0xac] sm:$0xf] }
 0x42f   :  { %v7427_v54 = vpop.f32.mrf.mxu0  ;;  %8403 = vmatpush.bf16.msra.mxu3 %v13173_v35  ;;  %v13222_v35 = vld [vmem:[#allocation9 + $0x3d0] sm:$0xf0] }
 0x430   :  { %8431 = vmatpush.bf16.msrb.mxu1 %v12889_v23  ;;  %8420 = vmatmul.bf16.vlgmr.msrb.gmra.mxu0 %v15135_v18  ;;  %v7428_v34 = vadd.f32 %v7427_v54, %v7415_v42  ;;  %v13157_v23 = vor.u32 %v14444_v48, %v13156_v36  ;;  %v14399_v54 = vld [vmem:[#allocation9 + $0x1ec] sm:$0xf]  ;;  %v12849_v42 = vor.u32 %v14363_v15, %v12846_v16  ;;  %v14442_v15 = vld [vmem:[#allocation9 + $0x344] sm:$0xf]  ;;  %v13158_v16 = vld [vmem:[#allocation9 + $0x350] sm:$0xf0] }
 0x431   :  { %8464 = vmatpush.bf16.msra.mxu0 %v12861_v22  ;;  %v12764_v22 = vld [vmem:[#allocation9 + $0x28] sm:$0xf]  ;;  %v12993_v0 = vor.u32 %v14399_v54, %v12990_v5  ;;  %v14405_v5 = vld [vmem:[#allocation9 + $0x214] sm:$0xf0] }
 0x432   :  { %v12765_v40 = vor.u32 %v14345_v45, %v12764_v22  ;;  %v13069_v22 = vor.u32 %v14421_v21, %v13068_v28  ;;  %v13052_v45 = vld [vmem:[#allocation9 + $0x268] sm:$0xf]  ;;  %v13161_v28 = vor.u32 %v14442_v15, %v13158_v16  ;;  %v14379_v21 = vld [vmem:[#allocation9 + $0x14c] sm:$0xf] }
 0x433   :  { %8404 = vmatpush.bf16.msra.mxu3 %v13157_v23  ;;  %v14454_v23 = vld [vmem:[#allocation9 + $0x3a4] sm:$0xf]  ;;  %v13004_v54 = vld [vmem:[#allocation9 + $0x208] sm:$0xf] }
 0x434   :  { %8432 = vmatpush.bf16.msrb.mxu1 %v12873_v39  ;;  %v7440_v9 = vpop.f32.mrf.mxu1  ;;  %v12748_v39 = vld [vmem:[#allocation9 + $0x8] sm:$0xf] }
 0x435   :  { %8465 = vmatpush.bf16.msra.mxu0 %v12845_v11  ;;  %v15160_v44 = vpop.f32.mrf.mxu2  ;;  %v7441_v1 = vadd.f32 %v7440_v9, %v7428_v34  ;;  %v13117_v11 = vor.u32 %v14433_v6, %v13116_v32  ;;  %v12749_v20 = vor.u32 %v14341_v43, %v12748_v39  ;;  %v12830_v34 = vld [vmem:[#allocation9 + $0xb8] sm:$0xf0]  ;;  %v14395_v9 = vld [vmem:[#allocation9 + $0x1cc] sm:$0xf]  ;;  %v14417_v32 = vld [vmem:[#allocation9 + $0x274] sm:$0xf0]  ;;  %v12817_v43 = vor.u32 %v14355_v55, %v12814_v10 }
 0x436   :  { %v13190_v39 = vld [vmem:[#allocation9 + $0x390] sm:$0xf0]  ;;  %v12894_v55 = vld [vmem:[#allocation9 + $0x138] sm:$0xf0] }
 0x437   :  { %8433 = vmatmul.bf16.vlgmr.msrb.gmra.mxu1 %v15138_v53  ;;  %v7576_v37 = vmax.f32 %v7441_v1, 0.0  ;;  %v7429_v27 = vpop.f32.mrf.mxu0  ;;  %8405 = vmatpush.bf16.msra.mxu3 %v13141_v50  ;;  %v13206_v1 = vld [vmem:[#allocation9 + $0x3b0] sm:$0xf0] }
 0x438   :  { %8477 = vmatpush.bf16.msra.mxu1 %v12989_v29  ;;  %v14391_v27 = vld [vmem:[#allocation9 + $0x1ac] sm:$0xf] }
 0x439   :  { %8466 = vmatpush.bf16.msra.mxu0 %v12829_v2  ;;  %v15162_v29 = vpack.c.bf16 %v7576_v37, %v7576_v37  ;;  %v13209_v37 = vor.u32 %v14454_v23, %v13206_v1  ;;  %v12961_v17 = vor.u32 %v14391_v27, %v12958_v33  ;;  %v12750_v1 = vld [vmem:[#allocation9 + $0x18] sm:$0xf0]  ;;  %v13126_v27 = vld [vmem:[#allocation9 + $0x310] sm:$0xf0] }
 0x43a   :  { %v15164_v2 = vpop.f32.mrf.mxu3 }
 0x43b   :  { %8394 = vmatmul.bf16.vlgmr.msra.gmra.mxu2 %v15162_v29  ;;  %8406 = vmatpush.bf16.msra.mxu3 %v13125_v56 }
 0x43c   :  { %8478 = vmatpush.bf16.msra.mxu1 %v12973_v62  ;;  %8490 = vmatpush.bf16.msra.mxu2 %v13117_v11  ;;  %v7442_v62 = vpop.f32.mrf.mxu1  ;;  %v14450_v11 = vld [vmem:[#allocation9 + $0x384] sm:$0xf] }
 0x43d   :  { %8467 = vmatpush.bf16.msra.mxu0 %v12813_v58  ;;  %v7455_v14 = vpop.f32.mrf.mxu2  ;;  %v12893_v58 = vor.u32 %v14377_v49, %v12892_v12  ;;  %v13193_v50 = vor.u32 %v14450_v11, %v13190_v39  ;;  %v12942_v12 = vld [vmem:[#allocation9 + $0x198] sm:$0xf0]  ;;  %v13174_v62 = vld [vmem:[#allocation9 + $0x370] sm:$0xf0] }
 0x43e   :  { %v12801_v14 = vor.u32 %v14351_v47, %v12798_v4  ;;  %v12945_v56 = vor.u32 %v14387_v25, %v12942_v12  ;;  %v14371_v47 = vld [vmem:[#allocation9 + $0x10c] sm:$0xf]  ;;  %v12878_v4 = vld [vmem:[#allocation9 + $0x118] sm:$0xf0] }
 0x43f   :  { %8451 = vmatpush.bf16.msrb.mxu3 %v13241_v19  ;;  %v12785_v19 = vor.u32 %v14347_v63, %v12782_v61  ;;  %v14415_v63 = vld [vmem:[#allocation9 + $0x26c] sm:$0xf]  ;;  %v13054_v61 = vld [vmem:[#allocation9 + $0x278] sm:$0xf0] }
 0x440   :  { %8479 = vmatpush.bf16.msra.mxu1 %v12957_v59  ;;  %v14425_v59 = vld [vmem:[#allocation9 + $0x2b4] sm:$0xf0]  ;;  %8491 = vmatpush.bf16.msra.mxu2 %v13101_v52 }
 0x441   :  { %8468 = vmatpush.bf16.msra.mxu0 %v12797_v46  ;;  %v13085_v7 = vor.u32 %v14425_v59, %v13084_v41  ;;  %v14458_v46 = vld [vmem:[#allocation9 + $0x3c4] sm:$0xf]  ;;  %v14409_v52 = vld [vmem:[#allocation9 + $0x234] sm:$0xf0]  ;;  %v12926_v41 = vld [vmem:[#allocation9 + $0x178] sm:$0xf0] }
 0x442   :  { %v13225_v36 = vor.u32 %v14458_v46, %v13222_v35  ;;  %v7468_v48 = vpop.f32.mrf.mxu3  ;;  %v12766_v35 = vld [vmem:[#allocation9 + $0x38] sm:$0xf0] }
 0x443   :  { %v13142_v48 = vld [vmem:[#allocation9 + $0x330] sm:$0xf0] }
 0x444   :  { %8480 = vmatpush.bf16.msra.mxu1 %v12941_v24  ;;  %v12877_v24 = vor.u32 %v14373_v8, %v12876_v31  ;;  %8492 = vmatpush.bf16.msra.mxu2 %v13085_v7  ;;  %v14343_v7 = vld [vmem:[#allocation9 + $0x2c] sm:$0xf] }
 0x445   :  { %8469 = vmatpush.bf16.msra.mxu0 %v12781_v51  ;;  %v12974_v51 = vld [vmem:[#allocation9 + $0x1d8] sm:$0xf0]  ;;  %8452 = vmatpush.bf16.msrb.mxu3 %v13225_v36  ;;  %v14438_v36 = vld [vmem:[#allocation9 + $0x324] sm:$0xf] }
 0x446   :  { %v12977_v6 = vor.u32 %v14395_v9, %v12974_v51  ;;  %v12769_v9 = vor.u32 %v14343_v7, %v12766_v35  ;;  %v14403_v35 = vld [vmem:[#allocation9 + $0x20c] sm:$0xf] }
 0x448   :  { %8481 = vmatpush.bf16.msra.mxu1 %v12925_v30  ;;  %v12833_v30 = vor.u32 %v14359_v57, %v12830_v34  ;;  %8493 = vmatpush.bf16.msra.mxu2 %v13069_v22  ;;  %v13005_v34 = vor.u32 %v14405_v5, %v13004_v54  ;;  %v14339_v22 = vld [vmem:[#allocation9 + $0xc] sm:$0xf] }
 0x449   :  { %8470 = vmatpush.bf16.msra.mxu0 %v12765_v40  ;;  %v13053_v40 = vor.u32 %v14417_v32, %v13052_v45  ;;  %8453 = vmatpush.bf16.msrb.mxu3 %v13209_v37  ;;  %v13102_v45 = vld [vmem:[#allocation9 + $0x2d8] sm:$0xf0]  ;;  %v13145_v32 = vor.u32 %v14438_v36, %v13142_v48  ;;  %v14434_v37 = vld [vmem:[#allocation9 + $0x304] sm:$0xf]  ;;  %v12753_v11 = vor.u32 %v14339_v22, %v12750_v1  ;;  %v14465_v36 = vld [vmem:[#allocation9 + $0x3f4] sm:$0xf0] }
 0x44a   :  { %v13228_v22 = vld [vmem:[#allocation9 + $0x3c8] sm:$0xf] }
 0x44b   :  { %8446 = vmatmul.bf16.vlgmr.msrb.gmra.mxu2 %v15162_v29 }
 0x44c   :  { %8482 = vmatpush.bf16.msra.mxu1 %v12909_v26  ;;  %v14413_v26 = vld [vmem:[#allocation9 + $0x254] sm:$0xf0]  ;;  %8494 = vmatpush.bf16.msra.mxu2 %v13053_v40 }
 0x44d   :  { %8471 = vmatpush.bf16.msra.mxu0 %v12749_v20  ;;  %v13037_v60 = vor.u32 %v14413_v26, %v13036_v38  ;;  %v13020_v20 = vld [vmem:[#allocation9 + $0x228] sm:$0xf]  ;;  %8454 = vmatpush.bf16.msrb.mxu3 %v13193_v50  ;;  %v14423_v38 = vld [vmem:[#allocation9 + $0x2ac] sm:$0xf]  ;;  %v13086_v26 = vld [vmem:[#allocation9 + $0x2b8] sm:$0xf0] }
 0x44e   :  { %v13021_v59 = vor.u32 %v14409_v52, %v13020_v20  ;;  %v14514_v50 = vld [vmem:[#allocation7] sm:$0xf]  ;;  %v13089_v12 = vor.u32 %v14423_v38, %v13086_v26  ;;  %v13164_v38 = vld [vmem:[#allocation9 + $0x348] sm:$0xf]  ;;  %v14445_v26 = vld [vmem:[#allocation9 + $0x354] sm:$0xf0] }
 0x44f   :  { %v15170_v49 = vpop.f32.mrf.mxu0  ;;  %v5449_v25 = vperm.slane %v14514_v50, 3 }
 0x450   :  { %8483 = vmatpush.bf16.msra.mxu1 %v12893_v58  ;;  %8472 = vmatmul.bf16.vlgmr.msra.gmra.mxu0 %v15135_v18  ;;  %v14383_v58 = vld [vmem:[#allocation9 + $0x16c] sm:$0xf] }
 0x451   :  { %8516 = vmatpush.bf16.msrb.mxu0 %v12865_v13  ;;  %v13177_v13 = vor.u32 %v14446_v3, %v13174_v62  ;;  %8495 = vmatpush.bf16.msra.mxu2 %v13037_v60  ;;  %v12929_v46 = vor.u32 %v14383_v58, %v12926_v41  ;;  %v12881_v60 = vor.u32 %v14371_v47, %v12878_v4  ;;  %v14419_v3 = vld [vmem:[#allocation9 + $0x28c] sm:$0xf]  ;;  %v13070_v62 = vld [vmem:[#allocation9 + $0x298] sm:$0xf0] }
 0x452   :  { %v13073_v52 = vor.u32 %v14419_v3, %v13070_v62  ;;  %v13057_v58 = vor.u32 %v14415_v63, %v13054_v61  ;;  %v13165_v4 = vor.u32 %v14445_v26, %v13164_v38  ;;  %v13132_v3 = vld [vmem:[#allocation9 + $0x308] sm:$0xf]  ;;  %v14437_v62 = vld [vmem:[#allocation9 + $0x314] sm:$0xf0]  ;;  %v14459_v61 = vld [vmem:[#allocation9 + $0x3cc] sm:$0xf] }
 0x453   :  { %8455 = vmatpush.bf16.msrb.mxu3 %v13177_v13 }
 0x454   :  { %8484 = vmatpush.bf16.msra.mxu1 %v12877_v24  ;;  %v15172_v31 = vpop.f32.mrf.mxu1  ;;  %v13118_v24 = vld [vmem:[#allocation9 + $0x2f8] sm:$0xf0] }
 0x455   :  { %8517 = vmatpush.bf16.msrb.mxu0 %v12849_v42  ;;  %v15174_v8 = vpop.f32.mrf.mxu2  ;;  %v14431_v42 = vld [vmem:[#allocation9 + $0x2ec] sm:$0xf]  ;;  %8496 = vmatpush.bf16.msra.mxu2 %v13021_v59 }
 0x456   :  { %v13121_v51 = vor.u32 %v14431_v42, %v13118_v24  ;;  %v14411_v59 = vld [vmem:[#allocation9 + $0x24c] sm:$0xf] }
 0x457   :  { %8485 = vmatmul.bf16.vlgmr.msra.gmra.mxu1 %v15138_v53  ;;  %v7481_v57 = vpop.f32.mrf.mxu0  ;;  %8456 = vmatpush.bf16.msrb.mxu3 %v13161_v28 }
 0x458   :  { %8529 = vmatpush.bf16.msrb.mxu1 %v12993_v0  ;;  %v12910_v0 = vld [vmem:[#allocation9 + $0x158] sm:$0xf0] }
 0x459   :  { %8518 = vmatpush.bf16.msrb.mxu0 %v12833_v30  ;;  %v12913_v23 = vor.u32 %v14379_v21, %v12910_v0  ;;  %v14427_v30 = vld [vmem:[#allocation9 + $0x2cc] sm:$0xf]  ;;  %8497 = vmatpush.bf16.msra.mxu2 %v13005_v34  ;;  %v13244_v34 = vld [vmem:[#allocation9 + $0x3e8] sm:$0xf] }
 0x45a   :  { %v7518_v10 = vpop.f32.mrf.mxu3  ;;  %v13105_v39 = vor.u32 %v14427_v30, %v13102_v45  ;;  %v13212_v45 = vld [vmem:[#allocation9 + $0x3a8] sm:$0xf] }
 0x45b   :  { %8457 = vmatpush.bf16.msrb.mxu3 %v13145_v32  ;;  %v14457_v32 = vld [vmem:[#allocation9 + $0x3b4] sm:$0xf0] }
 0x45c   :  { %8530 = vmatpush.bf16.msrb.mxu1 %v12977_v6  ;;  %v14375_v6 = vld [vmem:[#allocation9 + $0x12c] sm:$0xf]  ;;  %v7494_v33 = vpop.f32.mrf.mxu1  ;;  %8498 = vmatmul.bf16.vlgmr.msra.gmra.mxu2 %v15162_v29 }
 0x45d   :  { %8519 = vmatpush.bf16.msrb.mxu0 %v12817_v43  ;;  %8542 = vmatpush.bf16.msrb.mxu2 %v13121_v51  ;;  %v7507_v40 = vpop.f32.mrf.mxu2  ;;  %v12897_v43 = vor.u32 %v14375_v6, %v12894_v55  ;;  %v13213_v6 = vor.u32 %v14457_v32, %v13212_v45  ;;  %v13196_v55 = vld [vmem:[#allocation9 + $0x388] sm:$0xf]  ;;  %v14473_v32 = vld [vmem:[#allocation12 + $0x38] sm:$0xff] }
 0x45e   :  { %v13180_v40 = vld [vmem:[#allocation9 + $0x368] sm:$0xf] }
 0x460   :  { %8531 = vmatpush.bf16.msrb.mxu1 %v12961_v17  ;;  %v13129_v17 = vor.u32 %v14434_v37, %v13126_v27  ;;  %v15188_v37 = vld [vmem:[#allocation10] sm:$0xf] }
 0x461   :  { %8520 = vmatpush.bf16.msrb.mxu0 %v12801_v14  ;;  %8543 = vmatpush.bf16.msrb.mxu2 %v13105_v39  ;;  %v7454_v14 = vadd.f32 %v15160_v44, %v5449_v25  ;;  %v13038_v44 = vld [vmem:[#allocation9 + $0x258] sm:$0xf0]  ;;  %v7712_v27 = vperm.slane %v15188_v37, 0  ;;  %v13148_v25 = vld [vmem:[#allocation9 + $0x328] sm:$0xf]  ;;  %v7715_v38 = vperm.slane %v15188_v37, 3 }
 0x462   :  { %8458 = vmatpush.bf16.msrb.mxu3 %v13129_v17  ;;  %v7520_v20 = vpop.f32.mrf.mxu3 }
 0x463   :  { %v14463_v20 = vld [vmem:[#allocation9 + $0x3ec] sm:$0xf] }
 0x464   :  { %8532 = vmatpush.bf16.msrb.mxu1 %v12945_v56  ;;  %v7467_v56 = vadd.f32 %v15164_v2, %v7454_v14  ;;  %v13022_v2 = vld [vmem:[#allocation9 + $0x238] sm:$0xf0] }
 0x465   :  { %8521 = vmatpush.bf16.msrb.mxu0 %v12785_v19  ;;  %8544 = vmatpush.bf16.msrb.mxu2 %v13089_v12  ;;  %v14407_v19 = vld [vmem:[#allocation9 + $0x22c] sm:$0xf]  ;;  %v14441_v12 = vld [vmem:[#allocation9 + $0x334] sm:$0xf0] }
 0x466   :  { %v7480_v13 = vadd.f32 %v15170_v49, %v7467_v56  ;;  %v13025_v5 = vor.u32 %v14407_v19, %v13022_v2  ;;  %v13133_v56 = vor.u32 %v14437_v62, %v13132_v3  ;;  %v7713_v19 = vperm.slane %v15188_v37, 1  ;;  %v14478_v3 = vld [vmem:[#allocation12 + $0x60] sm:$0xff] }
 0x468   :  { %8533 = vmatpush.bf16.msrb.mxu1 %v12929_v46  ;;  %v7493_v41 = vadd.f32 %v15172_v31, %v7480_v13  ;;  %v13230_v13 = vld [vmem:[#allocation9 + $0x3d8] sm:$0xf0] }
 0x469   :  { %8522 = vmatpush.bf16.msrb.mxu0 %v12769_v9  ;;  %8545 = vmatpush.bf16.msrb.mxu2 %v13073_v52  ;;  %v13245_v9 = vor.u32 %v14465_v36, %v13244_v34  ;;  %v13246_v52 = vld [vmem:[#allocation9 + $0x3f8] sm:$0xf0] }
 0x46a   :  { %v7506_v16 = vadd.f32 %v15174_v8, %v7493_v41  ;;  %v13249_v63 = vor.u32 %v14463_v20, %v13246_v52  ;;  %v14455_v41 = vld [vmem:[#allocation9 + $0x3ac] sm:$0xf]  ;;  %v14477_v52 = vld [vmem:[#allocation12 + $0x58] sm:$0xff] }
 0x46c   :  { %8534 = vmatpush.bf16.msrb.mxu1 %v12913_v23  ;;  %v7519_v54 = vadd.f32 %v7518_v10, %v7506_v16  ;;  %v14461_v23 = vld [vmem:[#allocation9 + $0x3d4] sm:$0xf0] }
 0x46d   :  { %8523 = vmatpush.bf16.msrb.mxu0 %v12753_v11  ;;  %8546 = vmatpush.bf16.msrb.mxu2 %v13057_v58  ;;  %v13229_v30 = vor.u32 %v14461_v23, %v13228_v22  ;;  %v14453_v10 = vld [vmem:[#allocation9 + $0x394] sm:$0xf0]  ;;  %v13233_v58 = vor.u32 %v14459_v61, %v13230_v13  ;;  %v14475_v13 = vld [vmem:[#allocation12 + $0x48] sm:$0xff] }
 0x46e   :  { %v14449_v11 = vld [vmem:[#allocation9 + $0x374] sm:$0xf0] }
 0x46f   :  { %v7531_v15 = vpop.f32.mrf.mxu0  ;;  %v13181_v39 = vor.u32 %v14449_v11, %v13180_v40  ;;  %v14469_v40 = vld [vmem:[#allocation12 + $0x18] sm:$0xff] }
 0x470   :  { %8535 = vmatpush.bf16.msrb.mxu1 %v12897_v43  ;;  %8524 = vmatmul.bf16.vlgmr.msrb.gmra.mxu0 %v15135_v18  ;;  %v13041_v18 = vor.u32 %v14411_v59, %v13038_v44  ;;  %v7532_v7 = vadd.f32 %v7531_v15, %v7519_v54  ;;  %v13214_v59 = vld [vmem:[#allocation9 + $0x3b8] sm:$0xf0]  ;;  %v14451_v15 = vld [vmem:[#allocation9 + $0x38c] sm:$0xf] }
 0x471   :  { %v13217_v44 = vor.u32 %v14455_v41, %v13214_v59  ;;  %v14447_v54 = vld [vmem:[#allocation9 + $0x36c] sm:$0xf]  ;;  %8836 = vmatpush.bf16.msra.mxu0 %v14473_v32  ;;  %v14474_v41 = vld [vmem:[#allocation12 + $0x40] sm:$0xff] }
 0x472   :  { %8547 = vmatpush.bf16.msrb.mxu2 %v13041_v18  ;;  %v13198_v18 = vld [vmem:[#allocation9 + $0x398] sm:$0xf0]  ;;  %v14486_v59 = vld [vmem:[#allocation12 + $0xa0] sm:$0xff] }
 0x473   :  { %v13201_v16 = vor.u32 %v14451_v15, %v13198_v18  ;;  %v14484_v15 = vld [vmem:[#allocation12 + $0x90] sm:$0xff] }
 0x474   :  { %8536 = vmatpush.bf16.msrb.mxu1 %v12881_v60  ;;  %v7544_v49 = vpop.f32.mrf.mxu1  ;;  %v13149_v60 = vor.u32 %v14441_v12, %v13148_v25 }
 0x475   :  { %v7557_v46 = vpop.f32.mrf.mxu2  ;;  %v7545_v42 = vadd.f32 %v7544_v49, %v7532_v7 }
 0x476   :  { %8548 = vmatpush.bf16.msrb.mxu2 %v13025_v5  ;;  %v13182_v5 = vld [vmem:[#allocation9 + $0x378] sm:$0xf0] }
 0x477   :  { %8537 = vmatmul.bf16.vlgmr.msrb.gmra.mxu1 %v15138_v53  ;;  %v13006_v53 = vld [vmem:[#allocation9 + $0x218] sm:$0xf0]  ;;  %v7533_v24 = vpop.f32.mrf.mxu0  ;;  %v7558_v28 = vadd.f32 %v7557_v46, %v7545_v42  ;;  %v13185_v7 = vor.u32 %v14447_v54, %v13182_v5  ;;  %v14443_v46 = vld [vmem:[#allocation9 + $0x34c] sm:$0xf] }
 0x478   :  { %v13009_v31 = vor.u32 %v14403_v35, %v13006_v53  ;;  %v13166_v35 = vld [vmem:[#allocation9 + $0x358] sm:$0xf0] }
 0x479   :  { %v13169_v24 = vor.u32 %v14443_v46, %v13166_v35 }
 0x47a   :  { %v7570_v21 = vpop.f32.mrf.mxu3  ;;  %8549 = vmatpush.bf16.msrb.mxu2 %v13009_v31 }
 0x47b   :  { %v7571_v0 = vadd.f32 %v7570_v21, %v7558_v28  ;;  %v14439_v28 = vld [vmem:[#allocation9 + $0x32c] sm:$0xf]  ;;  %v13150_v21 = vld [vmem:[#allocation9 + $0x338] sm:$0xf0] }
 0x47c   :  { %v7546_v57 = vpop.f32.mrf.mxu1 }
 0x47d   :  { %v7559_v8 = vpop.f32.mrf.mxu2  ;;  %v7577_v48 = vmax.f32 %v7571_v0, 0.0  ;;  %8550 = vmatmul.bf16.vlgmr.msrb.gmra.mxu2 %v15162_v29  ;;  %v13197_v29 = vor.u32 %v14453_v10, %v13196_v55  ;;  %v13153_v0 = vor.u32 %v14439_v28, %v13150_v21  ;;  %v14435_v57 = vld [vmem:[#allocation9 + $0x30c] sm:$0xf]  ;;  %v14472_v55 = vld [vmem:[#allocation12 + $0x30] sm:$0xff]  ;;  %v14481_v10 = vld [vmem:[#allocation12 + $0x78] sm:$0xff] }
 0x47e   :  { %v13134_v8 = vld [vmem:[#allocation9 + $0x318] sm:$0xf0]  ;;  %8837 = vmatpush.bf16.msra.mxu0 %v14472_v55  ;;  %8849 = vmatpush.bf16.msra.mxu1 %v14481_v10  ;;  %v14494_v28 = vld [vmem:[#allocation12 + $0xe0] sm:$0xff] }
 0x47f   :  { %v15185_v51 = vpack.c.bf16 %v7577_v48, %v7577_v48  ;;  %v13137_v36 = vor.u32 %v14435_v57, %v13134_v8  ;;  %v14493_v57 = vld [vmem:[#allocation12 + $0xd8] sm:$0xff] }
 0x481   :  { %8407 = vmatmul.bf16.vlgmr.msra.gmra.mxu3 %v15185_v51 }
 0x482   :  { %8503 = vmatpush.bf16.msra.mxu3 %v13245_v9  ;;  %v7572_v1 = vpop.f32.mrf.mxu3  ;;  %v7714_v9 = vperm.slane %v15188_v37, 2  ;;  %v14476_v37 = vld [vmem:[#allocation12 + $0x50] sm:$0xff] }
 0x486   :  { %8504 = vmatpush.bf16.msra.mxu3 %v13229_v30 }
 0x48a   :  { %8505 = vmatpush.bf16.msra.mxu3 %v13213_v6 }
 0x48d   :  { %v8369_v33 = vpop.f32.mrf.mxu0 }
 0x48e   :  { %8506 = vmatpush.bf16.msra.mxu3 %v13197_v29  ;;  %v8370_v43 = vadd.f32 %v8369_v33, %v7712_v27  ;;  %v14471_v29 = vld [vmem:[#allocation12 + $0x28] sm:$0xff]  ;;  %v14470_v33 = vld [vmem:[#allocation12 + $0x20] sm:$0xff] }
 0x48f   :  { %8838 = vmatpush.bf16.msra.mxu0 %v14471_v29 }
 0x491   :  { %8459 = vmatmul.bf16.vlgmr.msrb.gmra.mxu3 %v15185_v51 }
 0x492   :  { %8507 = vmatpush.bf16.msra.mxu3 %v13181_v39  ;;  %v14468_v39 = vld [vmem:[#allocation12 + $0x10] sm:$0xff] }
 0x493   :  { %8839 = vmatpush.bf16.msra.mxu0 %v14470_v33 }
 0x494   :  { %v8382_v17 = vpop.f32.mrf.mxu1 }
 0x495   :  { %v15191_v47 = vadd.f32 %v8382_v17, %v8370_v43  ;;  %v8371_v50 = vpop.f32.mrf.mxu0  ;;  %v14480_v43 = vld [vmem:[#allocation12 + $0x70] sm:$0xff] }
 0x496   :  { %8508 = vmatpush.bf16.msra.mxu3 %v13165_v4  ;;  %8850 = vmatpush.bf16.msra.mxu1 %v14480_v43  ;;  %v14467_v4 = vld [vmem:[#allocation12 + $0x8] sm:$0xff] }
 0x497   :  { %8840 = vmatpush.bf16.msra.mxu0 %v14469_v40  ;;  %v14479_v50 = vld [vmem:[#allocation12 + $0x68] sm:$0xff] }
 0x49a   :  { %8509 = vmatpush.bf16.msra.mxu3 %v13149_v60  ;;  %8851 = vmatpush.bf16.msra.mxu1 %v14479_v50  ;;  %v14466_v60 = vld [vmem:[#allocation12] sm:$0xff] }
 0x49b   :  { %8841 = vmatpush.bf16.msra.mxu0 %v14468_v39 }
 0x49c   :  { %v8384_v14 = vpop.f32.mrf.mxu1 }
 0x49e   :  { %8510 = vmatpush.bf16.msra.mxu3 %v13133_v56  ;;  %8852 = vmatpush.bf16.msra.mxu1 %v14478_v3  ;;  %v14489_v56 = vld [vmem:[#allocation12 + $0xb8] sm:$0xff] }
 0x49f   :  { %8842 = vmatpush.bf16.msra.mxu0 %v14467_v4  ;;  %8862 = vmatpush.bf16.msra.mxu2 %v14489_v56 }
 0x4a1   :  { %8511 = vmatmul.bf16.vlgmr.msra.gmra.mxu3 %v15185_v51 }
 0x4a2   :  { %8555 = vmatpush.bf16.msrb.mxu3 %v13249_v63  ;;  %8853 = vmatpush.bf16.msra.mxu1 %v14477_v52  ;;  %v14488_v63 = vld [vmem:[#allocation12 + $0xb0] sm:$0xff] }
 0x4a3   :  { %8843 = vmatpush.bf16.msra.mxu0 %v14466_v60  ;;  %8863 = vmatpush.bf16.msra.mxu2 %v14488_v63 }
 0x4a6   :  { %8556 = vmatpush.bf16.msrb.mxu3 %v13233_v58  ;;  %8854 = vmatpush.bf16.msra.mxu1 %v14476_v37  ;;  %v14487_v58 = vld [vmem:[#allocation12 + $0xa8] sm:$0xff] }
 0x4a7   :  { %8864 = vmatpush.bf16.msra.mxu2 %v14487_v58 }
 0x4aa   :  { %8557 = vmatpush.bf16.msrb.mxu3 %v13217_v44  ;;  %8855 = vmatpush.bf16.msra.mxu1 %v14475_v13  ;;  %v14485_v44 = vld [vmem:[#allocation12 + $0x98] sm:$0xff] }
 0x4ab   :  { %8865 = vmatpush.bf16.msra.mxu2 %v14486_v59 }
 0x4ad   :  { %v8421_v2 = vpop.f32.mrf.mxu0 }
 0x4ae   :  { %8558 = vmatpush.bf16.msrb.mxu3 %v13201_v16  ;;  %v8422_v49 = vadd.f32 %v8421_v2, %v7713_v19  ;;  %8856 = vmatpush.bf16.msra.mxu1 %v14474_v41  ;;  %v14483_v19 = vld [vmem:[#allocation12 + $0x88] sm:$0xff] }
 0x4af   :  { %8866 = vmatpush.bf16.msra.mxu2 %v14485_v44 }
 0x4b2   :  { %8559 = vmatpush.bf16.msrb.mxu3 %v13185_v7  ;;  %v14482_v7 = vld [vmem:[#allocation12 + $0x80] sm:$0xff] }
 0x4b3   :  { %8867 = vmatpush.bf16.msra.mxu2 %v14484_v15 }
 0x4b4   :  { %v8434_v53 = vpop.f32.mrf.mxu1 }
 0x4b5   :  { %v15196_v42 = vadd.f32 %v8434_v53, %v8422_v49  ;;  %v8423_v31 = vpop.f32.mrf.mxu0  ;;  %v14497_v49 = vld [vmem:[#allocation12 + $0xf8] sm:$0xff]  ;;  %v14496_v53 = vld [vmem:[#allocation12 + $0xf0] sm:$0xff] }
 0x4b6   :  { %8560 = vmatpush.bf16.msrb.mxu3 %v13169_v24  ;;  %v14495_v31 = vld [vmem:[#allocation12 + $0xe8] sm:$0xff] }
 0x4b7   :  { %8868 = vmatpush.bf16.msra.mxu2 %v14483_v19 }
 0x4ba   :  { %8561 = vmatpush.bf16.msrb.mxu3 %v13153_v0 }
 0x4bb   :  { %8869 = vmatpush.bf16.msra.mxu2 %v14482_v7 }
 0x4bc   :  { %v8436_v34 = vpop.f32.mrf.mxu1 }
 0x4be   :  { %8562 = vmatpush.bf16.msrb.mxu3 %v13137_v36  ;;  %v15199_v48 = vpop.f32.mrf.mxu2  ;;  %v14492_v36 = vld [vmem:[#allocation12 + $0xd0] sm:$0xff] }
 0x4bf   :  { %v8396_v16 = vadd.f32 %v15199_v48, %v15191_v47 }
 0x4c1   :  { %8563 = vmatmul.bf16.vlgmr.msrb.gmra.mxu3 %v15185_v51 }
 0x4c2   :  { %8875 = vmatpush.bf16.msra.mxu3 %v14497_v49 }
 0x4c6   :  { %v8397_v45 = vpop.f32.mrf.mxu2  ;;  %8876 = vmatpush.bf16.msra.mxu3 %v14496_v53 }
 0x4ca   :  { %8877 = vmatpush.bf16.msra.mxu3 %v14495_v31 }
 0x4cd   :  { %v8473_v22 = vpop.f32.mrf.mxu0 }
 0x4ce   :  { %v8474_v23 = vadd.f32 %v8473_v22, %v7714_v9  ;;  %v15204_v51 = vpop.f32.mrf.mxu2  ;;  %8878 = vmatpush.bf16.msra.mxu3 %v14494_v28  ;;  %v14491_v9 = vld [vmem:[#allocation12 + $0xc8] sm:$0xff] }
 0x4cf   :  { %v8448_v47 = vadd.f32 %v15204_v51, %v15196_v42 }
 0x4d2   :  { %8879 = vmatpush.bf16.msra.mxu3 %v14493_v57 }
 0x4d4   :  { %v8486_v1 = vpop.f32.mrf.mxu1 }
 0x4d5   :  { %v15202_v30 = vadd.f32 %v8486_v1, %v8474_v23  ;;  %v8475_v6 = vpop.f32.mrf.mxu0  ;;  %v14490_v23 = vld [vmem:[#allocation12 + $0xc0] sm:$0xff] }
 0x4d6   :  { %v8449_v11 = vpop.f32.mrf.mxu2  ;;  %8880 = vmatpush.bf16.msra.mxu3 %v14492_v36 }
 0x4da   :  { %8881 = vmatpush.bf16.msra.mxu3 %v14491_v9 }
 0x4dc   :  { %v8488_v27 = vpop.f32.mrf.mxu1 }
 0x4de   :  { %8882 = vmatpush.bf16.msra.mxu3 %v14490_v23 }
 0x4df   :  { %v15207_v17 = vpop.f32.mrf.mxu2 }
 0x4e0   :  { %v8500_v22 = vadd.f32 %v15207_v17, %v15202_v30 }
 0x4e7   :  { %v8501_v20 = vpop.f32.mrf.mxu2 }
 0x4ed   :  { %v8525_v26 = vpop.f32.mrf.mxu0 }
 0x4ee   :  { %v8526_v25 = vadd.f32 %v8525_v26, %v7715_v38  ;;  %v14512_v26 = vld [vmem:[#allocation13] ss:$0 sm:$0xff] }
 0x4f4   :  { %v8538_v12 = vpop.f32.mrf.mxu1 }
 0x4f5   :  { %v15209_v62 = vadd.f32 %v8538_v12, %v8526_v25  ;;  %v8527_v14 = vpop.f32.mrf.mxu0 }
 0x4fc   :  { %v8540_v61 = vpop.f32.mrf.mxu1 }
 0x500   :  { %v8551_v18 = vpop.f32.mrf.mxu2 }
 0x501   :  { %v8552_v55 = vadd.f32 %v8551_v18, %v15209_v62 }
 0x504   :  { %v8408_v2 = vpop.f32.mrf.mxu3 }
 0x505   :  { %v8409_v54 = vadd.f32 %v8408_v2, %v8396_v16 }
 0x507   :  { %v8568_v5 = vmax.f32 %v8409_v54, 0.0 }
 0x508   :  { %v8553_v46 = vpop.f32.mrf.mxu2 }
 0x509   :  { %v8572_v35 = vpack.c.bf16 %v8568_v5, %v8568_v5 }
 0x50b   :  { %8844 = vmatmul.bf16.vlgmr.msra.gmra.mxu0 %v8572_v35 }
 0x50c   :  { %v8410_v24 = vpop.f32.mrf.mxu3 }
 0x514   :  { %v8460_v21 = vpop.f32.mrf.mxu3 }
 0x515   :  { %v8461_v0 = vadd.f32 %v8460_v21, %v8448_v47 }
 0x517   :  { %v8569_v8 = vmax.f32 %v8461_v0, 0.0 }
 0x519   :  { %v8573_v34 = vpack.c.bf16 %v8569_v8, %v8569_v8 }
 0x51b   :  { %8857 = vmatmul.bf16.vlgmr.msra.gmra.mxu1 %v8573_v34 }
 0x51c   :  { %v8462_v48 = vpop.f32.mrf.mxu3 }
 0x524   :  { %v8512_v1 = vpop.f32.mrf.mxu3 }
 0x525   :  { %v8513_v45 = vadd.f32 %v8512_v1, %v8500_v22 }
 0x527   :  { %v8570_v42 = vmax.f32 %v8513_v45, 0.0 }
 0x529   :  { %v8574_v32 = vpack.c.bf16 %v8570_v42, %v8570_v42 }
 0x52b   :  { %8870 = vmatmul.bf16.vlgmr.msra.gmra.mxu2 %v8574_v32 }
 0x52c   :  { %v8514_v6 = vpop.f32.mrf.mxu3 }
 0x544   :  { %v8564_v10 = vpop.f32.mrf.mxu3 }
 0x545   :  { %v8565_v29 = vadd.f32 %v8564_v10, %v8552_v55 }
 0x547   :  { %v8571_v27 = vmax.f32 %v8565_v29, 0.0 }
 0x549   :  { %v8575_v51 = vpack.c.bf16 %v8571_v27, %v8571_v27 }
 0x54b   :  { %8883 = vmatmul.bf16.vlgmr.msra.gmra.mxu3 %v8575_v51 }
 0x54c   :  { %v8566_v33 = vpop.f32.mrf.mxu3 }
 0x588   :  { %v8845_v40 = vpop.f32.mrf.mxu0 }
 0x589   :  { %v8846_v17 = vadd.f32 %v14512_v26, %v8845_v40 }
 0x590   :  { %v8847_v11 = vpop.f32.mrf.mxu0 }
 0x598   :  { %v8858_v39 = vpop.f32.mrf.mxu1 }
 0x599   :  { %v8859_v4 = vadd.f32 %v8858_v39, %v8846_v17 }
 0x5a0   :  { %v8860_v30 = vpop.f32.mrf.mxu1 }
 0x5ae   :  { %v8871_v43 = vpop.f32.mrf.mxu2 }
 0x5af   :  { %v8872_v50 = vadd.f32 %v8871_v43, %v8859_v4 }
 0x5b6   :  { %v8873_v38 = vpop.f32.mrf.mxu2 }
 0x5ce   :  { %v8884_v25 = vpop.f32.mrf.mxu3 }
 0x5cf   :  { %v8885_v12 = vadd.f32 %v8884_v25, %v8872_v50 }
 0x5d1   :  { %8888 = vst [vmem:[%s15230_s9] sm:$0xff] %v8885_v12 }
 0x5d6   :  { %v8886_v60 = vpop.f32.mrf.mxu3 }
 0x5d7   :  { %8893 = vsyncpa [#allocation3], 1 }
 0x5d8   :  { %8894 = vsyncpa [#allocation5], 1 }
 0x5d9   :  { %8895 = vsyncpa [#allocation8], 1 }
 0x5da   :  { %8896 = vsyncpa [#allocation11], 1 }
 0x5db   :  { %8897 = vsyncpa [#allocation14], 1 }

</bundles_post_ra>
